<compile_context>
chip_gen: v5e
topology: v5e:2x2
jax: 0.10.0
libtpu: 0.0.40
codegen_flags: <defaults>
</compile_context>

<pallas_src>
import functools

import jax
import jax.numpy as jnp
from jax import lax
from jax.experimental import pallas as pl
from jax.experimental.pallas import tpu as pltpu

EPS = 1e-5


def _vmem_limit_bytes():
    """Per-generation VMEM budget (capacity minus headroom), with a safe fallback."""
    try:
        cap = pltpu.get_tpu_info().vmem_capacity_bytes
    except Exception:
        cap = 64 * 1024 * 1024
    return int(min(max(cap - 16 * 1024 * 1024, 32 * 1024 * 1024), 112 * 1024 * 1024))


_VMEM_LIMIT = _vmem_limit_bytes()


# ----------------------------------------------------------------------------------
# Pass 1: conv1 (im2col + one bf16 MXU matmul) + per-image partial BN1 statistics.
# ----------------------------------------------------------------------------------
def _conv1_kernel(s, Ho, Wo, Cin, Cout):
    M = Ho * Wo

    def kernel(x_ref, w_ref, y_ref, st_ref):
        # x_ref : (1, H+2, W+2, Cin) bf16   padded input, one image per grid step
        # w_ref : (9*Cin, Cout)      bf16   im2col weights (VMEM resident)
        # y_ref : (1, M, Cout)       bf16   pre-BN conv1 output
        # st_ref: (1, 2, Cout)       f32    partial [sum, sum_sq] for BN1
        taps = []
        for dy in range(3):
            for dx in range(3):
                if s == 1:
                    t = x_ref[:, dy:dy + Ho, dx:dx + Wo, :]
                else:
                    t = x_ref[:, pl.ds(dy, Ho, s), pl.ds(dx, Wo, s), :]
                taps.append(t.reshape(M, Cin))                      # bf16, no f32 trip
        patches = jnp.concatenate(taps, axis=1)                     # (M, 9*Cin) bf16
        acc = jnp.dot(patches, w_ref[...],
                      preferred_element_type=jnp.float32)           # (M, Cout) f32

        ssum = jnp.sum(acc, axis=0, keepdims=True)
        ssq = jnp.sum(acc * acc, axis=0, keepdims=True)
        st_ref[...] = jnp.concatenate([ssum, ssq], axis=0).reshape(1, 2, Cout)
        y_ref[...] = acc.astype(jnp.bfloat16).reshape(1, M, Cout)

    return kernel


# ----------------------------------------------------------------------------------
# Pass 2: apply BN1 + ReLU, stage into a bf16 zero-halo scratch, conv2, partial BN2.
# ----------------------------------------------------------------------------------
def _bn1_relu_conv2_kernel(Ho, Wo, Cout):
    M = Ho * Wo

    def kernel(y1_ref, sc_ref, sh_ref, w_ref, y2_ref, st_ref, pad_ref):
        # y1_ref : (1, M, Cout)       bf16   pre-BN conv1 output (one image)
        # sc_ref : (1, Cout) f32 BN1 scale ; sh_ref : (1, Cout) f32 BN1 shift
        # w_ref  : (9*Cout, Cout)     bf16   conv2 im2col weights (resident)
        # y2_ref : (1, M, Cout)       bf16   pre-BN conv2 output
        # st_ref : (1, 2, Cout)       f32    partial [sum, sum_sq] for BN2
        # pad_ref: (Ho+2, Wo+4, Cout) bf16   halo scratch; interior starts at col 2 so
        #          all stores hit even (packed-sublane-aligned) offsets.
        y1 = y1_ref[...].reshape(M, Cout).astype(jnp.float32)
        out1 = jnp.maximum(y1 * sc_ref[...] + sh_ref[...], 0.0)     # BN1 + ReLU, f32

        # Zero only the halo (re-zeroed every step; scratch is per-core).
        pad_ref[0:1, :, :] = jnp.zeros((1, Wo + 4, Cout), jnp.bfloat16)
        pad_ref[Ho + 1:Ho + 2, :, :] = jnp.zeros((1, Wo + 4, Cout), jnp.bfloat16)
        pad_ref[:, 0:2, :] = jnp.zeros((Ho + 2, 2, Cout), jnp.bfloat16)
        pad_ref[:, Wo + 2:Wo + 4, :] = jnp.zeros((Ho + 2, 2, Cout), jnp.bfloat16)
        pad_ref[1:Ho + 1, 2:Wo + 2, :] = (
            out1.reshape(Ho, Wo, Cout).astype(jnp.bfloat16))

        taps = []
        for dy in range(3):
            for dx in range(3):
                taps.append(
                    pad_ref[dy:dy + Ho, dx + 1:dx + 1 + Wo, :].reshape(M, Cout))
        patches = jnp.concatenate(taps, axis=1)                     # (M, 9*Cout) bf16
        acc = jnp.dot(patches, w_ref[...],
                      preferred_element_type=jnp.float32)           # (M, Cout) f32

        ssum = jnp.sum(acc, axis=0, keepdims=True)
        ssq = jnp.sum(acc * acc, axis=0, keepdims=True)
        st_ref[...] = jnp.concatenate([ssum, ssq], axis=0).reshape(1, 2, Cout)
        y2_ref[...] = acc.astype(jnp.bfloat16).reshape(1, M, Cout)

    return kernel


# ----------------------------------------------------------------------------------
# Pass 3: apply BN2 affine on a lane-dense (Ho, Wo*Cout) view — dense 128-lane stores.
# ----------------------------------------------------------------------------------
def _bn2_apply_kernel():
    def kernel(y2_ref, sc_ref, sh_ref, o_ref):
        # y2_ref: (1, Ho, Wo*Cout) bf16 ; sc/sh: (1, Wo*Cout) f32 (channel scale tiled
        # along W) ; o_ref: (1, Ho, Wo*Cout) f32.
        y2 = y2_ref[...].astype(jnp.float32)
        o_ref[...] = y2 * sc_ref[...] + sh_ref[...]

    return kernel


def _finalize_bn(stats, gamma, beta, m_total):
    """Reduce per-tile partial sums into training-mode BN scale/shift."""
    tot = jnp.sum(stats, axis=0)                                    # (2, Cout) f32
    mu = tot[0] / m_total
    var = jnp.maximum(tot[1] / m_total - mu * mu, 0.0)              # clamp E[x^2]-E[x]^2
    scale = gamma.astype(jnp.float32) * lax.rsqrt(var + EPS)
    shift = beta.astype(jnp.float32) - mu * scale
    return scale, shift


@functools.partial(jax.jit, static_argnames=("s",))
def resnet34_block(x_nchw, params, s=1):
    """Pallas implementation of ResNet34_Block.forward. Input/output are NCHW f32.

    Conv biases (params[1], params[5]) are accepted for interface parity but not used:
    a per-channel constant added before training-mode BN is exactly cancelled by the
    batch-mean subtraction.
    """
    w1, _b1, g1, be1, w2, _b2, g2, be2 = params
    N, Cin, H, W = x_nchw.shape
    Cout = w1.shape[3]
    Ho = (H + 2 - 3) // s + 1
    Wo = (W + 2 - 3) // s + 1
    M = Ho * Wo
    m_total = N * M

    # TODO(synk): NCHW->NHWC transpose, halo pad and bf16 cast are still XLA glue; fold
    # them into pass 1 (index_map clamping + masked edges) in a follow-up.
    x_nhwc = jnp.transpose(x_nchw, (0, 2, 3, 1)).astype(jnp.bfloat16)
    x_pad = jnp.pad(x_nhwc, ((0, 0), (1, 1), (1, 1), (0, 0)))
    Hp, Wp = H + 2, W + 2

    w1_2d = w1.reshape(9 * Cin, Cout).astype(jnp.bfloat16)
    w2_2d = w2.reshape(9 * Cout, Cout).astype(jnp.bfloat16)

    cparams = pltpu.CompilerParams(dimension_semantics=("parallel",),
                                   vmem_limit_bytes=_VMEM_LIMIT)

    # ---- pass 1: conv1 -> pre-BN bf16 activation + per-image partial BN1 stats -------
    y1, st1 = pl.pallas_call(
        _conv1_kernel(s, Ho, Wo, Cin, Cout),
        grid=(N,),
        in_specs=[
            pl.BlockSpec((1, Hp, Wp, Cin), lambda n: (n, 0, 0, 0)),
            pl.BlockSpec((9 * Cin, Cout), lambda n: (0, 0)),       # resident weights
        ],
        out_specs=(
            pl.BlockSpec((1, M, Cout), lambda n: (n, 0, 0)),
            pl.BlockSpec((1, 2, Cout), lambda n: (n, 0, 0)),
        ),
        out_shape=(
            jax.ShapeDtypeStruct((N, M, Cout), jnp.bfloat16),
            jax.ShapeDtypeStruct((N, 2, Cout), jnp.float32),
        ),
        compiler_params=cparams,
    )(x_pad, w1_2d)

    scale1, shift1 = _finalize_bn(st1, g1, be1, m_total)

    # ---- pass 2: BN1 + ReLU -> conv2 -> pre-BN bf16 activation + partial BN2 stats ---
    y2, st2 = pl.pallas_call(
        _bn1_relu_conv2_kernel(Ho, Wo, Cout),
        grid=(N,),
        in_specs=[
            pl.BlockSpec((1, M, Cout), lambda n: (n, 0, 0)),
            pl.BlockSpec((1, Cout), lambda n: (0, 0)),             # BN1 scale (resident)
            pl.BlockSpec((1, Cout), lambda n: (0, 0)),             # BN1 shift (resident)
            pl.BlockSpec((9 * Cout, Cout), lambda n: (0, 0)),      # resident weights
        ],
        out_specs=(
            pl.BlockSpec((1, M, Cout), lambda n: (n, 0, 0)),
            pl.BlockSpec((1, 2, Cout), lambda n: (n, 0, 0)),
        ),
        out_shape=(
            jax.ShapeDtypeStruct((N, M, Cout), jnp.bfloat16),
            jax.ShapeDtypeStruct((N, 2, Cout), jnp.float32),
        ),
        scratch_shapes=[pltpu.VMEM((Ho + 2, Wo + 4, Cout), jnp.bfloat16)],
        compiler_params=cparams,
    )(y1, scale1.reshape(1, Cout), shift1.reshape(1, Cout), w2_2d)

    scale2, shift2 = _finalize_bn(st2, g2, be2, m_total)

    # ---- pass 3: apply BN2 affine on a lane-dense view (free row-major re-view) ------
    y2_ld = y2.reshape(N, Ho, Wo * Cout)
    sc2 = jnp.tile(scale2, Wo).reshape(1, Wo * Cout)
    sh2 = jnp.tile(shift2, Wo).reshape(1, Wo * Cout)
    out_ld = pl.pallas_call(
        _bn2_apply_kernel(),
        grid=(N,),
        in_specs=[
            pl.BlockSpec((1, Ho, Wo * Cout), lambda n: (n, 0, 0)),
            pl.BlockSpec((1, Wo * Cout), lambda n: (0, 0)),
            pl.BlockSpec((1, Wo * Cout), lambda n: (0, 0)),
        ],
        out_specs=pl.BlockSpec((1, Ho, Wo * Cout), lambda n: (n, 0, 0)),
        out_shape=jax.ShapeDtypeStruct((N, Ho, Wo * Cout), jnp.float32),
        compiler_params=cparams,
    )(y2_ld, sc2, sh2)

    out_nhwc = out_ld.reshape(N, Ho, Wo, Cout)
    return jnp.transpose(out_nhwc, (0, 3, 1, 2))


def reference(x_nchw, params, s=1):
    """Pure-JAX f32 reference matching the PyTorch forward (training-mode BN, biases kept)."""
    w1, b1, g1, be1, w2, b2, g2, be2 = params
    x = jnp.transpose(x_nchw, (0, 2, 3, 1)).astype(jnp.float32)
    dn = lax.conv_dimension_numbers(x.shape, w1.shape, ("NHWC", "HWIO", "NHWC"))

    y = lax.conv_general_dilated(x, w1, (s, s), ((1, 1), (1, 1)),
                                 dimension_numbers=dn) + b1
    mu, var = y.mean(axis=(0, 1, 2)), y.var(axis=(0, 1, 2))
    y = (y - mu) * lax.rsqrt(var + EPS) * g1 + be1
    y = jnp.maximum(y, 0.0)

    y2 = lax.conv_general_dilated(y, w2, (1, 1), ((1, 1), (1, 1)),
                                  dimension_numbers=dn) + b2
    mu2, var2 = y2.mean(axis=(0, 1, 2)), y2.var(axis=(0, 1, 2))
    y2 = (y2 - mu2) * lax.rsqrt(var2 + EPS) * g2 + be2
    return jnp.transpose(y2, (0, 3, 1, 2))


if __name__ == "__main__":
    # Small deterministic setup: batch=2, in_c=4, out_c=8, 16x16, stride 1.
    N, Cin, Cout, H, W, s = 2, 4, 8, 16, 16, 1
    key = jax.random.PRNGKey(0)
    kx, kw1, kb1, kg1, kbe1, kw2, kb2, kg2, kbe2 = jax.random.split(key, 9)

    x = jax.random.normal(kx, (N, Cin, H, W), dtype=jnp.float32)

    # Conv weights in HWIO; BN affine params deterministic (non-trivial gamma/beta).
    w1 = jax.random.normal(kw1, (3, 3, Cin, Cout), dtype=jnp.float32) * 0.1
    b1 = jax.random.normal(kb1, (Cout,), dtype=jnp.float32) * 0.1
    g1 = 1.0 + 0.1 * jax.random.normal(kg1, (Cout,), dtype=jnp.float32)
    be1 = 0.1 * jax.random.normal(kbe1, (Cout,), dtype=jnp.float32)
    w2 = jax.random.normal(kw2, (3, 3, Cout, Cout), dtype=jnp.float32) * 0.1
    b2 = jax.random.normal(kb2, (Cout,), dtype=jnp.float32) * 0.1
    g2 = 1.0 + 0.1 * jax.random.normal(kg2, (Cout,), dtype=jnp.float32)
    be2 = 0.1 * jax.random.normal(kbe2, (Cout,), dtype=jnp.float32)

    params = (w1, b1, g1, be1, w2, b2, g2, be2)

    out = jax.block_until_ready(resnet34_block(x, params, s=s))
    ref = jax.block_until_ready(reference(x, params, s=s))

    assert out.shape == (N, Cout, H, W), out.shape
    # Tolerance relaxed vs. the f32 reference because conv operands / staged
    # activations are bf16 (f32 MXU accumulation); BN math stays in f32.
    max_err = float(jnp.max(jnp.abs(out - ref)))
    assert jnp.allclose(out, ref, atol=5e-2, rtol=5e-2), max_err

    print("KERNEL_OK")
</pallas_src>

<mosaic_0001>
module attributes {stable_mosaic.version = 11 : i64} {
  func.func @kernel(%arg0: i32, %arg1: memref<1x18x18x4xbf16, #tpu.memory_space<vmem>>, %arg2: memref<36x8xbf16, #tpu.memory_space<vmem>>, %arg3: memref<1x256x8xbf16, #tpu.memory_space<vmem>>, %arg4: memref<1x2x8xf32, #tpu.memory_space<vmem>>) attributes {dimension_semantics = [#tpu.dimension_semantics<parallel>], iteration_bounds = array<i64: 2>, scalar_prefetch = 0 : i64, scratch_operands = 0 : i64, tpu.core_type = #tpu.core_type<tc>, window_params = [{transform_indices = @transform_0, window_bounds = array<i64: 1, 18, 18, 4>}, {pipeline_mode = #tpu.pipeline_mode<synchronous>, transform_indices = @transform_1, window_bounds = array<i64: 36, 8>}, {transform_indices = @transform_2, window_bounds = array<i64: 1, 256, 8>}, {transform_indices = @transform_3, window_bounds = array<i64: 1, 2, 8>}]} {
    %c0 = arith.constant 0 : index
    %c0_0 = arith.constant 0 : index
    %c0_1 = arith.constant 0 : index
    %c0_2 = arith.constant 0 : index
    %0 = vector.load %arg1[%c0, %c0_0, %c0_1, %c0_2] : memref<1x18x18x4xbf16, #tpu.memory_space<vmem>>, vector<1x16x16x4xbf16>
    %1 = vector.shape_cast %0 : vector<1x16x16x4xbf16> to vector<256x4xbf16>
    %c0_3 = arith.constant 0 : index
    %c0_4 = arith.constant 0 : index
    %c1 = arith.constant 1 : index
    %c0_5 = arith.constant 0 : index
    %2 = vector.load %arg1[%c0_3, %c0_4, %c1, %c0_5] : memref<1x18x18x4xbf16, #tpu.memory_space<vmem>>, vector<1x16x16x4xbf16>
    %3 = vector.shape_cast %2 : vector<1x16x16x4xbf16> to vector<256x4xbf16>
    %c0_6 = arith.constant 0 : index
    %c0_7 = arith.constant 0 : index
    %c2 = arith.constant 2 : index
    %c0_8 = arith.constant 0 : index
    %4 = vector.load %arg1[%c0_6, %c0_7, %c2, %c0_8] : memref<1x18x18x4xbf16, #tpu.memory_space<vmem>>, vector<1x16x16x4xbf16>
    %5 = vector.shape_cast %4 : vector<1x16x16x4xbf16> to vector<256x4xbf16>
    %c0_9 = arith.constant 0 : index
    %c1_10 = arith.constant 1 : index
    %c0_11 = arith.constant 0 : index
    %c0_12 = arith.constant 0 : index
    %6 = vector.load %arg1[%c0_9, %c1_10, %c0_11, %c0_12] : memref<1x18x18x4xbf16, #tpu.memory_space<vmem>>, vector<1x16x16x4xbf16>
    %7 = vector.shape_cast %6 : vector<1x16x16x4xbf16> to vector<256x4xbf16>
    %c0_13 = arith.constant 0 : index
    %c1_14 = arith.constant 1 : index
    %c1_15 = arith.constant 1 : index
    %c0_16 = arith.constant 0 : index
    %8 = vector.load %arg1[%c0_13, %c1_14, %c1_15, %c0_16] : memref<1x18x18x4xbf16, #tpu.memory_space<vmem>>, vector<1x16x16x4xbf16>
    %9 = vector.shape_cast %8 : vector<1x16x16x4xbf16> to vector<256x4xbf16>
    %c0_17 = arith.constant 0 : index
    %c1_18 = arith.constant 1 : index
    %c2_19 = arith.constant 2 : index
    %c0_20 = arith.constant 0 : index
    %10 = vector.load %arg1[%c0_17, %c1_18, %c2_19, %c0_20] : memref<1x18x18x4xbf16, #tpu.memory_space<vmem>>, vector<1x16x16x4xbf16>
    %11 = vector.shape_cast %10 : vector<1x16x16x4xbf16> to vector<256x4xbf16>
    %c0_21 = arith.constant 0 : index
    %c2_22 = arith.constant 2 : index
    %c0_23 = arith.constant 0 : index
    %c0_24 = arith.constant 0 : index
    %12 = vector.load %arg1[%c0_21, %c2_22, %c0_23, %c0_24] : memref<1x18x18x4xbf16, #tpu.memory_space<vmem>>, vector<1x16x16x4xbf16>
    %13 = vector.shape_cast %12 : vector<1x16x16x4xbf16> to vector<256x4xbf16>
    %c0_25 = arith.constant 0 : index
    %c2_26 = arith.constant 2 : index
    %c1_27 = arith.constant 1 : index
    %c0_28 = arith.constant 0 : index
    %14 = vector.load %arg1[%c0_25, %c2_26, %c1_27, %c0_28] : memref<1x18x18x4xbf16, #tpu.memory_space<vmem>>, vector<1x16x16x4xbf16>
    %15 = vector.shape_cast %14 : vector<1x16x16x4xbf16> to vector<256x4xbf16>
    %c0_29 = arith.constant 0 : index
    %c2_30 = arith.constant 2 : index
    %c2_31 = arith.constant 2 : index
    %c0_32 = arith.constant 0 : index
    %16 = vector.load %arg1[%c0_29, %c2_30, %c2_31, %c0_32] : memref<1x18x18x4xbf16, #tpu.memory_space<vmem>>, vector<1x16x16x4xbf16>
    %17 = vector.shape_cast %16 : vector<1x16x16x4xbf16> to vector<256x4xbf16>
    %18 = tpu.concatenate %1, %3, %5, %7, %9, %11, %13, %15, %17 in 1 : vector<256x4xbf16>, vector<256x4xbf16>, vector<256x4xbf16>, vector<256x4xbf16>, vector<256x4xbf16>, vector<256x4xbf16>, vector<256x4xbf16>, vector<256x4xbf16>, vector<256x4xbf16> -> vector<256x36xbf16>
    %c0_33 = arith.constant 0 : index
    %c0_34 = arith.constant 0 : index
    %19 = vector.load %arg2[%c0_33, %c0_34] : memref<36x8xbf16, #tpu.memory_space<vmem>>, vector<36x8xbf16>
    %cst = arith.constant dense<0.000000e+00> : vector<256x8xf32>
    %20 = tpu.matmul %18, %19, %cst {dimension_numbers = #tpu.dot_dimension_numbers<[1], [0], [0], [1], [0, 0, 1, 1], [], []>} : vector<256x36xbf16>, vector<36x8xbf16>, vector<256x8xf32> -> vector<256x8xf32>
    %cst_35 = arith.constant dense<0.000000e+00> : vector<8xf32>
    %21 = vector.multi_reduction <add>, %20, %cst_35 [0] : vector<256x8xf32> to vector<8xf32>
    %22 = vector.shape_cast %21 : vector<8xf32> to vector<1x8xf32>
    %23 = arith.mulf %20, %20 : vector<256x8xf32>
    %cst_36 = arith.constant dense<0.000000e+00> : vector<8xf32>
    %24 = vector.multi_reduction <add>, %23, %cst_36 [0] : vector<256x8xf32> to vector<8xf32>
    %25 = vector.shape_cast %24 : vector<8xf32> to vector<1x8xf32>
    %26 = tpu.concatenate %22, %25 in 0 : vector<1x8xf32>, vector<1x8xf32> -> vector<2x8xf32>
    %27 = vector.shape_cast %26 : vector<2x8xf32> to vector<1x2x8xf32>
    %c0_37 = arith.constant 0 : index
    %c0_38 = arith.constant 0 : index
    %c0_39 = arith.constant 0 : index
    %28 = vector.load %arg4[%c0_37, %c0_38, %c0_39] : memref<1x2x8xf32, #tpu.memory_space<vmem>>, vector<1x2x8xf32>
    tpu.vector_store %arg4[%c0_37, %c0_38, %c0_39], %27 {strides = array<i32>} : memref<1x2x8xf32, #tpu.memory_space<vmem>>, vector<1x2x8xf32>,
    %29 = arith.truncf %20 : vector<256x8xf32> to vector<256x8xbf16>
    %30 = vector.shape_cast %29 : vector<256x8xbf16> to vector<1x256x8xbf16>
    %c0_40 = arith.constant 0 : index
    %c0_41 = arith.constant 0 : index
    %c0_42 = arith.constant 0 : index
    %31 = vector.load %arg3[%c0_40, %c0_41, %c0_42] : memref<1x256x8xbf16, #tpu.memory_space<vmem>>, vector<1x256x8xbf16>
    tpu.vector_store %arg3[%c0_40, %c0_41, %c0_42], %30 {strides = array<i32>} : memref<1x256x8xbf16, #tpu.memory_space<vmem>>, vector<1x256x8xbf16>,
    return
  }
  func.func @transform_0(%arg0: i32) -> (i32, i32, i32, i32) {
    %c0_i32 = arith.constant 0 : i32
    %c0_i32_0 = arith.constant 0 : i32
    %c0_i32_1 = arith.constant 0 : i32
    %c0_i32_2 = arith.constant 0 : i32
    return %arg0, %c0_i32, %c0_i32_0, %c0_i32_1 : i32, i32, i32, i32
  }
  func.func @transform_1(%arg0: i32) -> (i32, i32) {
    %c0_i32 = arith.constant 0 : i32
    %c0_i32_0 = arith.constant 0 : i32
    %c0_i32_1 = arith.constant 0 : i32
    return %c0_i32, %c0_i32_0 : i32, i32
  }
  func.func @transform_2(%arg0: i32) -> (i32, i32, i32) {
    %c0_i32 = arith.constant 0 : i32
    %c0_i32_0 = arith.constant 0 : i32
    %c0_i32_1 = arith.constant 0 : i32
    return %arg0, %c0_i32, %c0_i32_0 : i32, i32, i32
  }
  func.func @transform_3(%arg0: i32) -> (i32, i32, i32) {
    %c0_i32 = arith.constant 0 : i32
    %c0_i32_0 = arith.constant 0 : i32
    %c0_i32_1 = arith.constant 0 : i32
    return %arg0, %c0_i32, %c0_i32_0 : i32, i32, i32
  }
}

module attributes {stable_mosaic.version = 11 : i64} {
  func.func @kernel(%arg0: i32, %arg1: memref<1x256x8xbf16, #tpu.memory_space<vmem>>, %arg2: memref<1x8xf32, #tpu.memory_space<vmem>>, %arg3: memref<1x8xf32, #tpu.memory_space<vmem>>, %arg4: memref<72x8xbf16, #tpu.memory_space<vmem>>, %arg5: memref<1x256x8xbf16, #tpu.memory_space<vmem>>, %arg6: memref<1x2x8xf32, #tpu.memory_space<vmem>>, %arg7: memref<18x20x8xbf16, #tpu.memory_space<vmem>>) attributes {dimension_semantics = [#tpu.dimension_semantics<parallel>], iteration_bounds = array<i64: 2>, scalar_prefetch = 0 : i64, scratch_operands = 1 : i64, tpu.core_type = #tpu.core_type<tc>, window_params = [{transform_indices = @transform_0, window_bounds = array<i64: 1, 256, 8>}, {pipeline_mode = #tpu.pipeline_mode<synchronous>, transform_indices = @transform_1, window_bounds = array<i64: 1, 8>}, {pipeline_mode = #tpu.pipeline_mode<synchronous>, transform_indices = @transform_2, window_bounds = array<i64: 1, 8>}, {pipeline_mode = #tpu.pipeline_mode<synchronous>, transform_indices = @transform_3, window_bounds = array<i64: 72, 8>}, {transform_indices = @transform_4, window_bounds = array<i64: 1, 256, 8>}, {transform_indices = @transform_5, window_bounds = array<i64: 1, 2, 8>}]} {
    %c0 = arith.constant 0 : index
    %c0_0 = arith.constant 0 : index
    %c0_1 = arith.constant 0 : index
    %0 = vector.load %arg1[%c0, %c0_0, %c0_1] : memref<1x256x8xbf16, #tpu.memory_space<vmem>>, vector<1x256x8xbf16>
    %1 = vector.shape_cast %0 : vector<1x256x8xbf16> to vector<256x8xbf16>
    %2 = arith.extf %1 : vector<256x8xbf16> to vector<256x8xf32>
    %c0_2 = arith.constant 0 : index
    %c0_3 = arith.constant 0 : index
    %3 = vector.load %arg2[%c0_2, %c0_3] : memref<1x8xf32, #tpu.memory_space<vmem>>, vector<1x8xf32>
    %4 = vector.broadcast %3 : vector<1x8xf32> to vector<256x8xf32>
    %5 = arith.mulf %2, %4 : vector<256x8xf32>
    %c0_4 = arith.constant 0 : index
    %c0_5 = arith.constant 0 : index
    %6 = vector.load %arg3[%c0_4, %c0_5] : memref<1x8xf32, #tpu.memory_space<vmem>>, vector<1x8xf32>
    %7 = vector.broadcast %6 : vector<1x8xf32> to vector<256x8xf32>
    %8 = arith.addf %5, %7 : vector<256x8xf32>
    %cst = arith.constant 0.000000e+00 : f32
    %9 = vector.broadcast %cst : f32 to vector<256x8xf32>
    %10 = arith.maximumf %8, %9 : vector<256x8xf32>
    %cst_6 = arith.constant 0.000000e+00 : bf16
    %11 = vector.broadcast %cst_6 : bf16 to vector<1x20x8xbf16>
    %c0_7 = arith.constant 0 : index
    %c0_8 = arith.constant 0 : index
    %c0_9 = arith.constant 0 : index
    %12 = vector.load %arg7[%c0_7, %c0_8, %c0_9] : memref<18x20x8xbf16, #tpu.memory_space<vmem>>, vector<1x20x8xbf16>
    tpu.vector_store %arg7[%c0_7, %c0_8, %c0_9], %11 {strides = array<i32>} : memref<18x20x8xbf16, #tpu.memory_space<vmem>>, vector<1x20x8xbf16>,
    %cst_10 = arith.constant 0.000000e+00 : bf16
    %13 = vector.broadcast %cst_10 : bf16 to vector<1x20x8xbf16>
    %c17 = arith.constant 17 : index
    %c0_11 = arith.constant 0 : index
    %c0_12 = arith.constant 0 : index
    %14 = vector.load %arg7[%c17, %c0_11, %c0_12] : memref<18x20x8xbf16, #tpu.memory_space<vmem>>, vector<1x20x8xbf16>
    tpu.vector_store %arg7[%c17, %c0_11, %c0_12], %13 {strides = array<i32>} : memref<18x20x8xbf16, #tpu.memory_space<vmem>>, vector<1x20x8xbf16>,
    %cst_13 = arith.constant 0.000000e+00 : bf16
    %15 = vector.broadcast %cst_13 : bf16 to vector<18x2x8xbf16>
    %c0_14 = arith.constant 0 : index
    %c0_15 = arith.constant 0 : index
    %c0_16 = arith.constant 0 : index
    %16 = vector.load %arg7[%c0_14, %c0_15, %c0_16] : memref<18x20x8xbf16, #tpu.memory_space<vmem>>, vector<18x2x8xbf16>
    tpu.vector_store %arg7[%c0_14, %c0_15, %c0_16], %15 {strides = array<i32>} : memref<18x20x8xbf16, #tpu.memory_space<vmem>>, vector<18x2x8xbf16>,
    %cst_17 = arith.constant 0.000000e+00 : bf16
    %17 = vector.broadcast %cst_17 : bf16 to vector<18x2x8xbf16>
    %c0_18 = arith.constant 0 : index
    %c18 = arith.constant 18 : index
    %c0_19 = arith.constant 0 : index
    %18 = vector.load %arg7[%c0_18, %c18, %c0_19] : memref<18x20x8xbf16, #tpu.memory_space<vmem>>, vector<18x2x8xbf16>
    tpu.vector_store %arg7[%c0_18, %c18, %c0_19], %17 {strides = array<i32>} : memref<18x20x8xbf16, #tpu.memory_space<vmem>>, vector<18x2x8xbf16>,
    %19 = vector.shape_cast %10 : vector<256x8xf32> to vector<16x16x8xf32>
    %20 = arith.truncf %19 : vector<16x16x8xf32> to vector<16x16x8xbf16>
    %c1 = arith.constant 1 : index
    %c2 = arith.constant 2 : index
    %c0_20 = arith.constant 0 : index
    %21 = vector.load %arg7[%c1, %c2, %c0_20] : memref<18x20x8xbf16, #tpu.memory_space<vmem>>, vector<16x16x8xbf16>
    tpu.vector_store %arg7[%c1, %c2, %c0_20], %20 {strides = array<i32>} : memref<18x20x8xbf16, #tpu.memory_space<vmem>>, vector<16x16x8xbf16>,
    %c0_21 = arith.constant 0 : index
    %c1_22 = arith.constant 1 : index
    %c0_23 = arith.constant 0 : index
    %22 = vector.load %arg7[%c0_21, %c1_22, %c0_23] : memref<18x20x8xbf16, #tpu.memory_space<vmem>>, vector<16x16x8xbf16>
    %23 = vector.shape_cast %22 : vector<16x16x8xbf16> to vector<256x8xbf16>
    %c0_24 = arith.constant 0 : index
    %c2_25 = arith.constant 2 : index
    %c0_26 = arith.constant 0 : index
    %24 = vector.load %arg7[%c0_24, %c2_25, %c0_26] : memref<18x20x8xbf16, #tpu.memory_space<vmem>>, vector<16x16x8xbf16>
    %25 = vector.shape_cast %24 : vector<16x16x8xbf16> to vector<256x8xbf16>
    %c0_27 = arith.constant 0 : index
    %c3 = arith.constant 3 : index
    %c0_28 = arith.constant 0 : index
    %26 = vector.load %arg7[%c0_27, %c3, %c0_28] : memref<18x20x8xbf16, #tpu.memory_space<vmem>>, vector<16x16x8xbf16>
    %27 = vector.shape_cast %26 : vector<16x16x8xbf16> to vector<256x8xbf16>
    %c1_29 = arith.constant 1 : index
    %c1_30 = arith.constant 1 : index
    %c0_31 = arith.constant 0 : index
    %28 = vector.load %arg7[%c1_29, %c1_30, %c0_31] : memref<18x20x8xbf16, #tpu.memory_space<vmem>>, vector<16x16x8xbf16>
    %29 = vector.shape_cast %28 : vector<16x16x8xbf16> to vector<256x8xbf16>
    %c1_32 = arith.constant 1 : index
    %c2_33 = arith.constant 2 : index
    %c0_34 = arith.constant 0 : index
    %30 = vector.load %arg7[%c1_32, %c2_33, %c0_34] : memref<18x20x8xbf16, #tpu.memory_space<vmem>>, vector<16x16x8xbf16>
    %31 = vector.shape_cast %30 : vector<16x16x8xbf16> to vector<256x8xbf16>
    %c1_35 = arith.constant 1 : index
    %c3_36 = arith.constant 3 : index
    %c0_37 = arith.constant 0 : index
    %32 = vector.load %arg7[%c1_35, %c3_36, %c0_37] : memref<18x20x8xbf16, #tpu.memory_space<vmem>>, vector<16x16x8xbf16>
    %33 = vector.shape_cast %32 : vector<16x16x8xbf16> to vector<256x8xbf16>
    %c2_38 = arith.constant 2 : index
    %c1_39 = arith.constant 1 : index
    %c0_40 = arith.constant 0 : index
    %34 = vector.load %arg7[%c2_38, %c1_39, %c0_40] : memref<18x20x8xbf16, #tpu.memory_space<vmem>>, vector<16x16x8xbf16>
    %35 = vector.shape_cast %34 : vector<16x16x8xbf16> to vector<256x8xbf16>
    %c2_41 = arith.constant 2 : index
    %c2_42 = arith.constant 2 : index
    %c0_43 = arith.constant 0 : index
    %36 = vector.load %arg7[%c2_41, %c2_42, %c0_43] : memref<18x20x8xbf16, #tpu.memory_space<vmem>>, vector<16x16x8xbf16>
    %37 = vector.shape_cast %36 : vector<16x16x8xbf16> to vector<256x8xbf16>
    %c2_44 = arith.constant 2 : index
    %c3_45 = arith.constant 3 : index
    %c0_46 = arith.constant 0 : index
    %38 = vector.load %arg7[%c2_44, %c3_45, %c0_46] : memref<18x20x8xbf16, #tpu.memory_space<vmem>>, vector<16x16x8xbf16>
    %39 = vector.shape_cast %38 : vector<16x16x8xbf16> to vector<256x8xbf16>
    %40 = tpu.concatenate %23, %25, %27, %29, %31, %33, %35, %37, %39 in 1 : vector<256x8xbf16>, vector<256x8xbf16>, vector<256x8xbf16>, vector<256x8xbf16>, vector<256x8xbf16>, vector<256x8xbf16>, vector<256x8xbf16>, vector<256x8xbf16>, vector<256x8xbf16> -> vector<256x72xbf16>
    %c0_47 = arith.constant 0 : index
    %c0_48 = arith.constant 0 : index
    %41 = vector.load %arg4[%c0_47, %c0_48] : memref<72x8xbf16, #tpu.memory_space<vmem>>, vector<72x8xbf16>
    %cst_49 = arith.constant dense<0.000000e+00> : vector<256x8xf32>
    %42 = tpu.matmul %40, %41, %cst_49 {dimension_numbers = #tpu.dot_dimension_numbers<[1], [0], [0], [1], [0, 0, 1, 1], [], []>} : vector<256x72xbf16>, vector<72x8xbf16>, vector<256x8xf32> -> vector<256x8xf32>
    %cst_50 = arith.constant dense<0.000000e+00> : vector<8xf32>
    %43 = vector.multi_reduction <add>, %42, %cst_50 [0] : vector<256x8xf32> to vector<8xf32>
    %44 = vector.shape_cast %43 : vector<8xf32> to vector<1x8xf32>
    %45 = arith.mulf %42, %42 : vector<256x8xf32>
    %cst_51 = arith.constant dense<0.000000e+00> : vector<8xf32>
    %46 = vector.multi_reduction <add>, %45, %cst_51 [0] : vector<256x8xf32> to vector<8xf32>
    %47 = vector.shape_cast %46 : vector<8xf32> to vector<1x8xf32>
    %48 = tpu.concatenate %44, %47 in 0 : vector<1x8xf32>, vector<1x8xf32> -> vector<2x8xf32>
    %49 = vector.shape_cast %48 : vector<2x8xf32> to vector<1x2x8xf32>
    %c0_52 = arith.constant 0 : index
    %c0_53 = arith.constant 0 : index
    %c0_54 = arith.constant 0 : index
    %50 = vector.load %arg6[%c0_52, %c0_53, %c0_54] : memref<1x2x8xf32, #tpu.memory_space<vmem>>, vector<1x2x8xf32>
    tpu.vector_store %arg6[%c0_52, %c0_53, %c0_54], %49 {strides = array<i32>} : memref<1x2x8xf32, #tpu.memory_space<vmem>>, vector<1x2x8xf32>,
    %51 = arith.truncf %42 : vector<256x8xf32> to vector<256x8xbf16>
    %52 = vector.shape_cast %51 : vector<256x8xbf16> to vector<1x256x8xbf16>
    %c0_55 = arith.constant 0 : index
    %c0_56 = arith.constant 0 : index
    %c0_57 = arith.constant 0 : index
    %53 = vector.load %arg5[%c0_55, %c0_56, %c0_57] : memref<1x256x8xbf16, #tpu.memory_space<vmem>>, vector<1x256x8xbf16>
    tpu.vector_store %arg5[%c0_55, %c0_56, %c0_57], %52 {strides = array<i32>} : memref<1x256x8xbf16, #tpu.memory_space<vmem>>, vector<1x256x8xbf16>,
    return
  }
  func.func @transform_0(%arg0: i32) -> (i32, i32, i32) {
    %c0_i32 = arith.constant 0 : i32
    %c0_i32_0 = arith.constant 0 : i32
    %c0_i32_1 = arith.constant 0 : i32
    return %arg0, %c0_i32, %c0_i32_0 : i32, i32, i32
  }
  func.func @transform_1(%arg0: i32) -> (i32, i32) {
    %c0_i32 = arith.constant 0 : i32
    %c0_i32_0 = arith.constant 0 : i32
    %c0_i32_1 = arith.constant 0 : i32
    return %c0_i32, %c0_i32_0 : i32, i32
  }
  func.func @transform_2(%arg0: i32) -> (i32, i32) {
    %c0_i32 = arith.constant 0 : i32
    %c0_i32_0 = arith.constant 0 : i32
    %c0_i32_1 = arith.constant 0 : i32
    return %c0_i32, %c0_i32_0 : i32, i32
  }
  func.func @transform_3(%arg0: i32) -> (i32, i32) {
    %c0_i32 = arith.constant 0 : i32
    %c0_i32_0 = arith.constant 0 : i32
    %c0_i32_1 = arith.constant 0 : i32
    return %c0_i32, %c0_i32_0 : i32, i32
  }
  func.func @transform_4(%arg0: i32) -> (i32, i32, i32) {
    %c0_i32 = arith.constant 0 : i32
    %c0_i32_0 = arith.constant 0 : i32
    %c0_i32_1 = arith.constant 0 : i32
    return %arg0, %c0_i32, %c0_i32_0 : i32, i32, i32
  }
  func.func @transform_5(%arg0: i32) -> (i32, i32, i32) {
    %c0_i32 = arith.constant 0 : i32
    %c0_i32_0 = arith.constant 0 : i32
    %c0_i32_1 = arith.constant 0 : i32
    return %arg0, %c0_i32, %c0_i32_0 : i32, i32, i32
  }
}

module attributes {stable_mosaic.version = 11 : i64} {
  func.func @kernel(%arg0: i32, %arg1: memref<1x16x128xbf16, #tpu.memory_space<vmem>>, %arg2: memref<1x128xf32, #tpu.memory_space<vmem>>, %arg3: memref<1x128xf32, #tpu.memory_space<vmem>>, %arg4: memref<1x16x128xf32, #tpu.memory_space<vmem>>) attributes {dimension_semantics = [#tpu.dimension_semantics<parallel>], iteration_bounds = array<i64: 2>, scalar_prefetch = 0 : i64, scratch_operands = 0 : i64, tpu.core_type = #tpu.core_type<tc>, window_params = [{transform_indices = @transform_0, window_bounds = array<i64: 1, 16, 128>}, {pipeline_mode = #tpu.pipeline_mode<synchronous>, transform_indices = @transform_1, window_bounds = array<i64: 1, 128>}, {pipeline_mode = #tpu.pipeline_mode<synchronous>, transform_indices = @transform_2, window_bounds = array<i64: 1, 128>}, {transform_indices = @transform_3, window_bounds = array<i64: 1, 16, 128>}]} {
    %c0 = arith.constant 0 : index
    %c0_0 = arith.constant 0 : index
    %c0_1 = arith.constant 0 : index
    %0 = vector.load %arg1[%c0, %c0_0, %c0_1] : memref<1x16x128xbf16, #tpu.memory_space<vmem>>, vector<1x16x128xbf16>
    %1 = arith.extf %0 : vector<1x16x128xbf16> to vector<1x16x128xf32>
    %c0_2 = arith.constant 0 : index
    %c0_3 = arith.constant 0 : index
    %2 = vector.load %arg2[%c0_2, %c0_3] : memref<1x128xf32, #tpu.memory_space<vmem>>, vector<1x128xf32>
    %3 = vector.shape_cast %2 : vector<1x128xf32> to vector<1x1x128xf32>
    %4 = vector.broadcast %3 : vector<1x1x128xf32> to vector<1x16x128xf32>
    %5 = arith.mulf %1, %4 : vector<1x16x128xf32>
    %c0_4 = arith.constant 0 : index
    %c0_5 = arith.constant 0 : index
    %6 = vector.load %arg3[%c0_4, %c0_5] : memref<1x128xf32, #tpu.memory_space<vmem>>, vector<1x128xf32>
    %7 = vector.shape_cast %6 : vector<1x128xf32> to vector<1x1x128xf32>
    %8 = vector.broadcast %7 : vector<1x1x128xf32> to vector<1x16x128xf32>
    %9 = arith.addf %5, %8 : vector<1x16x128xf32>
    %c0_6 = arith.constant 0 : index
    %c0_7 = arith.constant 0 : index
    %c0_8 = arith.constant 0 : index
    %10 = vector.load %arg4[%c0_6, %c0_7, %c0_8] : memref<1x16x128xf32, #tpu.memory_space<vmem>>, vector<1x16x128xf32>
    tpu.vector_store %arg4[%c0_6, %c0_7, %c0_8], %9 {strides = array<i32>} : memref<1x16x128xf32, #tpu.memory_space<vmem>>, vector<1x16x128xf32>,
    return
  }
  func.func @transform_0(%arg0: i32) -> (i32, i32, i32) {
    %c0_i32 = arith.constant 0 : i32
    %c0_i32_0 = arith.constant 0 : i32
    %c0_i32_1 = arith.constant 0 : i32
    return %arg0, %c0_i32, %c0_i32_0 : i32, i32, i32
  }
  func.func @transform_1(%arg0: i32) -> (i32, i32) {
    %c0_i32 = arith.constant 0 : i32
    %c0_i32_0 = arith.constant 0 : i32
    %c0_i32_1 = arith.constant 0 : i32
    return %c0_i32, %c0_i32_0 : i32, i32
  }
  func.func @transform_2(%arg0: i32) -> (i32, i32) {
    %c0_i32 = arith.constant 0 : i32
    %c0_i32_0 = arith.constant 0 : i32
    %c0_i32_1 = arith.constant 0 : i32
    return %c0_i32, %c0_i32_0 : i32, i32
  }
  func.func @transform_3(%arg0: i32) -> (i32, i32, i32) {
    %c0_i32 = arith.constant 0 : i32
    %c0_i32_0 = arith.constant 0 : i32
    %c0_i32_1 = arith.constant 0 : i32
    return %arg0, %c0_i32, %c0_i32_0 : i32, i32, i32
  }
}

</mosaic_0001>

<bundles_post_ra>
// kernel: tile.13
= control target key start
LH: loop header
LB: loop body
LE: loop exit
PB: predicated region body
PF: predicated region fallthrough
CT: control target
= control target key end

     0   :  { %s28_s0 = inlined_call_operand.vmem [shape: f32[8], index: 0, kind: input, shape index: {}]   ;;  %s29_s1 = inlined_call_operand.vmem [shape: f32[16,8], index: 1, kind: output, shape index: {}]  }
   0x1   :  { %v4_v0 = vld [vmem:[%s28_s0] ss:$0 sm:$0xff] }
   0x2   :  { %5 = vst [vmem:[%s29_s1] sm:$0xff] %v4_v0 }
   0x3   :  { %8 = vst [vmem:[%s29_s1 + $0x8] sm:$0xff] %v4_v0 }

// kernel: tile.14
= control target key start
LH: loop header
LB: loop body
LE: loop exit
PB: predicated region body
PF: predicated region fallthrough
CT: control target
= control target key end

     0   :  { %s131_s10 = smov 120   ;;  %s132_s11 = smov 104   ;;  %vm3_vm0 = vcmask 64512   ;;  %vm9_vm1 = vcmask 1048512   ;;  %vm15_vm2 = vcmask 982912   ;;  %vm21_vm3 = vcmask 917312   ;;  %s207_s0 = inlined_call_operand.vmem [shape: f32[16,8], index: 0, kind: input, shape index: {}]   ;;  %s208_s1 = inlined_call_operand.vmem [shape: f32[1,128], index: 1, kind: output, shape index: {}]  }
   0x1   :  { %v101_v0 = vld [vmem:[%s207_s0 + $0xf] sm:$0x1]   ;;  %v103_v1 = vld [vmem:[%s207_s0 + $0xd] sm:$0x1]   ;;  %v105_v2 = vld [vmem:[%s207_s0 + $0xb] sm:$0x1]  }
   0x2   :  { %7 = vrot.lane.b32.xlu0 %v101_v0, %s131_s10  ;;  %19 = vrot.lane.b32.xlu1 %v103_v1, %s132_s11  ;;  %s133_s14 = smov 88   ;;  %v102_v3 = vld [vmem:[%s207_s0 + $0xe] sm:$0x1]   ;;  %v104_v4 = vld [vmem:[%s207_s0 + $0xc] sm:$0x1]   ;;  %s134_s19 = smov 112  }
   0x3   :  { %31 = vrot.lane.b32.xlu2 %v105_v2, %s133_s14  ;;  %s135_s20 = smov 96   ;;  %v106_v5 = vld [vmem:[%s207_s0 + $0xa] sm:$0x1]   ;;  %s136_s23 = smov 80   ;;  %v107_v6 = vld [vmem:[%s207_s0 + $0x9] sm:$0x1]  }
   0x4   :  { %v108_v7 = vld [vmem:[%s207_s0 + $0x8] sm:$0x1]   ;;  %s137_s28 = smov 72   ;;  %s138_s29 = smov 64   ;;  %v109_v8 = vld [vmem:[%s207_s0 + $0x7] sm:$0x1]  }
   0x5   :  { %s139_s3 = smov 56   ;;  %v110_v9 = vld [vmem:[%s207_s0 + $0x6] sm:$0x1]   ;;  %v111_v10 = vld [vmem:[%s207_s0 + $0x5] sm:$0x1]   ;;  %s140_s8 = smov 48  }
   0x6   :  { %s141_s9 = smov 40   ;;  %v112_v11 = vld [vmem:[%s207_s0 + $0x4] sm:$0x1]   ;;  %s142_s12 = smov 32   ;;  %v113_v12 = vld [vmem:[%s207_s0 + $0x3] sm:$0x1]  }
   0x7   :  { %v114_v13 = vld [vmem:[%s207_s0 + $0x2] sm:$0x1]   ;;  %s143_s17 = smov 24   ;;  %s144_s18 = smov 16   ;;  %v115_v14 = vld [vmem:[%s207_s0 + $0x1] sm:$0x1]  }
   0x8   :  { %s145_s21 = smov 8   ;;  %v2_v15 = vld [vmem:[%s207_s0] sm:$0x1]   ;;  %vm27_vm4 = vcmask 851712   ;;  %vm33_vm5 = vcmask 786112   ;;  %vm39_vm6 = vcmask 720512  }
   0x9   :  { %4 = vst.msk [vmem:[#allocation0] sm:$0x1] %vm3_vm0, %v2_v15   ;;  %vm45_vm7 = vcmask 654912   ;;  %vm51_vm8 = vcmask 589312   ;;  %vm57_vm9 = vcmask 523712   ;;  %vm63_vm10 = vcmask 458112  }
   0xa   :  { %13 = vrot.lane.b32.xlu0 %v102_v3, %s134_s19  ;;  %25 = vrot.lane.b32.xlu1 %v104_v4, %s135_s20  ;;  %vm69_vm11 = vcmask 392512   ;;  %vm75_vm12 = vcmask 326912   ;;  %vm81_vm13 = vcmask 261312   ;;  %vm87_vm14 = vcmask 195712  }
   0xb   :  { %37 = vrot.lane.b32.xlu2 %v106_v5, %s136_s23  ;;  %vm93_vm15 = vcmask 130112  }
  0x12   :  { %43 = vrot.lane.b32.xlu0 %v107_v6, %s137_s28  ;;  %49 = vrot.lane.b32.xlu1 %v108_v7, %s138_s29 }
  0x13   :  { %55 = vrot.lane.b32.xlu2 %v109_v8, %s139_s3 }
  0x1a   :  { %61 = vrot.lane.b32.xlu0 %v110_v9, %s140_s8  ;;  %67 = vrot.lane.b32.xlu1 %v111_v10, %s141_s9 }
  0x1b   :  { %73 = vrot.lane.b32.xlu2 %v112_v11, %s142_s12 }
  0x22   :  { %79 = vrot.lane.b32.xlu0 %v113_v12, %s143_s17  ;;  %85 = vrot.lane.b32.xlu1 %v114_v13, %s144_s18 }
  0x23   :  { %91 = vrot.lane.b32.xlu2 %v115_v14, %s145_s21 }
  0x5d   :  { %v32_v16 = vpop.permute.xlu2 %31  }
  0x65   :  { %v38_v17 = vpop.permute.xlu2 %37  }
  0x6d   :  { %v56_v18 = vpop.permute.xlu2 %55  }
  0x74   :  { %v8_v19 = vpop.permute.xlu0 %7   ;;  %v20_v20 = vpop.permute.xlu1 %19  }
  0x75   :  { %10 = vst.msk [vmem:[#allocation0] sm:$0x1] %vm9_vm1, %v8_v19   ;;  %v74_v21 = vpop.permute.xlu2 %73  }
  0x7c   :  { %v14_v22 = vpop.permute.xlu0 %13   ;;  %v26_v23 = vpop.permute.xlu1 %25  }
  0x7d   :  { %16 = vst.msk [vmem:[#allocation0] sm:$0x1] %vm15_vm2, %v14_v22   ;;  %v92_v24 = vpop.permute.xlu2 %91  }
  0x7e   :  { %22 = vst.msk [vmem:[#allocation0] sm:$0x1] %vm21_vm3, %v20_v20  }
  0x7f   :  { %28 = vst.msk [vmem:[#allocation0] sm:$0x1] %vm27_vm4, %v26_v23  }
  0x80   :  { %34 = vst.msk [vmem:[#allocation0] sm:$0x1] %vm33_vm5, %v32_v16  }
  0x81   :  { %40 = vst.msk [vmem:[#allocation0] sm:$0x1] %vm39_vm6, %v38_v17  }
  0x84   :  { %v44_v25 = vpop.permute.xlu0 %43   ;;  %v50_v26 = vpop.permute.xlu1 %49  }
  0x85   :  { %46 = vst.msk [vmem:[#allocation0] sm:$0x1] %vm45_vm7, %v44_v25  }
  0x86   :  { %52 = vst.msk [vmem:[#allocation0] sm:$0x1] %vm51_vm8, %v50_v26  }
  0x87   :  { %58 = vst.msk [vmem:[#allocation0] sm:$0x1] %vm57_vm9, %v56_v18  }
  0x8c   :  { %v62_v27 = vpop.permute.xlu0 %61   ;;  %v68_v28 = vpop.permute.xlu1 %67  }
  0x8d   :  { %64 = vst.msk [vmem:[#allocation0] sm:$0x1] %vm63_vm10, %v62_v27  }
  0x8e   :  { %70 = vst.msk [vmem:[#allocation0] sm:$0x1] %vm69_vm11, %v68_v28  }
  0x8f   :  { %76 = vst.msk [vmem:[#allocation0] sm:$0x1] %vm75_vm12, %v74_v21  }
  0x94   :  { %v80_v29 = vpop.permute.xlu0 %79   ;;  %v86_v30 = vpop.permute.xlu1 %85  }
  0x95   :  { %82 = vst.msk [vmem:[#allocation0] sm:$0x1] %vm81_vm13, %v80_v29  }
  0x96   :  { %88 = vst.msk [vmem:[#allocation0] sm:$0x1] %vm87_vm14, %v86_v30  }
  0x97   :  { %94 = vst.msk [vmem:[#allocation0] sm:$0x1] %vm93_vm15, %v92_v24  }
  0x9e   :  { %v97_v31 = vld [vmem:[#allocation0] sm:$0x1] }
  0x9f   :  { %100 = vst [vmem:[%s208_s1] sm:$0x1] %v97_v31 }

// kernel: resnet34_block.5
= control target key start
LH: loop header
LB: loop body
LE: loop exit
PB: predicated region body
PF: predicated region fallthrough
CT: control target
= control target key end

     0   :  { %s299_s12 = smov 0   ;;  %s316_s0 = inlined_call_operand.vmem [shape: bf16[2,16,128], index: 0, kind: input, shape index: {}]   ;;  %s317_s1 = inlined_call_operand.vmem [shape: f32[1,128], index: 1, kind: input, shape index: {}]   ;;  %s318_s2 = inlined_call_operand.vmem [shape: f32[1,128], index: 2, kind: input, shape index: {}]   ;;  %s319_s3 = inlined_call_operand.vmem [shape: f32[2,16,128], index: 3, kind: output, shape index: {}]  }
   0x1 LB: > { %s244_s13 = sadd.s32 4294967295, %s277_s12   ;;  %p248_p0 = scmp.ge.s32.totalorder %s277_s12, 1  ;;  %s277_s12 = sphi %s299_s12, %s13_s12  }
   0x2   : > { %p137_p1 = scmp.lt.s32.totalorder %s277_s12, 3 }
   0x4   : > { %p138_p2 = pnand %p248_p0, %p137_p1 }
   0x5   : > { %p161_p3 = scmp.lt.s32.totalorder (!%p138_p2), %s244_s13, 1 }
   0x6   : > { %141 = sbr.rel (%p138_p2) target bundleno = 23 (0x17), region = 32 }
   0xb   : > { %s321_s13 = smov (!%p161_p3, %s244_s13), 1  ;;  %v269_v0 = vld [vmem:[%s317_s1] ss:$0 sm:$0xff] }
   0xc   : > { %s255_s14 = sshll.u32 %s321_s13, 3  ;;  %s256_s20 = sshll.u32 %s321_s13, 4  ;;  %v270_v3 = vld [vmem:[%s318_s2] ss:$0 sm:$0xff] }
   0xd   : > { %s165_s17 = scalar_lea.vmem %s316_s0, %s255_s14  ;;  %s170_s25 = scalar_lea.vmem %s319_s3, %s256_s20 }
   0xe   : > { %v258_v1 = vld [vmem:[%s165_s17] sm:$0xff]  }
   0xf   : > { %v259_v2 = vunpack.c.l.bf16 %v258_v1  ;;  %v260_v4 = vunpack.c.h.bf16 %v258_v1 }
  0x11   : > { %v179_v5 = vmul.f32 %v269_v0, %v259_v2  ;;  %v180_v6 = vmul.f32 %v269_v0, %v260_v4 }
  0x13   : > { %v185_v7 = vadd.f32 %v270_v3, %v179_v5  ;;  %v186_v8 = vadd.f32 %v270_v3, %v180_v6 }
  0x15   : > { %187 = vst [vmem:[%s170_s25] sm:$0xff] %v185_v7 }
  0x16   : > { %188 = vst [vmem:[%s170_s25 + $0x8] sm:$0xff] %v186_v8 }
  0x17 PF: > { %s13_s12 = sadd.s32 1, %s277_s12  }
  0x18   : > { %p10_p4 = scmp.ge.s32.totalorder %s13_s12, 4  }
  0x1a   :  { %12 = sbr.rel (!%p10_p4) target bundleno = 1 (0x1), region = 62 }

// kernel: resnet34_block.3
= control target key start
LH: loop header
LB: loop body
LE: loop exit
PB: predicated region body
PF: predicated region fallthrough
CT: control target
= control target key end

     0   :  { %s4020_s12 = smov 0   ;;  %s5868_s0 = inlined_call_operand.vmem [shape: bf16[2,18,18,4], index: 0, kind: input, shape index: {}]   ;;  %s5869_s1 = inlined_call_operand.vmem [shape: bf16[36,8], index: 1, kind: input, shape index: {}]   ;;  %s5870_s2 = inlined_call_operand.vmem [shape: bf16[2,256,8], index: 2, kind: output, shape index: {0}]   ;;  %s5871_s3 = inlined_call_operand.vmem [shape: f32[2,2,8], index: 3, kind: output, shape index: {1}]  }
   0x1 LB: > { %s3502_s13 = sadd.s32 4294967295, %s3990_s12   ;;  %p3506_p0 = scmp.ge.s32.totalorder %s3990_s12, 1  ;;  %s3990_s12 = sphi %s4020_s12, %s14_s12  }
   0x2   : > { %p140_p1 = scmp.lt.s32.totalorder %s3990_s12, 3 }
   0x4   : > { %p141_p2 = pnand %p3506_p0, %p140_p1 }
   0x5   : > { %p168_p3 = scmp.lt.s32.totalorder (!%p141_p2), %s3502_s13, 1  ;;  %s3992_s18 = smov (!%p141_p2), 4  }
   0x6   : > { %144 = sbr.rel (%p141_p2) target bundleno = 677 (0x2a5), region = 28  ;;  %s3993_s19 = smov (!%p141_p2), 8  }
   0x7   : > { %s3994_s20 = smov (!%p141_p2), 16   ;;  %s3995_s21 = smov (!%p141_p2), 12  }
   0x8   : > { %s3996_s22 = smov (!%p141_p2), 28   ;;  %s3997_s23 = smov (!%p141_p2), 24  }
   0x9   : > { %s3998_s24 = smov (!%p141_p2), 20   ;;  %s3999_s25 = smov (!%p141_p2), 32  }
   0xb   : > { %s5877_s13 = smov (!%p168_p3, %s3502_s13), 1  ;;  %vm231_vm0 = vsmask.f32 3328  ;;  %vm232_vm1 = vsmask.f32 7440  ;;  %vm682_vm3 = vcmask 1042432  }
   0xc   : > { %s3965_s14 = smul.u32 216, %s5877_s13  ;;  %vm4062_vm2 = vmor %vm231_vm0, %vm232_vm1  ;;  %vm683_vm4 = vcmask 1046532   ;;  %vm2751_vm6 = vcmask 31744   ;;  %vm2800_vm7 = vcmask 64512   ;;  %vm3084_vm8 = vcmask 1041408   ;;  %s3905_s5 = sshll.u32 %s5877_s13, 7 }
   0xd   : > { %vm4264_vm5 = vmor %vm682_vm3, %vm683_vm4  ;;  %vm2833_vm9 = vcmask 97280   ;;  %vm2866_vm10 = vcmask 130048   ;;  %vm2899_vm11 = vcmask 162816   ;;  %vm2932_vm12 = vcmask 195584   ;;  %s5576_s8 = scalar_lea.vmem %s5870_s2, %s3905_s5  ;;  %s3510_s9 = sshll.u32 %s5877_s13, 1 }
   0xe   : > { %s4034_s17 = scalar_lea.vmem %s5868_s0, %s3965_s14  ;;  %vm2965_vm13 = vcmask 228352   ;;  %vm2998_vm14 = vcmask 261120   ;;  %vm3051_vm15 = vcmask 293888   ;;  %vm3383_vm0 = vcmask 60416   ;;  %s181_s14 = scalar_lea.vmem %s5871_s3, %s3510_s9 }
   0xf   : > { %v191_v0 = vld [vmem:[%s4034_s17 + $0x30] sm:$0xf]  ;;  %v4038_v1 = vld [vmem:[%s4034_s17 + $0x34] sm:$0xf]  ;;  %v4041_v2 = vld [vmem:[%s4034_s17 + $0x38] sm:$0x1] }
  0x10   : > { %v331_v3 = vshrl.u32 %v191_v0, 16  ;;  %v334_v4 = vshll.u32 %v191_v0, 16  ;;  %v340_v5 = vshll.u32 %v4038_v1, 16  ;;  %v344_v6 = vshrl.u32 %v4038_v1, 16  ;;  %v187_v7 = vld [vmem:[%s4034_s17 + $0x18] sm:$0xf] }
  0x11   : > { %v350_v8 = vshll.u32 %v4041_v2, 16  ;;  %v4048_v9 = vld [vmem:[%s4034_s17 + $0x1c] sm:$0xf]  ;;  %v4051_v10 = vld [vmem:[%s4034_s17 + $0x20] sm:$0x1]  ;;  %v283_v11 = vshrl.u32 %v187_v7, 16 }
  0x12   : > { %v333_v12 = vrot.slane %v331_v3, 4  ;;  %v336_v13 = vrot.slane %v334_v4, 5  ;;  %v342_v14 = vrot.slane %v340_v5, 5  ;;  %v346_v15 = vrot.slane %v344_v6, 4  ;;  %v183_v16 = vld [vmem:[%s4034_s17] sm:$0xf] }
  0x13   : > { %v352_v17 = vrot.slane %v350_v8, 5  ;;  %v285_v18 = vrot.slane %v283_v11, 4  ;;  %v286_v19 = vshll.u32 %v187_v7, 16  ;;  %v292_v20 = vshll.u32 %v4048_v9, 16  ;;  %v4058_v25 = vld [vmem:[%s4034_s17 + $0x4] sm:$0xf] }
  0x14   : > { %v337_v21 = vor.u32 %v336_v13, %v333_v12  ;;  %v347_v22 = vor.u32 %v346_v15, %v342_v14  ;;  %v296_v23 = vshrl.u32 %v4048_v9, 16  ;;  %v302_v24 = vshll.u32 %v4051_v10, 16  ;;  %v4067_v36 = vld [vmem:[%s4034_s17 + $0x8] sm:$0x1]  ;;  %v193_v44 = vld [vmem:[%s4034_s17 + $0x3c] sm:$0xf] }
  0x15   : > { %v288_v27 = vrot.slane %v286_v19, 5  ;;  %v294_v28 = vrot.slane %v292_v20, 5  ;;  %v235_v29 = vshrl.u32 %v183_v16, 16  ;;  %v238_v30 = vshll.u32 %v183_v16, 16  ;;  %v4080_v56 = vld [vmem:[%s4034_s17 + $0x40] sm:$0xf] }
  0x16   : > { %v338_v31 = vrot.slane %v337_v21, 4  ;;  %v348_v32 = vrot.slane %v347_v22, 4  ;;  %v298_v33 = vrot.slane %v296_v23, 4  ;;  %v304_v34 = vrot.slane %v302_v24, 5  ;;  %v4085_v62 = vld [vmem:[%s4034_s17 + $0x44] sm:$0x1] }
  0x17   : > { %v289_v35 = vor.u32 %v288_v27, %v285_v18  ;;  %v237_v37 = vrot.slane %v235_v29, 4  ;;  %v240_v38 = vrot.slane %v238_v30, 5  ;;  %v244_v39 = vshll.u32 %v4058_v25, 16  ;;  %v189_v63 = vld [vmem:[%s4034_s17 + $0x24] sm:$0xf] }
  0x18   : > { %v343_v40 = vsel %vm4062_vm2, %v338_v31, %v342_v14  ;;  %v353_v41 = vsel %vm4062_vm2, %v348_v32, %v352_v17  ;;  %v299_v42 = vor.u32 %v298_v33, %v294_v28  ;;  %v248_v43 = vshrl.u32 %v4058_v25, 16  ;;  %v4094_v12 = vld [vmem:[%s4034_s17 + $0x28] sm:$0xf]  ;;  %v4098_v16 = vld [vmem:[%s4034_s17 + $0x2c] sm:$0x1] }
  0x19   : > { %v2087_v45 = vunpack.c.l.b16 %v343_v40  ;;  %v2088_v46 = vunpack.c.l.b16 %v353_v41  ;;  %v290_v47 = vrot.slane %v289_v35, 4  ;;  %v241_v48 = vor.u32 %v240_v38, %v237_v37  ;;  %v185_v22 = vld [vmem:[%s4034_s17 + $0xc] sm:$0xf]  ;;  %v4108_v37 = vld [vmem:[%s4034_s17 + $0x10] sm:$0xf] }
  0x1a   : > { %v300_v49 = vrot.slane %v299_v42, 4  ;;  %v246_v50 = vrot.slane %v244_v39, 5  ;;  %v250_v51 = vrot.slane %v248_v43, 4  ;;  %v254_v52 = vshll.u32 %v4067_v36, 16  ;;  %v4111_v43 = vld [vmem:[%s4034_s17 + $0x14] sm:$0x1] }
  0x1b   : > { %v2115_v53 = vpack.c.b16 %v2088_v46, %v2087_v45  ;;  %v295_v54 = vsel %vm4062_vm2, %v290_v47, %v294_v28  ;;  %v242_v55 = vrot.slane %v241_v48, 4  ;;  %v355_v57 = vshrl.u32 %v193_v44, 16  ;;  %v199_v48 = vld [vmem:[%s4034_s17 + $0x60] sm:$0xf] }
  0x1c   : > { %v305_v58 = vsel %vm4062_vm2, %v300_v49, %v304_v34  ;;  %v2083_v59 = vunpack.c.l.b16 %v295_v54  ;;  %v251_v60 = vor.u32 %v250_v51, %v246_v50  ;;  %v256_v61 = vrot.slane %v254_v52, 5 }
  0x1d   : > { %2135 = vrot.lane.b32.xlu2 %v2115_v53, %s3992_s18  ;;  %v2084_v0 = vunpack.c.l.b16 %v305_v58  ;;  %v247_v3 = vsel %vm4062_vm2, %v242_v55, %v246_v50  ;;  %v357_v4 = vrot.slane %v355_v57, 4  ;;  %v358_v5 = vshll.u32 %v193_v44, 16 }
  0x1e   : > { %v252_v6 = vrot.slane %v251_v60, 4  ;;  %v2079_v7 = vunpack.c.l.b16 %v247_v3  ;;  %v364_v8 = vshll.u32 %v4080_v56, 16  ;;  %v368_v11 = vshrl.u32 %v4080_v56, 16 }
  0x1f   : > { %v2113_v13 = vpack.c.b16 %v2084_v0, %v2083_v59  ;;  %v360_v14 = vrot.slane %v358_v5, 5  ;;  %v374_v15 = vshll.u32 %v4085_v62, 16  ;;  %v307_v17 = vshrl.u32 %v189_v63, 16 }
  0x20   : > { %v257_v18 = vsel %vm4062_vm2, %v252_v6, %v256_v61  ;;  %v366_v19 = vrot.slane %v364_v8, 5  ;;  %v370_v20 = vrot.slane %v368_v11, 4  ;;  %v310_v21 = vshll.u32 %v189_v63, 16  ;;  %v4125_v61 = vld [vmem:[%s4034_s17 + $0x64] sm:$0xf] }
  0x21   : > { %2131 = vrot.lane.b32.xlu1 %v2113_v13, %s3992_s18  ;;  %v2080_v23 = vunpack.c.l.b16 %v257_v18  ;;  %v361_v24 = vor.u32 %v360_v14, %v357_v4  ;;  %v376_v27 = vrot.slane %v374_v15, 5  ;;  %v309_v28 = vrot.slane %v307_v17, 4  ;;  %v4128_v6 = vld [vmem:[%s4034_s17 + $0x68] sm:$0x1] }
  0x22   : > { %v371_v29 = vor.u32 %v370_v20, %v366_v19  ;;  %v312_v30 = vrot.slane %v310_v21, 5  ;;  %v316_v31 = vshll.u32 %v4094_v12, 16  ;;  %v320_v32 = vshrl.u32 %v4094_v12, 16 }
  0x23   : > { %v2111_v33 = vpack.c.b16 %v2080_v23, %v2079_v7  ;;  %v362_v34 = vrot.slane %v361_v24, 4  ;;  %v326_v35 = vshll.u32 %v4098_v16, 16  ;;  %v259_v38 = vshrl.u32 %v185_v22, 16  ;;  %v197_v7 = vld [vmem:[%s4034_s17 + $0x54] sm:$0xf] }
  0x24   : > { %v372_v39 = vrot.slane %v371_v29, 4  ;;  %v313_v40 = vor.u32 %v312_v30, %v309_v28  ;;  %v318_v41 = vrot.slane %v316_v31, 5  ;;  %v322_v42 = vrot.slane %v320_v32, 4  ;;  %v4138_v23 = vld [vmem:[%s4034_s17 + $0x58] sm:$0xf] }
  0x25   : > { %2127 = vrot.lane.b32.xlu0 %v2111_v33, %s3992_s18  ;;  %v367_v44 = vsel %vm4062_vm2, %v362_v34, %v366_v19  ;;  %v328_v45 = vrot.slane %v326_v35, 5  ;;  %v261_v46 = vrot.slane %v259_v38, 4  ;;  %v262_v47 = vshll.u32 %v185_v22, 16  ;;  %v4143_v31 = vld [vmem:[%s4034_s17 + $0x5c] sm:$0x1] }
  0x26   : > { %v377_v49 = vsel %vm4062_vm2, %v372_v39, %v376_v27  ;;  %v2089_v50 = vunpack.c.l.b16 %v367_v44  ;;  %v314_v51 = vrot.slane %v313_v40, 4  ;;  %v323_v52 = vor.u32 %v322_v42, %v318_v41  ;;  %v195_v42 = vld [vmem:[%s4034_s17 + $0x48] sm:$0xf] }
  0x27   : > { %v2090_v53 = vunpack.c.l.b16 %v377_v49  ;;  %v264_v54 = vrot.slane %v262_v47, 5  ;;  %v268_v55 = vshll.u32 %v4108_v37, 16  ;;  %v272_v57 = vshrl.u32 %v4108_v37, 16 }
  0x28   : > { %v319_v58 = vsel %vm4062_vm2, %v314_v51, %v318_v41  ;;  %v324_v59 = vrot.slane %v323_v52, 4  ;;  %v278_v60 = vshll.u32 %v4111_v43, 16  ;;  %v427_v63 = vshrl.u32 %v199_v48, 16 }
  0x29   : > { %v2116_v0 = vpack.c.b16 %v2090_v53, %v2089_v50  ;;  %v2085_v3 = vunpack.c.l.b16 %v319_v58  ;;  %v265_v4 = vor.u32 %v264_v54, %v261_v46  ;;  %v270_v5 = vrot.slane %v268_v55, 5  ;;  %v4153_v55 = vld [vmem:[%s4034_s17 + $0x4c] sm:$0xf] }
  0x2a   : > { %v329_v8 = vsel %vm4062_vm2, %v324_v59, %v328_v45  ;;  %v274_v11 = vrot.slane %v272_v57, 4  ;;  %v280_v13 = vrot.slane %v278_v60, 5  ;;  %v429_v14 = vrot.slane %v427_v63, 4  ;;  %v4158_v63 = vld [vmem:[%s4034_s17 + $0x50] sm:$0x1] }
  0x2b   : > { %2137 = vrot.lane.b32.xlu2 %v2116_v0, %s3992_s18  ;;  %v2086_v15 = vunpack.c.l.b16 %v329_v8  ;;  %v266_v17 = vrot.slane %v265_v4, 4  ;;  %v430_v18 = vshll.u32 %v199_v48, 16  ;;  %v436_v19 = vshll.u32 %v4125_v61, 16 }
  0x2c   : > { %v275_v20 = vor.u32 %v274_v11, %v270_v5  ;;  %v440_v21 = vshrl.u32 %v4125_v61, 16  ;;  %v446_v22 = vshll.u32 %v4128_v6, 16  ;;  %v403_v24 = vshrl.u32 %v197_v7, 16 }
  0x2d   : > { %v2114_v27 = vpack.c.b16 %v2086_v15, %v2085_v3  ;;  %v271_v28 = vsel %vm4062_vm2, %v266_v17, %v270_v5  ;;  %v432_v29 = vrot.slane %v430_v18, 5  ;;  %v438_v30 = vrot.slane %v436_v19, 5  ;;  %v205_v3 = vld [vmem:[%s4034_s17 + $0x84] sm:$0xf] }
  0x2e   : > { %v276_v32 = vrot.slane %v275_v20, 4  ;;  %v2081_v33 = vunpack.c.l.b16 %v271_v28  ;;  %v442_v34 = vrot.slane %v440_v21, 4  ;;  %v448_v35 = vrot.slane %v446_v22, 5  ;;  %v4170_v28 = vld [vmem:[%s4034_s17 + $0x88] sm:$0xf] }
  0x2f   : > { %2133 = vrot.lane.b32.xlu1 %v2114_v27, %s3992_s18  ;;  %v433_v38 = vor.u32 %v432_v29, %v429_v14  ;;  %v405_v39 = vrot.slane %v403_v24, 4  ;;  %v406_v40 = vshll.u32 %v197_v7, 16  ;;  %v412_v41 = vshll.u32 %v4138_v23, 16  ;;  %v4173_v29 = vld [vmem:[%s4034_s17 + $0x8c] sm:$0x1] }
  0x30   : > { %v281_v44 = vsel %vm4062_vm2, %v276_v32, %v280_v13  ;;  %v443_v45 = vor.u32 %v442_v34, %v438_v30  ;;  %v416_v46 = vshrl.u32 %v4138_v23, 16  ;;  %v422_v47 = vshll.u32 %v4143_v31, 16 }
  0x31   : > { %v2082_v48 = vunpack.c.l.b16 %v281_v44  ;;  %v434_v49 = vrot.slane %v433_v38, 4  ;;  %v408_v50 = vrot.slane %v406_v40, 5  ;;  %v414_v51 = vrot.slane %v412_v41, 5 }
  0x32   : > { %v444_v52 = vrot.slane %v443_v45, 4  ;;  %v418_v53 = vrot.slane %v416_v46, 4  ;;  %v424_v54 = vrot.slane %v422_v47, 5  ;;  %v379_v57 = vshrl.u32 %v195_v42, 16 }
  0x33   : > { %v2112_v58 = vpack.c.b16 %v2082_v48, %v2081_v33  ;;  %v439_v59 = vsel %vm4062_vm2, %v434_v49, %v438_v30  ;;  %v409_v60 = vor.u32 %v408_v50, %v405_v39  ;;  %v382_v0 = vshll.u32 %v195_v42, 16  ;;  %v4185_v50 = vld [vmem:[%s4034_s17 + $0x7c] sm:$0xf] }
  0x34   : > { %v449_v4 = vsel %vm4062_vm2, %v444_v52, %v448_v35  ;;  %v2095_v5 = vunpack.c.l.b16 %v439_v59  ;;  %v419_v7 = vor.u32 %v418_v53, %v414_v51  ;;  %v381_v8 = vrot.slane %v379_v57, 4  ;;  %v203_v35 = vld [vmem:[%s4034_s17 + $0x78] sm:$0xf] }
  0x35   : > { %2129 = vrot.lane.b32.xlu0 %v2112_v58, %s3992_s18  ;;  %v2096_v11 = vunpack.c.l.b16 %v449_v4  ;;  %v410_v13 = vrot.slane %v409_v60, 4  ;;  %v384_v14 = vrot.slane %v382_v0, 5  ;;  %v388_v15 = vshll.u32 %v4153_v55, 16  ;;  %v4188_v58 = vld [vmem:[%s4034_s17 + $0x80] sm:$0x1] }
  0x36   : > { %v420_v17 = vrot.slane %v419_v7, 4  ;;  %v392_v18 = vshrl.u32 %v4153_v55, 16  ;;  %v398_v19 = vshll.u32 %v4158_v63, 16  ;;  %v499_v20 = vshrl.u32 %v205_v3, 16  ;;  %v201_v4 = vld [vmem:[%s4034_s17 + $0x6c] sm:$0xf] }
  0x37   : > { %v2119_v21 = vpack.c.b16 %v2096_v11, %v2095_v5  ;;  %v415_v22 = vsel %vm4062_vm2, %v410_v13, %v414_v51  ;;  %v385_v24 = vor.u32 %v384_v14, %v381_v8  ;;  %v390_v27 = vrot.slane %v388_v15, 5 }
  0x38   : > { %v425_v30 = vsel %vm4062_vm2, %v420_v17, %v424_v54  ;;  %v2093_v32 = vunpack.c.l.b16 %v415_v22  ;;  %v394_v33 = vrot.slane %v392_v18, 4  ;;  %v400_v34 = vrot.slane %v398_v19, 5 }
  0x39   : > { %2143 = vrot.lane.b32.xlu2 %v2119_v21, %s3992_s18  ;;  %v2094_v38 = vunpack.c.l.b16 %v425_v30  ;;  %v386_v39 = vrot.slane %v385_v24, 4  ;;  %v501_v40 = vrot.slane %v499_v20, 4  ;;  %v502_v41 = vshll.u32 %v205_v3, 16  ;;  %v4198_v21 = vld [vmem:[%s4034_s17 + $0x70] sm:$0xf] }
  0x3a   : > { %v395_v42 = vor.u32 %v394_v33, %v390_v27  ;;  %v508_v44 = vshll.u32 %v4170_v28, 16  ;;  %v512_v45 = vshrl.u32 %v4170_v28, 16  ;;  %v518_v46 = vshll.u32 %v4173_v29, 16  ;;  %v4203_v33 = vld [vmem:[%s4034_s17 + $0x74] sm:$0x1] }
  0x3b   : > { %v2118_v47 = vpack.c.b16 %v2094_v38, %v2093_v32  ;;  %v391_v48 = vsel %vm4062_vm2, %v386_v39, %v390_v27  ;;  %v504_v49 = vrot.slane %v502_v41, 5  ;;  %v475_v51 = vshrl.u32 %v203_v35, 16 }
  0x3c   : > { %v396_v52 = vrot.slane %v395_v42, 4  ;;  %v2091_v53 = vunpack.c.l.b16 %v391_v48  ;;  %v510_v54 = vrot.slane %v508_v44, 5  ;;  %v514_v57 = vrot.slane %v512_v45, 4 }
  0x3d   : > { %2141 = vrot.lane.b32.xlu1 %v2118_v47, %s3992_s18  ;;  %v505_v59 = vor.u32 %v504_v49, %v501_v40  ;;  %v520_v60 = vrot.slane %v518_v46, 5  ;;  %v477_v0 = vrot.slane %v475_v51, 4  ;;  %v478_v3 = vshll.u32 %v203_v35, 16 }
  0x3e   : > { %v401_v5 = vsel %vm4062_vm2, %v396_v52, %v400_v34  ;;  %v515_v7 = vor.u32 %v514_v57, %v510_v54  ;;  %v484_v8 = vshll.u32 %v4185_v50, 16  ;;  %v488_v11 = vshrl.u32 %v4185_v50, 16  ;;  %v211_v34 = vld [vmem:[%s4034_s17 + $0xa8] sm:$0xf]  ;;  %v4215_v57 = vld [vmem:[%s4034_s17 + $0xac] sm:$0xf] }
  0x3f   : > { %v2092_v13 = vunpack.c.l.b16 %v401_v5  ;;  %v506_v14 = vrot.slane %v505_v59, 4  ;;  %v480_v15 = vrot.slane %v478_v3, 5  ;;  %v494_v17 = vshll.u32 %v4188_v58, 16  ;;  %v4218_v59 = vld [vmem:[%s4034_s17 + $0xb0] sm:$0x1] }
  0x40   : > { %v516_v18 = vrot.slane %v515_v7, 4  ;;  %v486_v19 = vrot.slane %v484_v8, 5  ;;  %v490_v20 = vrot.slane %v488_v11, 4  ;;  %v451_v22 = vshrl.u32 %v201_v4, 16  ;;  %v209_v5 = vld [vmem:[%s4034_s17 + $0x9c] sm:$0xf] }
  0x41   : > { %v2117_v24 = vpack.c.b16 %v2092_v13, %v2091_v53  ;;  %v511_v27 = vsel %vm4062_vm2, %v506_v14, %v510_v54  ;;  %v481_v30 = vor.u32 %v480_v15, %v477_v0  ;;  %v496_v32 = vrot.slane %v494_v17, 5 }
  0x42   : > { %v521_v35 = vsel %vm4062_vm2, %v516_v18, %v520_v60  ;;  %v2101_v38 = vunpack.c.l.b16 %v511_v27  ;;  %v491_v39 = vor.u32 %v490_v20, %v486_v19  ;;  %v453_v40 = vrot.slane %v451_v22, 4 }
  0x43   : > { %2139 = vrot.lane.b32.xlu0 %v2117_v24, %s3992_s18  ;;  %v2102_v41 = vunpack.c.l.b16 %v521_v35  ;;  %v482_v42 = vrot.slane %v481_v30, 4  ;;  %v454_v44 = vshll.u32 %v201_v4, 16  ;;  %v460_v45 = vshll.u32 %v4198_v21, 16  ;;  %v4228_v24 = vld [vmem:[%s4034_s17 + $0xa0] sm:$0xf] }
  0x44   : > { %v492_v46 = vrot.slane %v491_v39, 4  ;;  %v464_v47 = vshrl.u32 %v4198_v21, 16  ;;  %v470_v48 = vshll.u32 %v4203_v33, 16  ;;  %v571_v49 = vshrl.u32 %v211_v34, 16 }
  0x45   : > { %v2122_v51 = vpack.c.b16 %v2102_v41, %v2101_v38  ;;  %v487_v52 = vsel %vm4062_vm2, %v482_v42, %v486_v19  ;;  %v456_v53 = vrot.slane %v454_v44, 5  ;;  %v462_v54 = vrot.slane %v460_v45, 5  ;;  %v207_v44 = vld [vmem:[%s4034_s17 + $0x90] sm:$0xf] }
  0x46   : > { %v497_v60 = vsel %vm4062_vm2, %v492_v46, %v496_v32  ;;  %v2099_v0 = vunpack.c.l.b16 %v487_v52  ;;  %v466_v3 = vrot.slane %v464_v47, 4  ;;  %v472_v4 = vrot.slane %v470_v48, 5 }
  0x47   : > { %2149 = vrot.lane.b32.xlu2 %v2122_v51, %s3992_s18  ;;  %v2100_v7 = vunpack.c.l.b16 %v497_v60  ;;  %v457_v8 = vor.u32 %v456_v53, %v453_v40  ;;  %v573_v11 = vrot.slane %v571_v49, 4  ;;  %v574_v13 = vshll.u32 %v211_v34, 16  ;;  %v4234_v40 = vld [vmem:[%s4034_s17 + $0xa4] sm:$0x1] }
  0x48   : > { %v467_v14 = vor.u32 %v466_v3, %v462_v54  ;;  %v580_v15 = vshll.u32 %v4215_v57, 16  ;;  %v584_v17 = vshrl.u32 %v4215_v57, 16  ;;  %v590_v18 = vshll.u32 %v4218_v59, 16 }
  0x49   : > { %v2121_v19 = vpack.c.b16 %v2100_v7, %v2099_v0  ;;  %v458_v20 = vrot.slane %v457_v8, 4  ;;  %v576_v22 = vrot.slane %v574_v13, 5  ;;  %v547_v27 = vshrl.u32 %v209_v5, 16  ;;  %v4248_v13 = vld [vmem:[%s4034_s17 + $0x98] sm:$0x1] }
  0x4a   : > { %v468_v30 = vrot.slane %v467_v14, 4  ;;  %v582_v32 = vrot.slane %v580_v15, 5  ;;  %v586_v35 = vrot.slane %v584_v17, 4  ;;  %v592_v38 = vrot.slane %v590_v18, 5 }
  0x4b   : > { %2147 = vrot.lane.b32.xlu1 %v2121_v19, %s3992_s18  ;;  %v463_v34 = vsel %vm4062_vm2, %v458_v20, %v462_v54  ;;  %v577_v39 = vor.u32 %v576_v22, %v573_v11  ;;  %v549_v41 = vrot.slane %v547_v27, 4  ;;  %v550_v42 = vshll.u32 %v209_v5, 16  ;;  %v4245_v11 = vld [vmem:[%s4034_s17 + $0x94] sm:$0xf] }
  0x4c   : > { %v473_v45 = vsel %vm4062_vm2, %v468_v30, %v472_v4  ;;  %v2097_v46 = vunpack.c.l.b16 %v463_v34  ;;  %v587_v47 = vor.u32 %v586_v35, %v582_v32  ;;  %v556_v48 = vshll.u32 %v4228_v24, 16  ;;  %v619_v34 = vld [vmem:[%s4034_s17 + $0xc] sm:$0xe] }
  0x4d   : > { %v2098_v49 = vunpack.c.l.b16 %v473_v45  ;;  %v578_v51 = vrot.slane %v577_v39, 4  ;;  %v552_v52 = vrot.slane %v550_v42, 5  ;;  %v560_v53 = vshrl.u32 %v4228_v24, 16 }
  0x4e   : > { %v588_v54 = vrot.slane %v587_v47, 4  ;;  %v558_v60 = vrot.slane %v556_v48, 5  ;;  %v566_v0 = vshll.u32 %v4234_v40, 16  ;;  %v523_v3 = vshrl.u32 %v207_v44, 16 }
  0x4f   : > { %v2120_v5 = vpack.c.b16 %v2098_v49, %v2097_v46  ;;  %v583_v4 = vsel %vm4062_vm2, %v578_v51, %v582_v32  ;;  %v553_v7 = vor.u32 %v552_v52, %v549_v41  ;;  %v562_v8 = vrot.slane %v560_v53, 4  ;;  %v618_v49 = vld [vmem:[%s4034_s17] sm:$0xe] }
  0x50   : > { %v593_v14 = vsel %vm4062_vm2, %v588_v54, %v592_v38  ;;  %v2107_v15 = vunpack.c.l.b16 %v583_v4  ;;  %v568_v17 = vrot.slane %v566_v0, 5  ;;  %v525_v18 = vrot.slane %v523_v3, 4 }
  0x51   : > { %2145 = vrot.lane.b32.xlu0 %v2120_v5, %s3992_s18  ;;  %v2108_v19 = vunpack.c.l.b16 %v593_v14  ;;  %v554_v20 = vrot.slane %v553_v7, 4  ;;  %v563_v22 = vor.u32 %v562_v8, %v558_v60  ;;  %v526_v27 = vshll.u32 %v207_v44, 16 }
  0x52   : > { %v532_v30 = vshll.u32 %v4245_v11, 16  ;;  %v536_v32 = vshrl.u32 %v4245_v11, 16  ;;  %v542_v35 = vshll.u32 %v4248_v13, 16  ;;  %v3512_v52 = vrot.slane %v619_v34, 9 }
  0x53   : > { %v2125_v39 = vpack.c.b16 %v2108_v19, %v2107_v15  ;;  %v559_v38 = vsel %vm4062_vm2, %v554_v20, %v558_v60  ;;  %v564_v41 = vrot.slane %v563_v22, 4  ;;  %v528_v42 = vrot.slane %v526_v27, 5  ;;  %v213_v19 = vld [vmem:[%s4034_s17 + $0xb4] sm:$0xf] }
  0x54   : > { %v2105_v45 = vunpack.c.l.b16 %v559_v38  ;;  %v534_v46 = vrot.slane %v532_v30, 5  ;;  %v538_v47 = vrot.slane %v536_v32, 4  ;;  %v544_v48 = vrot.slane %v542_v35, 5  ;;  %v230_v35 = vld [vmem:[%s4034_s17 + $0xbc] sm:$0x1] }
  0x55   : > { %2155 = vrot.lane.b32.xlu2 %v2125_v39, %s3992_s18  ;;  %v569_v44 = vsel %vm4062_vm2, %v564_v41, %v568_v17  ;;  %v529_v51 = vor.u32 %v528_v42, %v525_v18  ;;  %v694_v0 = vrot.slane %v4108_v37, 5  ;;  %v697_v3 = vrot.slane %v4111_v43, 5 }
  0x56   : > { %v2106_v53 = vunpack.c.l.b16 %v569_v44  ;;  %v539_v54 = vor.u32 %v538_v47, %v534_v46  ;;  %v3511_v4 = vrot.slane %v618_v49, 9  ;;  %v687_v7 = vrot.slane %v4058_v25, 5  ;;  %v214_v25 = vld [vmem:[%s4034_s17 + $0xb8] sm:$0xf]  ;;  %v622_v49 = vld [vmem:[%s4034_s17 + $0x30] sm:$0xe] }
  0x57   : > { %v530_v5 = vrot.slane %v529_v51, 4  ;;  %v690_v8 = vrot.slane %v4067_v36, 5  ;;  %v695_v17 = vsel %vm4264_vm5, %v3512_v52, %v694_v0  ;;  %v696_v18 = vrot.slane %v694_v0, 4 }
  0x58   : > { %v2124_v14 = vpack.c.b16 %v2106_v53, %v2105_v45  ;;  %v540_v15 = vrot.slane %v539_v54, 4  ;;  %v2161_v37 = vunpack.c.l.b16 %v695_v17  ;;  %v688_v43 = vsel %vm4264_vm5, %v3511_v4, %v687_v7  ;;  %v621_v53 = vld [vmem:[%s4034_s17 + $0x24] sm:$0xe]  ;;  %v620_v4 = vld [vmem:[%s4034_s17 + $0x18] sm:$0xe] }
  0x59   : > { %v535_v20 = vsel %vm4062_vm2, %v530_v5, %v534_v46  ;;  %v689_v22 = vrot.slane %v687_v7, 4  ;;  %v698_v30 = vsel %vm4264_vm5, %v696_v18, %v697_v3  ;;  %v2159_v32 = vunpack.c.l.b16 %v688_v43 }
  0x5a   : > { %2153 = vrot.lane.b32.xlu1 %v2124_v14, %s3992_s18  ;;  %v545_v36 = vsel %vm4062_vm2, %v540_v15, %v544_v48  ;;  %v2103_v27 = vunpack.c.l.b16 %v535_v20  ;;  %v2162_v39 = vunpack.c.l.b16 %v698_v30  ;;  %v595_v41 = vshrl.u32 %v213_v19, 16 }
  0x5b   : > { %v2104_v34 = vunpack.c.l.b16 %v545_v36  ;;  %v691_v38 = vsel %vm4264_vm5, %v689_v22, %v690_v8  ;;  %v598_v45 = vshll.u32 %v213_v19, 16  ;;  %v604_v46 = vshll.u32 %v214_v25, 16 }
  0x5c   : > { %v2160_v42 = vunpack.c.l.b16 %v691_v38  ;;  %v608_v47 = vshrl.u32 %v214_v25, 16  ;;  %v2192_v44 = vpack.c.b16 %v2162_v39, %v2161_v37  ;;  %v597_v51 = vrot.slane %v595_v41, 4  ;;  %v625_v41 = vld [vmem:[%s4034_s17 + $0x54] sm:$0xe] }
  0x5d   : > { %v2123_v48 = vpack.c.b16 %v2104_v34, %v2103_v27  ;;  %v614_v52 = vshll.u32 %v230_v35, 16  ;;  %v600_v0 = vrot.slane %v598_v45, 5  ;;  %v606_v3 = vrot.slane %v604_v46, 5 }
  0x5e   : > { %v2191_v54 = vpack.c.b16 %v2160_v42, %v2159_v32  ;;  %v610_v5 = vrot.slane %v608_v47, 4  ;;  %2209 = vrot.lane.b32.xlu2 %v2192_v44, %s3993_s19  ;;  %v3515_v8 = vrot.slane %v622_v49, 9  ;;  %v715_v14 = vrot.slane %v4038_v1, 5 }
  0x5f   : > { %2151 = vrot.lane.b32.xlu0 %v2123_v48, %s3992_s18  ;;  %v616_v7 = vrot.slane %v614_v52, 5  ;;  %v718_v15 = vrot.slane %v4041_v2, 5  ;;  %v601_v17 = vor.u32 %v600_v0, %v597_v51  ;;  %v3514_v19 = vrot.slane %v621_v53, 9  ;;  %v623_v0 = vld [vmem:[%s4034_s17 + $0x3c] sm:$0xe] }
  0x60   : > { %v611_v18 = vor.u32 %v610_v5, %v606_v3  ;;  %v708_v20 = vrot.slane %v4094_v12, 5  ;;  %v716_v37 = vsel %vm4264_vm5, %v3515_v8, %v715_v14  ;;  %v717_v43 = vrot.slane %v715_v14, 4 }
  0x61   : > { %v711_v22 = vrot.slane %v4098_v16, 5  ;;  %v3513_v25 = vrot.slane %v620_v4, 9  ;;  %v602_v36 = vrot.slane %v601_v17, 4  ;;  %v2167_v1 = vunpack.c.l.b16 %v716_v37 }
  0x62   : > { %2207 = vrot.lane.b32.xlu1 %v2191_v54, %s3993_s19  ;;  %v612_v27 = vrot.slane %v611_v18, 4  ;;  %v709_v2 = vsel %vm4264_vm5, %v3514_v19, %v708_v20  ;;  %v719_v12 = vsel %vm4264_vm5, %v717_v43, %v718_v15  ;;  %v710_v30 = vrot.slane %v708_v20, 4  ;;  %v628_v15 = vld [vmem:[%s4034_s17 + $0x78] sm:$0xe] }
  0x63   : > { %v2165_v32 = vunpack.c.l.b16 %v709_v2  ;;  %v701_v35 = vrot.slane %v4048_v9, 5  ;;  %v607_v16 = vsel %vm4062_vm2, %v602_v36, %v606_v3  ;;  %v2168_v39 = vunpack.c.l.b16 %v719_v12  ;;  %v624_v9 = vld [vmem:[%s4034_s17 + $0x48] sm:$0xe] }
  0x64   : > { %v617_v34 = vsel %vm4062_vm2, %v612_v27, %v616_v7  ;;  %v704_v38 = vrot.slane %v4051_v10, 5  ;;  %v2109_v42 = vunpack.c.l.b16 %v607_v16  ;;  %v712_v46 = vsel %vm4264_vm5, %v710_v30, %v711_v22 }
  0x65   : > { %v2110_v45 = vunpack.c.l.b16 %v617_v34  ;;  %v702_v47 = vsel %vm4264_vm5, %v3513_v25, %v701_v35  ;;  %v2195_v49 = vpack.c.b16 %v2168_v39, %v2167_v1  ;;  %v2166_v48 = vunpack.c.l.b16 %v712_v46  ;;  %v627_v25 = vld [vmem:[%s4034_s17 + $0x6c] sm:$0xe]  ;;  %v626_v39 = vld [vmem:[%s4034_s17 + $0x60] sm:$0xe] }
  0x66   : > { %v703_v44 = vrot.slane %v701_v35, 4  ;;  %v2163_v51 = vunpack.c.l.b16 %v702_v47  ;;  %v3518_v53 = vrot.slane %v625_v41, 9  ;;  %v736_v54 = vrot.slane %v4138_v23, 5 }
  0x67   : > { %v2126_v52 = vpack.c.b16 %v2110_v45, %v2109_v42  ;;  %v739_v10 = vrot.slane %v4143_v31, 5  ;;  %2215 = vrot.lane.b32.xlu2 %v2195_v49, %s3993_s19  ;;  %v2194_v3 = vpack.c.b16 %v2166_v48, %v2165_v32  ;;  %v3517_v4 = vrot.slane %v624_v9, 9 }
  0x68   : > { %v705_v5 = vsel %vm4264_vm5, %v703_v44, %v704_v38  ;;  %v729_v7 = vrot.slane %v4153_v55, 5  ;;  %v737_v14 = vsel %vm4264_vm5, %v3518_v53, %v736_v54  ;;  %v738_v23 = vrot.slane %v736_v54, 4 }
  0x69   : > { %2157 = vrot.lane.b32.xlu0 %v2126_v52, %s3992_s18  ;;  %v2164_v8 = vunpack.c.l.b16 %v705_v5  ;;  %v732_v31 = vrot.slane %v4158_v63, 5  ;;  %v2173_v17 = vunpack.c.l.b16 %v737_v14  ;;  %v3516_v20 = vrot.slane %v623_v0, 9 }
  0x6a   : > { %2213 = vrot.lane.b32.xlu1 %v2194_v3, %s3993_s19  ;;  %v730_v18 = vsel %vm4264_vm5, %v3517_v4, %v729_v7  ;;  %v731_v19 = vrot.slane %v729_v7, 4  ;;  %v740_v37 = vsel %vm4264_vm5, %v738_v23, %v739_v10  ;;  %v722_v22 = vrot.slane %v4080_v56, 5  ;;  %v629_v4 = vld [vmem:[%s4034_s17 + $0x84] sm:$0xe] }
  0x6b   : > { %v2193_v55 = vpack.c.b16 %v2164_v8, %v2163_v51  ;;  %v2171_v43 = vunpack.c.l.b16 %v730_v18  ;;  %v2174_v36 = vunpack.c.l.b16 %v740_v37  ;;  %v725_v27 = vrot.slane %v4085_v62, 5  ;;  %v3527_v37 = vld [vmem:[%s4034_s17 + $0xc] sm:$0xf] }
  0x6c   : > { %v733_v63 = vsel %vm4264_vm5, %v731_v19, %v732_v31  ;;  %v3521_v1 = vrot.slane %v628_v15, 9  ;;  %v723_v12 = vsel %vm4264_vm5, %v3516_v20, %v722_v22  ;;  %v724_v30 = vrot.slane %v722_v22, 4 }
  0x6d   : > { %v2172_v2 = vunpack.c.l.b16 %v733_v63  ;;  %v757_v32 = vrot.slane %v4185_v50, 5  ;;  %v2198_v35 = vpack.c.b16 %v2174_v36, %v2173_v17  ;;  %v2169_v16 = vunpack.c.l.b16 %v723_v12 }
  0x6e   : > { %v760_v56 = vrot.slane %v4188_v58, 5  ;;  %v3520_v34 = vrot.slane %v627_v25, 9  ;;  %v726_v41 = vsel %vm4264_vm5, %v724_v30, %v725_v27  ;;  %v750_v50 = vrot.slane %v4198_v21, 5  ;;  %v631_v58 = vld [vmem:[%s4034_s17 + $0x9c] sm:$0xe] }
  0x6f   : > { %v2197_v38 = vpack.c.b16 %v2172_v2, %v2171_v43  ;;  %v758_v62 = vsel %vm4264_vm5, %v3521_v1, %v757_v32  ;;  %v759_v42 = vrot.slane %v757_v32, 4  ;;  %2221 = vrot.lane.b32.xlu2 %v2198_v35, %s3993_s19  ;;  %v2170_v45 = vunpack.c.l.b16 %v726_v41  ;;  %v4375_v43 = vld [vmem:[%s4034_s17 + $0x10] sm:$0xf]  ;;  %v4389_v2 = vld [vmem:[%s4034_s17 + $0x14] sm:$0x1] }
  0x70   : > { %v2179_v46 = vunpack.c.l.b16 %v758_v62  ;;  %v753_v47 = vrot.slane %v4203_v33, 5  ;;  %v3519_v49 = vrot.slane %v626_v39, 9  ;;  %v743_v48 = vrot.slane %v4125_v61, 5  ;;  %v630_v33 = vld [vmem:[%s4034_s17 + $0x90] sm:$0xe] }
  0x71   : > { %2211 = vrot.lane.b32.xlu0 %v2193_v55, %s3993_s19  ;;  %v761_v9 = vsel %vm4264_vm5, %v759_v42, %v760_v56  ;;  %v746_v44 = vrot.slane %v4128_v6, 5  ;;  %v751_v21 = vsel %vm4264_vm5, %v3520_v34, %v750_v50  ;;  %v752_v52 = vrot.slane %v750_v50, 4  ;;  %v632_v41 = vld [vmem:[%s4034_s17 + $0xa8] sm:$0xe]  ;;  %v3607_v62 = vld [vmem:[%s4034_s17 + $0x18] sm:$0xf] }
  0x72   : > { %2219 = vrot.lane.b32.xlu1 %v2197_v38, %s3993_s19  ;;  %v2180_v51 = vunpack.c.l.b16 %v761_v9  ;;  %v2177_v53 = vunpack.c.l.b16 %v751_v21  ;;  %v744_v54 = vsel %vm4264_vm5, %v3519_v49, %v743_v48  ;;  %v745_v10 = vrot.slane %v743_v48, 4 }
  0x73   : > { %v3524_v0 = vrot.slane %v631_v58, 9  ;;  %v2196_v3 = vpack.c.b16 %v2170_v45, %v2169_v16  ;;  %v754_v61 = vsel %vm4264_vm5, %v752_v52, %v753_v47  ;;  %v778_v6 = vrot.slane %v4228_v24, 5 }
  0x74   : > { %v2201_v5 = vpack.c.b16 %v2180_v51, %v2179_v46  ;;  %v2178_v7 = vunpack.c.l.b16 %v754_v61  ;;  %v747_v8 = vsel %vm4264_vm5, %v745_v10, %v746_v44  ;;  %v781_v14 = vrot.slane %v4234_v40, 5  ;;  %v4402_v51 = vld [vmem:[%s4034_s17 + $0x1c] sm:$0xf]  ;;  %v4407_v10 = vld [vmem:[%s4034_s17 + $0x20] sm:$0x1] }
  0x75   : > { %v3523_v23 = vrot.slane %v630_v33, 9  ;;  %v2175_v31 = vunpack.c.l.b16 %v744_v54  ;;  %v779_v15 = vsel %vm4264_vm5, %v3524_v0, %v778_v6  ;;  %v780_v17 = vrot.slane %v778_v6, 4  ;;  %v3575_v61 = vld [vmem:[%s4034_s17 + $0xc] sm:$0xe] }
  0x76   : > { %v771_v18 = vrot.slane %v4245_v11, 5  ;;  %v2200_v19 = vpack.c.b16 %v2178_v7, %v2177_v53  ;;  %v2176_v20 = vunpack.c.l.b16 %v747_v8  ;;  %v774_v55 = vrot.slane %v4248_v13, 5 }
  0x77   : > { %v3522_v24 = vrot.slane %v629_v4, 9  ;;  %2227 = vrot.lane.b32.xlu2 %v2201_v5, %s3993_s19  ;;  %v782_v40 = vsel %vm4264_vm5, %v780_v17, %v781_v14  ;;  %v2185_v22 = vunpack.c.l.b16 %v779_v15  ;;  %v764_v13 = vrot.slane %v4170_v28, 5 }
  0x78   : > { %v772_v25 = vsel %vm4264_vm5, %v3523_v23, %v771_v18  ;;  %v773_v36 = vrot.slane %v771_v18, 4  ;;  %v2186_v11 = vunpack.c.l.b16 %v782_v40  ;;  %v767_v27 = vrot.slane %v4173_v29, 5  ;;  %v3922_v40 = vld [vmem:[%s4034_s17 + $0xc] sm:$0xff] }
  0x79   : > { %2217 = vrot.lane.b32.xlu0 %v2196_v3, %s3993_s19  ;;  %v2183_v63 = vunpack.c.l.b16 %v772_v25  ;;  %v847_v12 = vshrl.u32 %v3527_v37, 16  ;;  %v850_v30 = vshll.u32 %v3527_v37, 16  ;;  %v856_v32 = vshll.u32 %v4375_v43, 16 }
  0x7a   : > { %2225 = vrot.lane.b32.xlu1 %v2200_v19, %s3993_s19  ;;  %v775_v1 = vsel %vm4264_vm5, %v773_v36, %v774_v55  ;;  %v2199_v35 = vpack.c.b16 %v2176_v20, %v2175_v31  ;;  %v765_v28 = vsel %vm4264_vm5, %v3522_v24, %v764_v13  ;;  %v766_v56 = vrot.slane %v764_v13, 4  ;;  %v4426_v13 = vpop.permute.xlu2 %2135 }
  0x7b   : > { %v2184_v16 = vunpack.c.l.b16 %v775_v1  ;;  %v2204_v34 = vpack.c.b16 %v2186_v11, %v2185_v22  ;;  %v2181_v29 = vunpack.c.l.b16 %v765_v28  ;;  %v849_v39 = vrot.slane %v847_v12, 4 }
  0x7c   : > { %v852_v38 = vrot.slane %v850_v30, 5  ;;  %v768_v42 = vsel %vm4264_vm5, %v766_v56, %v767_v27  ;;  %v858_v45 = vrot.slane %v856_v32, 5  ;;  %v860_v46 = vshrl.u32 %v4375_v43, 16  ;;  %v3655_v32 = vld [vmem:[%s4034_s17 + $0x18] sm:$0xe] }
  0x7d   : > { %v866_v50 = vshll.u32 %v4389_v2, 16  ;;  %v2203_v47 = vpack.c.b16 %v2184_v16, %v2183_v63  ;;  %v2182_v58 = vunpack.c.l.b16 %v768_v42  ;;  %v785_v49 = vrot.slane %v4215_v57, 5 }
  0x7e   : > { %v853_v9 = vor.u32 %v852_v38, %v849_v39  ;;  %v862_v48 = vrot.slane %v860_v46, 4  ;;  %v3525_v44 = vrot.slane %v632_v41, 9  ;;  %v1456_v21 = vshrl.u32 %v3607_v62, 16 }
  0x7f   : > { %2233 = vrot.lane.b32.xlu2 %v2204_v34, %s3993_s19  ;;  %v2202_v52 = vpack.c.b16 %v2182_v58, %v2181_v29  ;;  %v868_v53 = vrot.slane %v866_v50, 5  ;;  %v788_v54 = vrot.slane %v4218_v59, 5  ;;  %v787_v3 = vrot.slane %v785_v49, 4  ;;  %v3576_v34 = vld [vmem:[%s4034_s17 + $0x18] sm:$0xe] }
  0x80   : > { %v854_v33 = vrot.slane %v853_v9, 4  ;;  %v863_v0 = vor.u32 %v862_v48, %v858_v45  ;;  %v1458_v57 = vrot.slane %v1456_v21, 4  ;;  %v1459_v5 = vshll.u32 %v3607_v62, 16  ;;  %v3535_v29 = vld [vmem:[%s4034_s17 + $0x3c] sm:$0xf] }
  0x81   : > { %2223 = vrot.lane.b32.xlu0 %v2199_v35, %s3993_s19  ;;  %v1465_v4 = vshll.u32 %v4402_v51, 16  ;;  %v1469_v7 = vshrl.u32 %v4402_v51, 16  ;;  %v786_v14 = vsel %vm4264_vm5, %v3525_v44, %v785_v49  ;;  %v1475_v17 = vshll.u32 %v4407_v10, 16  ;;  %v3530_v62 = vld [vmem:[%s4034_s17 + $0x1c] sm:$0xf] }
  0x82   : > { %2231 = vrot.lane.b32.xlu1 %v2203_v47, %s3993_s19  ;;  %v859_v6 = vsel %vm4062_vm2, %v854_v33, %v858_v45  ;;  %v864_v59 = vrot.slane %v863_v0, 4  ;;  %v1461_v23 = vrot.slane %v1459_v5, 5  ;;  %v3591_v18 = vrot.slane %v3575_v61, 9  ;;  %v4446_v47 = vld [vmem:[%s4034_s17 + $0x40] sm:$0xf]  ;;  %v3938_v21 = vld [vmem:[%s4034_s17 + $0x18] sm:$0xff] }
  0x83   : > { %v2335_v8 = vunpack.c.l.b16 %v859_v6  ;;  %v1467_v31 = vrot.slane %v1465_v4, 5  ;;  %v1471_v15 = vrot.slane %v1469_v7, 4  ;;  %v789_v20 = vsel %vm4264_vm5, %v787_v3, %v788_v54  ;;  %v3560_v9 = vld [vmem:[%s4034_s17 + $0x20] sm:$0x1]  ;;  %v4450_v48 = vld [vmem:[%s4034_s17 + $0x44] sm:$0x1] }
  0x84   : > { %v869_v19 = vsel %vm4062_vm2, %v864_v59, %v868_v53  ;;  %v1462_v55 = vor.u32 %v1461_v23, %v1458_v57  ;;  %v1296_v24 = vrot.slane %v4375_v43, 5  ;;  %v1477_v25 = vrot.slane %v1475_v17, 5  ;;  %v3529_v54 = vld [vmem:[%s4034_s17 + $0x18] sm:$0xf] }
  0x85   : > { %v2336_v37 = vunpack.c.l.b16 %v869_v19  ;;  %v1472_v22 = vor.u32 %v1471_v15, %v1467_v31  ;;  %v1299_v36 = vrot.slane %v4389_v2, 5  ;;  %v2187_v1 = vunpack.c.l.b16 %v786_v14  ;;  %v4462_v7 = vpop.permute.xlu2 %2137 }
  0x86   : > { %v1463_v11 = vrot.slane %v1462_v55, 4  ;;  %v1298_v63 = vrot.slane %v1296_v24, 4  ;;  %v1297_v30 = vsel %vm4264_vm5, %v3591_v18, %v1296_v24  ;;  %v2188_v43 = vunpack.c.l.b16 %v789_v20 }
  0x87   : > { %v2367_v27 = vpack.c.b16 %v2336_v37, %v2335_v8  ;;  %v1473_v12 = vrot.slane %v1472_v22, 4  ;;  %v1905_v16 = vrot.slane %v4402_v51, 5  ;;  %v2415_v38 = vunpack.c.l.b16 %v1297_v30  ;;  %v3579_v37 = vld [vmem:[%s4034_s17 + $0x3c] sm:$0xe] }
  0x88   : > { %v1468_v2 = vsel %vm4062_vm2, %v1463_v11, %v1467_v31  ;;  %v1300_v35 = vsel %vm4264_vm5, %v1298_v63, %v1299_v36  ;;  %v3671_v41 = vrot.slane %v3655_v32, 9  ;;  %v1908_v46 = vrot.slane %v4407_v10, 5  ;;  %v3923_v30 = vld [vmem:[%s4034_s17 + $0x18] sm:$0xff] }
  0x89   : > { %2229 = vrot.lane.b32.xlu0 %v2202_v52, %s3993_s19  ;;  %2383 = vrot.lane.b32.xlu2 %v2367_v27, %s3994_s20  ;;  %v1478_v28 = vsel %vm4062_vm2, %v1473_v12, %v1477_v25  ;;  %v2591_v56 = vunpack.c.l.b16 %v1468_v2  ;;  %v2416_v42 = vunpack.c.l.b16 %v1300_v35  ;;  %v1907_v45 = vrot.slane %v1905_v16, 4  ;;  %v3926_v12 = vld [vmem:[%s4034_s17 + $0x3c] sm:$0xff] }
  0x8a   : > { %2303 = vrot.lane.b32.xlu1 %v3922_v40, %s3995_s21  ;;  %v2592_v39 = vunpack.c.l.b16 %v1478_v28  ;;  %v1303_v50 = vrot.slane %v3530_v62, 5  ;;  %v2205_v58 = vpack.c.b16 %v2188_v43, %v2187_v1  ;;  %v3592_v49 = vrot.slane %v3576_v34, 9 }
  0x8b   : > { %v943_v44 = vshrl.u32 %v3535_v29, 16  ;;  %v1306_v33 = vrot.slane %v3560_v9, 5  ;;  %v946_v53 = vshll.u32 %v3535_v29, 16  ;;  %v1906_v0 = vsel %vm4264_vm5, %v3671_v41, %v1905_v16 }
  0x8c   : > { %v2623_v51 = vpack.c.b16 %v2592_v39, %v2591_v56  ;;  %v1305_v52 = vrot.slane %v1303_v50, 4  ;;  %v952_v10 = vshll.u32 %v4446_v47, 16  ;;  %v956_v57 = vshrl.u32 %v4446_v47, 16 }
  0x8d   : > { %v945_v3 = vrot.slane %v943_v44, 4  ;;  %v2447_v5 = vpack.c.b16 %v2416_v42, %v2415_v38  ;;  %v1909_v61 = vsel %vm4264_vm5, %v1907_v45, %v1908_v46  ;;  %v948_v6 = vrot.slane %v946_v53, 5  ;;  %v3615_v42 = vld [vmem:[%s4034_s17 + $0x48] sm:$0xf]  ;;  %v4499_v53 = vld [vmem:[%s4034_s17 + $0x50] sm:$0x1] }
  0x8e   : > { %v962_v4 = vshll.u32 %v4450_v48, 16  ;;  %v1304_v59 = vsel %vm4264_vm5, %v3592_v49, %v1303_v50  ;;  %v954_v8 = vrot.slane %v952_v10, 5  ;;  %v958_v14 = vrot.slane %v956_v57, 4  ;;  %v3656_v50 = vld [vmem:[%s4034_s17 + $0x24] sm:$0xe] }
  0x8f   : > { %v871_v23 = vshrl.u32 %v3529_v54, 16  ;;  %v1307_v31 = vsel %vm4264_vm5, %v1305_v52, %v1306_v33  ;;  %v949_v15 = vor.u32 %v948_v6, %v945_v3  ;;  %v874_v17 = vshll.u32 %v3529_v54, 16 }
  0x90   : > { %v880_v18 = vshll.u32 %v3530_v62, 16  ;;  %v959_v19 = vor.u32 %v958_v14, %v954_v8  ;;  %v964_v20 = vrot.slane %v962_v4, 5  ;;  %v884_v24 = vshrl.u32 %v3530_v62, 16 }
  0x91   : > { %2235 = vrot.lane.b32.xlu0 %v2205_v58, %s3993_s19  ;;  %2639 = vrot.lane.b32.xlu2 %v2623_v51, %s3996_s22  ;;  %v873_v55 = vrot.slane %v871_v23, 4  ;;  %v950_v40 = vrot.slane %v949_v15, 4  ;;  %v876_v22 = vrot.slane %v874_v17, 5  ;;  %v890_v36 = vshll.u32 %v3560_v9, 16 }
  0x92   : > { %2559 = vrot.lane.b32.xlu1 %v3938_v21, %s3997_s23  ;;  %v882_v25 = vrot.slane %v880_v18, 5  ;;  %v2671_v11 = vunpack.c.l.b16 %v1906_v0  ;;  %v2672_v63 = vunpack.c.l.b16 %v1909_v61  ;;  %v960_v27 = vrot.slane %v959_v19, 4  ;;  %v3610_v21 = vld [vmem:[%s4034_s17 + $0x28] sm:$0xf]  ;;  %v3609_v61 = vld [vmem:[%s4034_s17 + $0x24] sm:$0xf] }
  0x93   : > { %v886_v1 = vrot.slane %v884_v24, 4  ;;  %v2417_v32 = vunpack.c.l.b16 %v1304_v59  ;;  %v955_v43 = vsel %vm4062_vm2, %v950_v40, %v954_v8  ;;  %v877_v2 = vor.u32 %v876_v22, %v873_v55  ;;  %v4494_v44 = vpop.permute.xlu2 %2143  ;;  %v3640_v59 = vld [vmem:[%s4034_s17 + $0x2c] sm:$0x1] }
  0x94   : > { %v3595_v35 = vrot.slane %v3579_v37, 9  ;;  %v2418_v16 = vunpack.c.l.b16 %v1307_v31  ;;  %v965_v28 = vsel %vm4062_vm2, %v960_v27, %v964_v20  ;;  %v892_v34 = vrot.slane %v890_v36, 5  ;;  %v3543_v22 = vld [vmem:[%s4034_s17 + $0x6c] sm:$0xf] }
  0x95   : > { %v887_v56 = vor.u32 %v886_v1, %v882_v25  ;;  %v878_v29 = vrot.slane %v877_v2, 4  ;;  %v1324_v39 = vrot.slane %v4446_v47, 5  ;;  %v2343_v38 = vunpack.c.l.b16 %v955_v43  ;;  %v4488_v47 = vld [vmem:[%s4034_s17 + $0x4c] sm:$0xf]  ;;  %v4520_v2 = vpop.permute.xlu1 %2131 }
  0x96   : > { %v2344_v41 = vunpack.c.l.b16 %v965_v28  ;;  %v2703_v45 = vpack.c.b16 %v2672_v63, %v2671_v11  ;;  %v2448_v58 = vpack.c.b16 %v2418_v16, %v2417_v32  ;;  %v1327_v51 = vrot.slane %v4450_v48, 5  ;;  %v4518_v32 = vld [vmem:[%s4034_s17 + $0x70] sm:$0xf] }
  0x97   : > { %v888_v62 = vrot.slane %v887_v56, 4  ;;  %v4484_v46 = vsel %vm4264_vm5, %v3595_v35, %v1324_v39  ;;  %v883_v9 = vsel %vm4062_vm2, %v878_v29, %v882_v25  ;;  %v1326_v52 = vrot.slane %v1324_v39, 4  ;;  %v3942_v56 = vld [vmem:[%s4034_s17 + $0x48] sm:$0xff] }
  0x98   : > { %v1912_v33 = vrot.slane %v3610_v21, 5  ;;  %v1552_v54 = vshrl.u32 %v3615_v42, 16  ;;  %v1555_v0 = vshll.u32 %v3615_v42, 16  ;;  %v2371_v3 = vpack.c.b16 %v2344_v41, %v2343_v38 }
  0x99   : > { %2463 = vrot.lane.b32.xlu0 %v2447_v5, %s3998_s24  ;;  %2311 = vrot.lane.b32.xlu2 %v3926_v12, %s3995_s21  ;;  %v893_v49 = vsel %vm4062_vm2, %v888_v62, %v892_v34  ;;  %v2423_v10 = vunpack.c.l.b16 %v4484_v46  ;;  %v3672_v57 = vrot.slane %v3656_v50, 9  ;;  %v1561_v5 = vshll.u32 %v4488_v47, 16  ;;  %v3939_v34 = vld [vmem:[%s4034_s17 + $0x24] sm:$0xff] }
  0x9a   : > { %2305 = vrot.lane.b32.xlu1 %v3923_v30, %s3995_s21  ;;  %v2337_v6 = vunpack.c.l.b16 %v883_v9  ;;  %v2338_v4 = vunpack.c.l.b16 %v893_v49  ;;  %v1554_v8 = vrot.slane %v1552_v54, 4  ;;  %v1557_v48 = vrot.slane %v1555_v0, 5 }
  0x9b   : > { %v1915_v14 = vrot.slane %v3640_v59, 5  ;;  %v1563_v23 = vrot.slane %v1561_v5, 5  ;;  %v1565_v31 = vshrl.u32 %v4488_v47, 16  ;;  %v1571_v15 = vshll.u32 %v4499_v53, 16 }
  0x9c   : > { %v1914_v17 = vrot.slane %v1912_v33, 4  ;;  %v1558_v18 = vor.u32 %v1557_v48, %v1554_v8  ;;  %v1480_v19 = vshrl.u32 %v3609_v61, 16  ;;  %v1483_v20 = vshll.u32 %v3609_v61, 16 }
  0x9d   : > { %v4510_v55 = vsel %vm4264_vm5, %v1326_v52, %v1327_v51  ;;  %v1567_v24 = vrot.slane %v1565_v31, 4  ;;  %v1489_v37 = vshll.u32 %v3610_v21, 16  ;;  %v1493_v40 = vshrl.u32 %v3610_v21, 16  ;;  %v3623_v31 = vld [vmem:[%s4034_s17 + $0x78] sm:$0xf] }
  0x9e   : > { %v1913_v25 = vsel %vm4264_vm5, %v3672_v57, %v1912_v33  ;;  %v1559_v36 = vrot.slane %v1558_v18, 4  ;;  %v1573_v11 = vrot.slane %v1571_v15, 5  ;;  %v1482_v63 = vrot.slane %v1480_v19, 4  ;;  %v4539_v57 = vpop.permute.xlu0 %2127 }
  0x9f   : > { %v1568_v27 = vor.u32 %v1567_v24, %v1563_v23  ;;  %v1485_v1 = vrot.slane %v1483_v20, 5  ;;  %v1491_v12 = vrot.slane %v1489_v37, 5  ;;  %v1495_v30 = vrot.slane %v1493_v40, 4  ;;  %v3624_v20 = vld [vmem:[%s4034_s17 + $0x7c] sm:$0xf] }
  0xa0   : > { %v2368_v43 = vpack.c.b16 %v2338_v4, %v2337_v6  ;;  %v1916_v35 = vsel %vm4264_vm5, %v1914_v17, %v1915_v14  ;;  %v1499_v16 = vshll.u32 %v3640_v59, 16  ;;  %v1039_v28 = vshrl.u32 %v3543_v22, 16  ;;  %v3659_v59 = vld [vmem:[%s4034_s17 + $0x48] sm:$0xe] }
  0xa1   : > { %2719 = vrot.lane.b32.xlu0 %v2703_v45, %s3999_s25  ;;  %2465 = vrot.lane.b32.xlu2 %v2448_v58, %s3998_s24  ;;  %v4526_v29 = vpop.permute.xlu2 %2149  ;;  %v1564_v39 = vsel %vm4062_vm2, %v1559_v36, %v1563_v23  ;;  %v1569_v38 = vrot.slane %v1568_v27, 4  ;;  %v1486_v41 = vor.u32 %v1485_v1, %v1482_v63  ;;  %v1496_v62 = vor.u32 %v1495_v30, %v1491_v12  ;;  %v4531_v45 = vld [vmem:[%s4034_s17 + $0x74] sm:$0x1]  ;;  %v4559_v1 = vpop.permute.xlu1 %2133 }
  0xa2   : > { %2391 = vrot.lane.b32.xlu1 %v2371_v3, %s3994_s20  ;;  %v1501_v42 = vrot.slane %v1499_v16, 5  ;;  %v1041_v50 = vrot.slane %v1039_v28, 4  ;;  %v1042_v58 = vshll.u32 %v3543_v22, 16  ;;  %v1048_v9 = vshll.u32 %v4518_v32, 16 }
  0xa3   : > { %v1574_v49 = vsel %vm4062_vm2, %v1569_v38, %v1573_v11  ;;  %v1487_v51 = vrot.slane %v1486_v41, 4  ;;  %v1497_v21 = vrot.slane %v1496_v62, 4  ;;  %v1052_v52 = vshrl.u32 %v4518_v32, 16  ;;  %v3663_v62 = vld [vmem:[%s4034_s17 + $0x78] sm:$0xe] }
  0xa4   : > { %v2424_v33 = vunpack.c.l.b16 %v4510_v55  ;;  %v2673_v54 = vunpack.c.l.b16 %v1913_v25  ;;  %v1044_v0 = vrot.slane %v1042_v58, 5  ;;  %v1050_v3 = vrot.slane %v1048_v9, 5 }
  0xa5   : > { %v1492_v5 = vsel %vm4062_vm2, %v1487_v51, %v1491_v12  ;;  %v1502_v61 = vsel %vm4062_vm2, %v1497_v21, %v1501_v42  ;;  %v1054_v6 = vrot.slane %v1052_v52, 4  ;;  %v1058_v4 = vshll.u32 %v4531_v45, 16  ;;  %v4562_v12 = vld [vmem:[%s4034_s17 + $0x80] sm:$0x1] }
  0xa6   : > { %v2674_v8 = vunpack.c.l.b16 %v1916_v35  ;;  %v2599_v48 = vunpack.c.l.b16 %v1564_v39  ;;  %v2600_v14 = vunpack.c.l.b16 %v1574_v49  ;;  %v1045_v23 = vor.u32 %v1044_v0, %v1041_v50  ;;  %v3583_v35 = vld [vmem:[%s4034_s17 + $0x6c] sm:$0xe] }
  0xa7   : > { %v4550_v15 = vunpack.c.l.b16 %v1492_v5  ;;  %v1055_v17 = vor.u32 %v1054_v6, %v1050_v3  ;;  %v1060_v18 = vrot.slane %v1058_v4, 5  ;;  %v1933_v19 = vrot.slane %v4488_v47, 5  ;;  %v2130_v49 = vpop.permute.xlu0 %2129  ;;  %v3907_v6 = vld [vmem:[%s4034_s17 + $0xc] sm:$0xff] }
  0xa8   : > { %v4554_v55 = vunpack.c.l.b16 %v1502_v61  ;;  %v1046_v24 = vrot.slane %v1045_v23, 4  ;;  %v3675_v37 = vrot.slane %v3659_v59, 9  ;;  %v1936_v40 = vrot.slane %v4499_v53, 5 }
  0xa9   : > { %2385 = vrot.lane.b32.xlu0 %v2368_v43, %s3994_s20  ;;  %2567 = vrot.lane.b32.xlu2 %v3942_v56, %s3997_s23  ;;  %v2451_v22 = vpack.c.b16 %v2424_v33, %v2423_v10  ;;  %v1056_v25 = vrot.slane %v1055_v17, 4  ;;  %v1935_v36 = vrot.slane %v1933_v19, 4  ;;  %v1648_v11 = vshrl.u32 %v3623_v31, 16 }
  0xaa   : > { %2561 = vrot.lane.b32.xlu1 %v3939_v34, %s3997_s23  ;;  %v2704_v63 = vpack.c.b16 %v2674_v8, %v2673_v54  ;;  %v2627_v27 = vpack.c.b16 %v2600_v14, %v2599_v48  ;;  %v1651_v47 = vshll.u32 %v3623_v31, 16  ;;  %v1657_v30 = vshll.u32 %v3624_v20, 16  ;;  %v3910_v54 = vld [vmem:[%s4034_s17 + $0x30] sm:$0xff] }
  0xab   : > { %v1051_v53 = vsel %vm4062_vm2, %v1046_v24, %v1050_v3  ;;  %v1061_v46 = vsel %vm4062_vm2, %v1056_v25, %v1060_v18  ;;  %v1650_v10 = vrot.slane %v1648_v11, 4  ;;  %v2624_v16 = vpack.c.b16 %v4554_v55, %v4550_v15  ;;  %v3930_v14 = vld [vmem:[%s4034_s17 + $0x6c] sm:$0xff] }
  0xac   : > { %v1934_v28 = vsel %vm4264_vm5, %v3675_v37, %v1933_v19  ;;  %v1937_v56 = vsel %vm4264_vm5, %v1935_v36, %v1936_v40  ;;  %v1653_v34 = vrot.slane %v1651_v47, 5  ;;  %v1659_v39 = vrot.slane %v1657_v30, 5  ;;  %v3532_v37 = vld [vmem:[%s4034_s17 + $0x28] sm:$0xf]  ;;  %v3577_v40 = vld [vmem:[%s4034_s17 + $0x24] sm:$0xe] }
  0xad   : > { %v1661_v38 = vshrl.u32 %v3624_v20, 16  ;;  %v1667_v41 = vshll.u32 %v4562_v12, 16  ;;  %v2351_v42 = vunpack.c.l.b16 %v1051_v53  ;;  %v2352_v50 = vunpack.c.l.b16 %v1061_v46  ;;  %v4621_v46 = vld [vmem:[%s4034_s17 + $0x50] sm:$0x1] }
  0xae   : > { %v3599_v58 = vrot.slane %v3583_v35, 9  ;;  %v1352_v9 = vrot.slane %v4518_v32, 5  ;;  %v2679_v51 = vunpack.c.l.b16 %v1934_v28  ;;  %v1654_v21 = vor.u32 %v1653_v34, %v1650_v10  ;;  %v3531_v10 = vld [vmem:[%s4034_s17 + $0x24] sm:$0xf] }
  0xaf   : > { %v4564_v43 = vpop.permute.xlu2 %2155  ;;  %v1663_v52 = vrot.slane %v1661_v38, 4  ;;  %v1355_v33 = vrot.slane %v4531_v45, 5  ;;  %v2680_v0 = vunpack.c.l.b16 %v1937_v56  ;;  %v3679_v5 = vrot.slane %v3663_v62, 9 }
  0xb0   : > { %v1354_v3 = vrot.slane %v1352_v9, 4  ;;  %v1961_v61 = vrot.slane %v3624_v20, 5  ;;  %v1655_v4 = vrot.slane %v1654_v21, 4  ;;  %v1669_v8 = vrot.slane %v1667_v41, 5  ;;  %v4602_v20 = vpop.permute.xlu1 %2141  ;;  %v3946_v21 = vld [vmem:[%s4034_s17 + $0x78] sm:$0xff] }
  0xb1   : > { %2471 = vrot.lane.b32.xlu0 %v2451_v22, %s3998_s24  ;;  %2721 = vrot.lane.b32.xlu2 %v2704_v63, %s3999_s25  ;;  %v1664_v59 = vor.u32 %v1663_v52, %v1659_v39  ;;  %v1353_v32 = vsel %vm4264_vm5, %v3599_v58, %v1352_v9  ;;  %v2375_v48 = vpack.c.b16 %v2352_v50, %v2351_v42  ;;  %v1964_v23 = vrot.slane %v4562_v12, 5  ;;  %v3537_v22 = vld [vmem:[%s4034_s17 + $0x48] sm:$0xf] }
  0xb2   : > { %2647 = vrot.lane.b32.xlu1 %v2627_v27, %s3996_s22  ;;  %v1356_v45 = vsel %vm4264_vm5, %v1354_v3, %v1355_v33  ;;  %v1660_v31 = vsel %vm4062_vm2, %v1655_v4, %v1659_v39  ;;  %v4596_v17 = vsel %vm4264_vm5, %v3679_v5, %v1961_v61  ;;  %v1963_v18 = vrot.slane %v1961_v61, 4  ;;  %v4612_v27 = vld [vmem:[%s4034_s17 + $0x4c] sm:$0xf] }
  0xb3   : > { %v1665_v15 = vrot.slane %v1664_v59, 4  ;;  %v4600_v19 = vsel %vm2751_vm6, %v3910_v54, %v4426_v13  ;;  %v2431_v55 = vunpack.c.l.b16 %v1353_v32  ;;  %v2432_v24 = vunpack.c.l.b16 %v1356_v45 }
  0xb4   : > { %v2757_v25 = vsel %vm2751_vm6, %v3907_v6, %v2130_v49  ;;  %v2707_v36 = vpack.c.b16 %v2680_v0, %v2679_v51  ;;  %v1310_v63 = vrot.slane %v3532_v37, 5  ;;  %v2607_v47 = vunpack.c.l.b16 %v1660_v31 }
  0xb5   : > { %v1670_v13 = vsel %vm4062_vm2, %v1665_v15, %v1669_v8  ;;  %v2687_v53 = vunpack.c.l.b16 %v4596_v17  ;;  %v4626_v35 = vsel %vm4264_vm5, %v1963_v18, %v1964_v23  ;;  %v3593_v28 = vrot.slane %v3577_v40, 9  ;;  %v4633_v42 = vpop.permute.xlu0 %2139  ;;  %v3913_v40 = vld [vmem:[%s4034_s17 + $0x54] sm:$0xff] }
  0xb6   : > { %v2608_v30 = vunpack.c.l.b16 %v1670_v13  ;;  %v967_v56 = vshrl.u32 %v3537_v22, 16  ;;  %v970_v34 = vshll.u32 %v3537_v22, 16  ;;  %v4629_v39 = vpack.c.b16 %v2432_v24, %v2431_v55  ;;  %v3916_v22 = vld [vmem:[%s4034_s17 + $0x78] sm:$0xff] }
  0xb7   : > { %v976_v41 = vshll.u32 %v4612_v27, 16  ;;  %v980_v62 = vshrl.u32 %v4612_v27, 16  ;;  %v1312_v50 = vrot.slane %v1310_v63, 4  ;;  %v986_v49 = vshll.u32 %v4621_v46, 16 }
  0xb8   : > { %v2210_v11 = vpop.permute.xlu2 %2209  ;;  %v969_v58 = vrot.slane %v967_v56, 4  ;;  %v972_v9 = vrot.slane %v970_v34, 5  ;;  %v2631_v51 = vpack.c.b16 %v2608_v30, %v2607_v47  ;;  %v895_v54 = vshrl.u32 %v3531_v10, 16 }
  0xb9   : > { %2641 = vrot.lane.b32.xlu0 %v2624_v16, %s3996_s22  ;;  %2399 = vrot.lane.b32.xlu2 %v2375_v48, %s3994_s20  ;;  %v4617_v12 = vsel %vm2800_vm7, %v2757_v25, %v2210_v11  ;;  %v3561_v16 = vld [vmem:[%s4034_s17 + $0x2c] sm:$0x1]  ;;  %v978_v52 = vrot.slane %v976_v41, 5  ;;  %v982_v33 = vrot.slane %v980_v62, 4  ;;  %v1311_v0 = vsel %vm4264_vm5, %v3593_v28, %v1310_v63 }
  0xba   : > { %2319 = vrot.lane.b32.xlu1 %v3930_v14, %s3995_s21  ;;  %v1313_v38 = vrot.slane %v3561_v16, 5  ;;  %v973_v3 = vor.u32 %v972_v9, %v969_v58  ;;  %v988_v5 = vrot.slane %v986_v49, 5  ;;  %v898_v61 = vshll.u32 %v3531_v10, 16  ;;  %v3657_v58 = vld [vmem:[%s4034_s17 + $0x30] sm:$0xe] }
  0xbb   : > { %v983_v6 = vor.u32 %v982_v33, %v978_v52  ;;  %v897_v4 = vrot.slane %v895_v54, 4  ;;  %v904_v59 = vshll.u32 %v3532_v37, 16  ;;  %v908_v8 = vshrl.u32 %v3532_v37, 16  ;;  %v3580_v37 = vld [vmem:[%s4034_s17 + $0x48] sm:$0xe] }
  0xbc   : > { %v2688_v32 = vunpack.c.l.b16 %v4626_v35  ;;  %v1314_v48 = vsel %vm4264_vm5, %v1312_v50, %v1313_v38  ;;  %v974_v14 = vrot.slane %v973_v3, 4  ;;  %v900_v45 = vrot.slane %v898_v61, 5  ;;  %v3927_v35 = vld [vmem:[%s4034_s17 + $0x48] sm:$0xff]  ;;  %v3617_v38 = vld [vmem:[%s4034_s17 + $0x54] sm:$0xf] }
  0xbd   : > { %v2148_v23 = vpop.permute.xlu1 %2147  ;;  %v984_v15 = vrot.slane %v983_v6, 4  ;;  %v906_v18 = vrot.slane %v904_v59, 5  ;;  %v910_v55 = vrot.slane %v908_v8, 4  ;;  %v914_v24 = vshll.u32 %v3561_v16, 16  ;;  %v3924_v16 = vld [vmem:[%s4034_s17 + $0x24] sm:$0xff] }
  0xbe   : > { %v979_v11 = vsel %vm4062_vm2, %v974_v14, %v978_v52  ;;  %v901_v13 = vor.u32 %v900_v45, %v897_v4  ;;  %v2420_v63 = vunpack.c.l.b16 %v1314_v48  ;;  %v1331_v10 = vrot.slane %v4612_v27, 5  ;;  %v3612_v50 = vld [vmem:[%s4034_s17 + $0x34] sm:$0xf]  ;;  %v4676_v52 = vld [vmem:[%s4034_s17 + $0x58] sm:$0xf] }
  0xbf   : > { %v989_v47 = vsel %vm4062_vm2, %v984_v15, %v988_v5  ;;  %v911_v30 = vor.u32 %v910_v55, %v906_v18  ;;  %v4659_v28 = vunpack.c.l.b16 %v979_v11  ;;  %v3596_v34 = vrot.slane %v3580_v37, 9  ;;  %v3611_v6 = vld [vmem:[%s4034_s17 + $0x30] sm:$0xf]  ;;  %v4698_v4 = vld [vmem:[%s4034_s17 + $0x5c] sm:$0x1] }
  0xc0   : > { %v902_v56 = vrot.slane %v901_v13, 4  ;;  %v916_v62 = vrot.slane %v914_v24, 5  ;;  %v2775_v9 = vsel %vm2751_vm6, %v3913_v40, %v4602_v20  ;;  %v4669_v27 = vsel %vm2751_vm6, %v3916_v22, %v2148_v23 }
  0xc1   : > { %2727 = vrot.lane.b32.xlu0 %v2707_v36, %s3999_s25  ;;  %2655 = vrot.lane.b32.xlu2 %v2631_v51, %s3996_s22  ;;  %v2216_v31 = vpop.permute.xlu2 %2215  ;;  %v2419_v36 = vunpack.c.l.b16 %v1311_v0  ;;  %v912_v41 = vrot.slane %v911_v30, 4  ;;  %v2711_v51 = vpack.c.b16 %v2688_v32, %v2687_v53  ;;  %v1333_v54 = vrot.slane %v1331_v10, 4  ;;  %v4690_v53 = vld [vmem:[%s4034_s17 + $0x38] sm:$0x1]  ;;  %v3911_v30 = vld [vmem:[%s4034_s17 + $0x3c] sm:$0xff] }
  0xc2   : > { %2575 = vrot.lane.b32.xlu1 %v3946_v21, %s3997_s23  ;;  %v4650_v25 = vsel %vm2800_vm7, %v4600_v19, %v2216_v31  ;;  %v4661_v19 = vunpack.c.l.b16 %v989_v47  ;;  %v1919_v21 = vrot.slane %v3612_v50, 5  ;;  %v907_v33 = vsel %vm4062_vm2, %v902_v56, %v906_v18 }
  0xc3   : > { %v4671_v49 = vpop.permute.xlu0 %2145  ;;  %v1334_v0 = vrot.slane %v4621_v46, 5  ;;  %v1576_v20 = vshrl.u32 %v3617_v38, 16  ;;  %v2449_v3 = vpack.c.b16 %v2420_v63, %v2419_v36  ;;  %v4687_v17 = vsel %vm4264_vm5, %v3596_v34, %v1331_v10  ;;  %v3914_v10 = vld [vmem:[%s4034_s17 + $0x60] sm:$0xff] }
  0xc4   : > { %v2372_v5 = vpack.c.b16 %v4661_v19, %v4659_v28  ;;  %v3673_v61 = vrot.slane %v3657_v58, 9  ;;  %v1579_v8 = vshll.u32 %v3617_v38, 16  ;;  %v1585_v32 = vshll.u32 %v4676_v52, 16 }
  0xc5   : > { %v1578_v59 = vrot.slane %v1576_v20, 4  ;;  %v4704_v14 = vunpack.c.l.b16 %v907_v33  ;;  %v1921_v45 = vrot.slane %v1919_v21, 4  ;;  %v1922_v23 = vrot.slane %v4690_v53, 5 }
  0xc6   : > { %v1335_v15 = vsel %vm4264_vm5, %v1333_v54, %v1334_v0  ;;  %v1581_v18 = vrot.slane %v1579_v8, 5  ;;  %v1587_v55 = vrot.slane %v1585_v32, 5  ;;  %v1589_v24 = vshrl.u32 %v4676_v52, 16  ;;  %v3919_v0 = vld [vmem:[%s4034_s17 + $0x9c] sm:$0xff]  ;;  %v3943_v8 = vld [vmem:[%s4034_s17 + $0x54] sm:$0xff] }
  0xc7   : > { %v1595_v40 = vshll.u32 %v4698_v4, 16  ;;  %v1504_v22 = vshrl.u32 %v3611_v6, 16  ;;  %v1507_v36 = vshll.u32 %v3611_v6, 16  ;;  %v1920_v11 = vsel %vm4264_vm5, %v3673_v61, %v1919_v21  ;;  %v3551_v32 = vld [vmem:[%s4034_s17 + $0x9c] sm:$0xf] }
  0xc8   : > { %v1582_v13 = vor.u32 %v1581_v18, %v1578_v59  ;;  %v1591_v63 = vrot.slane %v1589_v24, 4  ;;  %v1513_v47 = vshll.u32 %v3612_v50, 16  ;;  %v1517_v19 = vshrl.u32 %v3612_v50, 16 }
  0xc9   : > { %2479 = vrot.lane.b32.xlu0 %v4629_v39, %s3998_s24  ;;  %2313 = vrot.lane.b32.xlu2 %v3927_v35, %s3995_s21  ;;  %v2222_v46 = vpop.permute.xlu2 %2221  ;;  %v917_v39 = vsel %vm4062_vm2, %v912_v41, %v916_v62  ;;  %v1923_v35 = vsel %vm4264_vm5, %v1921_v45, %v1922_v23  ;;  %v1509_v28 = vrot.slane %v1507_v36, 5  ;;  %v1597_v38 = vrot.slane %v1595_v40, 5  ;;  %v3909_v62 = vld [vmem:[%s4034_s17 + $0x24] sm:$0xff]  ;;  %v4763_v36 = vld [vmem:[%s4034_s17 + $0xa0] sm:$0xf] }
  0xca   : > { %2307 = vrot.lane.b32.xlu1 %v3924_v16, %s3995_s21  ;;  %v4702_v48 = vsel %vm2800_vm7, %v2775_v9, %v2222_v46  ;;  %v4710_v37 = vunpack.c.l.b16 %v917_v39  ;;  %v1506_v16 = vrot.slane %v1504_v22, 4  ;;  %v1583_v56 = vrot.slane %v1582_v13, 4  ;;  %v3660_v46 = vld [vmem:[%s4034_s17 + $0x54] sm:$0xe]  ;;  %v3546_v22 = vld [vmem:[%s4034_s17 + $0x7c] sm:$0xf] }
  0xcb   : > { %v1592_v34 = vor.u32 %v1591_v63, %v1587_v55  ;;  %v4719_v41 = vrot.slane %v1513_v47, 5  ;;  %v2425_v9 = vunpack.c.l.b16 %v4687_v17  ;;  %v1519_v33 = vrot.slane %v1517_v19, 4  ;;  %v4781_v19 = vld [vmem:[%s4034_s17 + $0xa4] sm:$0x1] }
  0xcc   : > { %v2154_v31 = vpop.permute.xlu1 %2153  ;;  %v1510_v21 = vor.u32 %v1509_v28, %v1506_v16  ;;  %v1940_v54 = vrot.slane %v4676_v52, 5  ;;  %v2426_v20 = vunpack.c.l.b16 %v1335_v15  ;;  %v2675_v61 = vunpack.c.l.b16 %v1920_v11  ;;  %v4778_v28 = vld [vmem:[%s4034_s17 + $0x80] sm:$0x1] }
  0xcd   : > { %v2676_v6 = vunpack.c.l.b16 %v1923_v35  ;;  %v4733_v17 = vsel %vm2751_vm6, %v3911_v30, %v4462_v7  ;;  %v4737_v52 = vsel %vm2751_vm6, %v3914_v10, %v4494_v44  ;;  %v2369_v39 = vpack.c.b16 %v4710_v37, %v4704_v14  ;;  %v3584_v14 = vld [vmem:[%s4034_s17 + $0x78] sm:$0xe]  ;;  %v3940_v37 = vld [vmem:[%s4034_s17 + $0x30] sm:$0xff] }
  0xce   : > { %v1588_v7 = vsel %vm4062_vm2, %v1583_v56, %v1587_v55  ;;  %v1511_v45 = vrot.slane %v1510_v21, 4  ;;  %v3676_v23 = vrot.slane %v3660_v46, 9  ;;  %v1943_v15 = vrot.slane %v4698_v4, 5  ;;  %v3545_v21 = vld [vmem:[%s4034_s17 + $0x78] sm:$0xf] }
  0xcf   : > { %v2763_v18 = vsel %vm2751_vm6, %v3909_v62, %v4559_v1  ;;  %v2793_v24 = vsel %vm2751_vm6, %v3919_v0, %v2154_v31  ;;  %v2452_v40 = vpack.c.b16 %v2426_v20, %v2425_v9  ;;  %v2705_v55 = vpack.c.b16 %v2676_v6, %v2675_v61  ;;  %v3908_v61 = vld [vmem:[%s4034_s17 + $0x18] sm:$0xff] }
  0xd0   : > { %v2601_v11 = vunpack.c.l.b16 %v1588_v7  ;;  %v1359_v47 = vrot.slane %v3546_v22, 5  ;;  %v3600_v4 = vrot.slane %v3584_v14, 9  ;;  %v1135_v10 = vshrl.u32 %v3551_v32, 16 }
  0xd1   : > { %2735 = vrot.lane.b32.xlu0 %v2711_v51, %s3999_s25  ;;  %v4723_v58 = vpop.permute.xlu0 %2151  ;;  %2467 = vrot.lane.b32.xlu2 %v2449_v3, %s3998_s24  ;;  %v2228_v50 = vpop.permute.xlu2 %2227  ;;  %v1593_v51 = vrot.slane %v1592_v34, 4  ;;  %v1138_v35 = vshll.u32 %v3551_v32, 16  ;;  %v1516_v1 = vsel %vm4062_vm2, %v1511_v45, %v4719_v41  ;;  %v4771_v31 = vsel %vm4264_vm5, %v3676_v23, %v1940_v54 }
  0xd2   : > { %2393 = vrot.lane.b32.xlu1 %v2372_v5, %s3994_s20  ;;  %v4741_v3 = vsel %vm2800_vm7, %v4669_v27, %v2228_v50  ;;  %v1523_v5 = vshll.u32 %v4690_v53, 16  ;;  %v1520_v27 = vor.u32 %v1519_v33, %v4719_v41  ;;  %v1942_v53 = vrot.slane %v1940_v54, 4 }
  0xd3   : > { %v1598_v44 = vsel %vm4062_vm2, %v1593_v51, %v1597_v38  ;;  %v1144_v56 = vshll.u32 %v4763_v36, 16  ;;  %v1361_v38 = vrot.slane %v1359_v47, 4  ;;  %v1362_v41 = vrot.slane %v4778_v28, 5 }
  0xd4   : > { %v4746_v59 = vpop.permute.xlu1 %2207  ;;  %v2602_v13 = vunpack.c.l.b16 %v1598_v44  ;;  %v1525_v63 = vrot.slane %v1523_v5, 5  ;;  %v1521_v30 = vrot.slane %v1520_v27, 4  ;;  %v4775_v16 = vsel %vm4264_vm5, %v1942_v53, %v1943_v15  ;;  %v3912_v15 = vld [vmem:[%s4034_s17 + $0x48] sm:$0xff] }
  0xd5   : > { %v1137_v62 = vrot.slane %v1135_v10, 4  ;;  %v1140_v9 = vrot.slane %v1138_v35, 5  ;;  %v1146_v50 = vrot.slane %v1144_v56, 5  ;;  %v1148_v20 = vshrl.u32 %v4763_v36, 16  ;;  %v3587_v56 = vld [vmem:[%s4034_s17 + $0x9c] sm:$0xe] }
  0xd6   : > { %v2628_v0 = vpack.c.b16 %v2602_v13, %v2601_v11  ;;  %v1526_v51 = vsel %vm4062_vm2, %v1521_v30, %v1525_v63  ;;  %v1360_v46 = vsel %vm4264_vm5, %v3600_v4, %v1359_v47  ;;  %v1063_v44 = vshrl.u32 %v3545_v21, 16 }
  0xd7   : > { %v1141_v5 = vor.u32 %v1140_v9, %v1137_v62  ;;  %v1150_v7 = vrot.slane %v1148_v20, 4  ;;  %v1066_v27 = vshll.u32 %v3545_v21, 16  ;;  %v1363_v32 = vsel %vm4264_vm5, %v1361_v38, %v1362_v41  ;;  %v3631_v20 = vld [vmem:[%s4034_s17 + $0xa8] sm:$0xf] }
  0xd8   : > { %v1072_v53 = vshll.u32 %v3546_v22, 16  ;;  %v1076_v11 = vshrl.u32 %v3546_v22, 16  ;;  %v2595_v13 = vunpack.c.l.b16 %v1516_v1  ;;  %v2596_v63 = vunpack.c.l.b16 %v1526_v51  ;;  %v4842_v51 = vld [vmem:[%s4034_s17 + $0x88] sm:$0xf] }
  0xd9   : > { %2387 = vrot.lane.b32.xlu0 %v2369_v39, %s3994_s20  ;;  %2569 = vrot.lane.b32.xlu2 %v3943_v8, %s3997_s23  ;;  %v2234_v34 = vpop.permute.xlu2 %2233  ;;  %v1154_v39 = vshll.u32 %v4781_v19, 16  ;;  %v1142_v45 = vrot.slane %v1141_v5, 4  ;;  %v1151_v14 = vor.u32 %v1150_v7, %v1146_v50  ;;  %v2681_v47 = vunpack.c.l.b16 %v4771_v31  ;;  %v3931_v7 = vld [vmem:[%s4034_s17 + $0x78] sm:$0xff] }
  0xda   : > { %2563 = vrot.lane.b32.xlu1 %v3940_v37, %s3997_s23  ;;  %v4791_v54 = vsel %vm2800_vm7, %v2793_v24, %v2234_v34  ;;  %v1065_v24 = vrot.slane %v1063_v44, 4  ;;  %v1068_v37 = vrot.slane %v1066_v27, 5  ;;  %v4810_v10 = vrot.slane %v1072_v53, 5  ;;  %v3915_v34 = vld [vmem:[%s4034_s17 + $0x6c] sm:$0xff] }
  0xdb   : > { %v4788_v33 = vpop.permute.xlu0 %2157  ;;  %v1156_v23 = vrot.slane %v1154_v39, 5  ;;  %v1152_v30 = vrot.slane %v1151_v14, 4  ;;  %v1078_v35 = vrot.slane %v1076_v11, 4  ;;  %v2433_v22 = vunpack.c.l.b16 %v1360_v46  ;;  %v3664_v46 = vld [vmem:[%s4034_s17 + $0x84] sm:$0xe]  ;;  %v3934_v39 = vld [vmem:[%s4034_s17 + $0x9c] sm:$0xff] }
  0xdc   : > { %v2214_v6 = vpop.permute.xlu1 %2213  ;;  %v1069_v4 = vor.u32 %v1068_v37, %v1065_v24  ;;  %v2434_v1 = vunpack.c.l.b16 %v1363_v32  ;;  %v1147_v31 = vsel %vm4062_vm2, %v1142_v45, %v1146_v50  ;;  %v1380_v62 = vrot.slane %v4763_v36, 5  ;;  %v4853_v45 = vld [vmem:[%s4034_s17 + $0xac] sm:$0xf]  ;;  %v4865_v11 = vld [vmem:[%s4034_s17 + $0xb0] sm:$0x1] }
  0xdd   : > { %v4801_v8 = vsel %vm2800_vm7, %v2763_v18, %v2214_v6  ;;  %v2760_v18 = vsel %vm2751_vm6, %v3908_v61, %v4520_v2  ;;  %v2682_v2 = vunpack.c.l.b16 %v4775_v16  ;;  %v1157_v41 = vsel %vm4062_vm2, %v1152_v30, %v1156_v23 }
  0xde   : > { %v2625_v9 = vpack.c.b16 %v2596_v63, %v2595_v13  ;;  %v3603_v50 = vrot.slane %v3587_v56, 9  ;;  %v4838_v6 = vunpack.c.l.b16 %v1157_v41  ;;  %v1079_v36 = vor.u32 %v1078_v35, %v4810_v10  ;;  %v3625_v13 = vld [vmem:[%s4034_s17 + $0x84] sm:$0xf] }
  0xdf   : > { %v2781_v5 = vsel %vm2751_vm6, %v3915_v34, %v4671_v49  ;;  %v2708_v44 = vpack.c.b16 %v2682_v2, %v2681_v47  ;;  %v4849_v27 = vpack.c.b16 %v2434_v1, %v2433_v22  ;;  %v1968_v32 = vrot.slane %v4842_v51, 5  ;;  %v4872_v47 = vld [vmem:[%s4034_s17 + $0x8c] sm:$0x1] }
  0xe0   : > { %v1382_v53 = vrot.slane %v1380_v62, 4  ;;  %v1744_v14 = vshrl.u32 %v3631_v20, 16  ;;  %v4862_v24 = vsel %vm4264_vm5, %v3603_v50, %v1380_v62  ;;  %v3680_v37 = vrot.slane %v3664_v46, 9 }
  0xe1   : > { %2473 = vrot.lane.b32.xlu0 %v2452_v40, %s3998_s24  ;;  %2723 = vrot.lane.b32.xlu2 %v2705_v55, %s3999_s25  ;;  %v2772_v40 = vsel %vm2751_vm6, %v3912_v15, %v4633_v42  ;;  %v1082_v55 = vshll.u32 %v4778_v28, 16  ;;  %v4830_v42 = vrot.slane %v1069_v4, 4  ;;  %v4836_v28 = vunpack.c.l.b16 %v1147_v31 }
  0xe2   : > { %2649 = vrot.lane.b32.xlu1 %v2628_v0, %s3996_s22  ;;  %v1383_v15 = vrot.slane %v4781_v19, 5  ;;  %v1080_v63 = vrot.slane %v1079_v36, 4  ;;  %v1746_v30 = vrot.slane %v1744_v14, 4  ;;  %v1753_v4 = vshll.u32 %v4853_v45, 16 }
  0xe3   : > { %v2212_v38 = vpop.permute.xlu0 %2211  ;;  %v4828_v21 = vpop.permute.xlu2 %2383  ;;  %v1084_v23 = vrot.slane %v1082_v55, 5  ;;  %v1075_v49 = vsel %vm4062_vm2, %v4830_v42, %v4810_v10  ;;  %v2379_v19 = vpack.c.b16 %v4838_v6, %v4836_v28  ;;  %v1970_v10 = vrot.slane %v1968_v32, 4  ;;  %v3035_v42 = vld [vmem:[%s5869_s1 + $0x10] sm:$0x3] }
  0xe4   : > { %v4826_v16 = vsel %vm2800_vm7, %v2760_v18, %v2212_v38  ;;  %v2220_v0 = vpop.permute.xlu1 %2219  ;;  %v1747_v18 = vshll.u32 %v3631_v20, 16  ;;  %v1971_v35 = vrot.slane %v4872_v47, 5  ;;  %v1757_v34 = vshrl.u32 %v4853_v45, 16  ;;  %v3918_v6 = vld [vmem:[%s4034_s17 + $0x90] sm:$0xff] }
  0xe5   : > { %v4834_v61 = vsel %vm2800_vm7, %v2772_v40, %v2220_v0  ;;  %v4881_v22 = vsel %vm4264_vm5, %v1382_v53, %v1383_v15  ;;  %v4883_v1 = vrot.slane %v1753_v4, 5  ;;  %v1763_v31 = vshll.u32 %v4865_v11, 16 }
  0xe6   : > { %v1749_v56 = vrot.slane %v1747_v18, 5  ;;  %v1672_v40 = vshrl.u32 %v3625_v13, 16  ;;  %v1675_v0 = vshll.u32 %v3625_v13, 16  ;;  %v1085_v20 = vsel %vm4062_vm2, %v1080_v63, %v1084_v23 }
  0xe7   : > { %v1972_v36 = vsel %vm4264_vm5, %v1970_v10, %v1971_v35  ;;  %v1765_v53 = vrot.slane %v1763_v31, 5  ;;  %v1685_v23 = vshrl.u32 %v4842_v51, 16  ;;  %v3045_v15 = vunpack.c.l.b16 %v3035_v42  ;;  %v3917_v10 = vld [vmem:[%s4034_s17 + $0x84] sm:$0xff] }
  0xe8   : > { %v1750_v62 = vor.u32 %v1749_v56, %v1746_v30  ;;  %v1674_v28 = vrot.slane %v1672_v40, 4  ;;  %v2353_v13 = vunpack.c.l.b16 %v1075_v49  ;;  %v2354_v63 = vunpack.c.l.b16 %v1085_v20  ;;  %v3920_v35 = vld [vmem:[%s4034_s17 + $0xa8] sm:$0xff] }
  0xe9   : > { %2643 = vrot.lane.b32.xlu0 %v2625_v9, %s3996_s22  ;;  %2327 = vrot.lane.b32.xlu2 %v3934_v39, %s3995_s21  ;;  %v1759_v9 = vrot.slane %v1757_v34, 4  ;;  %v1677_v39 = vrot.slane %v1675_v0, 5  ;;  %v1687_v30 = vrot.slane %v1685_v23, 4  ;;  %v3048_v4 = vpack.c.b16 %v3045_v15, %v3045_v15  ;;  %v3667_v0 = vld [vmem:[%s4034_s17 + $0xa8] sm:$0xe]  ;;  %v3954_v15 = vld [vmem:[%s5869_s1] sm:$0xff] }
  0xea   : > { %2321 = vrot.lane.b32.xlu1 %v3931_v7, %s3995_s21  ;;  %v1681_v7 = vshll.u32 %v4842_v51, 16  ;;  %v2790_v56 = vsel %vm2751_vm6, %v3918_v6, %v4723_v58  ;;  %v2439_v51 = vunpack.c.l.b16 %v4862_v24  ;;  %v2440_v34 = vunpack.c.l.b16 %v4881_v22  ;;  %v3947_v6 = vld [vmem:[%s4034_s17 + $0x84] sm:$0xff] }
  0xeb   : > { %v2218_v2 = vpop.permute.xlu0 %2217  ;;  %v4890_v41 = vpop.permute.xlu2 %2639  ;;  %v1760_v46 = vor.u32 %v1759_v9, %v4883_v1  ;;  %v1678_v18 = vor.u32 %v1677_v39, %v1674_v28  ;;  %v2690_v49 = vunpack.c.l.b16 %v1972_v36  ;;  %v1691_v40 = vshll.u32 %v4872_v47, 16  ;;  %v3955_v47 = vld [vmem:[%s5869_s1 + $0x8] sm:$0xff]  ;;  %v3539_v36 = vld [vmem:[%s4034_s17 + $0x54] sm:$0xf] }
  0xec   : > { %v4888_v38 = vsel %vm2800_vm7, %v4733_v17, %v2218_v2  ;;  %v2226_v55 = vpop.permute.xlu1 %2225  ;;  %v1969_v17 = vsel %vm4264_vm5, %v3680_v37, %v1968_v32  ;;  %v4908_v32 = vrot.slane %v1681_v7, 5  ;;  %v3906_v37 = vld [vmem:[%s4034_s17] sm:$0xff]  ;;  %v3086_v58 = vsel %vm3084_vm8, %v3048_v4, 0  ;;  %v3950_v28 = vld [vmem:[%s4034_s17 + $0xa8] sm:$0xff]  ;;  %v4983_v4 = vld [vmem:[%s4034_s17 + $0x5c] sm:$0x1] }
  0xed   : > { %v4896_v50 = vsel %vm2800_vm7, %v2781_v5, %v2226_v55  ;;  %v1751_v5 = vrot.slane %v1750_v62, 4  ;;  %v1761_v14 = vrot.slane %v1760_v46, 4  ;;  %v2689_v2 = vunpack.c.l.b16 %v1969_v17  ;;  %3093 = vmatpush.bf16.msra.mxu0 %v3086_v58  ;;  %3956 = vmatpush.bf16.msra.mxu1 %v3086_v58 }
  0xee   : > { %v1679_v55 = vrot.slane %v1678_v18, 4  ;;  %v1688_v62 = vor.u32 %v1687_v30, %v4908_v32  ;;  %v1989_v42 = vrot.slane %v4853_v45, 5  ;;  %3957 = vmatpush.bf16.msra.mxu2 %v3086_v58  ;;  %3958 = vmatpush.bf16.msra.mxu3 %v3086_v58  ;;  %v2787_v20 = vsel %vm2751_vm6, %v3917_v10, %v4526_v29  ;;  %v3578_v29 = vld [vmem:[%s4034_s17 + $0x30] sm:$0xe] }
  0xef   : > { %v1756_v31 = vsel %vm4062_vm2, %v1751_v5, %v4883_v1  ;;  %v1766_v22 = vsel %vm4062_vm2, %v1761_v14, %v1765_v53  ;;  %v2376_v1 = vpack.c.b16 %v2354_v63, %v2353_v13  ;;  %v4949_v17 = vsel %vm2751_vm6, %v3920_v35, %v4564_v43  ;;  %v4966_v5 = vld [vmem:[%s4034_s17 + $0x58] sm:$0xf]  ;;  %v3534_v14 = vld [vmem:[%s4034_s17 + $0x34] sm:$0xf] }
  0xf0   : > { %v2459_v46 = vpack.c.b16 %v2440_v34, %v2439_v51  ;;  %v4958_v39 = vpack.c.b16 %v2690_v49, %v2689_v2  ;;  %v4960_v45 = vunpack.c.l.b16 %v1756_v31  ;;  %v4962_v7 = vunpack.c.l.b16 %v1766_v22  ;;  %v4978_v13 = vld [vmem:[%s4034_s17 + $0x38] sm:$0x1]  ;;  %v3533_v49 = vld [vmem:[%s4034_s17 + $0x30] sm:$0xf] }
  0xf1   : > { %2729 = vrot.lane.b32.xlu0 %v2708_v44, %s3999_s25  ;;  %2481 = vrot.lane.b32.xlu2 %v4849_v27, %s3998_s24  ;;  %v1684_v43 = vsel %vm4062_vm2, %v1679_v55, %v4908_v32  ;;  %v1693_v53 = vrot.slane %v1691_v40, 5  ;;  %v3683_v23 = vrot.slane %v3667_v0, 9  ;;  %v1991_v18 = vrot.slane %v1989_v42, 4 }
  0xf2   : > { %2407 = vrot.lane.b32.xlu1 %v2379_v19, %s3994_s20  ;;  %3094 = vmatpush.bf16.msra.mxu0 %v3955_v47  ;;  %v1317_v32 = vrot.slane %v3534_v14, 5  ;;  %v991_v63 = vshrl.u32 %v3539_v36, 16  ;;  %v3594_v30 = vrot.slane %v3578_v29, 9  ;;  %v994_v10 = vshll.u32 %v3539_v36, 16 }
  0xf3   : > { %v2224_v44 = vpop.permute.xlu0 %2223  ;;  %v4930_v19 = vpop.permute.xlu2 %2311  ;;  %3959 = vmatpush.bf16.msra.mxu1 %v3955_v47  ;;  %3960 = vmatpush.bf16.msra.mxu2 %v3955_v47  ;;  %v1000_v35 = vshll.u32 %v4966_v5, 16  ;;  %v1320_v2 = vrot.slane %v4978_v13, 5  ;;  %v928_v29 = vshll.u32 %v3534_v14, 16  ;;  %vm3347_vm1 = vcmask 1040384  }
  0xf4   : > { %v4928_v27 = vsel %vm2800_vm7, %v4737_v52, %v2224_v44  ;;  %v2232_v24 = vpop.permute.xlu1 %2231  ;;  %v2754_v52 = vsel %vm2751_vm6, %v3906_v37, %v4539_v57  ;;  %v1992_v37 = vrot.slane %v4865_v11, 5  ;;  %v2635_v11 = vpack.c.b16 %v4962_v7, %v4960_v45  ;;  %3961 = vmatpush.bf16.msra.mxu3 %v3955_v47 }
  0xf5   : > { %v4941_v9 = vsel %vm2800_vm7, %v2790_v56, %v2232_v24  ;;  %v4953_v57 = vsel %vm2800_vm7, %v2754_v52, %v4746_v59  ;;  %v1689_v59 = vrot.slane %v1688_v62, 4  ;;  %v1004_v56 = vshrl.u32 %v4966_v5, 16 }
  0xf6   : > { %v1319_v34 = vrot.slane %v1317_v32, 4  ;;  %v993_v44 = vrot.slane %v991_v63, 4  ;;  %v4996_v24 = vunpack.c.l.b16 %v1684_v43  ;;  %3095 = vmatpush.bf16.msra.mxu0 %v3954_v15  ;;  %v996_v22 = vrot.slane %v994_v10, 5  ;;  %v3581_v63 = vld [vmem:[%s4034_s17 + $0x54] sm:$0xe] }
  0xf7   : > { %v1002_v55 = vrot.slane %v1000_v35, 5  ;;  %3962 = vmatpush.bf16.msra.mxu1 %v3954_v15  ;;  %v1694_v62 = vsel %vm4062_vm2, %v1689_v59, %v1693_v53  ;;  %v1990_v47 = vsel %vm4264_vm5, %v3683_v23, %v1989_v42  ;;  %v1006_v52 = vrot.slane %v1004_v56, 4  ;;  %3963 = vmatpush.bf16.msra.mxu2 %v3954_v15 }
  0xf8   : > { %v1993_v0 = vsel %vm4264_vm5, %v1991_v18, %v1992_v37  ;;  %v1321_v36 = vsel %vm4264_vm5, %v1319_v34, %v1320_v2  ;;  %v922_v7 = vshll.u32 %v3533_v49, 16  ;;  %3964 = vmatpush.bf16.msra.mxu3 %v3954_v15  ;;  %v932_v53 = vshrl.u32 %v3534_v14, 16 }
  0xf9   : > { %2401 = vrot.lane.b32.xlu0 %v2376_v1, %s3994_s20  ;;  %2583 = vrot.lane.b32.xlu2 %v3950_v28, %s3997_s23  ;;  %v1010_v1 = vshll.u32 %v4983_v4, 16  ;;  %v997_v28 = vor.u32 %v996_v22, %v993_v44  ;;  %v1007_v45 = vor.u32 %v1006_v52, %v1002_v55  ;;  %v2610_v23 = vunpack.c.l.b16 %v1694_v62  ;;  %v3928_v62 = vld [vmem:[%s4034_s17 + $0x54] sm:$0xff] }
  0xfa   : > { %2577 = vrot.lane.b32.xlu1 %v3947_v6, %s3997_s23  ;;  %v919_v6 = vshrl.u32 %v3533_v49, 16  ;;  %v924_v37 = vrot.slane %v922_v7, 5  ;;  %v2696_v15 = vunpack.c.l.b16 %v1993_v0  ;;  %v934_v35 = vrot.slane %v932_v53, 4 }
  0xfb   : > { %v2230_v51 = vpop.permute.xlu0 %2229  ;;  %v4994_v40 = vpop.permute.xlu2 %2465  ;;  %v998_v42 = vrot.slane %v997_v28, 4  ;;  %v1012_v43 = vrot.slane %v1010_v1, 5  ;;  %v1008_v18 = vrot.slane %v1007_v45, 4  ;;  %v938_v34 = vshll.u32 %v4978_v13, 16  ;;  %v3614_v28 = vld [vmem:[%s4034_s17 + $0x40] sm:$0xf] }
  0xfc   : > { %v4992_v31 = vsel %vm2800_vm7, %v2787_v20, %v2230_v51  ;;  %v2304_v58 = vpop.permute.xlu1 %2303  ;;  %v1318_v20 = vsel %vm4264_vm5, %v3594_v30, %v1317_v32  ;;  %v921_v59 = vrot.slane %v919_v6, 4  ;;  %v5010_v32 = vrot.slane %v928_v29, 5  ;;  %v3658_v6 = vld [vmem:[%s4034_s17 + $0x3c] sm:$0xe]  ;;  %v5040_v29 = vld [vmem:[%s4034_s17 + $0x64] sm:$0xf] }
  0xfd   : > { %v2695_v30 = vunpack.c.l.b16 %v1990_v47  ;;  %v2421_v10 = vunpack.c.l.b16 %v1318_v20  ;;  %v1003_v56 = vsel %vm4062_vm2, %v998_v42, %v1002_v55  ;;  %v1013_v44 = vsel %vm4062_vm2, %v1008_v18, %v1012_v43  ;;  %v3619_v55 = vld [vmem:[%s4034_s17 + $0x60] sm:$0xf]  ;;  %v3925_v47 = vld [vmem:[%s4034_s17 + $0x30] sm:$0xff]  ;;  %v5049_v43 = vld [vmem:[%s4034_s17 + $0x68] sm:$0x1] }
  0xfe   : > { %v925_v51 = vor.u32 %v924_v37, %v921_v59  ;;  %v935_v49 = vor.u32 %v934_v35, %v5010_v32  ;;  %v3597_v22 = vrot.slane %v3581_v63, 9  ;;  %v2835_v13 = vsel %vm2833_vm9, %v4953_v57, %v2304_v58  ;;  %v3613_v18 = vld [vmem:[%s4034_s17 + $0x3c] sm:$0xf]  ;;  %v5060_v37 = vld [vmem:[%s4034_s17 + $0x44] sm:$0x1] }
  0xff   : > { %v1338_v1 = vrot.slane %v4966_v5, 5  ;;  %v2715_v0 = vpack.c.b16 %v2696_v15, %v2695_v30  ;;  %v2347_v20 = vunpack.c.l.b16 %v1003_v56  ;;  %v940_v7 = vrot.slane %v938_v34, 5 }
 0x100   : > { %v926_v52 = vrot.slane %v925_v51, 4  ;;  %v936_v45 = vrot.slane %v935_v49, 4  ;;  %v1600_v57 = vshrl.u32 %v3619_v55, 16  ;;  %v2868_v58 = vsel %vm2866_vm10, %v2835_v13, %v4828_v21 }
 0x101   : > { %2487 = vrot.lane.b32.xlu0 %v2459_v46, %s3998_s24  ;;  %2737 = vrot.lane.b32.xlu2 %v4958_v39, %s3999_s25  ;;  %v2422_v46 = vunpack.c.l.b16 %v1321_v36  ;;  %v2348_v36 = vunpack.c.l.b16 %v1013_v44  ;;  %v1926_v42 = vrot.slane %v3614_v28, 5  ;;  %v1340_v53 = vrot.slane %v1338_v1, 4 }
 0x102   : > { %2663 = vrot.lane.b32.xlu1 %v2635_v11, %s3996_s22  ;;  %v931_v59 = vsel %vm4062_vm2, %v926_v52, %v5010_v32  ;;  %v3674_v21 = vrot.slane %v3658_v6, 9  ;;  %v1602_v63 = vrot.slane %v1600_v57, 4  ;;  %v1603_v30 = vshll.u32 %v3619_v55, 16 }
 0x103   : > { %v2236_v14 = vpop.permute.xlu0 %2235  ;;  %v5023_v11 = vpop.permute.xlu2 %2567  ;;  %v2450_v5 = vpack.c.b16 %v2422_v46, %v2421_v10  ;;  %v1609_v15 = vshll.u32 %v5040_v29, 16  ;;  %v1613_v10 = vshrl.u32 %v5040_v29, 16  ;;  %v941_v32 = vsel %vm4062_vm2, %v936_v45, %v940_v7 }
 0x104   : > { %v5021_v39 = vsel %vm2800_vm7, %v4949_v17, %v2236_v14  ;;  %v5025_v2 = vpop.permute.xlu1 %2559  ;;  %v2632_v17 = vpack.c.b16 %v2610_v23, %v4996_v24  ;;  %v5046_v24 = vsel %vm4264_vm5, %v3597_v22, %v1338_v1  ;;  %v1341_v23 = vrot.slane %v4983_v4, 5 }
 0x105   : > { %v2373_v14 = vpack.c.b16 %v2348_v36, %v2347_v20  ;;  %v1929_v4 = vrot.slane %v5060_v37, 5  ;;  %v1619_v46 = vshll.u32 %v5049_v43, 16  ;;  %v1928_v34 = vrot.slane %v1926_v42, 4 }
 0x106   : > { %v1605_v44 = vrot.slane %v1603_v30, 5  ;;  %v1611_v49 = vrot.slane %v1609_v15, 5  ;;  %v1528_v22 = vshrl.u32 %v3613_v18, 16  ;;  %v2341_v13 = vunpack.c.l.b16 %v931_v59 }
 0x107   : > { %v1927_v52 = vsel %vm4264_vm5, %v3674_v21, %v1926_v42  ;;  %v1621_v20 = vrot.slane %v1619_v46, 5  ;;  %v1531_v36 = vshll.u32 %v3613_v18, 16  ;;  %v1537_v45 = vshll.u32 %v3614_v28, 16 }
 0x108   : > { %v1606_v1 = vor.u32 %v1605_v44, %v1602_v63  ;;  %v1541_v7 = vshrl.u32 %v3614_v28, 16  ;;  %v1530_v30 = vrot.slane %v1528_v22, 4  ;;  %v2677_v18 = vunpack.c.l.b16 %v1927_v52 }
 0x109   : > { %2657 = vrot.lane.b32.xlu0 %v2632_v17, %s3996_s22  ;;  %2315 = vrot.lane.b32.xlu2 %v3928_v62, %s3995_s21  ;;  %v1342_v17 = vsel %vm4264_vm5, %v1340_v53, %v1341_v23  ;;  %v1615_v62 = vrot.slane %v1613_v10, 4  ;;  %v1533_v23 = vrot.slane %v1531_v36, 5  ;;  %v5082_v42 = vrot.slane %v1537_v45, 5  ;;  %v5109_v45 = vld [vmem:[%s4034_s17 + $0xac] sm:$0xf] }
 0x10a   : > { %2309 = vrot.lane.b32.xlu1 %v3925_v47, %s3995_s21  ;;  %v2342_v47 = vunpack.c.l.b16 %v941_v32  ;;  %v1607_v59 = vrot.slane %v1606_v1, 4  ;;  %v1543_v21 = vrot.slane %v1541_v7, 4  ;;  %v2428_v28 = vunpack.c.l.b16 %v1342_v17  ;;  %v3548_v1 = vld [vmem:[%s4034_s17 + $0x88] sm:$0xf] }
 0x10b   : > { %v2464_v35 = vpop.permute.xlu0 %2463  ;;  %v5068_v56 = vpop.permute.xlu2 %2721  ;;  %v1616_v6 = vor.u32 %v1615_v62, %v1611_v49  ;;  %v1947_v46 = vrot.slane %v5040_v29, 5 }
 0x10c   : > { %v5070_v51 = vpop.permute.xlu1 %2305  ;;  %v2901_v55 = vsel %vm2899_vm11, %v2868_v58, %v2464_v35  ;;  %v1930_v58 = vsel %vm4264_vm5, %v1928_v34, %v1929_v4  ;;  %v1612_v10 = vsel %vm4062_vm2, %v1607_v59, %v1611_v49  ;;  %v3661_v35 = vld [vmem:[%s4034_s17 + $0x60] sm:$0xe]  ;;  %v1534_v4 = vor.u32 %v1533_v23, %v1530_v30  ;;  %v3553_v34 = vld [vmem:[%s4034_s17 + $0xa8] sm:$0xf] }
 0x10d   : > { %v2934_v57 = vsel %vm2932_vm12, %v2901_v55, %v5025_v2  ;;  %v1617_v53 = vrot.slane %v1616_v6, 4  ;;  %v2427_v2 = vunpack.c.l.b16 %v5046_v24  ;;  %v2678_v15 = vunpack.c.l.b16 %v1930_v58  ;;  %v3944_v49 = vld [vmem:[%s4034_s17 + $0x60] sm:$0xff] }
 0x10e   : > { %v2370_v44 = vpack.c.b16 %v2342_v47, %v2341_v13  ;;  %v1544_v22 = vor.u32 %v1543_v21, %v5082_v42  ;;  %v3941_v55 = vld [vmem:[%s4034_s17 + $0x3c] sm:$0xff]  ;;  %v2603_v17 = vunpack.c.l.b16 %v1612_v10  ;;  %v3677_v52 = vrot.slane %v3661_v35, 9  ;;  %v3547_v58 = vld [vmem:[%s4034_s17 + $0x84] sm:$0xf]  ;;  %v5125_v10 = vld [vmem:[%s4034_s17 + $0xb0] sm:$0x1] }
 0x10f   : > { %v2453_v6 = vpack.c.b16 %v2428_v28, %v2427_v2  ;;  %v2706_v36 = vpack.c.b16 %v2678_v15, %v2677_v18  ;;  %v1159_v29 = vshrl.u32 %v3553_v34, 16  ;;  %v1535_v7 = vrot.slane %v1534_v4, 4  ;;  %v5119_v28 = vld [vmem:[%s4034_s17 + $0x8c] sm:$0x1] }
 0x110   : > { %v1949_v13 = vrot.slane %v1947_v46, 4  ;;  %v1950_v47 = vrot.slane %v5049_v43, 5  ;;  %v1545_v59 = vrot.slane %v1544_v22, 4  ;;  %v1162_v23 = vshll.u32 %v3553_v34, 16 }
 0x111   : > { %2743 = vrot.lane.b32.xlu0 %v2715_v0, %s3999_s25  ;;  %2469 = vrot.lane.b32.xlu2 %v2450_v5, %s3998_s24  ;;  %v2967_v0 = vsel %vm2965_vm13, %v2934_v57, %v4890_v41  ;;  %v1622_v5 = vsel %vm4062_vm2, %v1617_v53, %v1621_v20  ;;  %v1547_v41 = vshll.u32 %v5060_v37, 16  ;;  %v3585_v20 = vld [vmem:[%s4034_s17 + $0x84] sm:$0xe]  ;;  %v1366_v37 = vrot.slane %v3548_v1, 5 }
 0x112   : > { %2395 = vrot.lane.b32.xlu1 %v2373_v14, %s3994_s20  ;;  %v2604_v62 = vunpack.c.l.b16 %v1622_v5  ;;  %v3601_v30 = vrot.slane %v3585_v20, 9  ;;  %v1161_v53 = vrot.slane %v1159_v29, 4  ;;  %v1948_v2 = vsel %vm4264_vm5, %v3677_v52, %v1947_v46 }
 0x113   : > { %v2720_v63 = vpop.permute.xlu0 %2719  ;;  %v5095_v24 = vpop.permute.xlu2 %2399  ;;  %v1549_v57 = vrot.slane %v1547_v41, 5  ;;  %v1168_v43 = vshll.u32 %v5109_v45, 16  ;;  %v1172_v18 = vshrl.u32 %v5109_v45, 16  ;;  %v1369_v15 = vrot.slane %v5119_v28, 5 }
 0x114   : > { %v3000_v14 = vsel %vm2998_vm14, %v2967_v0, %v2720_v63  ;;  %v5097_v32 = vpop.permute.xlu1 %2391  ;;  %v2629_v21 = vpack.c.b16 %v2604_v62, %v2603_v17  ;;  %v1368_v0 = vrot.slane %v1366_v37, 4  ;;  %v1164_v5 = vrot.slane %v1162_v23, 5 }
 0x115   : > { %3887 = vmatmul.msk.bf16.vlgmr.msra.gmra.mxu0 %vm3051_vm15, %v3000_v14  ;;  %v1087_v35 = vshrl.u32 %v3547_v58, 16  ;;  %v1951_v41 = vsel %vm4264_vm5, %v1949_v13, %v1950_v47  ;;  %v1170_v46 = vrot.slane %v1168_v43, 5  ;;  %v1174_v34 = vrot.slane %v1172_v18, 4  ;;  %v3588_v18 = vld [vmem:[%s4034_s17 + $0xa8] sm:$0xe] }
 0x116   : > { %v1550_v22 = vsel %vm4062_vm2, %v1545_v59, %v1549_v57  ;;  %v1165_v17 = vor.u32 %v1164_v5, %v1161_v53  ;;  %v1178_v52 = vshll.u32 %v5125_v10, 16  ;;  %v2837_v13 = vsel %vm2833_vm9, %v4617_v12, %v5070_v51 }
 0x117   : > { %v1175_v62 = vor.u32 %v1174_v34, %v1170_v46  ;;  %v1089_v20 = vrot.slane %v1087_v35, 4  ;;  %v1100_v47 = vshrl.u32 %v3548_v1, 16  ;;  %v2684_v59 = vunpack.c.l.b16 %v1951_v41 }
 0x118   : > { %v2843_v5 = vsel %vm2833_vm9, %v4650_v25, %v4930_v19  ;;  %v3604_v34 = vrot.slane %v3588_v18, 9  ;;  %v3935_v19 = vld [vmem:[%s4034_s17 + $0xa8] sm:$0xff] }
 0x119   : > { %2389 = vrot.lane.b32.xlu0 %v2370_v44, %s3994_s20  ;;  %2571 = vrot.lane.b32.xlu2 %v3944_v49, %s3997_s23  ;;  %v1090_v44 = vshll.u32 %v3547_v58, 16  ;;  %v1540_v49 = vsel %vm4062_vm2, %v1535_v7, %v5082_v42  ;;  %v1370_v42 = vsel %vm4264_vm5, %v1368_v0, %v1369_v15  ;;  %v1096_v7 = vshll.u32 %v3548_v1, 16 }
 0x11a   : > { %2565 = vrot.lane.b32.xlu1 %v3941_v55, %s3997_s23  ;;  %v1367_v55 = vsel %vm4264_vm5, %v3601_v30, %v1366_v37  ;;  %v2597_v57 = vunpack.c.l.b16 %v1540_v49  ;;  %v2683_v58 = vunpack.c.l.b16 %v1948_v2  ;;  %v1166_v37 = vrot.slane %v1165_v17, 4 }
 0x11b   : > { %v2386_v63 = vpop.permute.xlu0 %2385  ;;  %v5127_v14 = vpop.permute.xlu2 %2655  ;;  %v1092_v29 = vrot.slane %v1090_v44, 5  ;;  %v2598_v30 = vunpack.c.l.b16 %v1550_v22  ;;  %v2435_v53 = vunpack.c.l.b16 %v1367_v55  ;;  %v5145_v23 = vrot.slane %v1096_v7, 5  ;;  %v3633_v44 = vld [vmem:[%s4034_s17 + $0xb4] sm:$0xf]  ;;  %v3932_v55 = vld [vmem:[%s4034_s17 + $0x84] sm:$0xff] }
 0x11c   : > { %v2562_v4 = vpop.permute.xlu1 %2561  ;;  %v1102_v43 = vrot.slane %v1100_v47, 4  ;;  %v2436_v12 = vunpack.c.l.b16 %v1370_v42  ;;  %v1176_v51 = vrot.slane %v1175_v62, 4  ;;  %v1180_v1 = vrot.slane %v1178_v52, 5  ;;  %v5171_v52 = vld [vmem:[%s4034_s17 + $0xb8] sm:$0xf] }
 0x11d   : > { %v1093_v0 = vor.u32 %v1092_v29, %v1089_v20  ;;  %v2870_v2 = vsel %vm2866_vm10, %v2837_v13, %v2386_v63  ;;  %v1106_v15 = vshll.u32 %v5119_v28, 16  ;;  %v2876_v63 = vsel %vm2866_vm10, %v2843_v5, %v5097_v32  ;;  %v5180_v7 = vld [vmem:[%s4034_s17 + $0x94] sm:$0xf]  ;;  %v3665_v47 = vld [vmem:[%s4034_s17 + $0x90] sm:$0xe] }
 0x11e   : > { %v1103_v41 = vor.u32 %v1102_v43, %v5145_v23  ;;  %v2626_v49 = vpack.c.b16 %v2598_v30, %v2597_v57  ;;  %v2709_v28 = vpack.c.b16 %v2684_v59, %v2683_v58  ;;  %v1387_v22 = vrot.slane %v5109_v45, 5 }
 0x11f   : > { %v2903_v25 = vsel %vm2899_vm11, %v2870_v2, %v4994_v40  ;;  %v2457_v17 = vpack.c.b16 %v2436_v12, %v2435_v53  ;;  %v1094_v62 = vrot.slane %v1093_v0, 4  ;;  %v1108_v29 = vrot.slane %v1106_v15, 5 }
 0x120   : > { %v2936_v32 = vsel %vm2932_vm12, %v2903_v25, %v2562_v4  ;;  %v1768_v13 = vshrl.u32 %v3633_v44, 16  ;;  %v1104_v42 = vrot.slane %v1103_v41, 4  ;;  %v5177_v40 = vsel %vm4264_vm5, %v3604_v34, %v1387_v22  ;;  %v5185_v4 = vld [vmem:[%s4034_s17 + $0xbc] sm:$0x1] }
 0x121   : > { %2475 = vrot.lane.b32.xlu0 %v2453_v6, %s3998_s24  ;;  %2725 = vrot.lane.b32.xlu2 %v2706_v36, %s3999_s25  ;;  %v1771_v57 = vshll.u32 %v3633_v44, 16  ;;  %v1389_v59 = vrot.slane %v1387_v22, 4  ;;  %v1777_v30 = vshll.u32 %v5171_v52, 16  ;;  %v1099_v53 = vsel %vm4062_vm2, %v1094_v62, %v5145_v23  ;;  %v3541_v22 = vld [vmem:[%s4034_s17 + $0x60] sm:$0xf] }
 0x122   : > { %2651 = vrot.lane.b32.xlu1 %v2629_v21, %s3996_s22  ;;  %v1171_v21 = vsel %vm4062_vm2, %v1166_v37, %v1170_v46  ;;  %v1181_v46 = vsel %vm4062_vm2, %v1176_v51, %v1180_v1  ;;  %v1770_v37 = vrot.slane %v1768_v13, 4  ;;  %v1390_v43 = vrot.slane %v5125_v10, 5  ;;  %v3627_v51 = vld [vmem:[%s4034_s17 + $0x90] sm:$0xf] }
 0x123   : > { %v2472_v6 = vpop.permute.xlu0 %2471  ;;  %v5155_v35 = vpop.permute.xlu2 %2313  ;;  %v2361_v20 = vunpack.c.l.b16 %v1171_v21  ;;  %v2362_v58 = vunpack.c.l.b16 %v1181_v46  ;;  %v1773_v18 = vrot.slane %v1771_v57, 5  ;;  %v1781_v12 = vshrl.u32 %v5171_v52, 16  ;;  %v3649_v46 = vld [vmem:[%s4034_s17 + $0x98] sm:$0x1] }
 0x124   : > { %v2648_v36 = vpop.permute.xlu1 %2647  ;;  %v2909_v45 = vsel %vm2899_vm11, %v2876_v63, %v2472_v6  ;;  %v3681_v2 = vrot.slane %v3665_v47, 9  ;;  %v1975_v6 = vrot.slane %v5180_v7, 5  ;;  %v5199_v15 = vrot.slane %v1777_v30, 5  ;;  %v5219_v47 = vld [vmem:[%s4034_s17 + $0x64] sm:$0xf] }
 0x125   : > { %v2942_v1 = vsel %vm2932_vm12, %v2909_v45, %v5023_v11  ;;  %v1109_v21 = vsel %vm4062_vm2, %v1104_v42, %v1108_v29  ;;  %v1783_v41 = vrot.slane %v1781_v12, 4  ;;  %v1787_v34 = vshll.u32 %v5185_v4, 16 }
 0x126   : > { %v1774_v44 = vor.u32 %v1773_v18, %v1770_v37  ;;  %v1696_v63 = vshrl.u32 %v3627_v51, 16  ;;  %v2975_v25 = vsel %vm2965_vm13, %v2942_v1, %v2648_v36  ;;  %v1978_v29 = vrot.slane %v3649_v46, 5 }
 0x127   : > { %v1784_v62 = vor.u32 %v1783_v41, %v5199_v15  ;;  %v1705_v13 = vshll.u32 %v5180_v7, 16  ;;  %v1977_v45 = vrot.slane %v1975_v6, 4  ;;  %v1789_v42 = vrot.slane %v1787_v34, 5 }
 0x128   : > { %v1015_v57 = vshrl.u32 %v3541_v22, 16  ;;  %v1018_v37 = vshll.u32 %v3541_v22, 16  ;;  %v1775_v36 = vrot.slane %v1774_v44, 4  ;;  %v1715_v44 = vshll.u32 %v3649_v46, 16  ;;  %v3951_v22 = vld [vmem:[%s4034_s17 + $0xb4] sm:$0xff] }
 0x129   : > { %2645 = vrot.lane.b32.xlu0 %v2626_v49, %s3996_s22  ;;  %2329 = vrot.lane.b32.xlu2 %v3935_v19, %s3995_s21  ;;  %v1699_v49 = vshll.u32 %v3627_v51, 16  ;;  %v2380_v19 = vpack.c.b16 %v2362_v58, %v2361_v20  ;;  %v1785_v20 = vrot.slane %v1784_v62, 4  ;;  %v1698_v58 = vrot.slane %v1696_v63, 4 }
 0x12a   : > { %2323 = vrot.lane.b32.xlu1 %v3932_v55, %s3995_s21  ;;  %v2355_v55 = vunpack.c.l.b16 %v1099_v53  ;;  %v5224_v53 = vrot.slane %v1705_v13, 5  ;;  %v1017_v18 = vrot.slane %v1015_v57, 4  ;;  %v1020_v12 = vrot.slane %v1018_v37, 5  ;;  %v5256_v57 = vld [vmem:[%s4034_s17 + $0x70] sm:$0xf] }
 0x12b   : > { %v2642_v0 = vpop.permute.xlu0 %2641  ;;  %v5202_v23 = vpop.permute.xlu2 %2467  ;;  %v1701_v30 = vrot.slane %v1699_v49, 5  ;;  %v3621_v49 = vld [vmem:[%s4034_s17 + $0x6c] sm:$0xf] }
 0x12c   : > { %v2969_v5 = vsel %vm2965_vm13, %v2936_v32, %v2642_v0  ;;  %v5204_v10 = vpop.permute.xlu1 %2319  ;;  %v2356_v32 = vunpack.c.l.b16 %v1109_v21  ;;  %v1391_v0 = vsel %vm4264_vm5, %v1389_v59, %v1390_v43  ;;  %v1028_v59 = vshrl.u32 %v5219_v47, 16 }
 0x12d   : > { %v3002_v11 = vsel %vm2998_vm14, %v2969_v5, %v5068_v56  ;;  %v1709_v56 = vshrl.u32 %v5180_v7, 16  ;;  %v5231_v5 = vld [vmem:[%s4034_s17 + $0x68] sm:$0x1]  ;;  %v1780_v43 = vsel %vm4062_vm2, %v1775_v36, %v5199_v15  ;;  %v1624_v37 = vshrl.u32 %v3621_v49, 16 }
 0x12e   : > { %3888 = vmatmul.msk.bf16.gmra.mxu0 %vm3051_vm15, %v3002_v11  ;;  %v2377_v1 = vpack.c.b16 %v2356_v32, %v2355_v55  ;;  %v1979_v11 = vsel %vm4264_vm5, %v1977_v45, %v1978_v29  ;;  %v1021_v55 = vor.u32 %v1020_v12, %v1017_v18  ;;  %v1030_v46 = vrot.slane %v1028_v59, 4 }
 0x12f   : > { %v1711_v7 = vrot.slane %v1709_v56, 4  ;;  %v1034_v62 = vshll.u32 %v5231_v5, 16  ;;  %v2441_v32 = vunpack.c.l.b16 %v5177_v40  ;;  %v2442_v29 = vunpack.c.l.b16 %v1391_v0 }
 0x130   : > { %v2692_v15 = vunpack.c.l.b16 %v1979_v11  ;;  %v2851_v56 = vsel %vm2833_vm9, %v4928_v27, %v5204_v10  ;;  %v2617_v45 = vunpack.c.l.b16 %v1780_v43  ;;  %v1626_v12 = vrot.slane %v1624_v37, 4 }
 0x131   : > { %2731 = vrot.lane.b32.xlu0 %v2709_v28, %s3999_s25  ;;  %2483 = vrot.lane.b32.xlu2 %v2457_v17, %s3998_s24  ;;  %v1976_v28 = vsel %vm4264_vm5, %v3681_v2, %v1975_v6  ;;  %v1024_v17 = vshll.u32 %v5219_v47, 16  ;;  %v1790_v2 = vsel %vm4062_vm2, %v1785_v20, %v1789_v42  ;;  %v1702_v6 = vor.u32 %v1701_v30, %v1698_v58 }
 0x132   : > { %2409 = vrot.lane.b32.xlu1 %v2380_v19, %s3994_s20  ;;  %v1712_v19 = vor.u32 %v1711_v7, %v5224_v53  ;;  %v2691_v13 = vunpack.c.l.b16 %v1976_v28  ;;  %v2618_v36 = vunpack.c.l.b16 %v1790_v2  ;;  %v1717_v58 = vrot.slane %v1715_v44, 5  ;;  %v5270_v44 = vld [vmem:[%s4034_s17 + $0x74] sm:$0x1] }
 0x133   : > { %v2728_v51 = vpop.permute.xlu0 %2727  ;;  %v5235_v41 = vpop.permute.xlu2 %2569  ;;  %v1026_v63 = vrot.slane %v1024_v17, 5  ;;  %v1703_v20 = vrot.slane %v1702_v6, 4  ;;  %v1627_v30 = vshll.u32 %v3621_v49, 16  ;;  %v1022_v7 = vrot.slane %v1021_v55, 4 }
 0x134   : > { %v3008_v21 = vsel %vm2998_vm14, %v2975_v25, %v2728_v51  ;;  %v2576_v34 = vpop.permute.xlu1 %2575  ;;  %v3948_v25 = vld [vmem:[%s4034_s17 + $0x90] sm:$0xff]  ;;  %v1713_v40 = vrot.slane %v1712_v19, 4  ;;  %v1036_v27 = vrot.slane %v1034_v62, 5  ;;  %v1633_v0 = vshll.u32 %v5256_v57, 16 }
 0x135   : > { %3891 = vmatmul.msk.bf16.vlgmr.msra.gmra.mxu1 %vm3051_vm15, %v3008_v21  ;;  %v1031_v42 = vor.u32 %v1030_v46, %v1026_v63  ;;  %v1629_v51 = vrot.slane %v1627_v30, 5  ;;  %v2884_v28 = vsel %vm2866_vm10, %v2851_v56, %v5095_v24  ;;  %v2460_v17 = vpack.c.b16 %v2442_v29, %v2441_v32  ;;  %v3555_v30 = vld [vmem:[%s4034_s17 + $0xb4] sm:$0xf] }
 0x136   : > { %v2713_v43 = vpack.c.b16 %v2692_v15, %v2691_v13  ;;  %v1708_v2 = vsel %vm4062_vm2, %v1703_v20, %v5224_v53  ;;  %v1996_v6 = vrot.slane %v5171_v52, 5  ;;  %v2636_v49 = vpack.c.b16 %v2618_v36, %v2617_v45 }
 0x137   : > { %v1032_v18 = vrot.slane %v1031_v42, 4  ;;  %v1718_v24 = vsel %vm4062_vm2, %v1713_v40, %v1717_v58  ;;  %v1027_v55 = vsel %vm4062_vm2, %v1022_v7, %v1026_v63  ;;  %v1630_v62 = vor.u32 %v1629_v51, %v1626_v12  ;;  %v3582_v12 = vld [vmem:[%s4034_s17 + $0x60] sm:$0xe] }
 0x138   : > { %v1643_v32 = vshll.u32 %v5270_v44, 16  ;;  %v2611_v29 = vunpack.c.l.b16 %v1708_v2  ;;  %v2612_v13 = vunpack.c.l.b16 %v1718_v24  ;;  %v1998_v56 = vrot.slane %v1996_v6, 4 }
 0x139   : > { %2403 = vrot.lane.b32.xlu0 %v2377_v1, %s3994_s20  ;;  %2585 = vrot.lane.b32.xlu2 %v3951_v22, %s3997_s23  ;;  %v1637_v1 = vshrl.u32 %v5256_v57, 16  ;;  %v3668_v22 = vld [vmem:[%s4034_s17 + $0xb4] sm:$0xe]  ;;  %v1037_v46 = vsel %vm4062_vm2, %v1032_v18, %v1036_v27  ;;  %v1999_v45 = vrot.slane %v5185_v4, 5  ;;  %v2349_v63 = vunpack.c.l.b16 %v1027_v55  ;;  %v5299_v18 = vld [vmem:[%s4034_s17 + $0xb8] sm:$0xf] }
 0x13a   : > { %2579 = vrot.lane.b32.xlu1 %v3948_v25, %s3997_s23  ;;  %v1635_v25 = vrot.slane %v1633_v0, 5  ;;  %v3684_v15 = vrot.slane %v3668_v22, 9  ;;  %v2350_v42 = vunpack.c.l.b16 %v1037_v46  ;;  %v1631_v36 = vrot.slane %v1630_v62, 4  ;;  %v3662_v55 = vld [vmem:[%s4034_s17 + $0x6c] sm:$0xe] }
 0x13b   : > { %v2480_v10 = vpop.permute.xlu0 %2479  ;;  %v5265_v21 = vpop.permute.xlu2 %2723  ;;  %v1639_v19 = vrot.slane %v1637_v1, 4  ;;  %v1645_v58 = vrot.slane %v1643_v32, 5  ;;  %v2633_v27 = vpack.c.b16 %v2612_v13, %v2611_v29  ;;  %v1345_v51 = vrot.slane %v5219_v47, 5  ;;  %v3929_v1 = vld [vmem:[%s4034_s17 + $0x60] sm:$0xff]  ;;  %v3549_v29 = vld [vmem:[%s4034_s17 + $0x90] sm:$0xf] }
 0x13c   : > { %v5267_v11 = vpop.permute.xlu1 %2307  ;;  %v2917_v59 = vsel %vm2899_vm11, %v2884_v28, %v2480_v10  ;;  %v1997_v10 = vsel %vm4264_vm5, %v3684_v15, %v1996_v6  ;;  %v2374_v0 = vpack.c.b16 %v2350_v42, %v2349_v63  ;;  %v1183_v28 = vshrl.u32 %v3555_v30, 16 }
 0x13d   : > { %v2950_v53 = vsel %vm2932_vm12, %v2917_v59, %v2576_v34  ;;  %v1640_v52 = vor.u32 %v1639_v19, %v1635_v25  ;;  %v1636_v59 = vsel %vm4062_vm2, %v1631_v36, %v1635_v25  ;;  %v1192_v2 = vshll.u32 %v5299_v18, 16 }
 0x13e   : > { %v2983_v34 = vsel %vm2965_vm13, %v2950_v53, %v5127_v14  ;;  %v2000_v14 = vsel %vm4264_vm5, %v1998_v56, %v1999_v45  ;;  %v1196_v6 = vshrl.u32 %v5299_v18, 16  ;;  %v3598_v22 = vrot.slane %v3582_v12, 9  ;;  %v5325_v56 = vld [vmem:[%s4034_s17 + $0x94] sm:$0xf] }
 0x13f   : > { %v1641_v20 = vrot.slane %v1640_v52, 4  ;;  %v2698_v24 = vunpack.c.l.b16 %v2000_v14  ;;  %v1347_v47 = vrot.slane %v1345_v51, 4  ;;  %v1348_v19 = vrot.slane %v5231_v5, 5 }
 0x140   : > { %v1954_v25 = vrot.slane %v5256_v57, 5  ;;  %v2605_v46 = vunpack.c.l.b16 %v1636_v59  ;;  %v1185_v32 = vrot.slane %v1183_v28, 4  ;;  %v5322_v13 = vrot.slane %v1192_v2, 5  ;;  %v5348_v59 = vld [vmem:[%s4034_s17 + $0x98] sm:$0x1] }
 0x141   : > { %2489 = vrot.lane.b32.xlu0 %v2460_v17, %s3998_s24  ;;  %2739 = vrot.lane.b32.xlu2 %v2713_v43, %s3999_s25  ;;  %v1186_v17 = vshll.u32 %v3555_v30, 16  ;;  %v1646_v43 = vsel %vm4062_vm2, %v1641_v20, %v1645_v58  ;;  %v1198_v15 = vrot.slane %v1196_v6, 4  ;;  %v1346_v63 = vsel %vm4264_vm5, %v3598_v22, %v1345_v51 }
 0x142   : > { %2665 = vrot.lane.b32.xlu1 %v2636_v49, %s3996_s22  ;;  %v2697_v49 = vunpack.c.l.b16 %v1997_v10  ;;  %v2606_v62 = vunpack.c.l.b16 %v1646_v43  ;;  %v3678_v42 = vrot.slane %v3662_v55, 9  ;;  %v1349_v36 = vsel %vm4264_vm5, %v1347_v47, %v1348_v19  ;;  %v3635_v55 = vld [vmem:[%s4034_s17 + $0xc0] sm:$0xf] }
 0x143   : > { %v2736_v37 = vpop.permute.xlu0 %2735  ;;  %v5294_v7 = vpop.permute.xlu2 %2327  ;;  %v1188_v53 = vrot.slane %v1186_v17, 5  ;;  %v1956_v20 = vrot.slane %v1954_v25, 4  ;;  %v1111_v58 = vshrl.u32 %v3549_v29, 16  ;;  %v1114_v30 = vshll.u32 %v3549_v29, 16  ;;  %v5362_v29 = vld [vmem:[%s4034_s17 + $0xc4] sm:$0xf] }
 0x144   : > { %v3016_v40 = vsel %vm2998_vm14, %v2983_v34, %v2736_v37  ;;  %v5296_v4 = vpop.permute.xlu1 %2393  ;;  %v2716_v5 = vpack.c.b16 %v2698_v24, %v2697_v49  ;;  %v1957_v37 = vrot.slane %v5270_v44, 5  ;;  %v5333_v34 = vld [vmem:[%s4034_s17 + $0xbc] sm:$0x1]  ;;  %v1120_v14 = vshll.u32 %v5325_v56, 16 }
 0x145   : > { %3895 = vmatmul.msk.bf16.vlgmr.msra.gmra.mxu2 %vm3051_vm15, %v3016_v40  ;;  %v2630_v40 = vpack.c.b16 %v2606_v62, %v2605_v46  ;;  %v1189_v10 = vor.u32 %v1188_v53, %v1185_v32  ;;  %v1124_v12 = vshrl.u32 %v5325_v56, 16  ;;  %v1199_v51 = vor.u32 %v1198_v15, %v5322_v13 }
 0x146   : > { %v1202_v44 = vshll.u32 %v5333_v34, 16  ;;  %v2430_v28 = vunpack.c.l.b16 %v1349_v36  ;;  %v1958_v17 = vsel %vm4264_vm5, %v1956_v20, %v1957_v37  ;;  %v1113_v43 = vrot.slane %v1111_v58, 4  ;;  %v3936_v37 = vld [vmem:[%s4034_s17 + $0xb4] sm:$0xff] }
 0x147   : > { %v1116_v2 = vrot.slane %v1114_v30, 5  ;;  %v1190_v6 = vrot.slane %v1189_v10, 4  ;;  %v5352_v49 = vrot.slane %v1120_v14, 5  ;;  %v1126_v24 = vrot.slane %v1124_v12, 4  ;;  %v3933_v36 = vld [vmem:[%s4034_s17 + $0x90] sm:$0xff] }
 0x148   : > { %v1200_v47 = vrot.slane %v1199_v51, 4  ;;  %v1204_v19 = vrot.slane %v1202_v44, 5  ;;  %v2686_v32 = vunpack.c.l.b16 %v1958_v17  ;;  %v1130_v53 = vshll.u32 %v5348_v59, 16  ;;  %v3629_v51 = vld [vmem:[%s4034_s17 + $0x9c] sm:$0xf] }
 0x149   : > { %2659 = vrot.lane.b32.xlu0 %v2633_v27, %s3996_s22  ;;  %2397 = vrot.lane.b32.xlu2 %v2374_v0, %s3994_s20  ;;  %v3945_v27 = vld [vmem:[%s4034_s17 + $0x6c] sm:$0xff]  ;;  %v2429_v0 = vunpack.c.l.b16 %v1346_v63  ;;  %v1117_v63 = vor.u32 %v1116_v2, %v1113_v43  ;;  %v1792_v20 = vshrl.u32 %v3635_v55, 16  ;;  %v1795_v58 = vshll.u32 %v3635_v55, 16 }
 0x14a   : > { %2317 = vrot.lane.b32.xlu1 %v3929_v1, %s3995_s21  ;;  %v1955_v1 = vsel %vm4264_vm5, %v3678_v42, %v1954_v25  ;;  %v2839_v25 = vsel %vm2833_vm9, %v4826_v16, %v5267_v11  ;;  %v1195_v16 = vsel %vm4062_vm2, %v1190_v6, %v5322_v13  ;;  %v1127_v11 = vor.u32 %v1126_v24, %v5352_v49  ;;  %v5395_v6 = vld [vmem:[%s4034_s17 + $0xc8] sm:$0x1] }
 0x14b   : > { %v2388_v52 = vpop.permute.xlu0 %2387  ;;  %v5327_v45 = vpop.permute.xlu2 %2481  ;;  %v2685_v62 = vunpack.c.l.b16 %v1955_v1  ;;  %v1205_v30 = vsel %vm4062_vm2, %v1200_v47, %v1204_v19  ;;  %v1132_v12 = vrot.slane %v1130_v53, 5  ;;  %v1394_v1 = vrot.slane %v5299_v18, 5 }
 0x14c   : > { %v2564_v57 = vpop.permute.xlu1 %2563  ;;  %v2872_v15 = vsel %vm2866_vm10, %v2839_v25, %v2388_v52  ;;  %v2845_v52 = vsel %vm2833_vm9, %v4888_v38, %v5155_v35  ;;  %v2363_v38 = vunpack.c.l.b16 %v1195_v16  ;;  %v1118_v35 = vrot.slane %v1117_v63, 4 }
 0x14d   : > { %v2878_v13 = vsel %vm2866_vm10, %v2845_v52, %v5296_v4  ;;  %v2905_v10 = vsel %vm2899_vm11, %v2872_v15, %v5202_v23  ;;  %v2710_v14 = vpack.c.b16 %v2686_v32, %v2685_v62  ;;  %v2364_v23 = vunpack.c.l.b16 %v1205_v30 }
 0x14e   : > { %v2938_v44 = vsel %vm2932_vm12, %v2905_v10, %v2564_v57  ;;  %v1128_v4 = vrot.slane %v1127_v11, 4  ;;  %v1794_v17 = vrot.slane %v1792_v20, 4  ;;  %v1797_v43 = vrot.slane %v1795_v58, 5  ;;  %v3586_v20 = vld [vmem:[%s4034_s17 + $0x90] sm:$0xe] }
 0x14f   : > { %v1720_v47 = vshrl.u32 %v3629_v51, 16  ;;  %v1723_v19 = vshll.u32 %v3629_v51, 16  ;;  %v1123_v15 = vsel %vm4062_vm2, %v1118_v35, %v5352_v49  ;;  %v1397_v63 = vrot.slane %v5333_v34, 5 }
 0x150   : > { %v1133_v16 = vsel %vm4062_vm2, %v1128_v4, %v1132_v12  ;;  %v1811_v11 = vshll.u32 %v5395_v6, 16 }
 0x151   : > { %2745 = vrot.lane.b32.xlu0 %v2716_v5, %s3999_s25  ;;  %2653 = vrot.lane.b32.xlu2 %v2630_v40, %s3996_s22  ;;  %v2454_v5 = vpack.c.b16 %v2430_v28, %v2429_v0  ;;  %v1801_v40 = vshll.u32 %v5362_v29, 16  ;;  %v3589_v0 = vld [vmem:[%s4034_s17 + $0xb4] sm:$0xe]  ;;  %v5390_v28 = vld [vmem:[%s4034_s17 + $0xa0] sm:$0xf]  ;;  %v1722_v52 = vrot.slane %v1720_v47, 4  ;;  %v2358_v12 = vunpack.c.l.b16 %v1133_v16 }
 0x152   : > { %2573 = vrot.lane.b32.xlu1 %v3945_v27, %s3997_s23  ;;  %v1805_v27 = vshrl.u32 %v5362_v29, 16  ;;  %v3605_v25 = vrot.slane %v3589_v0, 9  ;;  %v1729_v62 = vshll.u32 %v5390_v28, 16  ;;  %v1733_v32 = vshrl.u32 %v5390_v28, 16  ;;  %v633_v47 = vld [vmem:[%s4034_s17 + $0xb4] sm:$0xe] }
 0x153   : > { %v2474_v22 = vpop.permute.xlu0 %2473  ;;  %v5365_v42 = vpop.permute.xlu2 %2583  ;;  %v5397_v57 = vrot.slane %v1801_v40, 5  ;;  %v1725_v49 = vrot.slane %v1723_v19, 5  ;;  %v2357_v40 = vunpack.c.l.b16 %v1123_v15  ;;  %v1813_v35 = vrot.slane %v1811_v11, 5 }
 0x154   : > { %v5358_v46 = vpop.permute.xlu1 %2649  ;;  %v1807_v24 = vrot.slane %v1805_v27, 4  ;;  %v1395_v34 = vsel %vm4264_vm5, %v3605_v25, %v1394_v1  ;;  %v5424_v27 = vrot.slane %v1729_v62, 5  ;;  %v1373_v0 = vrot.slane %v5325_v56, 5 }
 0x155   : > { %v1726_v4 = vor.u32 %v1725_v49, %v1722_v52  ;;  %v2443_v25 = vunpack.c.l.b16 %v1395_v34  ;;  %v3983_v34 = vld [vmem:[%s4034_s17 + $0xbc] sm:$0x1] }
 0x156   : > { %v1808_v58 = vor.u32 %v1807_v24, %v5397_v57  ;;  %v1375_v56 = vrot.slane %v1373_v0, 4 }
 0x159   : > { %2477 = vrot.lane.b32.xlu0 %v2454_v5, %s3998_s24  ;;  %2331 = vrot.lane.b32.xlu2 %v3936_v37, %s3995_s21  ;;  %v1396_v5 = vrot.slane %v1394_v1, 4  ;;  %v2911_v37 = vsel %vm2899_vm11, %v2878_v13, %v2474_v22  ;;  %v5422_v22 = vld [vmem:[%s4034_s17 + $0xa4] sm:$0x1]  ;;  %v1735_v13 = vrot.slane %v1733_v32, 4  ;;  %v1376_v1 = vrot.slane %v5348_v59, 5 }
 0x15a   : > { %2325 = vrot.lane.b32.xlu1 %v3933_v36, %s3995_s21  ;;  %v2381_v36 = vpack.c.b16 %v2364_v23, %v2363_v38  ;;  %v2944_v10 = vsel %vm2932_vm12, %v2911_v37, %v5235_v41  ;;  %v2378_v59 = vpack.c.b16 %v2358_v12, %v2357_v40  ;;  %v3982_v32 = vld [vmem:[%s4034_s17 + $0xb8] sm:$0xf]  ;;  %v1727_v37 = vrot.slane %v1726_v4, 4  ;;  %v5462_v12 = vld [vmem:[%s4034_s17 + $0xc4] sm:$0xf] }
 0x15b   : > { %v2644_v2 = vpop.permute.xlu0 %2643  ;;  %v5417_v30 = vpop.permute.xlu2 %2737  ;;  %v1398_v51 = vsel %vm4264_vm5, %v1396_v5, %v1397_v63  ;;  %v2977_v38 = vsel %vm2965_vm13, %v2944_v10, %v5358_v46  ;;  %v1736_v46 = vor.u32 %v1735_v13, %v5424_v27  ;;  %v1377_v15 = vsel %vm4264_vm5, %v1375_v56, %v1376_v1  ;;  %v3669_v10 = vld [vmem:[%s4034_s17 + $0xc0] sm:$0xe] }
 0x15c   : > { %v2971_v18 = vsel %vm2965_vm13, %v2938_v44, %v2644_v2  ;;  %v5400_v55 = vpop.permute.xlu1 %2321  ;;  %v3602_v44 = vrot.slane %v3586_v20, 9  ;;  %v2444_v62 = vunpack.c.l.b16 %v1398_v51  ;;  %v3526_v20 = vrot.slane %v633_v47, 9 }
 0x15d   : > { %v3004_v53 = vsel %vm2998_vm14, %v2971_v18, %v5265_v21  ;;  %v1798_v21 = vor.u32 %v1797_v43, %v1794_v17  ;;  %v1739_v17 = vshll.u32 %v5422_v22, 16  ;;  %v3949_v18 = vld [vmem:[%s4034_s17 + $0x9c] sm:$0xff]  ;;  %v1737_v16 = vrot.slane %v1736_v46, 4 }
 0x15e   : > { %3889 = vmatmul.msk.bf16.gmra.mxu0 %vm3051_vm15, %v3004_v53  ;;  %v1374_v24 = vsel %vm4264_vm5, %v3602_v44, %v1373_v0  ;;  %v792_v53 = vrot.slane %v3982_v32, 5  ;;  %v795_v13 = vrot.slane %v3983_v34, 5  ;;  %v5467_v51 = vsel %vm2833_vm9, %v4941_v9, %v5294_v7 }
 0x15f   : > { %v1799_v23 = vrot.slane %v1798_v21, 4  ;;  %v2437_v19 = vunpack.c.l.b16 %v1374_v24  ;;  %v1741_v11 = vrot.slane %v1739_v17, 5  ;;  %v2003_v0 = vrot.slane %v5362_v29, 5 }
 0x160   : > { %v794_v40 = vrot.slane %v792_v53, 4  ;;  %v793_v9 = vsel %vm4264_vm5, %v3526_v20, %v792_v53  ;;  %v3685_v29 = vrot.slane %v3669_v10, 9  ;;  %v1216_v4 = vshll.u32 %v5462_v12, 16 }
 0x161   : > { %2733 = vrot.lane.b32.xlu0 %v2710_v14, %s3999_s25  ;;  %v1809_v14 = vrot.slane %v1808_v58, 4  ;;  %v1804_v5 = vsel %vm4062_vm2, %v1799_v23, %v5397_v57  ;;  %v3557_v58 = vld [vmem:[%s4034_s17 + $0xc0] sm:$0xf]  ;;  %v1220_v17 = vshrl.u32 %v5462_v12, 16  ;;  %v2006_v56 = vrot.slane %v5395_v6, 5 }
 0x162   : > { %2411 = vrot.lane.b32.xlu1 %v2381_v36, %s3994_s20  ;;  %v2438_v36 = vunpack.c.l.b16 %v1377_v15  ;;  %v2619_v49 = vunpack.c.l.b16 %v1804_v5  ;;  %v1207_v7 = vshrl.u32 %v3557_v58, 16  ;;  %v1210_v23 = vshll.u32 %v3557_v58, 16  ;;  %v3574_v6 = vld [vmem:[%s4034_s17 + $0xc8] sm:$0x1] }
 0x163   : > { %v2730_v41 = vpop.permute.xlu0 %2729  ;;  %v1814_v63 = vsel %vm4062_vm2, %v1809_v14, %v1813_v35  ;;  %v5456_v52 = vpop.permute.xlu2 %2315  ;;  %v1732_v35 = vsel %vm4062_vm2, %v1727_v37, %v5424_v27  ;;  %v3666_v14 = vld [vmem:[%s4034_s17 + $0x9c] sm:$0xe]  ;;  %v2853_v27 = vsel %vm2833_vm9, %v4896_v50, %v5400_v55  ;;  %v796_v24 = vsel %vm4264_vm5, %v794_v40, %v795_v13 }
 0x164   : > { %v3010_v43 = vsel %vm2998_vm14, %v2977_v38, %v2730_v41  ;;  %v5438_v2 = vpop.permute.xlu1 %2407  ;;  %v2458_v21 = vpack.c.b16 %v2438_v36, %v2437_v19  ;;  %v2620_v57 = vunpack.c.l.b16 %v1814_v63  ;;  %v2461_v38 = vpack.c.b16 %v2444_v62, %v2443_v25  ;;  %v3952_v19 = vld [vmem:[%s4034_s17 + $0xc0] sm:$0xff] }
 0x165   : > { %3892 = vmatmul.msk.bf16.gmra.mxu1 %vm3051_vm15, %v3010_v43  ;;  %v1742_v41 = vsel %vm4062_vm2, %v1737_v16, %v1741_v11  ;;  %v2613_v46 = vunpack.c.l.b16 %v1732_v35  ;;  %v2005_v47 = vrot.slane %v2003_v0, 4  ;;  %v1401_v50 = vrot.slane %v5462_v12, 5  ;;  %v3637_v11 = vld [vmem:[%s4034_s17 + $0xcc] sm:$0xf] }
 0x166   : > { %2485 = vrot.lane.b32.xlu2 %v2458_v21, %s3998_s24  ;;  %v2637_v43 = vpack.c.b16 %v2620_v57, %v2619_v49  ;;  %v3682_v55 = vrot.slane %v3666_v14, 9  ;;  %v1209_v25 = vrot.slane %v1207_v7, 4  ;;  %v1212_v62 = vrot.slane %v1210_v23, 5  ;;  %v3638_v57 = vld [vmem:[%s4034_s17 + $0xd0] sm:$0xf] }
 0x167   : > { %v1982_v32 = vrot.slane %v5390_v28, 5  ;;  %v1985_v53 = vrot.slane %v5422_v22, 5  ;;  %v2189_v15 = vunpack.c.l.b16 %v793_v9  ;;  %v2190_v5 = vunpack.c.l.b16 %v796_v24 }
 0x168   : > { %v5498_v63 = vrot.slane %v1216_v4, 5  ;;  %v1222_v37 = vrot.slane %v1220_v17, 4  ;;  %v2004_v36 = vsel %vm4264_vm5, %v3685_v29, %v2003_v0  ;;  %v2007_v21 = vsel %vm4264_vm5, %v2005_v47, %v2006_v56 }
 0x169   : > { %2405 = vrot.lane.b32.xlu0 %v2378_v59, %s3994_s20  ;;  %v2614_v59 = vunpack.c.l.b16 %v1742_v41  ;;  %v1983_v28 = vsel %vm4264_vm5, %v3682_v55, %v1982_v32  ;;  %v1984_v22 = vrot.slane %v1982_v32, 4  ;;  %v1403_v58 = vrot.slane %v1401_v50, 4  ;;  %v3654_v32 = vld [vmem:[%s4034_s17 + $0xd4] sm:$0x1] }
 0x16a   : > { %2581 = vrot.lane.b32.xlu1 %v3949_v18, %s3997_s23  ;;  %v3590_v18 = vld [vmem:[%s4034_s17 + $0xc0] sm:$0xe]  ;;  %v1404_v49 = vrot.slane %v3574_v6, 5  ;;  %v2693_v40 = vunpack.c.l.b16 %v1983_v28  ;;  %v1213_v12 = vor.u32 %v1212_v62, %v1209_v25  ;;  %v1223_v0 = vor.u32 %v1222_v37, %v5498_v63 }
 0x16b   : > { %v5469_v44 = vpop.permute.xlu0 %2401  ;;  %v3606_v16 = vrot.slane %v3590_v18, 9  ;;  %v5510_v34 = vpop.permute.xlu2 %2469  ;;  %v2634_v13 = vpack.c.b16 %v2614_v59, %v2613_v46  ;;  %v1986_v35 = vsel %vm4264_vm5, %v1984_v22, %v1985_v53  ;;  %v1816_v41 = vshrl.u32 %v3637_v11, 16  ;;  %v3670_v18 = vld [vmem:[%s4034_s17 + $0xcc] sm:$0xe] }
 0x16c   : > { %v5476_v1 = vpop.permute.xlu1 %2577  ;;  %v1819_v9 = vshll.u32 %v3637_v11, 16  ;;  %v2694_v7 = vunpack.c.l.b16 %v1986_v35  ;;  %v2206_v23 = vpack.c.b16 %v2190_v5, %v2189_v15  ;;  %v1825_v29 = vshll.u32 %v3638_v57, 16 }
 0x16d   : > { %v1402_v14 = vsel %vm4264_vm5, %v3606_v16, %v1401_v50  ;;  %v1829_v4 = vshrl.u32 %v3638_v57, 16  ;;  %v2886_v17 = vsel %vm2866_vm10, %v2853_v27, %v5469_v44  ;;  %v2010_v24 = vrot.slane %v3638_v57, 5 }
 0x16e   : > { %2587 = vrot.lane.b32.xlu2 %v3952_v19, %s3997_s23  ;;  %v2714_v46 = vpack.c.b16 %v2694_v7, %v2693_v40  ;;  %v2699_v56 = vunpack.c.l.b16 %v2004_v36  ;;  %v2700_v59 = vunpack.c.l.b16 %v2007_v21  ;;  %v1214_v47 = vrot.slane %v1213_v12, 4 }
 0x16f   : > { %v1224_v55 = vrot.slane %v1223_v0, 4  ;;  %v2445_v50 = vunpack.c.l.b16 %v1402_v14  ;;  %v1818_v25 = vrot.slane %v1816_v41, 4  ;;  %v1821_v62 = vrot.slane %v1819_v9, 5 }
 0x170   : > { %v2919_v44 = vsel %vm2899_vm11, %v2886_v17, %v5327_v45  ;;  %v1827_v53 = vrot.slane %v1825_v29, 5  ;;  %v1831_v15 = vrot.slane %v1829_v4, 4  ;;  %v3686_v37 = vrot.slane %v3670_v18, 9 }
 0x171   : > { %2491 = vrot.lane.b32.xlu0 %v2461_v38, %s3998_s24  ;;  %v1226_v38 = vshll.u32 %v3574_v6, 16  ;;  %v2952_v5 = vsel %vm2932_vm12, %v2919_v44, %v5476_v1  ;;  %v2012_v36 = vrot.slane %v2010_v24, 4  ;;  %v2013_v16 = vrot.slane %v3654_v32, 5 }
 0x172   : > { %2667 = vrot.lane.b32.xlu1 %v2637_v43, %s3996_s22  ;;  %v1405_v43 = vsel %vm4264_vm5, %v1403_v58, %v1404_v49  ;;  %v2892_v11 = vsel %vm2866_vm10, %v5467_v51, %v5438_v2  ;;  %v2717_v21 = vpack.c.b16 %v2700_v59, %v2699_v56  ;;  %v1822_v58 = vor.u32 %v1821_v62, %v1818_v25 }
 0x173   : > { %v2488_v20 = vpop.permute.xlu0 %2487  ;;  %v1228_v19 = vrot.slane %v1226_v38, 5  ;;  %v2446_v27 = vunpack.c.l.b16 %v1405_v43  ;;  %v1835_v1 = vshll.u32 %v3654_v32, 16  ;;  %v5538_v49 = vpop.permute.xlu2 %2571  ;;  %v1219_v57 = vsel %vm4062_vm2, %v1214_v47, %v5498_v63  ;;  %v3937_v38 = vld [vmem:[%s4034_s17 + $0xc0] sm:$0xff] }
 0x174   : > { %v5512_v10 = vpop.permute.xlu1 %2663  ;;  %v1832_v40 = vor.u32 %v1831_v15, %v1827_v53  ;;  %v2014_v12 = vsel %vm4264_vm5, %v2012_v36, %v2013_v16  ;;  %v2365_v35 = vunpack.c.l.b16 %v1219_v57  ;;  %v1823_v41 = vrot.slane %v1822_v58, 4 }
 0x175   : > { %v1229_v2 = vsel %vm4062_vm2, %v1224_v55, %v1228_v19  ;;  %v2462_v51 = vpack.c.b16 %v2446_v27, %v2445_v50  ;;  %v1837_v63 = vrot.slane %v1835_v1, 5 }
 0x176   : > { %2741 = vrot.lane.b32.xlu2 %v2714_v46, %s3999_s25  ;;  %v2366_v0 = vunpack.c.l.b16 %v1229_v2 }
 0x178   : > { %v2382_v17 = vpack.c.b16 %v2366_v0, %v2365_v35 }
 0x179   : > { %2661 = vrot.lane.b32.xlu0 %v2634_v13, %s3996_s22  ;;  %v2925_v13 = vsel %vm2899_vm11, %v2892_v11, %v2488_v20  ;;  %v1833_v20 = vrot.slane %v1832_v40, 4 }
 0x17a   : > { %2237 = vrot.lane.b32.xlu1 %v2206_v23, %s3993_s19  ;;  %v2958_v9 = vsel %vm2932_vm12, %v2925_v13, %v5365_v42  ;;  %v2702_v23 = vunpack.c.l.b16 %v2014_v12  ;;  %v1828_v42 = vsel %vm4062_vm2, %v1823_v41, %v1827_v53 }
 0x17b   : > { %v2658_v6 = vpop.permute.xlu0 %2657  ;;  %v2991_v60 = vsel %vm2965_vm13, %v2958_v9, %v5512_v10  ;;  %v1838_v43 = vsel %vm4062_vm2, %v1833_v20, %v1837_v63  ;;  %v2726_v56 = vpop.permute.xlu2 %2725  ;;  %v2621_v10 = vunpack.c.l.b16 %v1828_v42  ;;  %vm3349_vm2 = vcmask 58368  }
 0x17c   : > { %v2985_v45 = vsel %vm2965_vm13, %v2952_v5, %v2658_v6  ;;  %v2310_v28 = vpop.permute.xlu1 %2309  ;;  %v2622_v59 = vunpack.c.l.b16 %v1838_v43 }
 0x17d   : > { %v3018_v22 = vsel %vm2998_vm14, %v2985_v45, %v5417_v30  ;;  %v2011_v30 = vsel %vm4264_vm5, %v3686_v37, %v2010_v24  ;;  %v3953_v24 = vld [vmem:[%s4034_s17 + $0xcc] sm:$0xff]  ;;  %v2841_v44 = vsel %vm2833_vm9, %v4801_v8, %v2310_v28 }
 0x17e   : > { %3896 = vmatmul.msk.bf16.gmra.mxu2 %vm3051_vm15, %v3018_v22  ;;  %v2701_v7 = vunpack.c.l.b16 %v2011_v30  ;;  %2333 = vrot.lane.b32.xlu2 %v3937_v38, %s3995_s21  ;;  %v2638_v18 = vpack.c.b16 %v2622_v59, %v2621_v10 }
 0x180   : > { %v2718_v46 = vpack.c.b16 %v2702_v23, %v2701_v7 }
 0x181   : > { %2747 = vrot.lane.b32.xlu0 %v2717_v21, %s3999_s25  ;;  %v2847_v21 = vsel %vm2833_vm9, %v4834_v61, %v5456_v52 }
 0x182   : > { %2493 = vrot.lane.b32.xlu1 %v2462_v51, %s3998_s24 }
 0x183   : > { %v2744_v14 = vpop.permute.xlu0 %2743  ;;  %v5571_v55 = vpop.permute.xlu2 %2329 }
 0x184   : > { %v3024_v29 = vsel %vm2998_vm14, %v2991_v60, %v2744_v14  ;;  %v2396_v4 = vpop.permute.xlu1 %2395 }
 0x185   : > { %3899 = vmatmul.msk.bf16.vlgmr.msra.gmra.mxu3 %vm3051_vm15, %v3024_v29  ;;  %v2880_v57 = vsel %vm2866_vm10, %v2847_v21, %v2396_v4 }
 0x186   : > { %2589 = vrot.lane.b32.xlu2 %v3953_v24, %s3997_s23 }
 0x189   : > { %2413 = vrot.lane.b32.xlu0 %v2382_v17, %s3994_s20 }
 0x18a   : > { %2749 = vrot.lane.b32.xlu1 %v2718_v46, %s3999_s25 }
 0x18b   : > { %v2390_v47 = vpop.permute.xlu0 %2389  ;;  %v2484_v8 = vpop.permute.xlu2 %2483 }
 0x18c   : > { %v2566_v19 = vpop.permute.xlu1 %2565  ;;  %v2874_v27 = vsel %vm2866_vm10, %v2841_v44, %v2390_v47 }
 0x18d   : > { %v2907_v53 = vsel %vm2899_vm11, %v2874_v27, %v5510_v34  ;;  %v2861_v27 = vsel %vm2833_vm9, %v4791_v54, %v5571_v55 }
 0x18e   : > { %v2940_v15 = vsel %vm2932_vm12, %v2907_v53, %v2566_v19 }
 0x191   : > { %2669 = vrot.lane.b32.xlu0 %v2638_v18, %s3996_s22 }
 0x192   : > { %v3097_v26 = vpop.f32.mrf.mxu0 }
 0x193   : > { %v3351_v50 = vpack.c.bf16 %v3097_v26, %v3097_v26  ;;  %v2476_v25 = vpop.permute.xlu0 %2475  ;;  %v3246_v32 = vmul.f32 %v3097_v26, %v3097_v26  ;;  %v3177_v6 = vsel %vm2800_vm7, %v3097_v26, 0.0  ;;  %v2586_v12 = vpop.permute.xlu2 %2585 }
 0x194   : > { %v2652_v62 = vpop.permute.xlu1 %2651  ;;  %v2913_v51 = vsel %vm2899_vm11, %v2880_v57, %v2476_v25 }
 0x195   : > { %3384 = vst.msk [vmem:[%s5576_s8] sm:$0xf] %vm3383_vm0, %v3351_v50  ;;  %v3278_v34 = vsel %vm2800_vm7, %v3246_v32, 0.0  ;;  %v2946_v40 = vsel %vm2932_vm12, %v2913_v51, %v5538_v49 }
 0x196   : > { %v2979_v61 = vsel %vm2965_vm13, %v2946_v40, %v2652_v62 }
 0x19a   : > { %v3099_v5 = vpop.f32.mrf.mxu0 }
 0x19b   : > { %v3178_v37 = vsel %vm2800_vm7, %v3099_v5, 0.0  ;;  %v3247_v36 = vmul.f32 %v3099_v5, %v3099_v5  ;;  %v3352_v16 = vpack.c.bf16 %v3099_v5, %v3099_v5  ;;  %v2646_v11 = vpop.permute.xlu0 %2645  ;;  %v2740_v23 = vpop.permute.xlu2 %2739 }
 0x19c   : > { %v3179_v45 = vadd.f32 %v3178_v37, %v3177_v6  ;;  %v2973_v28 = vsel %vm2965_vm13, %v2940_v15, %v2646_v11  ;;  %v2324_v22 = vpop.permute.xlu1 %2323 }
 0x19d   : > { %v3279_v58 = vsel %vm2800_vm7, %v3247_v36, 0.0  ;;  %3385 = vst.msk [vmem:[%s5576_s8 + $0x4] sm:$0xf] %vm3383_vm0, %v3352_v16  ;;  %v3006_v1 = vsel %vm2998_vm14, %v2973_v28, %v2726_v56  ;;  %v2855_v56 = vsel %vm2833_vm9, %v4741_v3, %v2324_v22 }
 0x19e   : > { %v3280_v2 = vadd.f32 %v3279_v58, %v3278_v34  ;;  %3890 = vmatmul.msk.bf16.gmra.mxu0 %vm3051_vm15, %v3006_v1 }
 0x1a3   : > { %v2732_v52 = vpop.permute.xlu0 %2731  ;;  %v2398_v19 = vpop.permute.xlu2 %2397 }
 0x1a4   : > { %v3012_v13 = vsel %vm2998_vm14, %v2979_v61, %v2732_v52  ;;  %v2410_v30 = vpop.permute.xlu1 %2409 }
 0x1a5   : > { %3893 = vmatmul.msk.bf16.gmra.mxu1 %vm3051_vm15, %v3012_v13  ;;  %v2894_v53 = vsel %vm2866_vm10, %v2861_v27, %v2410_v30 }
 0x1ab   : > { %v3102_v38 = vpop.f32.mrf.mxu0  ;;  %v2404_v35 = vpop.permute.xlu0 %2403 }
 0x1ac   : > { %v3180_v0 = vsel %vm2800_vm7, %v3102_v38, 0.0  ;;  %v3248_v41 = vmul.f32 %v3102_v38, %v3102_v38  ;;  %v3353_v63 = vpack.c.bf16 %v3102_v38, %v3102_v38  ;;  %v2580_v9 = vpop.permute.xlu1 %2579  ;;  %v2888_v59 = vsel %vm2866_vm10, %v2855_v56, %v2404_v35  ;;  %v2654_v36 = vpop.permute.xlu2 %2653 }
 0x1ad   : > { %v3181_v20 = vadd.f32 %v3180_v0, %v3179_v45  ;;  %v2921_v18 = vsel %vm2899_vm11, %v2888_v59, %v2484_v8 }
 0x1ae   : > { %v3281_v49 = vsel %vm2800_vm7, %v3248_v41, 0.0  ;;  %3386 = vst.msk [vmem:[%s5576_s8 + $0x8] sm:$0xf] %vm3383_vm0, %v3353_v63  ;;  %v2954_v50 = vsel %vm2932_vm12, %v2921_v18, %v2580_v9 }
 0x1af   : > { %v3282_v7 = vadd.f32 %v3281_v49, %v3280_v2 }
 0x1b2   : > { %v5609_v60 = vpop.f32.mrf.mxu1 }
 0x1b3   : > { %v3359_v14 = vpack.c.bf16 %v5609_v60, %v5609_v60  ;;  %v3104_v29 = vpop.f32.mrf.mxu0  ;;  %v2490_v4 = vpop.permute.xlu0 %2489 }
 0x1b4   : > { %v3182_v17 = vsel %vm2800_vm7, %v3104_v29, 0.0  ;;  %v3249_v42 = vmul.f32 %v3104_v29, %v3104_v29  ;;  %v3354_v43 = vpack.c.bf16 %v3104_v29, %v3104_v29  ;;  %v2666_v46 = vpop.permute.xlu1 %2665  ;;  %v2927_v15 = vsel %vm2899_vm11, %v2894_v53, %v2490_v4  ;;  %v2332_v34 = vpop.permute.xlu2 %2331 }
 0x1b5   : > { %3392 = vst.msk [vmem:[%s5576_s8 + $0x20] sm:$0xf] %vm3383_vm0, %v3359_v14  ;;  %v3183_v24 = vadd.f32 %v3182_v17, %v3181_v20  ;;  %v2960_v5 = vsel %vm2932_vm12, %v2927_v15, %v2586_v12 }
 0x1b6   : > { %v3283_v10 = vsel %vm2800_vm7, %v3249_v42, 0.0  ;;  %3387 = vst.msk [vmem:[%s5576_s8 + $0xc] sm:$0xf] %vm3383_vm0, %v3354_v43  ;;  %v2993_v6 = vsel %vm2965_vm13, %v2960_v5, %v2666_v46  ;;  %v3921_v5 = vld [vmem:[%s4034_s17 + $0xb4] sm:$0xff] }
 0x1b7   : > { %v3284_v47 = vadd.f32 %v3283_v10, %v3282_v7 }
 0x1ba   : > { %v5623_v26 = vpop.f32.mrf.mxu1 }
 0x1bb   : > { %v3360_v25 = vpack.c.bf16 %v5623_v26, %v5623_v26  ;;  %v2660_v62 = vpop.permute.xlu0 %2659 }
 0x1bc   : > { %v2987_v3 = vsel %vm2965_vm13, %v2954_v50, %v2660_v62  ;;  %v2318_v44 = vpop.permute.xlu1 %2317 }
 0x1bd   : > { %3393 = vst.msk [vmem:[%s5576_s8 + $0x24] sm:$0xf] %vm3383_vm0, %v3360_v25  ;;  %v3020_v32 = vsel %vm2998_vm14, %v2987_v3, %v2740_v23  ;;  %v2849_v11 = vsel %vm2833_vm9, %v4702_v48, %v2318_v44  ;;  %v2863_v25 = vsel %vm2833_vm9, %v5021_v39, %v2332_v34 }
 0x1be   : > { %3897 = vmatmul.msk.bf16.gmra.mxu2 %vm3051_vm15, %v3020_v32  ;;  %v2882_v28 = vsel %vm2866_vm10, %v2849_v11, %v2398_v19 }
 0x1c0   : > { %v2486_v61 = vpop.permute.xlu2 %2485 }
 0x1c3   : > { %v2746_v37 = vpop.permute.xlu0 %2745 }
 0x1c4   : > { %v3026_v54 = vsel %vm2998_vm14, %v2993_v6, %v2746_v37  ;;  %v2574_v55 = vpop.permute.xlu1 %2573  ;;  %v2799_v37 = vsel %vm2751_vm6, %v3921_v5, %v4788_v33 }
 0x1c5   : > { %3900 = vmatmul.msk.bf16.gmra.mxu3 %vm3051_vm15, %v3026_v54 }
 0x1c8   : > { %v5642_v16 = vpop.f32.mrf.mxu2  ;;  %v2588_v9 = vpop.permute.xlu2 %2587 }
 0x1c9   : > { %v3367_v8 = vpack.c.bf16 %v5642_v16, %v5642_v16 }
 0x1cb   : > { %3400 = vst.msk [vmem:[%s5576_s8 + $0x40] sm:$0xf] %vm3383_vm0, %v3367_v8  ;;  %v2478_v45 = vpop.permute.xlu0 %2477 }
 0x1cc   : > { %v2326_v22 = vpop.permute.xlu1 %2325  ;;  %v2915_v21 = vsel %vm2899_vm11, %v2882_v28, %v2478_v45 }
 0x1cd   : > { %v2948_v58 = vsel %vm2932_vm12, %v2915_v21, %v2574_v55  ;;  %v2857_v43 = vsel %vm2833_vm9, %v4992_v31, %v2326_v22 }
 0x1ce   : > { %v2981_v2 = vsel %vm2965_vm13, %v2948_v58, %v2654_v36 }
 0x1d0   : > { %v5653_v1 = vpop.f32.mrf.mxu2 }
 0x1d1   : > { %v3368_v57 = vpack.c.bf16 %v5653_v1, %v5653_v1 }
 0x1d3   : > { %3401 = vst.msk [vmem:[%s5576_s8 + $0x44] sm:$0xf] %vm3383_vm0, %v3368_v57  ;;  %v2734_v48 = vpop.permute.xlu0 %2733 }
 0x1d4   : > { %v3014_v51 = vsel %vm2998_vm14, %v2981_v2, %v2734_v48  ;;  %v2412_v40 = vpop.permute.xlu1 %2411 }
 0x1d5   : > { %3894 = vmatmul.msk.bf16.gmra.mxu1 %vm3051_vm15, %v3014_v51  ;;  %v2896_v3 = vsel %vm2866_vm10, %v2863_v25, %v2412_v40 }
 0x1db   : > { %v3107_v52 = vpop.f32.mrf.mxu0  ;;  %v2406_v13 = vpop.permute.xlu0 %2405 }
 0x1dc   : > { %v3184_v30 = vsel %vm2800_vm7, %v3107_v52, 0.0  ;;  %v3250_v12 = vmul.f32 %v3107_v52, %v3107_v52  ;;  %v3355_v38 = vpack.c.bf16 %v3107_v52, %v3107_v52  ;;  %v2582_v35 = vpop.permute.xlu1 %2581 }
 0x1dd   : > { %v3185_v0 = vadd.f32 %v3184_v30, %v3183_v24  ;;  %v2890_v24 = vsel %vm2866_vm10, %v2857_v43, %v2406_v13  ;;  %v3255_v43 = vmul.f32 %v5623_v26, %v5623_v26 }
 0x1de   : > { %v3285_v41 = vsel %vm2800_vm7, %v3250_v12, 0.0  ;;  %3388 = vst.msk [vmem:[%s5576_s8 + $0x10] sm:$0xf] %vm3383_vm0, %v3355_v38  ;;  %v2923_v10 = vsel %vm2899_vm11, %v2890_v24, %v2486_v61 }
 0x1df   : > { %v3286_v63 = vadd.f32 %v3285_v41, %v3284_v47  ;;  %v2742_v47 = vpop.permute.xlu2 %2741  ;;  %v2956_v19 = vsel %vm2932_vm12, %v2923_v10, %v2582_v35 }
 0x1e2   : > { %v5666_v20 = vpop.f32.mrf.mxu1 }
 0x1e3   : > { %v3361_v49 = vpack.c.bf16 %v5666_v20, %v5666_v20  ;;  %v3109_v7 = vpop.f32.mrf.mxu0  ;;  %v2492_v23 = vpop.permute.xlu0 %2491 }
 0x1e4   : > { %v3186_v14 = vsel %vm2800_vm7, %v3109_v7, 0.0  ;;  %v3251_v29 = vmul.f32 %v3109_v7, %v3109_v7  ;;  %v3356_v4 = vpack.c.bf16 %v3109_v7, %v3109_v7  ;;  %v2668_v17 = vpop.permute.xlu1 %2667  ;;  %v2929_v27 = vsel %vm2899_vm11, %v2896_v3, %v2492_v23 }
 0x1e5   : > { %3394 = vst.msk [vmem:[%s5576_s8 + $0x28] sm:$0xf] %vm3383_vm0, %v3361_v49  ;;  %v3187_v42 = vadd.f32 %v3186_v14, %v3185_v0  ;;  %v2962_v32 = vsel %vm2932_vm12, %v2929_v27, %v2588_v9  ;;  %v3254_v23 = vmul.f32 %v5609_v60, %v5609_v60 }
 0x1e6   : > { %v3287_v46 = vsel %vm2800_vm7, %v3251_v29, 0.0  ;;  %3389 = vst.msk [vmem:[%s5576_s8 + $0x14] sm:$0xf] %vm3383_vm0, %v3356_v4  ;;  %v2995_v53 = vsel %vm2965_vm13, %v2962_v32, %v2668_v17 }
 0x1e7   : > { %v3288_v56 = vadd.f32 %v3287_v46, %v3286_v63  ;;  %v2334_v39 = vpop.permute.xlu2 %2333  ;;  %v3293_v10 = vsel %vm2800_vm7, %v3254_v23, 0.0 }
 0x1ea   : > { %v5680_v59 = vpop.f32.mrf.mxu1 }
 0x1eb   : > { %v3362_v18 = vpack.c.bf16 %v5680_v59, %v5680_v59  ;;  %v2662_v50 = vpop.permute.xlu0 %2661  ;;  %v3257_v25 = vmul.f32 %v5680_v59, %v5680_v59 }
 0x1ec   : > { %v2989_v31 = vsel %vm2965_vm13, %v2956_v19, %v2662_v50  ;;  %v2238_v44 = vpop.permute.xlu1 %2237  ;;  %v3256_v19 = vmul.f32 %v5666_v20, %v5666_v20 }
 0x1ed   : > { %3395 = vst.msk [vmem:[%s5576_s8 + $0x2c] sm:$0xf] %vm3383_vm0, %v3362_v18  ;;  %v3022_v62 = vsel %vm2998_vm14, %v2989_v31, %v2742_v47  ;;  %v2832_v54 = vsel %vm2800_vm7, %v2799_v37, %v2238_v44  ;;  %v3194_v47 = vsel %vm2800_vm7, %v5623_v26, 0.0  ;;  %v3196_v31 = vsel %vm2800_vm7, %v5666_v20, 0.0 }
 0x1ee   : > { %3898 = vmatmul.msk.bf16.gmra.mxu2 %vm3051_vm15, %v3022_v62  ;;  %v2865_v11 = vsel %vm2833_vm9, %v2832_v54, %v2334_v39  ;;  %v3297_v27 = vsel %vm2800_vm7, %v3256_v19, 0.0  ;;  %v3198_v26 = vsel %vm2800_vm7, %v5680_v59, 0.0 }
 0x1ef   : > { %v2590_v28 = vpop.permute.xlu2 %2589 }
 0x1f3   : > { %v2748_v15 = vpop.permute.xlu0 %2747 }
 0x1f4   : > { %v3028_v6 = vsel %vm2998_vm14, %v2995_v53, %v2748_v15  ;;  %v2494_v36 = vpop.permute.xlu1 %2493 }
 0x1f5   : > { %3901 = vmatmul.msk.bf16.gmra.mxu3 %vm3051_vm15, %v3028_v6  ;;  %v3299_v6 = vsel %vm2800_vm7, %v3257_v25, 0.0 }
 0x1fb   : > { %v2414_v55 = vpop.permute.xlu0 %2413 }
 0x1fc   : > { %v2898_v8 = vsel %vm2866_vm10, %v2865_v11, %v2414_v55  ;;  %v2750_v33 = vpop.permute.xlu1 %2749 }
 0x1fd   : > { %v2931_v45 = vsel %vm2899_vm11, %v2898_v8, %v2494_v36 }
 0x1fe   : > { %v2964_v34 = vsel %vm2932_vm12, %v2931_v45, %v2590_v28 }
 0x201   : > { %v5705_v22 = vpop.f32.mrf.mxu2 }
 0x202   : > { %v3369_v21 = vpack.c.bf16 %v5705_v22, %v5705_v22 }
 0x203   : > { %v2670_v58 = vpop.permute.xlu0 %2669 }
 0x204   : > { %3402 = vst.msk [vmem:[%s5576_s8 + $0x48] sm:$0xf] %vm3383_vm0, %v3369_v21  ;;  %v2997_v57 = vsel %vm2965_vm13, %v2964_v34, %v2670_v58 }
 0x205   : > { %v3030_v48 = vsel %vm2998_vm14, %v2997_v57, %v2750_v33 }
 0x206   : > { %3902 = vmatmul.msk.bf16.gmra.mxu3 %vm3051_vm15, %v3030_v48 }
 0x208   : > { %v5715_v2 = vpop.f32.mrf.mxu3 }
 0x209   : > { %v3375_v51 = vpack.c.bf16 %v5715_v2, %v5715_v2  ;;  %v5719_v40 = vpop.f32.mrf.mxu2 }
 0x20a   : > { %v3370_v61 = vpack.c.bf16 %v5719_v40, %v5719_v40  ;;  %v3265_v19 = vmul.f32 %v5719_v40, %v5719_v40 }
 0x20b   : > { %3408 = vst.msk [vmem:[%s5576_s8 + $0x60] sm:$0xf] %vm3383_vm0, %v3375_v51 }
 0x20c   : > { %3403 = vst.msk [vmem:[%s5576_s8 + $0x4c] sm:$0xf] %vm3383_vm0, %v3370_v61 }
 0x210   : > { %v5727_v52 = vpop.f32.mrf.mxu3 }
 0x211   : > { %v3376_v13 = vpack.c.bf16 %v5727_v52, %v5727_v52 }
 0x213   : > { %3409 = vst.msk [vmem:[%s5576_s8 + $0x64] sm:$0xf] %vm3383_vm0, %v3376_v13 }
 0x21b   : > { %v3112_v30 = vpop.f32.mrf.mxu0 }
 0x21c   : > { %v3188_v12 = vsel %vm2800_vm7, %v3112_v30, 0.0  ;;  %v3252_v38 = vmul.f32 %v3112_v30, %v3112_v30  ;;  %v3357_v35 = vpack.c.bf16 %v3112_v30, %v3112_v30 }
 0x21d   : > { %v3189_v0 = vadd.f32 %v3188_v12, %v3187_v42  ;;  %v3192_v42 = vsel %vm2800_vm7, %v5609_v60, 0.0  ;;  %v3295_v60 = vsel %vm2800_vm7, %v3255_v43, 0.0 }
 0x21e   : > { %v3289_v41 = vsel %vm2800_vm7, %v3252_v38, 0.0  ;;  %3390 = vst.msk [vmem:[%s5576_s8 + $0x18] sm:$0xf] %vm3383_vm0, %v3357_v35 }
 0x21f   : > { %v3290_v63 = vadd.f32 %v3289_v41, %v3288_v56  ;;  %v3262_v41 = vmul.f32 %v5642_v16, %v5642_v16 }
 0x221   : > { %v3309_v43 = vsel %vm2800_vm7, %v3262_v41, 0.0 }
 0x222   : > { %v3127_v9 = vpop.f32.mrf.mxu1 }
 0x223   : > { %v3363_v49 = vpack.c.bf16 %v3127_v9, %v3127_v9  ;;  %v3114_v7 = vpop.f32.mrf.mxu0  ;;  %v3258_v32 = vmul.f32 %v3127_v9, %v3127_v9  ;;  %v3200_v20 = vsel %vm2800_vm7, %v3127_v9, 0.0 }
 0x224   : > { %v3190_v14 = vsel %vm2800_vm7, %v3114_v7, 0.0  ;;  %v3253_v29 = vmul.f32 %v3114_v7, %v3114_v7  ;;  %v3358_v4 = vpack.c.bf16 %v3114_v7, %v3114_v7 }
 0x225   : > { %3396 = vst.msk [vmem:[%s5576_s8 + $0x30] sm:$0xf] %vm3383_vm0, %v3363_v49  ;;  %v3191_v17 = vadd.f32 %v3190_v14, %v3189_v0  ;;  %v3301_v54 = vsel %vm2800_vm7, %v3258_v32, 0.0  ;;  %v3208_v14 = vsel %vm2800_vm7, %v5642_v16, 0.0 }
 0x226   : > { %v3291_v46 = vsel %vm2800_vm7, %v3253_v29, 0.0  ;;  %3391 = vst.msk [vmem:[%s5576_s8 + $0x1c] sm:$0xf] %vm3383_vm0, %v3358_v4  ;;  %v3263_v29 = vmul.f32 %v5653_v1, %v5653_v1 }
 0x227   : > { %v3193_v24 = vadd.f32 %v3192_v42, %v3191_v17  ;;  %v3292_v56 = vadd.f32 %v3291_v46, %v3290_v63  ;;  %v3210_v46 = vsel %vm2800_vm7, %v5653_v1, 0.0  ;;  %v3214_v1 = vsel %vm2800_vm7, %v5719_v40, 0.0 }
 0x228   : > { %v3311_v16 = vsel %vm2800_vm7, %v3263_v29, 0.0 }
 0x229   : > { %v3195_v18 = vadd.f32 %v3194_v47, %v3193_v24  ;;  %v3294_v50 = vadd.f32 %v3293_v10, %v3292_v56  ;;  %v3264_v24 = vmul.f32 %v5705_v22, %v5705_v22  ;;  %v3212_v47 = vsel %vm2800_vm7, %v5705_v22, 0.0 }
 0x22a   : > { %v3129_v62 = vpop.f32.mrf.mxu1 }
 0x22b   : > { %v3197_v3 = vadd.f32 %v3196_v31, %v3195_v18  ;;  %v3296_v44 = vadd.f32 %v3295_v60, %v3294_v50  ;;  %v3364_v53 = vpack.c.bf16 %v3129_v62, %v3129_v62  ;;  %v3259_v39 = vmul.f32 %v3129_v62, %v3129_v62 }
 0x22c   : > { %v3202_v59 = vsel %vm2800_vm7, %v3129_v62, 0.0  ;;  %v3313_v60 = vsel %vm2800_vm7, %v3264_v24, 0.0  ;;  %v3315_v62 = vsel %vm2800_vm7, %v3265_v19, 0.0 }
 0x22d   : > { %v3298_v15 = vadd.f32 %v3297_v27, %v3296_v44  ;;  %v3199_v5 = vadd.f32 %v3198_v26, %v3197_v3  ;;  %3397 = vst.msk [vmem:[%s5576_s8 + $0x34] sm:$0xf] %vm3383_vm0, %v3364_v53  ;;  %v3303_v8 = vsel %vm2800_vm7, %v3259_v39, 0.0 }
 0x22f   : > { %v3201_v37 = vadd.f32 %v3200_v20, %v3199_v5  ;;  %v3300_v36 = vadd.f32 %v3299_v6, %v3298_v15 }
 0x231   : > { %v3203_v55 = vadd.f32 %v3202_v59, %v3201_v37  ;;  %v3302_v11 = vadd.f32 %v3301_v54, %v3300_v36 }
 0x233   : > { %v3304_v45 = vadd.f32 %v3303_v8, %v3302_v11 }
 0x241   : > { %v3147_v28 = vpop.f32.mrf.mxu2 }
 0x242   : > { %v3371_v21 = vpack.c.bf16 %v3147_v28, %v3147_v28  ;;  %v3266_v44 = vmul.f32 %v3147_v28, %v3147_v28  ;;  %v3216_v22 = vsel %vm2800_vm7, %v3147_v28, 0.0 }
 0x244   : > { %3404 = vst.msk [vmem:[%s5576_s8 + $0x50] sm:$0xf] %vm3383_vm0, %v3371_v21  ;;  %v3317_v53 = vsel %vm2800_vm7, %v3266_v44, 0.0 }
 0x248   : > { %v5771_v33 = vpop.f32.mrf.mxu3 }
 0x249   : > { %v3377_v34 = vpack.c.bf16 %v5771_v33, %v5771_v33  ;;  %v3149_v58 = vpop.f32.mrf.mxu2 }
 0x24a   : > { %v3372_v57 = vpack.c.bf16 %v3149_v58, %v3149_v58  ;;  %v3267_v15 = vmul.f32 %v3149_v58, %v3149_v58  ;;  %v3218_v40 = vsel %vm2800_vm7, %v3149_v58, 0.0 }
 0x24b   : > { %3410 = vst.msk [vmem:[%s5576_s8 + $0x68] sm:$0xf] %vm3383_vm0, %v3377_v34 }
 0x24c   : > { %3405 = vst.msk [vmem:[%s5576_s8 + $0x54] sm:$0xf] %vm3383_vm0, %v3372_v57  ;;  %v3319_v37 = vsel %vm2800_vm7, %v3267_v15, 0.0 }
 0x250   : > { %v5779_v48 = vpop.f32.mrf.mxu3 }
 0x251   : > { %v3378_v51 = vpack.c.bf16 %v5779_v48, %v5779_v48 }
 0x252   : > { %v3132_v61 = vpop.f32.mrf.mxu1 }
 0x253   : > { %3411 = vst.msk [vmem:[%s5576_s8 + $0x6c] sm:$0xf] %vm3383_vm0, %v3378_v51  ;;  %v3365_v13 = vpack.c.bf16 %v3132_v61, %v3132_v61  ;;  %v3260_v30 = vmul.f32 %v3132_v61, %v3132_v61  ;;  %v3204_v12 = vsel %vm2800_vm7, %v3132_v61, 0.0  ;;  %v3224_v51 = vsel %vm2800_vm7, %v5715_v2, 0.0 }
 0x254   : > { %v3205_v35 = vadd.f32 %v3204_v12, %v3203_v55  ;;  %v3271_v61 = vmul.f32 %v5727_v52, %v5727_v52 }
 0x255   : > { %3398 = vst.msk [vmem:[%s5576_s8 + $0x38] sm:$0xf] %vm3383_vm0, %v3365_v13  ;;  %v3305_v38 = vsel %vm2800_vm7, %v3260_v30, 0.0 }
 0x256   : > { %v3306_v7 = vadd.f32 %v3305_v38, %v3304_v45  ;;  %v3270_v45 = vmul.f32 %v5715_v2, %v5715_v2  ;;  %v3228_v2 = vsel %vm2800_vm7, %v5771_v33, 0.0 }
 0x258   : > { %v3325_v38 = vsel %vm2800_vm7, %v3270_v45, 0.0 }
 0x25a   : > { %v3134_v0 = vpop.f32.mrf.mxu1 }
 0x25b   : > { %v3206_v63 = vsel %vm2800_vm7, %v3134_v0, 0.0  ;;  %v3261_v9 = vmul.f32 %v3134_v0, %v3134_v0  ;;  %v3366_v49 = vpack.c.bf16 %v3134_v0, %v3134_v0 }
 0x25c   : > { %v3207_v23 = vadd.f32 %v3206_v63, %v3205_v35  ;;  %v3226_v35 = vsel %vm2800_vm7, %v5727_v52, 0.0  ;;  %v3327_v63 = vsel %vm2800_vm7, %v3271_v61, 0.0  ;;  %v3273_v52 = vmul.f32 %v5779_v48, %v5779_v48 }
 0x25d   : > { %v3307_v4 = vsel %vm2800_vm7, %v3261_v9, 0.0  ;;  %3399 = vst.msk [vmem:[%s5576_s8 + $0x3c] sm:$0xf] %vm3383_vm0, %v3366_v49  ;;  %v3272_v9 = vmul.f32 %v5771_v33, %v5771_v33 }
 0x25e   : > { %v3209_v17 = vadd.f32 %v3208_v14, %v3207_v23  ;;  %v3308_v42 = vadd.f32 %v3307_v4, %v3306_v7 }
 0x25f   : > { %v3329_v29 = vsel %vm2800_vm7, %v3272_v9, 0.0 }
 0x260   : > { %v3211_v56 = vadd.f32 %v3210_v46, %v3209_v17  ;;  %v3310_v10 = vadd.f32 %v3309_v43, %v3308_v42  ;;  %v3230_v17 = vsel %vm2800_vm7, %v5779_v48, 0.0  ;;  %v3331_v43 = vsel %vm2800_vm7, %v3273_v52, 0.0 }
 0x262   : > { %v3213_v18 = vadd.f32 %v3212_v47, %v3211_v56  ;;  %v3312_v50 = vadd.f32 %v3311_v16, %v3310_v10 }
 0x264   : > { %v3314_v31 = vadd.f32 %v3313_v60, %v3312_v50  ;;  %v3215_v25 = vadd.f32 %v3214_v1, %v3213_v18 }
 0x266   : > { %v3316_v3 = vadd.f32 %v3315_v62, %v3314_v31  ;;  %v3217_v32 = vadd.f32 %v3216_v22, %v3215_v25 }
 0x268   : > { %v3318_v6 = vadd.f32 %v3317_v53, %v3316_v3  ;;  %v3219_v39 = vadd.f32 %v3218_v40, %v3217_v32 }
 0x26a   : > { %v3320_v55 = vadd.f32 %v3319_v37, %v3318_v6 }
 0x271   : > { %v3152_v27 = vpop.f32.mrf.mxu2 }
 0x272   : > { %v3373_v26 = vpack.c.bf16 %v3152_v27, %v3152_v27  ;;  %v3268_v5 = vmul.f32 %v3152_v27, %v3152_v27  ;;  %v3220_v20 = vsel %vm2800_vm7, %v3152_v27, 0.0 }
 0x273   : > { %v3221_v59 = vadd.f32 %v3220_v20, %v3219_v39 }
 0x274   : > { %3406 = vst.msk [vmem:[%s5576_s8 + $0x58] sm:$0xf] %vm3383_vm0, %v3373_v26  ;;  %v3321_v36 = vsel %vm2800_vm7, %v3268_v5, 0.0 }
 0x275   : > { %v3322_v58 = vadd.f32 %v3321_v36, %v3320_v55 }
 0x278   : > { %v3167_v54 = vpop.f32.mrf.mxu3 }
 0x279   : > { %v3379_v11 = vpack.c.bf16 %v3167_v54, %v3167_v54  ;;  %v3154_v8 = vpop.f32.mrf.mxu2  ;;  %v3274_v33 = vmul.f32 %v3167_v54, %v3167_v54  ;;  %v3232_v56 = vsel %vm2800_vm7, %v3167_v54, 0.0 }
 0x27a   : > { %v3222_v28 = vsel %vm2800_vm7, %v3154_v8, 0.0  ;;  %v3269_v21 = vmul.f32 %v3154_v8, %v3154_v8  ;;  %v3374_v34 = vpack.c.bf16 %v3154_v8, %v3154_v8 }
 0x27b   : > { %3412 = vst.msk [vmem:[%s5576_s8 + $0x70] sm:$0xf] %vm3383_vm0, %v3379_v11  ;;  %v3223_v57 = vadd.f32 %v3222_v28, %v3221_v59  ;;  %v3333_v47 = vsel %vm2800_vm7, %v3274_v33, 0.0 }
 0x27c   : > { %v3323_v13 = vsel %vm2800_vm7, %v3269_v21, 0.0  ;;  %3407 = vst.msk [vmem:[%s5576_s8 + $0x5c] sm:$0xf] %vm3383_vm0, %v3374_v34 }
 0x27d   : > { %v3225_v30 = vadd.f32 %v3224_v51, %v3223_v57  ;;  %v3324_v12 = vadd.f32 %v3323_v13, %v3322_v58 }
 0x27f   : > { %v3227_v0 = vadd.f32 %v3226_v35, %v3225_v30  ;;  %v3326_v41 = vadd.f32 %v3325_v38, %v3324_v12 }
 0x280   : > { %v3169_v49 = vpop.f32.mrf.mxu3 }
 0x281   : > { %v3229_v7 = vadd.f32 %v3228_v2, %v3227_v0  ;;  %v3328_v23 = vadd.f32 %v3327_v63, %v3326_v41  ;;  %v3380_v14 = vpack.c.bf16 %v3169_v49, %v3169_v49  ;;  %v3275_v19 = vmul.f32 %v3169_v49, %v3169_v49 }
 0x282   : > { %v3234_v48 = vsel %vm2800_vm7, %v3169_v49, 0.0 }
 0x283   : > { %3413 = vst.msk [vmem:[%s5576_s8 + $0x74] sm:$0xf] %vm3383_vm0, %v3380_v14  ;;  %v3330_v4 = vadd.f32 %v3329_v29, %v3328_v23  ;;  %v3231_v42 = vadd.f32 %v3230_v17, %v3229_v7  ;;  %v3335_v31 = vsel %vm2800_vm7, %v3275_v19, 0.0 }
 0x285   : > { %v3332_v46 = vadd.f32 %v3331_v43, %v3330_v4  ;;  %v3233_v16 = vadd.f32 %v3232_v56, %v3231_v42 }
 0x287   : > { %v3334_v50 = vadd.f32 %v3333_v47, %v3332_v46  ;;  %v3235_v1 = vadd.f32 %v3234_v48, %v3233_v16 }
 0x289   : > { %v3172_v24 = vpop.f32.mrf.mxu3  ;;  %v3336_v62 = vadd.f32 %v3335_v31, %v3334_v50 }
 0x28a   : > { %v3381_v10 = vpack.c.bf16 %v3172_v24, %v3172_v24  ;;  %v3276_v18 = vmul.f32 %v3172_v24, %v3172_v24  ;;  %v3236_v60 = vsel %vm2800_vm7, %v3172_v24, 0.0 }
 0x28b   : > { %v3237_v3 = vadd.f32 %v3236_v60, %v3235_v1 }
 0x28c   : > { %3414 = vst.msk [vmem:[%s5576_s8 + $0x78] sm:$0xf] %vm3383_vm0, %v3381_v10  ;;  %v3337_v25 = vsel %vm2800_vm7, %v3276_v18, 0.0 }
 0x28d   : > { %v3338_v32 = vadd.f32 %v3337_v25, %v3336_v62 }
 0x291   : > { %v3174_v44 = vpop.f32.mrf.mxu3 }
 0x292   : > { %v3238_v27 = vsel %vm2800_vm7, %v3174_v44, 0.0  ;;  %v3277_v22 = vmul.f32 %v3174_v44, %v3174_v44  ;;  %v3382_v26 = vpack.c.bf16 %v3174_v44, %v3174_v44 }
 0x293   : > { %v3239_v53 = vadd.f32 %v3238_v27, %v3237_v3 }
 0x294   : > { %v3339_v15 = vsel %vm2800_vm7, %v3277_v22, 0.0  ;;  %3415 = vst.msk [vmem:[%s5576_s8 + $0x7c] sm:$0xf] %vm3383_vm0, %v3382_v26 }
 0x295   : > { %v3240_v5 = vrot.slane %v3239_v53, 4  ;;  %v3340_v6 = vadd.f32 %v3339_v15, %v3338_v32 }
 0x297   : > { %v3241_v40 = vadd.f32 %v3240_v5, %v3239_v53  ;;  %v3341_v20 = vrot.slane %v3340_v6, 4 }
 0x299   : > { %v3242_v39 = vrot.slane %v3241_v40, 2  ;;  %v3342_v37 = vadd.f32 %v3341_v20, %v3340_v6 }
 0x29b   : > { %v3243_v36 = vadd.f32 %v3242_v39, %v3241_v40  ;;  %v3343_v54 = vrot.slane %v3342_v37, 2 }
 0x29d   : > { %v3244_v59 = vrot.slane %v3243_v36, 1  ;;  %v3344_v55 = vadd.f32 %v3343_v54, %v3342_v37 }
 0x29f   : > { %v3345_v11 = vrot.slane %v3344_v55, 1  ;;  %v3245_v8 = vadd.f32 %v3244_v59, %v3243_v36 }
 0x2a1   : > { %v3346_v45 = vadd.f32 %v3345_v11, %v3344_v55 }
 0x2a3   : > { %v3348_v28 = vsel %vm3347_vm1, %v3245_v8, %v3346_v45 }
 0x2a4   : > { %3350 = vst.msk [vmem:[%s181_s14] sm:$0x3] %vm3349_vm2, %v3348_v28 }
 0x2a5 PF: > { %s14_s12 = sadd.s32 1, %s3990_s12  }
 0x2a6   : > { %p11_p4 = scmp.ge.s32.totalorder %s14_s12, 4  }
 0x2a8   :  { %13 = sbr.rel (!%p11_p4) target bundleno = 1 (0x1), region = 72 }

// kernel: resnet34_block.4
= control target key start
LH: loop header
LB: loop body
LE: loop exit
PB: predicated region body
PF: predicated region fallthrough
CT: control target
= control target key end

     0   :  { %s5400_s18 = smov 0   ;;  %s8025_s0 = inlined_call_operand.vmem [shape: bf16[2,256,8], index: 0, kind: input, shape index: {}]   ;;  %s8026_s1 = inlined_call_operand.vmem [shape: f32[1,8], index: 1, kind: input, shape index: {}]   ;;  %s8027_s2 = inlined_call_operand.vmem [shape: f32[1,8], index: 2, kind: input, shape index: {}]   ;;  %s8028_s3 = inlined_call_operand.vmem [shape: bf16[72,8], index: 3, kind: input, shape index: {}]   ;;  %s8029_s4 = inlined_call_operand.vmem [shape: bf16[2,256,8], index: 4, kind: output, shape index: {0}]   ;;  %s8030_s5 = inlined_call_operand.vmem [shape: f32[2,2,8], index: 5, kind: output, shape index: {1}]  }
   0x1 LB: > { %s5136_s19 = sadd.s32 4294967295, %s5359_s18   ;;  %p5140_p0 = scmp.ge.s32.totalorder %s5359_s18, 1  ;;  %s5359_s18 = sphi %s5400_s18, %s16_s18  }
   0x2   : > { %p190_p1 = scmp.lt.s32.totalorder %s5359_s18, 3 }
   0x4   : > { %p191_p2 = pnand %p5140_p0, %p190_p1 }
   0x6   : > { %194 = sbr.rel (%p191_p2) target bundleno = 964 (0x3c4), region = 36 }
   0xb   : > { %vm405_vm0 = vcmask 60416   ;;  %vm8065_vm1 = vcmask 58368   ;;  %p222_p3 = scmp.lt.s32.totalorder %s5136_s19, 1  ;;  %v5361_v0 = vmov 0   ;;  %vm433_vm2 = vcmask 58369   ;;  %s5362_s28 = smov 8  }
   0xc   : > { %406 = vst.msk [vmem:[#allocation2] sm:$0xf] %vm405_vm0, %v5361_v0  ;;  %vm414_vm3 = vcmask 57344   ;;  %vm1196_vm4 = vcmask 1042432   ;;  %v5431_v1 = vld [vmem:[%s8026_s1] ss:$0 sm:$0xff] }
   0xd   : > { %407 = vst.msk [vmem:[#allocation2 + $0x4] sm:$0xf] %vm405_vm0, %v5361_v0  ;;  %s8151_s19 = smov (!%p222_p3, %s5136_s19), 1  ;;  %vm1197_vm5 = vcmask 1046532   ;;  %v5443_v7 = vld [vmem:[%s8027_s2] ss:$0 sm:$0xff] }
   0xe   : > { %409 = vst.msk [vmem:[#allocation2 + $0x8] sm:$0x3] %vm8065_vm1, %v5361_v0  ;;  %s5228_s20 = sshll.u32 %s8151_s19, 7  ;;  %vm5453_vm6 = vmor %vm1196_vm4, %vm1197_vm5  ;;  %vm8066_vm7 = vcmask 1040384   ;;  %vm517_vm8 = vcmask 1044484   ;;  %v8069_v62 = vmov 0 }
   0xf   : > { %434 = vst.msk [vmem:[#allocation2 + $0x8] sm:$0x2] %vm433_vm2, %v5361_v0  ;;  %s5426_s23 = scalar_lea.vmem %s8025_s0, %s5228_s20  ;;  %vm5518_vm9 = vmor %vm8066_vm7, %vm517_vm8  ;;  %vm648_vm10 = vcmask 60417   ;;  %vm1327_vm11 = vsmask.f32 2304  ;;  %s5363_s8 = smov 16  }
  0x10   : > { %415 = vst.msk [vmem:[#allocation2] sm:$0x1] %vm414_vm3, %v5361_v0  ;;  %v5300_v2 = vld [vmem:[%s5426_s23 + $0x18] sm:$0xff]   ;;  %v5298_v3 = vld [vmem:[%s5426_s23 + $0x8] sm:$0xff]   ;;  %v5235_v4 = vld [vmem:[%s5426_s23] sm:$0xff]   ;;  %v8070_v62 = vsel %vm5518_vm9, 4294967295, %v8069_v62  ;;  %s7665_s15 = scalar_lea.vmem %s8029_s4, %s5228_s20 }
  0x11   : > { %411 = vst.msk [vmem:[#allocation2 + $0xcc] sm:$0xf] %vm405_vm0, %v5361_v0  ;;  %v5248_v5 = vunpack.c.l.bf16 %v5300_v2  ;;  %v5249_v6 = vunpack.c.h.bf16 %v5300_v2  ;;  %v5240_v8 = vunpack.c.l.bf16 %v5298_v3  ;;  %v5241_v10 = vunpack.c.h.bf16 %v5298_v3  ;;  %v5301_v39 = vld [vmem:[%s5426_s23 + $0x20] sm:$0xff]   ;;  %v5299_v60 = vld [vmem:[%s5426_s23 + $0x10] sm:$0xff]   ;;  %s5364_s9 = smov 24   ;;  %s5365_s10 = smov 32  }
  0x12   : > { %412 = vst.msk [vmem:[#allocation2 + $0xd0] sm:$0xf] %vm405_vm0, %v5361_v0  ;;  %v5236_v11 = vunpack.c.l.bf16 %v5235_v4  ;;  %v5237_v17 = vunpack.c.h.bf16 %v5235_v4  ;;  %v5252_v47 = vunpack.c.l.bf16 %v5301_v39  ;;  %v5253_v55 = vunpack.c.h.bf16 %v5301_v39  ;;  %s5366_s11 = smov 40   ;;  %s5367_s12 = smov 56  }
  0x13   : > { %v5445_v9 = vld [vmem:[#allocation2] sm:$0xe]  ;;  %413 = vst.msk [vmem:[#allocation2 + $0xd4] sm:$0x3] %vm8065_vm1, %v5361_v0  ;;  %v311_v16 = vmul.f32 %v5431_v1, %v5248_v5  ;;  %v312_v22 = vmul.f32 %v5431_v1, %v5249_v6  ;;  %v307_v26 = vmul.f32 %v5431_v1, %v5240_v8  ;;  %v308_v34 = vmul.f32 %v5431_v1, %v5241_v10  ;;  %s5368_s13 = smov 48   ;;  %s5369_s14 = smov 64  }
  0x14   : > { %v5449_v12 = vld [vmem:[#allocation2 + $0x4] sm:$0xf]  ;;  %v5146_v14 = vrot.slane %v5445_v9, 9  ;;  %416 = vst.msk [vmem:[#allocation2 + $0xc] sm:$0x1] %vm414_vm3, %v5361_v0  ;;  %v305_v38 = vmul.f32 %v5431_v1, %v5236_v11  ;;  %v306_v43 = vmul.f32 %v5431_v1, %v5237_v17  ;;  %v313_v59 = vmul.f32 %v5431_v1, %v5252_v47  ;;  %v5302_v17 = vld [vmem:[%s5426_s23 + $0x28] sm:$0xff]  }
  0x15   : > { %v699_v18 = vld [vmem:[#allocation2 + $0x8] sm:$0x1]  ;;  %v1201_v20 = vrot.slane %v5449_v12, 5  ;;  %v8032_v23 = vshrl.u32 %v5449_v12, 16  ;;  %v347_v25 = vadd.f32 %v5443_v7, %v311_v16  ;;  %417 = vst.msk [vmem:[#allocation2 + $0x18] sm:$0x1] %vm414_vm3, %v5361_v0  ;;  %v348_v30 = vadd.f32 %v5443_v7, %v312_v22 }
  0x16   : > { %v1204_v24 = vrot.slane %v699_v18, 5  ;;  %v768_v27 = vshll.u32 %v699_v18, 16  ;;  %418 = vst.msk [vmem:[#allocation2 + $0x24] sm:$0x1] %vm414_vm3, %v5361_v0  ;;  %v343_v37 = vadd.f32 %v5443_v7, %v307_v26  ;;  %v344_v42 = vadd.f32 %v5443_v7, %v308_v34  ;;  %v5304_v34 = vld [vmem:[%s5426_s23 + $0x38] sm:$0xff]   ;;  %s5145_s20 = sshll.u32 %s8151_s19, 1 }
  0x17   : > { %v1202_v28 = vsel %vm5453_vm6, %v5146_v14, %v1201_v20  ;;  %v1203_v29 = vrot.slane %v1201_v20, 4  ;;  %v5476_v31 = vrot.slane %v8032_v23, 4  ;;  %v379_v33 = vmax.f32 %v347_v25, 0.0  ;;  %419 = vst.msk [vmem:[#allocation2 + $0x30] sm:$0x1] %vm414_vm3, %v5361_v0 }
  0x18   : > { %v3731_v32 = vunpack.c.l.b16 %v1202_v28  ;;  %v380_v36 = vmax.f32 %v348_v30, 0.0  ;;  %420 = vst.msk [vmem:[#allocation2 + $0x3c] sm:$0x1] %vm414_vm3, %v5361_v0  ;;  %v375_v45 = vmax.f32 %v343_v37, 0.0  ;;  %v341_v46 = vadd.f32 %v5443_v7, %v305_v38 }
  0x19   : > { %v1205_v35 = vsel %vm5453_vm6, %v1203_v29, %v1204_v24  ;;  %v5490_v41 = vpack.c.bf16 %v379_v33, %v379_v33  ;;  %421 = vst.msk [vmem:[#allocation2 + $0x48] sm:$0x1] %vm414_vm3, %v5361_v0  ;;  %v376_v50 = vmax.f32 %v344_v42, 0.0  ;;  %v342_v51 = vadd.f32 %v5443_v7, %v306_v43 }
  0x1a   : > { %v3732_v40 = vunpack.c.l.b16 %v1205_v35  ;;  %v459_v44 = vpack.c.bf16 %v380_v36, %v380_v36  ;;  %422 = vst.msk [vmem:[#allocation2 + $0x54] sm:$0x1] %vm414_vm3, %v5361_v0  ;;  %v5503_v53 = vpack.c.bf16 %v375_v45, %v375_v45  ;;  %v373_v54 = vmax.f32 %v341_v46, 0.0 }
  0x1b   : > { %v534_v49 = vrot.slane %v5490_v41, 7  ;;  %423 = vst.msk [vmem:[#allocation2 + $0x60] sm:$0x1] %vm414_vm3, %v5361_v0  ;;  %v455_v57 = vpack.c.bf16 %v376_v50, %v376_v50  ;;  %v374_v58 = vmax.f32 %v342_v51, 0.0  ;;  %v5512_v61 = vrot.slane %v768_v27, 5 }
  0x1c   : > { %v3763_v48 = vpack.c.b16 %v3732_v40, %v3731_v32  ;;  %v536_v52 = vrot.slane %v459_v44, 7  ;;  %424 = vst.msk [vmem:[#allocation2 + $0x6c] sm:$0x1] %vm414_vm3, %v5361_v0  ;;  %v524_v63 = vrot.slane %v5503_v53, 7  ;;  %v5523_v2 = vpack.c.bf16 %v373_v54, %v373_v54  ;;  %v5303_v54 = vld [vmem:[%s5426_s23 + $0x30] sm:$0xff]  }
  0x1d   : > { %v535_v56 = vrot.slane %v534_v49, 4  ;;  %425 = vst.msk [vmem:[#allocation2 + $0x78] sm:$0x1] %vm414_vm3, %v5361_v0  ;;  %v314_v3 = vmul.f32 %v5431_v1, %v5253_v55  ;;  %v526_v5 = vrot.slane %v455_v57, 7  ;;  %v453_v6 = vpack.c.bf16 %v374_v58, %v374_v58 }
  0x1e   : > { %3779 = vrot.lane.b32.xlu0 %v3763_v48, %s5362_s28  ;;  %8071 = vst [vmem:[#allocation3_spill] sm:$0xff] %v8070_v62  ;;  %v5528_v4 = vrot.slane %v536_v52, 4  ;;  %v349_v8 = vadd.f32 %v5443_v7, %v313_v59  ;;  %v525_v10 = vrot.slane %v524_v63, 4  ;;  %v519_v11 = vrot.slane %v5523_v2, 7 }
  0x1f   : > { %426 = vst.msk [vmem:[#allocation2 + $0x84] sm:$0x1] %vm414_vm3, %v5361_v0  ;;  %v350_v14 = vadd.f32 %v5443_v7, %v314_v3  ;;  %v5244_v16 = vunpack.c.l.bf16 %v5299_v60  ;;  %v5542_v18 = vsel %vm5518_vm9, %v535_v56, %v536_v52  ;;  %v521_v20 = vrot.slane %v453_v6, 7 }
  0x20   : > { %427 = vst.msk [vmem:[#allocation2 + $0x90] sm:$0x1] %vm414_vm3, %v5361_v0  ;;  %v381_v22 = vmax.f32 %v349_v8, 0.0  ;;  %v5245_v24 = vunpack.c.h.bf16 %v5299_v60  ;;  %v5548_v25 = vsel %vm5518_vm9, %v525_v10, %v526_v5  ;;  %v5550_v26 = vrot.slane %v526_v5, 4 }
  0x21   : > { %428 = vst.msk [vmem:[#allocation2 + $0x9c] sm:$0x1] %vm414_vm3, %v5361_v0  ;;  %v382_v27 = vmax.f32 %v350_v14, 0.0  ;;  %v309_v28 = vmul.f32 %v5431_v1, %v5244_v16  ;;  %v520_v29 = vrot.slane %v519_v11, 4  ;;  %v5256_v33 = vunpack.c.l.bf16 %v5302_v17 }
  0x22   : > { %429 = vst.msk [vmem:[#allocation2 + $0xa8] sm:$0x1] %vm414_vm3, %v5361_v0  ;;  %v5557_v30 = vpack.c.bf16 %v381_v22, %v381_v22  ;;  %v310_v32 = vmul.f32 %v5431_v1, %v5245_v24  ;;  %v5563_v35 = vrot.slane %v521_v20, 4  ;;  %v5257_v38 = vunpack.c.h.bf16 %v5302_v17 }
  0x23   : > { %430 = vst.msk [vmem:[#allocation2 + $0xb4] sm:$0x1] %vm414_vm3, %v5361_v0  ;;  %v461_v36 = vpack.c.bf16 %v382_v27, %v382_v27  ;;  %v345_v37 = vadd.f32 %v5443_v7, %v309_v28  ;;  %v315_v42 = vmul.f32 %v5431_v1, %v5256_v33  ;;  %v5264_v43 = vunpack.c.l.bf16 %v5304_v34 }
  0x24   : > { %431 = vst.msk [vmem:[#allocation2 + $0xc0] sm:$0x1] %vm414_vm3, %v5361_v0  ;;  %v539_v39 = vrot.slane %v5557_v30, 7  ;;  %v346_v40 = vadd.f32 %v5443_v7, %v310_v32  ;;  %v316_v46 = vmul.f32 %v5431_v1, %v5257_v38  ;;  %v5265_v47 = vunpack.c.h.bf16 %v5304_v34  ;;  %v5305_v32 = vld [vmem:[%s5426_s23 + $0x40] sm:$0xff]  }
  0x25   : > { %435 = vst.msk [vmem:[#allocation2 + $0x14] sm:$0x2] %vm433_vm2, %v5361_v0  ;;  %v541_v44 = vrot.slane %v461_v36, 7  ;;  %v377_v45 = vmax.f32 %v345_v37, 0.0  ;;  %v5578_v48 = vsel %vm5518_vm9, %v520_v29, %v521_v20  ;;  %v351_v51 = vadd.f32 %v5443_v7, %v315_v42 }
  0x26   : > { %436 = vst.msk [vmem:[#allocation2 + $0x20] sm:$0x2] %vm433_vm2, %v5361_v0  ;;  %v378_v50 = vmax.f32 %v346_v40, 0.0  ;;  %v319_v52 = vmul.f32 %v5431_v1, %v5264_v43  ;;  %v540_v55 = vrot.slane %v539_v39, 4  ;;  %v352_v57 = vadd.f32 %v5443_v7, %v316_v46 }
  0x27   : > { %437 = vst.msk [vmem:[#allocation2 + $0x2c] sm:$0x2] %vm433_vm2, %v5361_v0  ;;  %v5587_v56 = vpack.c.bf16 %v377_v45, %v377_v45  ;;  %v320_v58 = vmul.f32 %v5431_v1, %v5265_v47  ;;  %v5593_v59 = vrot.slane %v541_v44, 4  ;;  %v383_v3 = vmax.f32 %v351_v51, 0.0 }
  0x28   : > { %438 = vst.msk [vmem:[#allocation2 + $0x38] sm:$0x2] %vm433_vm2, %v5361_v0  ;;  %v457_v60 = vpack.c.bf16 %v378_v50, %v378_v50  ;;  %v355_v5 = vadd.f32 %v5443_v7, %v319_v52  ;;  %v384_v8 = vmax.f32 %v352_v57, 0.0  ;;  %v5260_v14 = vunpack.c.l.bf16 %v5303_v54  ;;  %v5307_v50 = vld [vmem:[%s5426_s23 + $0x50] sm:$0xff]  }
  0x29   : > { %439 = vst.msk [vmem:[#allocation2 + $0x44] sm:$0x2] %vm433_vm2, %v5361_v0  ;;  %v529_v6 = vrot.slane %v5587_v56, 7  ;;  %v356_v10 = vadd.f32 %v5443_v7, %v320_v58  ;;  %v5602_v17 = vpack.c.bf16 %v383_v3, %v383_v3  ;;  %v5261_v22 = vunpack.c.h.bf16 %v5303_v54 }
  0x2a   : > { %440 = vst.msk [vmem:[#allocation2 + $0x50] sm:$0x2] %vm433_vm2, %v5361_v0  ;;  %v531_v16 = vrot.slane %v457_v60, 7  ;;  %v387_v20 = vmax.f32 %v355_v5, 0.0  ;;  %v463_v27 = vpack.c.bf16 %v384_v8, %v384_v8  ;;  %v317_v29 = vmul.f32 %v5431_v1, %v5260_v14 }
  0x2b   : > { %441 = vst.msk [vmem:[#allocation2 + $0x5c] sm:$0x2] %vm433_vm2, %v5361_v0  ;;  %v530_v24 = vrot.slane %v529_v6, 4  ;;  %v388_v28 = vmax.f32 %v356_v10, 0.0  ;;  %v5614_v33 = vsel %vm5518_vm9, %v540_v55, %v541_v44  ;;  %v544_v34 = vrot.slane %v5602_v17, 7 }
  0x2c   : > { %442 = vst.msk [vmem:[#allocation2 + $0x68] sm:$0x2] %vm433_vm2, %v5361_v0  ;;  %v5617_v36 = vpack.c.bf16 %v387_v20, %v387_v20  ;;  %v318_v37 = vmul.f32 %v5431_v1, %v5261_v22  ;;  %v5622_v38 = vrot.slane %v531_v16, 4  ;;  %v546_v40 = vrot.slane %v463_v27, 7 }
  0x2d   : > { %443 = vst.msk [vmem:[#allocation2 + $0x74] sm:$0x2] %vm433_vm2, %v5361_v0  ;;  %v467_v42 = vpack.c.bf16 %v388_v28, %v388_v28  ;;  %v353_v43 = vadd.f32 %v5443_v7, %v317_v29  ;;  %v545_v44 = vrot.slane %v544_v34, 4  ;;  %v5268_v47 = vunpack.c.l.bf16 %v5305_v32 }
  0x2e   : > { %444 = vst.msk [vmem:[#allocation2 + $0x80] sm:$0x2] %vm433_vm2, %v5361_v0  ;;  %v554_v45 = vrot.slane %v5617_v36, 7  ;;  %v354_v46 = vadd.f32 %v5443_v7, %v318_v37  ;;  %v5636_v51 = vsel %vm5518_vm9, %v530_v24, %v531_v16  ;;  %v5269_v55 = vunpack.c.h.bf16 %v5305_v32  ;;  %v5306_v16 = vld [vmem:[%s5426_s23 + $0x48] sm:$0xff]  }
  0x2f   : > { %445 = vst.msk [vmem:[#allocation2 + $0x8c] sm:$0x2] %vm433_vm2, %v5361_v0  ;;  %v556_v52 = vrot.slane %v467_v42, 7  ;;  %v385_v54 = vmax.f32 %v353_v43, 0.0  ;;  %v5640_v57 = vrot.slane %v546_v40, 4  ;;  %v321_v3 = vmul.f32 %v5431_v1, %v5268_v47 }
  0x30   : > { %446 = vst.msk [vmem:[#allocation2 + $0x98] sm:$0x2] %vm433_vm2, %v5361_v0  ;;  %v555_v58 = vrot.slane %v554_v45, 4  ;;  %v386_v60 = vmax.f32 %v354_v46, 0.0  ;;  %v322_v8 = vmul.f32 %v5431_v1, %v5269_v55  ;;  %v5276_v10 = vunpack.c.l.bf16 %v5307_v50  ;;  %v5308_v55 = vld [vmem:[%s5426_s23 + $0x58] sm:$0xff]  }
  0x31   : > { %447 = vst.msk [vmem:[#allocation2 + $0xa4] sm:$0x2] %vm433_vm2, %v5361_v0  ;;  %v5647_v5 = vpack.c.bf16 %v385_v54, %v385_v54  ;;  %v5277_v14 = vunpack.c.h.bf16 %v5307_v50  ;;  %v5655_v20 = vsel %vm5518_vm9, %v545_v44, %v546_v40  ;;  %v357_v27 = vadd.f32 %v5443_v7, %v321_v3 }
  0x32   : > { %448 = vst.msk [vmem:[#allocation2 + $0xb0] sm:$0x2] %vm433_vm2, %v5361_v0  ;;  %v5659_v22 = vsel %vm5518_vm9, %v555_v58, %v556_v52  ;;  %v465_v24 = vpack.c.bf16 %v386_v60, %v386_v60  ;;  %v358_v29 = vadd.f32 %v5443_v7, %v322_v8  ;;  %v325_v32 = vmul.f32 %v5431_v1, %v5276_v10 }
  0x33   : > { %449 = vst.msk [vmem:[#allocation2 + $0xbc] sm:$0x2] %vm433_vm2, %v5361_v0  ;;  %v549_v28 = vrot.slane %v5647_v5, 7  ;;  %v326_v37 = vmul.f32 %v5431_v1, %v5277_v14  ;;  %v389_v42 = vmax.f32 %v357_v27, 0.0  ;;  %v5272_v43 = vunpack.c.l.bf16 %v5306_v16 }
  0x34   : > { %450 = vst.msk [vmem:[#allocation2 + $0xc8] sm:$0x2] %vm433_vm2, %v5361_v0  ;;  %v551_v40 = vrot.slane %v465_v24, 7  ;;  %v5273_v44 = vunpack.c.h.bf16 %v5306_v16  ;;  %v390_v47 = vmax.f32 %v358_v29, 0.0  ;;  %v361_v50 = vadd.f32 %v5443_v7, %v325_v32 }
  0x35   : > { %658 = vst.msk [vmem:[#allocation2 + $0x30] sm:$0xe] %vm648_vm10, %v534_v49  ;;  %v550_v46 = vrot.slane %v549_v28, 4  ;;  %v362_v54 = vadd.f32 %v5443_v7, %v326_v37  ;;  %v5680_v41 = vrot.slane %v556_v52, 4  ;;  %v5682_v49 = vpack.c.bf16 %v389_v42, %v389_v42 }
  0x36   : > { %659 = vst.msk [vmem:[#allocation2 + $0x34] sm:$0xf] %vm405_vm0, %v5542_v18  ;;  %v323_v58 = vmul.f32 %v5431_v1, %v5272_v43  ;;  %v324_v18 = vmul.f32 %v5431_v1, %v5273_v44  ;;  %v5688_v60 = vrot.slane %v551_v40, 4  ;;  %v469_v3 = vpack.c.bf16 %v390_v47, %v390_v47 }
  0x37   : > { %660 = vst.msk [vmem:[#allocation2 + $0x38] sm:$0x1] %vm414_vm3, %v5528_v4  ;;  %v393_v8 = vmax.f32 %v361_v50, 0.0  ;;  %v394_v10 = vmax.f32 %v362_v54, 0.0  ;;  %v559_v4 = vrot.slane %v5682_v49, 7  ;;  %v5280_v16 = vunpack.c.l.bf16 %v5308_v55 }
  0x38   : > { %432 = vst.msk [vmem:[#allocation2 + $0xcc] sm:$0x1] %vm414_vm3, %v5361_v0  ;;  %v359_v52 = vadd.f32 %v5443_v7, %v323_v58  ;;  %v360_v14 = vadd.f32 %v5443_v7, %v324_v18  ;;  %v5700_v24 = vsel %vm5518_vm9, %v550_v46, %v551_v40  ;;  %v561_v27 = vrot.slane %v469_v3, 7 }
  0x39   : > { %451 = vst.msk [vmem:[#allocation2 + $0xd4] sm:$0x2] %vm433_vm2, %v5361_v0  ;;  %v5702_v29 = vpack.c.bf16 %v393_v8, %v393_v8  ;;  %v5281_v32 = vunpack.c.h.bf16 %v5308_v55  ;;  %v5705_v0 = vld [vmem:[%s5426_s23 + $0x68] sm:$0xff]   ;;  %v560_v37 = vrot.slane %v559_v4, 4  ;;  %v5711_v42 = vpack.c.bf16 %v394_v10, %v394_v10 }
  0x3a   : > { %652 = vst.msk [vmem:[#allocation2 + $0x18] sm:$0xe] %vm648_vm10, %v524_v63  ;;  %v391_v53 = vmax.f32 %v359_v52, 0.0  ;;  %v392_v63 = vmax.f32 %v360_v14, 0.0  ;;  %v5717_v40 = vrot.slane %v561_v27, 4  ;;  %v327_v46 = vmul.f32 %v5431_v1, %v5280_v16 }
  0x3b   : > { %653 = vst.msk [vmem:[#allocation2 + $0x1c] sm:$0xf] %vm405_vm0, %v5548_v25  ;;  %v569_v44 = vrot.slane %v5702_v29, 7  ;;  %v328_v25 = vmul.f32 %v5431_v1, %v5281_v32  ;;  %v5288_v58 = vunpack.c.l.bf16 %v5705_v0  ;;  %v571_v16 = vrot.slane %v5711_v42, 7 }
  0x3c   : > { %v5713_v43 = vld [vmem:[#allocation2 + $0x30] sm:$0xe]  ;;  %654 = vst.msk [vmem:[#allocation2 + $0x20] sm:$0x1] %vm414_vm3, %v5550_v26  ;;  %v5737_v32 = vpack.c.bf16 %v391_v53, %v391_v53  ;;  %v5755_v42 = vsel %vm5518_vm9, %v560_v37, %v561_v27  ;;  %vm1328_vm12 = vsmask.f32 6416 }
  0x3d   : > { %v5722_v47 = vld [vmem:[#allocation2 + $0x34] sm:$0xf]  ;;  %v5150_v50 = vrot.slane %v5713_v43, 9  ;;  %v570_v10 = vrot.slane %v569_v44, 4  ;;  %649 = vst.msk [vmem:[#allocation2 + $0xc] sm:$0xe] %vm648_vm10, %v519_v11  ;;  %vm6087_vm13 = vmor %vm1327_vm11, %vm1328_vm12 }
  0x3e   : > { %v711_v18 = vld [vmem:[#allocation2 + $0x38] sm:$0x1]  ;;  %v1229_v26 = vrot.slane %v5722_v47, 5  ;;  %v8031_v8 = vshrl.u32 %v5722_v47, 16  ;;  %650 = vst.msk [vmem:[#allocation2 + $0x10] sm:$0xf] %vm405_vm0, %v5578_v48 }
  0x3f   : > { %v864_v52 = vshll.u32 %v711_v18, 16  ;;  %v1232_v14 = vrot.slane %v711_v18, 5  ;;  %v471_v18 = vpack.c.bf16 %v392_v63, %v392_v63  ;;  %651 = vst.msk [vmem:[#allocation2 + $0x14] sm:$0x1] %vm414_vm3, %v5563_v35  ;;  %v5757_v53 = vrot.slane %v571_v16, 4 }
  0x40   : > { %v1230_v55 = vsel %vm5453_vm6, %v5150_v50, %v1229_v26  ;;  %v1231_v54 = vrot.slane %v1229_v26, 4  ;;  %v5743_v3 = vrot.slane %v8031_v8, 4  ;;  %661 = vst.msk [vmem:[#allocation2 + $0x3c] sm:$0xe] %vm648_vm10, %v539_v39  ;;  %vm745_vm14 = vsmask.f32 3328 }
  0x41   : > { %v5747_v19 = vrot.slane %v864_v52, 5  ;;  %v3739_v2 = vunpack.c.l.b16 %v1230_v55  ;;  %v5749_v11 = vld [vmem:[#allocation2 + $0x18] sm:$0xe]  ;;  %662 = vst.msk [vmem:[#allocation2 + $0x40] sm:$0xf] %vm405_vm0, %v5614_v33  ;;  %vm4371_vm4 = vcmask 64512  }
  0x42   : > { %v1233_v50 = vsel %vm5453_vm6, %v1231_v54, %v1232_v14  ;;  %v5761_v26 = vld [vmem:[#allocation2 + $0x1c] sm:$0xf]  ;;  %v5148_v48 = vrot.slane %v5749_v11, 9  ;;  %v564_v54 = vrot.slane %v5737_v32, 7  ;;  %v566_v14 = vrot.slane %v471_v18, 7 }
  0x43   : > { %v3740_v52 = vunpack.c.l.b16 %v1233_v50  ;;  %v705_v8 = vld [vmem:[#allocation2 + $0x20] sm:$0x1]  ;;  %v1215_v35 = vrot.slane %v5761_v26, 5  ;;  %v8033_v37 = vshrl.u32 %v5761_v26, 16  ;;  %663 = vst.msk [vmem:[#allocation2 + $0x44] sm:$0x1] %vm414_vm3, %v5593_v59  ;;  %v363_v18 = vadd.f32 %v5443_v7, %v327_v46 }
  0x44   : > { %v816_v23 = vshll.u32 %v705_v8, 16  ;;  %v1218_v21 = vrot.slane %v705_v8, 5  ;;  %v5783_v27 = vld [vmem:[#allocation2 + $0xc] sm:$0xe]  ;;  %v565_v39 = vrot.slane %v564_v54, 4  ;;  %v5799_v33 = vrot.slane %v566_v14, 4 }
  0x45   : > { %v3767_v63 = vpack.c.b16 %v3740_v52, %v3739_v2  ;;  %v1216_v50 = vsel %vm5453_vm6, %v5148_v48, %v1215_v35  ;;  %v1217_v55 = vrot.slane %v1215_v35, 4  ;;  %v5777_v15 = vrot.slane %v8033_v37, 4  ;;  %v5793_v48 = vld [vmem:[#allocation2 + $0x10] sm:$0xf]  ;;  %655 = vst.msk [vmem:[#allocation2 + $0x24] sm:$0xe] %vm648_vm10, %v529_v6 }
  0x46   : > { %v5781_v8 = vrot.slane %v816_v23, 5  ;;  %v3735_v30 = vunpack.c.l.b16 %v1216_v50  ;;  %v5147_v23 = vrot.slane %v5783_v27, 9  ;;  %v364_v59 = vadd.f32 %v5443_v7, %v328_v25  ;;  %v5802_v46 = vld [vmem:[#allocation2 + $0x14] sm:$0x1]  ;;  %656 = vst.msk [vmem:[#allocation2 + $0x28] sm:$0xf] %vm405_vm0, %v5636_v51 }
  0x47   : > { %3787 = vrot.lane.b32.xlu2 %v3767_v63, %s5362_s28  ;;  %v1219_v2 = vsel %vm5453_vm6, %v1217_v55, %v1218_v21  ;;  %8073 = vst [vmem:[#allocation5_spill] sm:$0xff] %v5802_v46  ;;  %v1208_v63 = vrot.slane %v5793_v48, 5  ;;  %v5809_v21 = vsel %vm5518_vm9, %v570_v10, %v571_v16  ;;  %v395_v56 = vmax.f32 %v363_v18, 0.0  ;;  %v5309_v16 = vld [vmem:[%s5426_s23 + $0x60] sm:$0xff]  }
  0x48   : > { %8072 = vst [vmem:[#allocation4_spill] sm:$0xff] %v5781_v8  ;;  %v3736_v52 = vunpack.c.l.b16 %v1219_v2  ;;  %v1211_v6 = vrot.slane %v5802_v46, 5  ;;  %v5816_v25 = vsel %vm5518_vm9, %v565_v39, %v566_v14  ;;  %v396_v55 = vmax.f32 %v364_v59, 0.0  ;;  %v5828_v14 = vld [vmem:[#allocation2 + $0x3c] sm:$0xe] }
  0x49   : > { %657 = vst.msk [vmem:[#allocation2 + $0x2c] sm:$0x1] %vm414_vm3, %v5622_v38  ;;  %v5289_v35 = vunpack.c.h.bf16 %v5705_v0  ;;  %v1209_v51 = vsel %vm5453_vm6, %v5147_v23, %v1208_v63  ;;  %v1210_v2 = vrot.slane %v1208_v63, 4  ;;  %v5824_v10 = vpack.c.bf16 %v395_v56, %v395_v56 }
  0x4a   : > { %v3765_v50 = vpack.c.b16 %v3736_v52, %v3735_v30  ;;  %664 = vst.msk [vmem:[#allocation2 + $0x48] sm:$0xe] %vm648_vm10, %v544_v34  ;;  %v3733_v18 = vunpack.c.l.b16 %v1209_v51  ;;  %v5832_v30 = vpack.c.bf16 %v396_v55, %v396_v55  ;;  %v331_v39 = vmul.f32 %v5431_v1, %v5288_v58  ;;  %v5840_v34 = vld [vmem:[#allocation2 + $0x40] sm:$0xf]  ;;  %v5847_v0 = vld [vmem:[#allocation2 + $0x44] sm:$0x1] }
  0x4b   : > { %665 = vst.msk [vmem:[#allocation2 + $0x4c] sm:$0xf] %vm405_vm0, %v5655_v20  ;;  %v1212_v17 = vsel %vm5453_vm6, %v1210_v2, %v1211_v6  ;;  %v5151_v23 = vrot.slane %v5828_v14, 9  ;;  %v574_v20 = vrot.slane %v5824_v10, 7  ;;  %v332_v59 = vmul.f32 %v5431_v1, %v5289_v35 }
  0x4c   : > { %3783 = vrot.lane.b32.xlu1 %v3765_v50, %s5362_s28  ;;  %666 = vst.msk [vmem:[#allocation2 + $0x50] sm:$0x1] %vm414_vm3, %v5640_v57  ;;  %v3734_v52 = vunpack.c.l.b16 %v1212_v17  ;;  %v1236_v58 = vrot.slane %v5840_v34, 5  ;;  %v576_v63 = vrot.slane %v5832_v30, 7  ;;  %v5284_v56 = vunpack.c.l.bf16 %v5309_v16  ;;  %v5856_v55 = vld [vmem:[#allocation2 + $0x24] sm:$0xe] }
  0x4d   : > { %670 = vst.msk [vmem:[#allocation2 + $0x60] sm:$0xe] %vm648_vm10, %v554_v45  ;;  %v1239_v57 = vrot.slane %v5847_v0, 5  ;;  %v5861_v35 = vadd.f32 %v5443_v7, %v331_v39  ;;  %v5285_v50 = vunpack.c.h.bf16 %v5309_v16  ;;  %v5865_v2 = vld [vmem:[#allocation2 + $0x28] sm:$0xf]  ;;  %v5149_v30 = vrot.slane %v5856_v55, 9 }
  0x4e   : > { %671 = vst.msk [vmem:[#allocation2 + $0x64] sm:$0xf] %vm405_vm0, %v5659_v22  ;;  %v3764_v51 = vpack.c.b16 %v3734_v52, %v3733_v18  ;;  %v1237_v36 = vsel %vm5453_vm6, %v5151_v23, %v1236_v58  ;;  %v1238_v45 = vrot.slane %v1236_v58, 4  ;;  %v1222_v22 = vrot.slane %v5865_v2, 5 }
  0x4f   : > { %672 = vst.msk [vmem:[#allocation2 + $0x68] sm:$0x1] %vm414_vm3, %v5680_v41  ;;  %v3741_v17 = vunpack.c.l.b16 %v1237_v36  ;;  %v575_v16 = vrot.slane %v574_v20, 4  ;;  %v5879_v18 = vadd.f32 %v5443_v7, %v332_v59  ;;  %v329_v5 = vmul.f32 %v5431_v1, %v5284_v56 }
  0x50   : > { %v5870_v38 = vld [vmem:[#allocation2 + $0x2c] sm:$0x1]  ;;  %667 = vst.msk [vmem:[#allocation2 + $0x54] sm:$0xe] %vm648_vm10, %v549_v28  ;;  %3781 = vrot.lane.b32.xlu0 %v3764_v51, %s5362_s28  ;;  %v1240_v41 = vsel %vm5453_vm6, %v1238_v45, %v1239_v57  ;;  %v1223_v59 = vsel %vm5453_vm6, %v5149_v30, %v1222_v22  ;;  %v1224_v58 = vrot.slane %v1222_v22, 4  ;;  %v5907_v56 = vmul.f32 %v5431_v1, %v5285_v50 }
  0x51   : > { %8074 = vst [vmem:[#allocation6_spill] sm:$0xff] %v5870_v38  ;;  %v1225_v23 = vrot.slane %v5870_v38, 5  ;;  %v5886_v52 = vld [vmem:[#allocation2 + $0x48] sm:$0xe]  ;;  %v3742_v28 = vunpack.c.l.b16 %v1240_v41  ;;  %v3737_v36 = vunpack.c.l.b16 %v1223_v59  ;;  %v5942_v29 = vadd.f32 %v5443_v7, %v329_v5 }
  0x52   : > { %668 = vst.msk [vmem:[#allocation2 + $0x58] sm:$0xf] %vm405_vm0, %v5700_v24  ;;  %v5893_v51 = vld [vmem:[#allocation2 + $0x4c] sm:$0xf]  ;;  %v5152_v57 = vrot.slane %v5886_v52, 9  ;;  %v5904_v24 = vrot.slane %v576_v63, 4 }
  0x53   : > { %669 = vst.msk [vmem:[#allocation2 + $0x5c] sm:$0x1] %vm414_vm3, %v5688_v60  ;;  %v5898_v45 = vld [vmem:[#allocation2 + $0x50] sm:$0x1]  ;;  %v1243_v39 = vrot.slane %v5893_v51, 5  ;;  %v3768_v30 = vpack.c.b16 %v3742_v28, %v3741_v17  ;;  %v1226_v22 = vsel %vm5453_vm6, %v1224_v58, %v1225_v23  ;;  %v400_v5 = vmax.f32 %v5879_v18, 0.0 }
  0x54   : > { %8075 = vst [vmem:[#allocation7_spill] sm:$0xff] %v5898_v45  ;;  %v1246_v41 = vrot.slane %v5898_v45, 5  ;;  %v5913_v59 = vld [vmem:[#allocation2 + $0x60] sm:$0xe]  ;;  %v3738_v49 = vunpack.c.l.b16 %v1226_v22  ;;  %vm746_vm15 = vsmask.f32 7440 }
  0x55   : > { %673 = vst.msk [vmem:[#allocation2 + $0x6c] sm:$0xe] %vm648_vm10, %v559_v4  ;;  %v1244_v4 = vsel %vm5453_vm6, %v5152_v57, %v1243_v39  ;;  %v1245_v6 = vrot.slane %v1243_v39, 4  ;;  %v5919_v50 = vld [vmem:[#allocation2 + $0x64] sm:$0xf]  ;;  %v5154_v17 = vrot.slane %v5913_v59, 9  ;;  %3789 = vrot.lane.b32.xlu2 %v3768_v30, %s5362_s28  ;;  %vm6314_vm2 = vmor %vm745_vm14, %vm746_vm15 }
  0x56   : > { %674 = vst.msk [vmem:[#allocation2 + $0x70] sm:$0xf] %vm405_vm0, %v5755_v42  ;;  %v3743_v23 = vunpack.c.l.b16 %v1244_v4  ;;  %v5925_v28 = vld [vmem:[#allocation2 + $0x68] sm:$0x1]  ;;  %v1257_v58 = vrot.slane %v5919_v50, 5  ;;  %v577_v42 = vsel %vm5518_vm9, %v575_v16, %v576_v63  ;;  %v399_v39 = vmax.f32 %v5861_v35, 0.0 }
  0x57   : > { %675 = vst.msk [vmem:[#allocation2 + $0x74] sm:$0x1] %vm414_vm3, %v5717_v40  ;;  %v3766_v57 = vpack.c.b16 %v3738_v49, %v3737_v36  ;;  %v1247_v40 = vsel %vm5453_vm6, %v1245_v6, %v1246_v41  ;;  %v1260_v30 = vrot.slane %v5925_v28, 5  ;;  %v5937_v22 = vld [vmem:[#allocation2 + $0x54] sm:$0xe]  ;;  %vm4420_vm5 = vcmask 130048  }
  0x58   : > { %679 = vst.msk [vmem:[#allocation2 + $0x84] sm:$0xe] %vm648_vm10, %v569_v44  ;;  %v3744_v44 = vunpack.c.l.b16 %v1247_v40  ;;  %v1258_v63 = vsel %vm5453_vm6, %v5154_v17, %v1257_v58  ;;  %v1259_v16 = vrot.slane %v1257_v58, 4  ;;  %v5153_v36 = vrot.slane %v5937_v22, 9 }
  0x59   : > { %680 = vst.msk [vmem:[#allocation2 + $0x88] sm:$0xf] %vm405_vm0, %v5809_v21  ;;  %v5946_v35 = vld [vmem:[#allocation2 + $0x58] sm:$0xf]  ;;  %3785 = vrot.lane.b32.xlu1 %v3766_v57, %s5362_s28  ;;  %v3747_v6 = vunpack.c.l.b16 %v1258_v63  ;;  %v478_v49 = vpack.c.bf16 %v399_v39, %v399_v39  ;;  %vm4453_vm8 = vcmask 195584   ;;  %vm4720_vm11 = vcmask 1043456  }
  0x5a   : > { %681 = vst.msk [vmem:[#allocation2 + $0x8c] sm:$0x1] %vm414_vm3, %v5757_v53  ;;  %v5952_v41 = vld [vmem:[#allocation2 + $0x5c] sm:$0x1]  ;;  %v1250_v21 = vrot.slane %v5946_v35, 5  ;;  %v3769_v4 = vpack.c.b16 %v3744_v44, %v3743_v23  ;;  %v1261_v53 = vsel %vm5453_vm6, %v1259_v16, %v1260_v30  ;;  %vm4486_vm12 = vcmask 261120  }
  0x5b   : > { %8076 = vst [vmem:[#allocation8_spill] sm:$0xff] %v5952_v41  ;;  %v1253_v58 = vrot.slane %v5952_v41, 5  ;;  %v3748_v40 = vunpack.c.l.b16 %v1261_v53  ;;  %v584_v63 = vrot.slane %v478_v49, 7  ;;  %vm4519_vm14 = vcmask 326656  }
  0x5c   : > { %676 = vst.msk [vmem:[#allocation2 + $0x78] sm:$0xe] %vm648_vm10, %v564_v54  ;;  %v5963_v57 = vld [vmem:[#allocation2 + $0x6c] sm:$0xe]  ;;  %v1251_v32 = vsel %vm5453_vm6, %v5153_v36, %v1250_v21  ;;  %v1252_v54 = vrot.slane %v1250_v21, 4  ;;  %3791 = vrot.lane.b32.xlu0 %v3769_v4, %s5362_s28  ;;  %vm4552_vm15 = vcmask 392192  }
  0x5d   : > { %677 = vst.msk [vmem:[#allocation2 + $0x7c] sm:$0xf] %vm405_vm0, %v5816_v25  ;;  %v5969_v18 = vld [vmem:[#allocation2 + $0x70] sm:$0xf]  ;;  %v5155_v23 = vrot.slane %v5963_v57, 9  ;;  %v3745_v39 = vunpack.c.l.b16 %v1251_v32  ;;  %v479_v25 = vpack.c.bf16 %v400_v5, %v400_v5  ;;  %v3771_v16 = vpack.c.b16 %v3748_v40, %v3747_v6 }
  0x5e   : > { %678 = vst.msk [vmem:[#allocation2 + $0x80] sm:$0x1] %vm414_vm3, %v5799_v33  ;;  %v5975_v30 = vld [vmem:[#allocation2 + $0x74] sm:$0x1]  ;;  %v1264_v44 = vrot.slane %v5969_v18, 5  ;;  %v1254_v21 = vsel %vm5453_vm6, %v1252_v54, %v1253_v58  ;;  %vm4618_vm1 = vcmask 523264  }
  0x5f   : > { %8077 = vst [vmem:[#allocation9_spill] sm:$0xff] %v5975_v30  ;;  %v1267_v33 = vrot.slane %v5975_v30, 5  ;;  %v5985_v4 = vld [vmem:[#allocation2 + $0x84] sm:$0xe]  ;;  %v3746_v53 = vunpack.c.l.b16 %v1254_v21  ;;  %3795 = vrot.lane.b32.xlu2 %v3771_v16, %s5362_s28  ;;  %v586_v40 = vrot.slane %v479_v25, 7  ;;  %vm4687_vm7 = vcmask 588800  }
  0x60   : > { %682 = vst.msk [vmem:[#allocation2 + $0x90] sm:$0xe] %vm648_vm10, %v574_v20  ;;  %v1265_v10 = vsel %vm5453_vm6, %v5155_v23, %v1264_v44  ;;  %v1266_v32 = vrot.slane %v1264_v44, 4  ;;  %v5990_v20 = vld [vmem:[#allocation2 + $0x88] sm:$0xf]  ;;  %v5157_v6 = vrot.slane %v5985_v4, 9 }
  0x61   : > { %683 = vst.msk [vmem:[#allocation2 + $0x94] sm:$0xf] %vm405_vm0, %v577_v42  ;;  %v3749_v5 = vunpack.c.l.b16 %v1265_v10  ;;  %v5996_v49 = vld [vmem:[#allocation2 + $0x8c] sm:$0x1]  ;;  %v1278_v58 = vrot.slane %v5990_v20, 5  ;;  %v585_v42 = vrot.slane %v584_v63, 4  ;;  %v3770_v54 = vpack.c.b16 %v3746_v53, %v3745_v39 }
  0x62   : > { %684 = vst.msk [vmem:[#allocation2 + $0x98] sm:$0x1] %vm414_vm3, %v5904_v24  ;;  %v1268_v44 = vsel %vm5453_vm6, %v1266_v32, %v1267_v33  ;;  %v1281_v21 = vrot.slane %v5996_v49, 5 }
  0x63   : > { %v6003_v36 = vld [vmem:[#allocation2 + $0x78] sm:$0xe]  ;;  %688 = vst.msk [vmem:[#allocation2 + $0xa8] sm:$0xe] %vm648_vm10, %v584_v63  ;;  %v3750_v24 = vunpack.c.l.b16 %v1268_v44  ;;  %v1279_v16 = vsel %vm5453_vm6, %v5157_v6, %v1278_v58  ;;  %v1280_v10 = vrot.slane %v1278_v58, 4  ;;  %3793 = vrot.lane.b32.xlu1 %v3770_v54, %s5362_s28  ;;  %v587_v32 = vsel %vm5518_vm9, %v585_v42, %v586_v40 }
  0x64   : > { %v6008_v60 = vld [vmem:[#allocation2 + $0x7c] sm:$0xf]  ;;  %v5156_v39 = vrot.slane %v6003_v36, 9  ;;  %v3753_v25 = vunpack.c.l.b16 %v1279_v16  ;;  %v588_v63 = vrot.slane %v586_v40, 4  ;;  %689 = vst.msk [vmem:[#allocation2 + $0xac] sm:$0xf] %vm405_vm0, %v587_v32 }
  0x65   : > { %v6012_v53 = vld [vmem:[#allocation2 + $0x80] sm:$0x1]  ;;  %v1271_v33 = vrot.slane %v6008_v60, 5  ;;  %v3772_v44 = vpack.c.b16 %v3750_v24, %v3749_v5  ;;  %v1282_v6 = vsel %vm5453_vm6, %v1280_v10, %v1281_v21  ;;  %v366_v10 = vadd.f32 %v5443_v7, %v5907_v56 }
  0x66   : > { %8078 = vst [vmem:[#allocation10_spill] sm:$0xff] %v6012_v53  ;;  %v1274_v58 = vrot.slane %v6012_v53, 5  ;;  %v3754_v54 = vunpack.c.l.b16 %v1282_v6  ;;  %v397_v32 = vmax.f32 %v5942_v29, 0.0  ;;  %v8083_v6 = vshrl.u32 %v5449_v12, 16 }
  0x67   : > { %v6021_v17 = vld [vmem:[#allocation2 + $0x90] sm:$0xe]  ;;  %v1272_v16 = vsel %vm5453_vm6, %v5156_v39, %v1271_v33  ;;  %v1273_v37 = vrot.slane %v1271_v33, 4  ;;  %690 = vst.msk [vmem:[#allocation2 + $0xb0] sm:$0x1] %vm414_vm3, %v588_v63  ;;  %3797 = vrot.lane.b32.xlu0 %v3772_v44, %s5362_s28  ;;  %v398_v45 = vmax.f32 %v366_v10, 0.0 }
  0x68   : > { %v6026_v42 = vld [vmem:[#allocation2 + $0x94] sm:$0xf]  ;;  %v5158_v5 = vrot.slane %v6021_v17, 9  ;;  %v3751_v40 = vunpack.c.l.b16 %v1272_v16  ;;  %v3774_v33 = vpack.c.b16 %v3754_v54, %v3753_v25  ;;  %v476_v29 = vpack.c.bf16 %v397_v32, %v397_v32 }
  0x69   : > { %v6031_v21 = vld [vmem:[#allocation2 + $0x98] sm:$0x1]  ;;  %v1285_v24 = vrot.slane %v6026_v42, 5  ;;  %v5311_v39 = vld [vmem:[%s5426_s23 + $0x70] sm:$0xff]   ;;  %v1275_v23 = vsel %vm5453_vm6, %v1273_v37, %v1274_v58  ;;  %v477_v58 = vpack.c.bf16 %v398_v45, %v398_v45  ;;  %v5347_v45 = vld [vmem:[%s8026_s1] ss:$0 sm:$0xff] }
  0x6a   : > { %8079 = vst [vmem:[#allocation11_spill] sm:$0xff] %v6031_v21  ;;  %v1288_v63 = vrot.slane %v6031_v21, 5  ;;  %v3752_v44 = vunpack.c.l.b16 %v1275_v23  ;;  %v6044_v41 = vld [vmem:[#allocation2 + $0xa8] sm:$0xe]  ;;  %3801 = vrot.lane.b32.xlu2 %v3774_v33, %s5362_s28  ;;  %v5292_v25 = vunpack.c.l.bf16 %v5311_v39  ;;  %v5293_v23 = vunpack.c.h.bf16 %v5311_v39 }
  0x6b   : > { %v1286_v16 = vsel %vm5453_vm6, %v5158_v5, %v1285_v24  ;;  %v1287_v30 = vrot.slane %v1285_v24, 4  ;;  %v5160_v56 = vrot.slane %v6044_v41, 9  ;;  %v6051_v24 = vld [vmem:[#allocation2 + $0xac] sm:$0xf]  ;;  %v579_v53 = vrot.slane %v476_v29, 7 }
  0x6c   : > { %v3755_v7 = vunpack.c.l.b16 %v1286_v16  ;;  %v3773_v54 = vpack.c.b16 %v3752_v44, %v3751_v40  ;;  %v333_v10 = vmul.f32 %v5431_v1, %v5292_v25  ;;  %v1299_v32 = vrot.slane %v6051_v24, 5  ;;  %v5348_v25 = vld [vmem:[%s8027_s2] ss:$0 sm:$0xff] }
  0x6d   : > { %v1289_v37 = vsel %vm5453_vm6, %v1287_v30, %v1288_v63  ;;  %v581_v40 = vrot.slane %v477_v58, 7  ;;  %v334_v30 = vmul.f32 %v5347_v45, %v5293_v23  ;;  %v580_v44 = vrot.slane %v579_v53, 4  ;;  %685 = vst.msk [vmem:[#allocation2 + $0x9c] sm:$0xe] %vm648_vm10, %v579_v53 }
  0x6e   : > { %v3756_v5 = vunpack.c.l.b16 %v1289_v37  ;;  %3799 = vrot.lane.b32.xlu1 %v3773_v54, %s5362_s28  ;;  %v6055_v33 = vld [vmem:[#allocation2 + $0xb0] sm:$0x1]  ;;  %v1300_v1 = vsel %vm5453_vm6, %v5160_v56, %v1299_v32  ;;  %v1301_v16 = vrot.slane %v1299_v32, 4  ;;  %v369_v54 = vadd.f32 %v5348_v25, %v333_v10  ;;  %v1311_v37 = vld [vmem:[#allocation2 + $0x8] sm:$0x3] }
  0x6f   : > { %8080 = vst [vmem:[#allocation12_spill] sm:$0xff] %v6055_v33  ;;  %v1302_v63 = vrot.slane %v6055_v33, 5  ;;  %v583_v29 = vrot.slane %v581_v40, 4  ;;  %v582_v58 = vsel %vm5518_vm9, %v580_v44, %v581_v40  ;;  %v370_v23 = vadd.f32 %v5348_v25, %v334_v30 }
  0x70   : > { %v3775_v39 = vpack.c.b16 %v3756_v5, %v3755_v7  ;;  %v3759_v7 = vunpack.c.l.b16 %v1300_v1  ;;  %v8081_v53 = vshrl.u32 %v5445_v9, 16  ;;  %686 = vst.msk [vmem:[#allocation2 + $0xa0] sm:$0xf] %vm405_vm0, %v582_v58  ;;  %v401_v32 = vmax.f32 %v369_v54, 0.0 }
  0x71   : > { %v1303_v56 = vsel %vm5453_vm6, %v1301_v16, %v1302_v63  ;;  %v8082_v45 = vshll.u32 %v5445_v9, 16  ;;  %687 = vst.msk [vmem:[#allocation2 + $0xa4] sm:$0x1] %vm414_vm3, %v583_v29  ;;  %v402_v40 = vmax.f32 %v370_v23, 0.0  ;;  %v8084_v30 = vshll.u32 %v5449_v12, 16 }
  0x72   : > { %3803 = vrot.lane.b32.xlu0 %v3775_v39, %s5362_s28  ;;  %v1333_v5 = vrot.slane %v8081_v53, 5  ;;  %v1339_v39 = vrot.slane %v8083_v6, 5  ;;  %v3760_v1 = vunpack.c.l.b16 %v1303_v56  ;;  %v1345_v25 = vshrl.u32 %v1311_v37, 16  ;;  %v1313_v56 = vld [vmem:[#allocation2 + $0x20] sm:$0x3] }
  0x73   : > { %v1336_v10 = vrot.slane %v8082_v45, 6  ;;  %v1340_v44 = vrot.slane %v8084_v30, 6  ;;  %v480_v53 = vpack.c.bf16 %v401_v32, %v401_v32  ;;  %v1348_v63 = vshll.u32 %v1311_v37, 16 }
  0x74   : > { %v8085_v16 = vshrl.u32 %v5749_v11, 16  ;;  %v3777_v58 = vpack.c.b16 %v3760_v1, %v3759_v7  ;;  %v481_v9 = vpack.c.bf16 %v402_v40, %v402_v40  ;;  %v1347_v23 = vrot.slane %v1345_v25, 5  ;;  %v6091_v45 = vld [vmem:[#allocation2 + $0x9c] sm:$0xe] }
  0x75   : > { %v1337_v21 = vor.u32 %v1336_v10, %v1333_v5  ;;  %v1341_v29 = vor.u32 %v1340_v44, %v1339_v39  ;;  %v589_v30 = vrot.slane %v480_v53, 7  ;;  %v1350_v5 = vrot.slane %v1348_v63, 6 }
  0x76   : > { %v1379_v54 = vrot.slane %v8085_v16, 5  ;;  %v8088_v37 = vshll.u32 %v5749_v11, 16  ;;  %3807 = vrot.lane.b32.xlu2 %v3777_v58, %s5362_s28  ;;  %v5159_v7 = vrot.slane %v6091_v45, 9  ;;  %v591_v1 = vrot.slane %v481_v9, 7 }
  0x77   : > { %v1338_v32 = vrot.slane %v1337_v21, 4  ;;  %v1343_v40 = vrot.slane %v1341_v29, 4  ;;  %v8089_v16 = vshrl.u32 %v5761_v26, 16  ;;  %v590_v39 = vrot.slane %v589_v30, 4  ;;  %691 = vst.msk [vmem:[#allocation2 + $0xb4] sm:$0xe] %vm648_vm10, %v589_v30 }
  0x78   : > { %v1382_v10 = vrot.slane %v8088_v37, 6  ;;  %v1351_v21 = vor.u32 %v1350_v5, %v1347_v23  ;;  %v6103_v53 = vld [vmem:[#allocation2 + $0xa0] sm:$0xf]  ;;  %v593_v63 = vrot.slane %v591_v1, 4  ;;  %v8090_v58 = vshll.u32 %v5761_v26, 16 }
  0x79   : > { %v1385_v38 = vrot.slane %v8089_v16, 5  ;;  %v1342_v44 = vsel %vm6087_vm13, %v1338_v32, %v1341_v29  ;;  %v1391_v37 = vshrl.u32 %v1313_v56, 16  ;;  %v6107_v8 = vld [vmem:[#allocation2 + $0xa4] sm:$0x1]  ;;  %v1292_v16 = vrot.slane %v6103_v53, 5 }
  0x7a   : > { %v1383_v25 = vor.u32 %v1382_v10, %v1379_v54  ;;  %v1386_v9 = vrot.slane %v8090_v58, 6  ;;  %8091 = vst [vmem:[#allocation13_spill] sm:$0xff] %v6107_v8  ;;  %v592_v30 = vsel %vm5518_vm9, %v590_v39, %v591_v1  ;;  %v1352_v29 = vsel %vm6087_vm13, %v1343_v40, %v1351_v21 }
  0x7b   : > { %v1295_v32 = vrot.slane %v6107_v8, 5  ;;  %692 = vst.msk [vmem:[#allocation2 + $0xb8] sm:$0xf] %vm405_vm0, %v592_v30  ;;  %v3811_v5 = vunpack.c.l.b16 %v1342_v44  ;;  %v1293_v58 = vsel %vm5453_vm6, %v5159_v7, %v1292_v16  ;;  %v1294_v11 = vrot.slane %v1292_v16, 4 }
  0x7c   : > { %v1384_v54 = vrot.slane %v1383_v25, 4  ;;  %v1387_v10 = vor.u32 %v1386_v9, %v1385_v38  ;;  %693 = vst.msk [vmem:[#allocation2 + $0xbc] sm:$0x1] %vm414_vm3, %v593_v63  ;;  %v1393_v62 = vrot.slane %v1391_v37, 5  ;;  %v1394_v1 = vshll.u32 %v1313_v56, 16 }
  0x7d   : > { %v3757_v39 = vunpack.c.l.b16 %v1293_v58  ;;  %v3812_v33 = vunpack.c.l.b16 %v1352_v29  ;;  %v1312_v25 = vld [vmem:[#allocation2 + $0x14] sm:$0x3]  ;;  %v1296_v30 = vsel %vm5453_vm6, %v1294_v11, %v1295_v32  ;;  %v8045_v9 = vshll.u32 %v5793_v48, 16 }
  0x7e   : > { %v1388_v40 = vsel %vm6087_vm13, %v1384_v54, %v1387_v10  ;;  %v1389_v21 = vrot.slane %v1387_v10, 4  ;;  %v1396_v44 = vrot.slane %v1394_v1, 6  ;;  %v3758_v7 = vunpack.c.l.b16 %v1296_v30  ;;  %v1147_v16 = vld [vmem:[#allocation2 + $0xb4] sm:$0xe] }
  0x7f   : > { %v3815_v38 = vunpack.c.l.b16 %v1388_v40  ;;  %v8044_v63 = vshrl.u32 %v5793_v48, 16  ;;  %v1354_v56 = vshrl.u32 %v5783_v27, 16  ;;  %v1357_v37 = vshll.u32 %v5783_v27, 16 }
  0x80   : > { %v5161_v29 = vrot.slane %v1147_v16, 9  ;;  %v1397_v58 = vor.u32 %v1396_v44, %v1393_v62  ;;  %v1363_v54 = vrot.slane %v8045_v9, 6  ;;  %v1368_v10 = vshrl.u32 %v1312_v25, 16 }
  0x81   : > { %v3776_v23 = vpack.c.b16 %v3758_v7, %v3757_v39  ;;  %v1356_v11 = vrot.slane %v1354_v56, 5  ;;  %v1359_v32 = vrot.slane %v1357_v37, 6  ;;  %v1362_v1 = vrot.slane %v8044_v63, 5 }
  0x82   : > { %v6132_v40 = vld [vmem:[#allocation2 + $0xb8] sm:$0xf]  ;;  %v3843_v30 = vpack.c.b16 %v3812_v33, %v3811_v5  ;;  %v1398_v8 = vsel %vm6087_vm13, %v1389_v21, %v1397_v58  ;;  %v1370_v46 = vrot.slane %v1368_v10, 5  ;;  %v1371_v27 = vshll.u32 %v1312_v25, 16 }
  0x83   : > { %8092 = vst [vmem:[#allocation14_spill] sm:$0xff] %v6132_v40  ;;  %3805 = vrot.lane.b32.xlu1 %v3776_v23, %s5362_s28  ;;  %v6137_v62 = vld [vmem:[#allocation2 + $0xbc] sm:$0x1]  ;;  %v1306_v44 = vrot.slane %v6132_v40, 5  ;;  %v3816_v39 = vunpack.c.l.b16 %v1398_v8  ;;  %v1360_v7 = vor.u32 %v1359_v32, %v1356_v11  ;;  %v8047_v16 = vshll.u32 %v5865_v2, 16 }
  0x84   : > { %v1309_v37 = vrot.slane %v6137_v62, 5  ;;  %v1364_v33 = vor.u32 %v1363_v54, %v1362_v1  ;;  %v1373_v5 = vrot.slane %v1371_v27, 6  ;;  %v8046_v8 = vshrl.u32 %v5865_v2, 16  ;;  %v1314_v54 = vld [vmem:[#allocation2 + $0x2c] sm:$0x3] }
  0x85   : > { %v1307_v21 = vsel %vm5453_vm6, %v5161_v29, %v1306_v44  ;;  %v1308_v25 = vrot.slane %v1306_v44, 4  ;;  %v6145_v58 = vpack.c.b16 %v3816_v39, %v3815_v38  ;;  %v1361_v23 = vrot.slane %v1360_v7, 4 }
  0x86   : > { %v3761_v10 = vunpack.c.l.b16 %v1307_v21  ;;  %v1366_v63 = vrot.slane %v1364_v33, 4  ;;  %v1374_v9 = vor.u32 %v1373_v5, %v1370_v46  ;;  %v1400_v1 = vshrl.u32 %v5856_v55, 16 }
  0x87   : > { %v1310_v11 = vsel %vm5453_vm6, %v1308_v25, %v1309_v37  ;;  %v1365_v32 = vsel %vm6087_vm13, %v1361_v23, %v1364_v33  ;;  %v1403_v29 = vshll.u32 %v5856_v55, 16  ;;  %v1408_v46 = vrot.slane %v8046_v8, 5 }
  0x88   : > { %v3762_v27 = vunpack.c.l.b16 %v1310_v11  ;;  %v1375_v38 = vsel %vm6087_vm13, %v1366_v63, %v1374_v9  ;;  %v3813_v44 = vunpack.c.l.b16 %v1365_v32  ;;  %v1402_v7 = vrot.slane %v1400_v1, 5  ;;  %v1316_v32 = vld [vmem:[#allocation2 + $0x44] sm:$0x3] }
  0x89   : > { %v3814_v39 = vunpack.c.l.b16 %v1375_v38  ;;  %v1405_v5 = vrot.slane %v1403_v29, 6  ;;  %v1409_v37 = vrot.slane %v8047_v16, 6  ;;  %v1414_v21 = vshrl.u32 %v1314_v54, 16 }
  0x8a   : > { %v3778_v33 = vpack.c.b16 %v3762_v27, %v3761_v10  ;;  %v1417_v25 = vshll.u32 %v1314_v54, 16  ;;  %v8049_v23 = vshll.u32 %v5840_v34, 16  ;;  %v8048_v11 = vshrl.u32 %v5840_v34, 16 }
  0x8b   : > { %3859 = vrot.lane.b32.xlu1 %v3843_v30, %s5363_s8  ;;  %v3844_v55 = vpack.c.b16 %v3814_v39, %v3813_v44  ;;  %v1406_v9 = vor.u32 %v1405_v5, %v1402_v7  ;;  %v1410_v63 = vor.u32 %v1409_v37, %v1408_v46  ;;  %v1416_v1 = vrot.slane %v1414_v21, 5 }
  0x8c   : > { %3809 = vrot.lane.b32.xlu0 %v3778_v33, %s5362_s28  ;;  %v1419_v29 = vrot.slane %v1417_v25, 6  ;;  %v1446_v38 = vshrl.u32 %v5828_v14, 16  ;;  %v1449_v10 = vshll.u32 %v5828_v14, 16  ;;  %v1454_v30 = vrot.slane %v8048_v11, 5  ;;  %v1315_v14 = vld [vmem:[#allocation2 + $0x38] sm:$0x3] }
  0x8d   : > { %3861 = vrot.lane.b32.xlu2 %v3844_v55, %s5363_s8  ;;  %v1407_v54 = vrot.slane %v1406_v9, 4  ;;  %v1412_v27 = vrot.slane %v1410_v63, 4  ;;  %v1455_v44 = vrot.slane %v8049_v23, 6  ;;  %v1460_v5 = vshrl.u32 %v1316_v32, 16 }
  0x8e   : > { %v1420_v46 = vor.u32 %v1419_v29, %v1416_v1  ;;  %v1448_v39 = vrot.slane %v1446_v38, 5  ;;  %v1451_v7 = vrot.slane %v1449_v10, 6  ;;  %v1463_v21 = vshll.u32 %v1316_v32, 16 }
  0x8f   : > { %v1411_v37 = vsel %vm6087_vm13, %v1407_v54, %v1410_v63  ;;  %v1456_v33 = vor.u32 %v1455_v44, %v1454_v30  ;;  %v8093_v25 = vshrl.u32 %v5713_v43, 16  ;;  %v1462_v16 = vrot.slane %v1460_v5, 5 }
  0x90   : > { %v1421_v9 = vsel %vm6087_vm13, %v1412_v27, %v1420_v46  ;;  %v3817_v56 = vunpack.c.l.b16 %v1411_v37  ;;  %v1452_v8 = vor.u32 %v1451_v7, %v1448_v39  ;;  %v1465_v29 = vrot.slane %v1463_v21, 6 }
  0x91   : > { %v1425_v55 = vrot.slane %v8093_v25, 5  ;;  %v3818_v11 = vunpack.c.l.b16 %v1421_v9  ;;  %v1458_v1 = vrot.slane %v1456_v33, 4  ;;  %v8094_v38 = vshll.u32 %v5713_v43, 16 }
  0x92   : > { %v1453_v23 = vrot.slane %v1452_v8, 4  ;;  %v8095_v63 = vshrl.u32 %v5722_v47, 16  ;;  %v8096_v54 = vshll.u32 %v5722_v47, 16  ;;  %v1437_v44 = vshrl.u32 %v1315_v14, 16 }
  0x93   : > { %v1428_v10 = vrot.slane %v8094_v38, 6  ;;  %v3846_v25 = vpack.c.b16 %v3818_v11, %v3817_v56  ;;  %v1466_v40 = vor.u32 %v1465_v29, %v1462_v16  ;;  %v1440_v46 = vshll.u32 %v1315_v14, 16 }
  0x94   : > { %v1431_v32 = vrot.slane %v8095_v63, 5  ;;  %v1432_v30 = vrot.slane %v8096_v54, 6  ;;  %3863 = vrot.lane.b32.xlu0 %v6145_v58, %s5363_s8  ;;  %v1457_v39 = vsel %vm6087_vm13, %v1453_v23, %v1456_v33  ;;  %v1439_v7 = vrot.slane %v1437_v44, 5  ;;  %v1317_v58 = vld [vmem:[#allocation2 + $0x50] sm:$0x3] }
  0x95   : > { %v1429_v27 = vor.u32 %v1428_v10, %v1425_v55  ;;  %v8063_v8 = vshll.u32 %v5893_v51, 16  ;;  %3865 = vrot.lane.b32.xlu1 %v3846_v25, %s5363_s8  ;;  %v1467_v5 = vsel %vm6087_vm13, %v1458_v1, %v1466_v40  ;;  %v3821_v37 = vunpack.c.l.b16 %v1457_v39 }
  0x96   : > { %v1433_v43 = vor.u32 %v1432_v30, %v1431_v32  ;;  %v1442_v16 = vrot.slane %v1440_v46, 6  ;;  %v3822_v11 = vunpack.c.l.b16 %v1467_v5  ;;  %v8062_v14 = vshrl.u32 %v5893_v51, 16 }
  0x97   : > { %v1430_v56 = vrot.slane %v1429_v27, 4  ;;  %v1469_v55 = vshrl.u32 %v5886_v52, 16  ;;  %v1472_v9 = vshll.u32 %v5886_v52, 16  ;;  %v1478_v29 = vrot.slane %v8063_v8, 6 }
  0x98   : > { %v1435_v21 = vrot.slane %v1433_v43, 4  ;;  %v1443_v33 = vor.u32 %v1442_v16, %v1439_v7  ;;  %v3848_v40 = vpack.c.b16 %v3822_v11, %v3821_v37  ;;  %v1477_v10 = vrot.slane %v8062_v14, 5  ;;  %v1319_v7 = vld [vmem:[#allocation2 + $0x68] sm:$0x3] }
  0x99   : > { %v1434_v23 = vsel %vm6087_vm13, %v1430_v56, %v1433_v43  ;;  %v1471_v38 = vrot.slane %v1469_v55, 5  ;;  %v1474_v32 = vrot.slane %v1472_v9, 6  ;;  %v1483_v54 = vshrl.u32 %v1317_v58, 16 }
  0x9a   : > { %v3819_v1 = vunpack.c.l.b16 %v1434_v23  ;;  %v1444_v63 = vsel %vm6087_vm13, %v1435_v21, %v1443_v33  ;;  %v1486_v30 = vshll.u32 %v1317_v58, 16  ;;  %v1479_v25 = vor.u32 %v1478_v29, %v1477_v10 }
  0x9b   : > { %v3820_v44 = vunpack.c.l.b16 %v1444_v63  ;;  %v950_v27 = vshll.u32 %v5919_v50, 16  ;;  %v954_v52 = vshrl.u32 %v5919_v50, 16  ;;  %v1475_v46 = vor.u32 %v1474_v32, %v1471_v38 }
  0x9c   : > { %v1485_v39 = vrot.slane %v1483_v54, 5  ;;  %v1488_v43 = vrot.slane %v1486_v30, 6  ;;  %v1515_v5 = vshrl.u32 %v5913_v59, 16  ;;  %3869 = vrot.lane.b32.xlu0 %v3848_v40, %s5363_s8  ;;  %v1481_v56 = vrot.slane %v1479_v25, 4 }
  0x9d   : > { %v3847_v37 = vpack.c.b16 %v3820_v44, %v3819_v1  ;;  %v1518_v16 = vshll.u32 %v5913_v59, 16  ;;  %v1523_v11 = vrot.slane %v954_v52, 5  ;;  %v1476_v21 = vrot.slane %v1475_v46, 4  ;;  %v1318_v44 = vld [vmem:[#allocation2 + $0x5c] sm:$0x3] }
  0x9e   : > { %v1489_v58 = vor.u32 %v1488_v43, %v1485_v39  ;;  %v1517_v55 = vrot.slane %v1515_v5, 5  ;;  %v1524_v23 = vrot.slane %v950_v27, 6  ;;  %v1529_v9 = vshrl.u32 %v1319_v7, 16 }
  0x9f   : > { %3867 = vrot.lane.b32.xlu2 %v3847_v37, %s5363_s8  ;;  %v1520_v33 = vrot.slane %v1518_v16, 6  ;;  %v1532_v29 = vshll.u32 %v1319_v7, 16  ;;  %v8061_v40 = vshll.u32 %v5946_v35, 16  ;;  %v1480_v1 = vsel %vm6087_vm13, %v1476_v21, %v1479_v25 }
  0xa0   : > { %v1490_v59 = vsel %vm6087_vm13, %v1481_v56, %v1489_v58  ;;  %v1525_v38 = vor.u32 %v1524_v23, %v1523_v11  ;;  %v8060_v10 = vshrl.u32 %v5946_v35, 16  ;;  %v3823_v63 = vunpack.c.l.b16 %v1480_v1 }
  0xa1   : > { %v3824_v32 = vunpack.c.l.b16 %v1490_v59  ;;  %v1521_v54 = vor.u32 %v1520_v33, %v1517_v55  ;;  %v1531_v30 = vrot.slane %v1529_v9, 5  ;;  %v1534_v39 = vrot.slane %v1532_v29, 6 }
  0xa2   : > { %v1527_v46 = vrot.slane %v1525_v38, 4  ;;  %v1492_v43 = vshrl.u32 %v5937_v22, 16  ;;  %v1495_v7 = vshll.u32 %v5937_v22, 16  ;;  %v1500_v25 = vrot.slane %v8060_v10, 5 }
  0xa3   : > { %v3849_v5 = vpack.c.b16 %v3824_v32, %v3823_v63  ;;  %v1522_v37 = vrot.slane %v1521_v54, 4  ;;  %v1501_v56 = vrot.slane %v8061_v40, 6  ;;  %v1535_v16 = vor.u32 %v1534_v39, %v1531_v30  ;;  %v1320_v63 = vld [vmem:[#allocation2 + $0x74] sm:$0x3] }
  0xa4   : > { %v1494_v11 = vrot.slane %v1492_v43, 5  ;;  %v1497_v21 = vrot.slane %v1495_v7, 6  ;;  %v1506_v58 = vshrl.u32 %v1318_v44, 16  ;;  %v1509_v33 = vshll.u32 %v1318_v44, 16 }
  0xa5   : > { %3871 = vrot.lane.b32.xlu1 %v3849_v5, %s5363_s8  ;;  %v1526_v55 = vsel %vm6087_vm13, %v1522_v37, %v1525_v38  ;;  %v1502_v23 = vor.u32 %v1501_v56, %v1500_v25  ;;  %v8059_v22 = vshll.u32 %v5969_v18, 16  ;;  %v1536_v9 = vsel %vm6087_vm13, %v1527_v46, %v1535_v16 }
  0xa6   : > { %v3827_v29 = vunpack.c.l.b16 %v1526_v55  ;;  %v1498_v1 = vor.u32 %v1497_v21, %v1494_v11  ;;  %v1508_v59 = vrot.slane %v1506_v58, 5  ;;  %v3828_v32 = vunpack.c.l.b16 %v1536_v9 }
  0xa7   : > { %v1504_v54 = vrot.slane %v1502_v23, 4  ;;  %v1511_v30 = vrot.slane %v1509_v33, 6  ;;  %v8052_v39 = vshrl.u32 %v5969_v18, 16  ;;  %v1538_v7 = vshrl.u32 %v5963_v57, 16 }
  0xa8   : > { %v1499_v43 = vrot.slane %v1498_v1, 4  ;;  %v1541_v38 = vshll.u32 %v5963_v57, 16  ;;  %v1547_v44 = vrot.slane %v8059_v22, 6  ;;  %v3851_v5 = vpack.c.b16 %v3828_v32, %v3827_v29  ;;  %v1322_v32 = vld [vmem:[#allocation2 + $0x8c] sm:$0x3] }
  0xa9   : > { %v1512_v37 = vor.u32 %v1511_v30, %v1508_v59  ;;  %v1546_v46 = vrot.slane %v8052_v39, 5  ;;  %v1552_v25 = vshrl.u32 %v1320_v63, 16  ;;  %v1540_v16 = vrot.slane %v1538_v7, 5 }
  0xaa   : > { %v1503_v56 = vsel %vm6087_vm13, %v1499_v43, %v1502_v23  ;;  %v1543_v11 = vrot.slane %v1541_v38, 6  ;;  %v1555_v21 = vshll.u32 %v1320_v63, 16  ;;  %3875 = vrot.lane.b32.xlu0 %v3851_v5, %s5363_s8  ;;  %v1022_v59 = vshll.u32 %v5990_v20, 16 }
  0xab   : > { %v1513_v57 = vsel %vm6087_vm13, %v1504_v54, %v1512_v37  ;;  %v3825_v58 = vunpack.c.l.b16 %v1503_v56  ;;  %v1548_v55 = vor.u32 %v1547_v44, %v1546_v46  ;;  %v1554_v33 = vrot.slane %v1552_v25, 5 }
  0xac   : > { %v3826_v9 = vunpack.c.l.b16 %v1513_v57  ;;  %v1544_v29 = vor.u32 %v1543_v11, %v1540_v16  ;;  %v1557_v1 = vrot.slane %v1555_v21, 6  ;;  %v1026_v23 = vshrl.u32 %v5990_v20, 16 }
  0xad   : > { %v1550_v30 = vrot.slane %v1548_v55, 4  ;;  %v1584_v43 = vshrl.u32 %v5985_v4, 16  ;;  %v1587_v63 = vshll.u32 %v5985_v4, 16  ;;  %v1593_v54 = vrot.slane %v1022_v59, 6 }
  0xae   : > { %v3850_v7 = vpack.c.b16 %v3826_v9, %v3825_v58  ;;  %v1545_v38 = vrot.slane %v1544_v29, 4  ;;  %v1558_v5 = vor.u32 %v1557_v1, %v1554_v33  ;;  %v1592_v46 = vrot.slane %v1026_v23, 5 }
  0xaf   : > { %v1586_v44 = vrot.slane %v1584_v43, 5  ;;  %v1589_v37 = vrot.slane %v1587_v63, 6  ;;  %v1598_v25 = vshrl.u32 %v1322_v32, 16  ;;  %v1601_v16 = vshll.u32 %v1322_v32, 16  ;;  %v1321_v43 = vld [vmem:[#allocation2 + $0x80] sm:$0x3] }
  0xb0   : > { %3873 = vrot.lane.b32.xlu2 %v3850_v7, %s5363_s8  ;;  %v1549_v56 = vsel %vm6087_vm13, %v1545_v38, %v1548_v55  ;;  %v1559_v4 = vsel %vm6087_vm13, %v1550_v30, %v1558_v5  ;;  %v8058_v11 = vshll.u32 %v6008_v60, 16  ;;  %v1594_v33 = vor.u32 %v1593_v54, %v1592_v46 }
  0xb1   : > { %v3829_v21 = vunpack.c.l.b16 %v1549_v56  ;;  %v3830_v57 = vunpack.c.l.b16 %v1559_v4  ;;  %v1590_v58 = vor.u32 %v1589_v37, %v1586_v44  ;;  %v1600_v9 = vrot.slane %v1598_v25, 5 }
  0xb2   : > { %v1603_v29 = vrot.slane %v1601_v16, 6  ;;  %v8053_v1 = vshrl.u32 %v6008_v60, 16  ;;  %v1561_v63 = vshrl.u32 %v6003_v36, 16  ;;  %v1596_v55 = vrot.slane %v1594_v33, 4 }
  0xb3   : > { %v3852_v7 = vpack.c.b16 %v3830_v57, %v3829_v21  ;;  %v1591_v39 = vrot.slane %v1590_v58, 4  ;;  %v1564_v38 = vshll.u32 %v6003_v36, 16  ;;  %v1570_v54 = vrot.slane %v8058_v11, 6 }
  0xb4   : > { %v1604_v30 = vor.u32 %v1603_v29, %v1600_v9  ;;  %v1563_v32 = vrot.slane %v1561_v63, 5  ;;  %v1569_v5 = vrot.slane %v8053_v1, 5  ;;  %v1575_v46 = vshrl.u32 %v1321_v43, 16  ;;  %v1323_v29 = vld [vmem:[#allocation2 + $0x98] sm:$0x3] }
  0xb5   : > { %3877 = vrot.lane.b32.xlu1 %v3852_v7, %s5363_s8  ;;  %v1595_v44 = vsel %vm6087_vm13, %v1591_v39, %v1594_v33  ;;  %v1566_v37 = vrot.slane %v1564_v38, 6  ;;  %v1578_v25 = vshll.u32 %v1321_v43, 16  ;;  %v8055_v16 = vshll.u32 %v6026_v42, 16 }
  0xb6   : > { %v1605_v56 = vsel %vm6087_vm13, %v1596_v55, %v1604_v30  ;;  %v3833_v36 = vunpack.c.l.b16 %v1595_v44  ;;  %v1571_v4 = vor.u32 %v1570_v54, %v1569_v5  ;;  %v1577_v58 = vrot.slane %v1575_v46, 5 }
  0xb7   : > { %v3834_v21 = vunpack.c.l.b16 %v1605_v56  ;;  %v1567_v57 = vor.u32 %v1566_v37, %v1563_v32  ;;  %v1580_v9 = vrot.slane %v1578_v25, 6  ;;  %v8054_v7 = vshrl.u32 %v6026_v42, 16 }
  0xb8   : > { %v1573_v63 = vrot.slane %v1571_v4, 4  ;;  %v1607_v39 = vshrl.u32 %v6021_v17, 16  ;;  %v1610_v33 = vshll.u32 %v6021_v17, 16  ;;  %v1616_v55 = vrot.slane %v8055_v16, 6 }
  0xb9   : > { %v3854_v43 = vpack.c.b16 %v3834_v21, %v3833_v36  ;;  %v1568_v38 = vrot.slane %v1567_v57, 4  ;;  %v1581_v1 = vor.u32 %v1580_v9, %v1577_v58  ;;  %v1615_v32 = vrot.slane %v8054_v7, 5 }
  0xba   : > { %v1609_v30 = vrot.slane %v1607_v39, 5  ;;  %v1612_v5 = vrot.slane %v1610_v33, 6  ;;  %v1621_v54 = vshrl.u32 %v1323_v29, 16  ;;  %v1624_v37 = vshll.u32 %v1323_v29, 16  ;;  %v1325_v39 = vld [vmem:[#allocation2 + $0xb0] sm:$0x3] }
  0xbb   : > { %3881 = vrot.lane.b32.xlu0 %v3854_v43, %s5363_s8  ;;  %v1572_v44 = vsel %vm6087_vm13, %v1568_v38, %v1571_v4  ;;  %v1582_v17 = vsel %vm6087_vm13, %v1573_v63, %v1581_v1  ;;  %v1094_v46 = vshll.u32 %v6051_v24, 16  ;;  %v1617_v21 = vor.u32 %v1616_v55, %v1615_v32 }
  0xbc   : > { %v3831_v25 = vunpack.c.l.b16 %v1572_v44  ;;  %v3832_v56 = vunpack.c.l.b16 %v1582_v17  ;;  %v1613_v36 = vor.u32 %v1612_v5, %v1609_v30  ;;  %v1623_v57 = vrot.slane %v1621_v54, 5 }
  0xbd   : > { %v1626_v58 = vrot.slane %v1624_v37, 6  ;;  %v8064_v9 = vshrl.u32 %v6051_v24, 16  ;;  %v1653_v33 = vshrl.u32 %v6044_v41, 16  ;;  %v1619_v4 = vrot.slane %v1617_v21, 4 }
  0xbe   : > { %v3853_v43 = vpack.c.b16 %v3832_v56, %v3831_v25  ;;  %v1614_v7 = vrot.slane %v1613_v36, 4  ;;  %v1656_v38 = vshll.u32 %v6044_v41, 16  ;;  %v1662_v55 = vrot.slane %v1094_v46, 6 }
  0xbf   : > { %v1627_v1 = vor.u32 %v1626_v58, %v1623_v57  ;;  %v1655_v29 = vrot.slane %v1653_v33, 5  ;;  %v1661_v63 = vrot.slane %v8064_v9, 5  ;;  %v1667_v32 = vshrl.u32 %v1325_v39, 16  ;;  %v1324_v58 = vld [vmem:[#allocation2 + $0xa4] sm:$0x3] }
  0xc0   : > { %3879 = vrot.lane.b32.xlu2 %v3853_v43, %s5363_s8  ;;  %v1618_v30 = vsel %vm6087_vm13, %v1614_v7, %v1617_v21  ;;  %v1658_v5 = vrot.slane %v1656_v38, 6  ;;  %v1670_v54 = vshll.u32 %v1325_v39, 16  ;;  %v8057_v37 = vshll.u32 %v6103_v53, 16 }
  0xc1   : > { %v1628_v44 = vsel %vm6087_vm13, %v1619_v4, %v1627_v1  ;;  %v3835_v41 = vunpack.c.l.b16 %v1618_v30  ;;  %v1663_v17 = vor.u32 %v1662_v55, %v1661_v63  ;;  %v1669_v36 = vrot.slane %v1667_v32, 5  ;;  %v1698_v30 = vld [vmem:[#allocation2 + $0xc] sm:$0xf] }
  0xc2   : > { %v3836_v25 = vunpack.c.l.b16 %v1628_v44  ;;  %v1659_v56 = vor.u32 %v1658_v5, %v1655_v29  ;;  %v1672_v57 = vrot.slane %v1670_v54, 6  ;;  %v8056_v43 = vshrl.u32 %v6103_v53, 16 }
  0xc3   : > { %v1665_v33 = vrot.slane %v1663_v17, 4  ;;  %v1630_v7 = vshrl.u32 %v6091_v45, 16  ;;  %v1633_v21 = vshll.u32 %v6091_v45, 16  ;;  %v1639_v4 = vrot.slane %v8057_v37, 6 }
  0xc4   : > { %v3855_v39 = vpack.c.b16 %v3836_v25, %v3835_v41  ;;  %v1660_v38 = vrot.slane %v1659_v56, 4  ;;  %v1673_v16 = vor.u32 %v1672_v57, %v1669_v36  ;;  %v1638_v29 = vrot.slane %v8056_v43, 5  ;;  %v1699_v56 = vld [vmem:[#allocation2 + $0x10] sm:$0xf]  ;;  %v1700_v36 = vld [vmem:[#allocation2 + $0x14] sm:$0x1] }
  0xc5   : > { %v1632_v1 = vrot.slane %v1630_v7, 5  ;;  %v1635_v63 = vrot.slane %v1633_v21, 6  ;;  %v1644_v55 = vshrl.u32 %v1324_v58, 16  ;;  %v1647_v32 = vshll.u32 %v1324_v58, 16  ;;  %v2130_v58 = vld [vmem:[#allocation2 + $0xc] sm:$0xe] }
  0xc6   : > { %3883 = vrot.lane.b32.xlu1 %v3855_v39, %s5363_s8  ;;  %v1664_v5 = vsel %vm6087_vm13, %v1660_v38, %v1663_v17  ;;  %v1674_v45 = vsel %vm6087_vm13, %v1665_v33, %v1673_v16  ;;  %v1640_v25 = vor.u32 %v1639_v4, %v1638_v29  ;;  %v1747_v21 = vshrl.u32 %v1698_v30, 16 }
  0xc7   : > { %v3839_v54 = vunpack.c.l.b16 %v1664_v5  ;;  %v3840_v44 = vunpack.c.l.b16 %v1674_v45  ;;  %v1636_v41 = vor.u32 %v1635_v63, %v1632_v1  ;;  %v1646_v57 = vrot.slane %v1644_v55, 5 }
  0xc8   : > { %v1649_v7 = vrot.slane %v1647_v32, 6  ;;  %v1642_v37 = vrot.slane %v1640_v25, 4  ;;  %v1750_v11 = vshll.u32 %v1698_v30, 16  ;;  %v1749_v38 = vrot.slane %v1747_v21, 4 }
  0xc9   : > { %v3857_v43 = vpack.c.b16 %v3840_v44, %v3839_v54  ;;  %v1637_v39 = vrot.slane %v1636_v41, 4  ;;  %v1756_v22 = vshll.u32 %v1699_v56, 16  ;;  %v1760_v16 = vshrl.u32 %v1699_v56, 16 }
  0xca   : > { %v1650_v17 = vor.u32 %v1649_v7, %v1646_v57  ;;  %v1752_v4 = vrot.slane %v1750_v11, 5  ;;  %v1766_v1 = vshll.u32 %v1700_v36, 16  ;;  %v5162_v63 = vrot.slane %v2130_v58, 9 }
  0xcb   : > { %3887 = vrot.lane.b32.xlu0 %v3857_v43, %s5363_s8  ;;  %v1641_v33 = vsel %vm6087_vm13, %v1637_v39, %v1640_v25  ;;  %v1758_v5 = vrot.slane %v1756_v22, 5  ;;  %v1762_v45 = vrot.slane %v1760_v16, 4  ;;  %v2196_v44 = vrot.slane %v1699_v56, 5 }
  0xcc   : > { %v1651_v29 = vsel %vm6087_vm13, %v1642_v37, %v1650_v17  ;;  %v3837_v55 = vunpack.c.l.b16 %v1641_v33  ;;  %v1753_v32 = vor.u32 %v1752_v4, %v1749_v38  ;;  %v1768_v54 = vrot.slane %v1766_v1, 5  ;;  %v2306_v33 = vld [vmem:[#allocation2 + $0x14] sm:$0x3] }
  0xcd   : > { %v3838_v30 = vunpack.c.l.b16 %v1651_v29  ;;  %v1763_v41 = vor.u32 %v1762_v45, %v1758_v5  ;;  %v2199_v11 = vrot.slane %v1700_v36, 5  ;;  %v2323_v25 = vshrl.u32 %v2130_v58, 16 }
  0xce   : > { %v2326_v57 = vshll.u32 %v2130_v58, 16  ;;  %v1754_v21 = vrot.slane %v1753_v32, 4  ;;  %v2197_v37 = vsel %vm5453_vm6, %v5162_v63, %v2196_v44  ;;  %v2198_v39 = vrot.slane %v2196_v44, 4 }
  0xcf   : > { %v3856_v7 = vpack.c.b16 %v3838_v30, %v3837_v55  ;;  %v1764_v17 = vrot.slane %v1763_v41, 4  ;;  %v3971_v38 = vunpack.c.l.b16 %v2197_v37  ;;  %v2325_v56 = vrot.slane %v2323_v25, 5  ;;  %v2691_v55 = vld [vmem:[#allocation2 + $0x18] sm:$0xf] }
  0xd0   : > { %v2328_v4 = vrot.slane %v2326_v57, 6  ;;  %v1759_v1 = vsel %vm6314_vm2, %v1754_v21, %v1758_v5  ;;  %v2200_v36 = vsel %vm5453_vm6, %v2198_v39, %v2199_v11  ;;  %v2331_v58 = vrot.slane %v1760_v16, 5  ;;  %v2693_v5 = vld [vmem:[#allocation2 + $0x20] sm:$0x1] }
  0xd1   : > { %3885 = vrot.lane.b32.xlu2 %v3856_v7, %s5363_s8  ;;  %v2332_v29 = vrot.slane %v1756_v22, 6  ;;  %v1769_v63 = vsel %vm6314_vm2, %v1764_v17, %v1768_v54  ;;  %v3891_v45 = vunpack.c.l.b16 %v1759_v1  ;;  %v3972_v30 = vunpack.c.l.b16 %v2200_v36  ;;  %v2692_v7 = vld [vmem:[#allocation2 + $0x1c] sm:$0xf] }
  0xd2   : > { %v2329_v32 = vor.u32 %v2328_v4, %v2325_v56  ;;  %v3892_v44 = vunpack.c.l.b16 %v1769_v63  ;;  %v2337_v25 = vshrl.u32 %v2306_v33, 16  ;;  %v2340_v57 = vshll.u32 %v2306_v33, 16 }
  0xd3   : > { %v2333_v41 = vor.u32 %v2332_v29, %v2331_v58  ;;  %v4003_v37 = vpack.c.b16 %v3972_v30, %v3971_v38  ;;  %v2740_v21 = vshrl.u32 %v2691_v55, 16  ;;  %v2743_v40 = vshll.u32 %v2691_v55, 16  ;;  %v3123_v58 = vld [vmem:[#allocation2 + $0x18] sm:$0xe] }
  0xd4   : > { %v2330_v10 = vrot.slane %v2329_v32, 4  ;;  %v3923_v11 = vpack.c.b16 %v3892_v44, %v3891_v45  ;;  %v2339_v22 = vrot.slane %v2337_v25, 5  ;;  %v2342_v39 = vrot.slane %v2340_v57, 6 }
  0xd5   : > { %v2335_v16 = vrot.slane %v2333_v41, 4  ;;  %v2742_v17 = vrot.slane %v2740_v21, 4  ;;  %v2745_v1 = vrot.slane %v2743_v40, 5  ;;  %v2749_v56 = vshll.u32 %v2692_v7, 16 }
  0xd6   : > { %v2334_v54 = vsel %vm6087_vm13, %v2330_v10, %v2333_v41  ;;  %3939 = vrot.lane.b32.xlu1 %v3923_v11, %s5364_s9  ;;  %v2343_v33 = vor.u32 %v2342_v39, %v2339_v22  ;;  %v2753_v38 = vshrl.u32 %v2692_v7, 16  ;;  %v2759_v36 = vshll.u32 %v2693_v5, 16  ;;  %v3299_v22 = vld [vmem:[#allocation2 + $0x20] sm:$0x3] }
  0xd7   : > { %v4051_v4 = vunpack.c.l.b16 %v2334_v54  ;;  %v2746_v29 = vor.u32 %v2745_v1, %v2742_v17  ;;  %v2751_v55 = vrot.slane %v2749_v56, 5  ;;  %v5178_v63 = vrot.slane %v3123_v58, 9 }
  0xd8   : > { %v3189_v45 = vrot.slane %v2692_v7, 5  ;;  %v2344_v10 = vsel %vm6087_vm13, %v2335_v16, %v2343_v33  ;;  %v2755_v40 = vrot.slane %v2753_v38, 4  ;;  %v2761_v30 = vrot.slane %v2759_v36, 5 }
  0xd9   : > { %4019 = vrot.lane.b32.xlu2 %v4003_v37, %s5365_s10  ;;  %v3192_v32 = vrot.slane %v2693_v5, 5  ;;  %v4052_v44 = vunpack.c.l.b16 %v2344_v10  ;;  %v2747_v41 = vrot.slane %v2746_v29, 4  ;;  %v3316_v39 = vshrl.u32 %v3123_v58, 16  ;;  %v709_v5 = vld [vmem:[#allocation2 + $0x30] sm:$0xf] }
  0xda   : > { %v3190_v25 = vsel %vm5453_vm6, %v5178_v63, %v3189_v45  ;;  %v3191_v57 = vrot.slane %v3189_v45, 4  ;;  %v2756_v21 = vor.u32 %v2755_v40, %v2751_v55  ;;  %v3319_v7 = vshll.u32 %v3123_v58, 16 }
  0xdb   : > { %v4211_v11 = vunpack.c.l.b16 %v3190_v25  ;;  %v4083_v54 = vpack.c.b16 %v4052_v44, %v4051_v4  ;;  %v2752_v37 = vsel %vm6314_vm2, %v2747_v41, %v2751_v55  ;;  %v3324_v17 = vrot.slane %v2753_v38, 5 }
  0xdc   : > { %v3193_v16 = vsel %vm5453_vm6, %v3191_v57, %v3192_v32  ;;  %v2757_v1 = vrot.slane %v2756_v21, 4  ;;  %v4131_v33 = vunpack.c.l.b16 %v2752_v37  ;;  %v3318_v29 = vrot.slane %v3316_v39, 5  ;;  %v1701_v57 = vld [vmem:[#allocation2 + $0x18] sm:$0xf] }
  0xdd   : > { %v4212_v36 = vunpack.c.l.b16 %v3193_v16  ;;  %4099 = vrot.lane.b32.xlu0 %v4083_v54, %s5366_s11  ;;  %v3321_v63 = vrot.slane %v3319_v7, 6  ;;  %v3325_v45 = vrot.slane %v2749_v56, 6  ;;  %v3330_v10 = vshrl.u32 %v3299_v22, 16 }
  0xde   : > { %v3333_v58 = vshll.u32 %v3299_v22, 16  ;;  %v2762_v4 = vsel %vm6314_vm2, %v2757_v1, %v2761_v30  ;;  %v845_v40 = vshrl.u32 %v709_v5, 16  ;;  %v848_v44 = vshll.u32 %v709_v5, 16  ;;  %v6344_v22 = vld [vmem:[#allocation2 + $0x1c] sm:$0xf] }
  0xdf   : > { %v4243_v55 = vpack.c.b16 %v4212_v36, %v4211_v11  ;;  %v4132_v32 = vunpack.c.l.b16 %v2762_v4  ;;  %v3322_v38 = vor.u32 %v3321_v63, %v3318_v29  ;;  %v3326_v41 = vor.u32 %v3325_v45, %v3324_v17  ;;  %v6352_v45 = vld [vmem:[#allocation2 + $0x20] sm:$0x1] }
  0xe0   : > { %v3332_v25 = vrot.slane %v3330_v10, 5  ;;  %v3335_v39 = vrot.slane %v3333_v58, 6  ;;  %v847_v56 = vrot.slane %v845_v40, 4  ;;  %v850_v7 = vrot.slane %v848_v44, 5  ;;  %v1710_v10 = vld [vmem:[#allocation2 + $0x3c] sm:$0xf] }
  0xe1   : > { %4259 = vrot.lane.b32.xlu2 %v4243_v55, %s5367_s12  ;;  %v4163_v54 = vpack.c.b16 %v4132_v32, %v4131_v33  ;;  %v3323_v30 = vrot.slane %v3322_v38, 4  ;;  %v3328_v11 = vrot.slane %v3326_v41, 4  ;;  %v8099_v37 = vshll.u32 %v5722_v47, 16 }
  0xe2   : > { %v3336_v5 = vor.u32 %v3335_v39, %v3332_v25  ;;  %v851_v17 = vor.u32 %v850_v7, %v847_v56  ;;  %v1771_v1 = vshrl.u32 %v1701_v57, 16  ;;  %v1774_v36 = vshll.u32 %v1701_v57, 16  ;;  %v6365_v39 = vld [vmem:[#allocation2 + $0x40] sm:$0xf] }
  0xe3   : > { %v856_v16 = vrot.slane %v8099_v37, 5  ;;  %4179 = vrot.lane.b32.xlu1 %v4163_v54, %s5368_s13  ;;  %v3327_v29 = vsel %vm6087_vm13, %v3323_v30, %v3326_v41  ;;  %v1780_v33 = vshll.u32 %v6344_v22, 16  ;;  %v1784_v47 = vshrl.u32 %v6344_v22, 16  ;;  %v6370_v37 = vld [vmem:[#allocation2 + $0x44] sm:$0x1] }
  0xe4   : > { %v3337_v58 = vsel %vm6087_vm13, %v3328_v11, %v3336_v5  ;;  %v4291_v4 = vunpack.c.l.b16 %v3327_v29  ;;  %v852_v55 = vrot.slane %v851_v17, 4  ;;  %v1773_v40 = vrot.slane %v1771_v1, 4  ;;  %v6372_v5 = vld [vmem:[#allocation2 + $0x18] sm:$0xe] }
  0xe5   : > { %v861_v63 = vor.u32 %v5743_v3, %v856_v16  ;;  %v4292_v44 = vunpack.c.l.b16 %v3337_v58  ;;  %v1776_v38 = vrot.slane %v1774_v36, 5  ;;  %v1782_v41 = vrot.slane %v1780_v33, 5 }
  0xe6   : > { %v857_v3 = vsel %vm6314_vm2, %v852_v55, %v856_v16  ;;  %v1786_v25 = vrot.slane %v1784_v47, 4  ;;  %v1790_v57 = vshll.u32 %v6352_v45, 16  ;;  %v1843_v56 = vshrl.u32 %v1710_v10, 16 }
  0xe7   : > { %v862_v32 = vrot.slane %v861_v63, 4  ;;  %v4323_v7 = vpack.c.b16 %v4292_v44, %v4291_v4  ;;  %v3691_v30 = vunpack.c.l.b16 %v857_v3  ;;  %v1777_v11 = vor.u32 %v1776_v38, %v1773_v40 }
  0xe8   : > { %v1787_v17 = vor.u32 %v1786_v25, %v1782_v41  ;;  %v1792_v1 = vrot.slane %v1790_v57, 5  ;;  %v1845_v36 = vrot.slane %v1843_v56, 4  ;;  %v1846_v63 = vshll.u32 %v1710_v10, 16  ;;  %v712_v57 = vld [vmem:[#allocation2 + $0x3c] sm:$0xf] }
  0xe9   : > { %v867_v54 = vsel %vm6314_vm2, %v862_v32, %v5747_v19  ;;  %4339 = vrot.lane.b32.xlu0 %v4323_v7, %s5369_s14  ;;  %v1778_v29 = vrot.slane %v1777_v11, 4  ;;  %v1852_v58 = vshll.u32 %v6365_v39, 16  ;;  %v1856_v4 = vshrl.u32 %v6365_v39, 16  ;;  %v3788_v32 = vpop.permute.xlu2 %3787 }
  0xea   : > { %v3692_v16 = vunpack.c.l.b16 %v867_v54  ;;  %v1788_v55 = vrot.slane %v1787_v17, 4  ;;  %v1862_v40 = vshll.u32 %v6370_v37, 16  ;;  %v5163_v44 = vrot.slane %v6372_v5, 9 }
  0xeb   : > { %v1783_v38 = vsel %vm6314_vm2, %v1778_v29, %v1782_v41  ;;  %v1848_v3 = vrot.slane %v1846_v63, 5  ;;  %v1854_v25 = vrot.slane %v1852_v58, 5  ;;  %v1858_v10 = vrot.slane %v1856_v4, 4 }
  0xec   : > { %v3719_v19 = vpack.c.b16 %v3692_v16, %v3691_v30  ;;  %v1793_v7 = vsel %vm6314_vm2, %v1788_v55, %v1792_v1  ;;  %v3893_v54 = vunpack.c.l.b16 %v1783_v38  ;;  %v1864_v30 = vrot.slane %v1862_v40, 5 }
  0xed   : > { %v3894_v11 = vunpack.c.l.b16 %v1793_v7  ;;  %v1849_v16 = vor.u32 %v1848_v3, %v1845_v36  ;;  %v1859_v17 = vor.u32 %v1858_v10, %v1854_v25  ;;  %v2203_v41 = vrot.slane %v6344_v22, 5 }
  0xee   : > { %v6386_v56 = vsel %vm4371_vm4, %v3719_v19, %v3788_v32  ;;  %v2206_v29 = vrot.slane %v6352_v45, 5  ;;  %v869_v63 = vshrl.u32 %v712_v57, 16  ;;  %v872_v21 = vshll.u32 %v712_v57, 16 }
  0xef   : > { %v8100_v14 = vshll.u32 %v5840_v34, 16  ;;  %v3924_v9 = vpack.c.b16 %v3894_v11, %v3893_v54  ;;  %v1850_v19 = vrot.slane %v1849_v16, 4  ;;  %v1860_v32 = vrot.slane %v1859_v17, 4  ;;  %v2134_v16 = vld [vmem:[#allocation2 + $0x3c] sm:$0xe] }
  0xf0   : > { %v2204_v1 = vsel %vm5453_vm6, %v5163_v44, %v2203_v41  ;;  %v2205_v55 = vrot.slane %v2203_v41, 4  ;;  %v871_v38 = vrot.slane %v869_v63, 4  ;;  %v874_v36 = vrot.slane %v872_v21, 5 }
  0xf1   : > { %v880_v8 = vrot.slane %v8100_v14, 5  ;;  %v3973_v40 = vunpack.c.l.b16 %v2204_v1  ;;  %3941 = vrot.lane.b32.xlu1 %v3924_v9, %s5364_s9  ;;  %v1855_v45 = vsel %vm6314_vm2, %v1850_v19, %v1854_v25  ;;  %v1865_v3 = vsel %vm6314_vm2, %v1860_v32, %v1864_v30 }
  0xf2   : > { %v8101_v14 = vshrl.u32 %v5840_v34, 16  ;;  %v8102_v57 = vshll.u32 %v5847_v0, 16  ;;  %v3899_v54 = vunpack.c.l.b16 %v1855_v45  ;;  %v3900_v44 = vunpack.c.l.b16 %v1865_v3 }
  0xf3   : > { %v2207_v11 = vsel %vm5453_vm6, %v2205_v55, %v2206_v29  ;;  %v875_v21 = vor.u32 %v874_v36, %v871_v38  ;;  %v5166_v41 = vrot.slane %v2134_v16, 9  ;;  %v2224_v25 = vrot.slane %v6365_v39, 5  ;;  %v2307_v38 = vld [vmem:[#allocation2 + $0x20] sm:$0x3] }
  0xf4   : > { %v884_v10 = vrot.slane %v8101_v14, 4  ;;  %v890_v7 = vrot.slane %v8102_v57, 5  ;;  %v3974_v9 = vunpack.c.l.b16 %v2207_v11  ;;  %v3927_v63 = vpack.c.b16 %v3900_v44, %v3899_v54 }
  0xf5   : > { %v876_v30 = vrot.slane %v875_v21, 4  ;;  %v2227_v34 = vrot.slane %v6370_v37, 5  ;;  %v2346_v19 = vshrl.u32 %v6372_v5, 16  ;;  %v2225_v1 = vsel %vm5453_vm6, %v5166_v41, %v2224_v25 }
  0xf6   : > { %v885_v17 = vor.u32 %v884_v10, %v880_v8  ;;  %v4004_v0 = vpack.c.b16 %v3974_v9, %v3973_v40  ;;  %v2226_v45 = vrot.slane %v2224_v25, 4  ;;  %3947 = vrot.lane.b32.xlu2 %v3927_v63, %s5364_s9  ;;  %v3979_v55 = vunpack.c.l.b16 %v2225_v1  ;;  %v2310_v63 = vld [vmem:[#allocation2 + $0x44] sm:$0x3] }
  0xf7   : > { %v881_v29 = vsel %vm6314_vm2, %v876_v30, %v880_v8  ;;  %v2348_v36 = vrot.slane %v2346_v19, 5  ;;  %v2349_v3 = vshll.u32 %v6372_v5, 16  ;;  %v2354_v10 = vrot.slane %v1784_v47, 5  ;;  %v3790_v30 = vpop.permute.xlu2 %3789 }
  0xf8   : > { %v886_v32 = vrot.slane %v885_v17, 4  ;;  %4021 = vrot.lane.b32.xlu0 %v4004_v0, %s5365_s10  ;;  %v3693_v40 = vunpack.c.l.b16 %v881_v29  ;;  %v2228_v14 = vsel %vm5453_vm6, %v2226_v45, %v2227_v34  ;;  %v2355_v44 = vrot.slane %v1780_v33, 6 }
  0xf9   : > { %v3980_v54 = vunpack.c.l.b16 %v2228_v14  ;;  %v2351_v8 = vrot.slane %v2349_v3, 6  ;;  %v2360_v11 = vshrl.u32 %v2307_v38, 16  ;;  %v2363_v5 = vshll.u32 %v2307_v38, 16 }
  0xfa   : > { %v891_v37 = vsel %vm6314_vm2, %v886_v32, %v890_v7  ;;  %v2415_v21 = vshrl.u32 %v2134_v16, 16  ;;  %v2418_v9 = vshll.u32 %v2134_v16, 16  ;;  %v2356_v25 = vor.u32 %v2355_v44, %v2354_v10  ;;  %v697_v32 = vld [vmem:[#allocation2] sm:$0xf] }
  0xfb   : > { %v3694_v57 = vunpack.c.l.b16 %v891_v37  ;;  %v4007_v41 = vpack.c.b16 %v3980_v54, %v3979_v55  ;;  %v2352_v7 = vor.u32 %v2351_v8, %v2348_v36  ;;  %v2362_v34 = vrot.slane %v2360_v11, 5 }
  0xfc   : > { %v2365_v19 = vrot.slane %v2363_v5, 6  ;;  %v2417_v0 = vrot.slane %v2415_v21, 5  ;;  %v2420_v47 = vrot.slane %v2418_v9, 6  ;;  %v2358_v33 = vrot.slane %v2356_v25, 4 }
  0xfd   : > { %v3720_v17 = vpack.c.b16 %v3694_v57, %v3693_v40  ;;  %4027 = vrot.lane.b32.xlu1 %v4007_v41, %s5365_s10  ;;  %v2353_v22 = vrot.slane %v2352_v7, 4  ;;  %v2423_v16 = vrot.slane %v1856_v4, 5  ;;  %v2424_v55 = vrot.slane %v1852_v58, 6  ;;  %v721_v58 = vld [vmem:[#allocation2 + $0x60] sm:$0xf] }
  0xfe   : > { %v2366_v45 = vor.u32 %v2365_v19, %v2362_v34  ;;  %v2421_v29 = vor.u32 %v2420_v47, %v2417_v0  ;;  %v2429_v38 = vshrl.u32 %v2310_v63, 16  ;;  %v2432_v3 = vshll.u32 %v2310_v63, 16  ;;  %v2694_v0 = vld [vmem:[#allocation2 + $0x24] sm:$0xf] }
  0xff   : > { %v6426_v1 = vsel %vm4371_vm4, %v3720_v17, %v3790_v30  ;;  %v2357_v36 = vsel %vm6087_vm13, %v2353_v22, %v2356_v25  ;;  %v8103_v37 = vshll.u32 %v5449_v12, 16  ;;  %v749_v14 = vshrl.u32 %v697_v32, 16 }
 0x100   : > { %v2367_v10 = vsel %vm6087_vm13, %v2358_v33, %v2366_v45  ;;  %v4053_v57 = vunpack.c.l.b16 %v2357_v36  ;;  %v2422_v54 = vrot.slane %v2421_v29, 4  ;;  %v2425_v4 = vor.u32 %v2424_v55, %v2423_v16  ;;  %v6454_v16 = vld [vmem:[#allocation2 + $0x28] sm:$0xf] }
 0x101   : > { %v760_v40 = vrot.slane %v8103_v37, 5  ;;  %v4054_v8 = vunpack.c.l.b16 %v2367_v10  ;;  %v2431_v44 = vrot.slane %v2429_v38, 5  ;;  %v2434_v11 = vrot.slane %v2432_v3, 6  ;;  %v6456_v3 = vld [vmem:[#allocation2 + $0x2c] sm:$0x1] }
 0x102   : > { %v2426_v5 = vsel %vm6087_vm13, %v2422_v54, %v2425_v4  ;;  %v2427_v21 = vrot.slane %v2425_v4, 4  ;;  %v751_v9 = vrot.slane %v749_v14, 4  ;;  %v752_v12 = vshll.u32 %v697_v32, 16 }
 0x103   : > { %v765_v39 = vor.u32 %v5476_v31, %v760_v40  ;;  %v4084_v17 = vpack.c.b16 %v4054_v8, %v4053_v57  ;;  %v2435_v41 = vor.u32 %v2434_v11, %v2431_v44  ;;  %v4059_v7 = vunpack.c.l.b16 %v2426_v5  ;;  %v2703_v8 = vld [vmem:[#allocation2 + $0x48] sm:$0xf] }
 0x104   : > { %v754_v63 = vrot.slane %v752_v12, 5  ;;  %v941_v30 = vshrl.u32 %v721_v58, 16  ;;  %v944_v34 = vshll.u32 %v721_v58, 16  ;;  %v952_v19 = vrot.slane %v950_v27, 5 }
 0x105   : > { %v766_v25 = vrot.slane %v765_v39, 4  ;;  %4101 = vrot.lane.b32.xlu2 %v4084_v17, %s5366_s11  ;;  %v2436_v31 = vsel %vm6087_vm13, %v2427_v21, %v2435_v41  ;;  %v956_v32 = vrot.slane %v954_v52, 4  ;;  %v8104_v22 = vshll.u32 %v5925_v28, 16  ;;  %v6470_v17 = vld [vmem:[#allocation2 + $0x4c] sm:$0xf] }
 0x106   : > { %v4060_v45 = vunpack.c.l.b16 %v2436_v31  ;;  %v755_v29 = vor.u32 %v754_v63, %v751_v9  ;;  %v943_v55 = vrot.slane %v941_v30, 4  ;;  %v946_v38 = vrot.slane %v944_v34, 5  ;;  %v3780_v31 = vpop.permute.xlu0 %3779 }
 0x107   : > { %v771_v47 = vsel %vm6314_vm2, %v766_v25, %v5512_v61  ;;  %v962_v33 = vrot.slane %v8104_v22, 5  ;;  %v957_v36 = vor.u32 %v956_v32, %v952_v19  ;;  %v2764_v37 = vshrl.u32 %v2694_v0, 16  ;;  %v6474_v22 = vld [vmem:[#allocation2 + $0x50] sm:$0x1] }
 0x108   : > { %v3684_v27 = vunpack.c.l.b16 %v771_v47  ;;  %v2767_v14 = vshll.u32 %v2694_v0, 16  ;;  %v4087_v10 = vpack.c.b16 %v4060_v45, %v4059_v7  ;;  %v756_v61 = vrot.slane %v755_v29, 4 }
 0x109   : > { %v2773_v50 = vshll.u32 %v6454_v16, 16  ;;  %v2777_v52 = vshrl.u32 %v6454_v16, 16  ;;  %v947_v28 = vor.u32 %v946_v38, %v943_v55  ;;  %v958_v57 = vrot.slane %v957_v36, 4 }
 0x10a   : > { %v2766_v54 = vrot.slane %v2764_v37, 4  ;;  %v2769_v4 = vrot.slane %v2767_v14, 5  ;;  %4107 = vrot.lane.b32.xlu0 %v4087_v10, %s5366_s11  ;;  %v761_v44 = vsel %vm6314_vm2, %v756_v61, %v760_v40  ;;  %v2783_v58 = vshll.u32 %v6456_v3, 16  ;;  %v3796_v61 = vpop.permute.xlu2 %3795 }
 0x10b   : > { %v2775_v11 = vrot.slane %v2773_v50, 5  ;;  %v2779_v39 = vrot.slane %v2777_v52, 4  ;;  %v3683_v5 = vunpack.c.l.b16 %v761_v44  ;;  %v948_v21 = vrot.slane %v947_v28, 4 }
 0x10c   : > { %v963_v9 = vsel %vm6314_vm2, %v958_v57, %v962_v33  ;;  %v2770_v12 = vor.u32 %v2769_v4, %v2766_v54  ;;  %v2785_v25 = vrot.slane %v2783_v58, 5  ;;  %v2836_v40 = vshrl.u32 %v2703_v8, 16 }
 0x10d   : > { %v3700_v41 = vunpack.c.l.b16 %v963_v9  ;;  %v2780_v7 = vor.u32 %v2779_v39, %v2775_v11  ;;  %v3715_v63 = vpack.c.b16 %v3684_v27, %v3683_v5  ;;  %v953_v30 = vsel %vm6314_vm2, %v948_v21, %v952_v19  ;;  %v6483_v19 = vld [vmem:[#allocation2 + $0x24] sm:$0xe] }
 0x10e   : > { %v2771_v34 = vrot.slane %v2770_v12, 4  ;;  %v2839_v0 = vshll.u32 %v2703_v8, 16  ;;  %v3699_v47 = vunpack.c.l.b16 %v953_v30  ;;  %v2838_v45 = vrot.slane %v2836_v40, 4  ;;  %v730_v8 = vld [vmem:[#allocation2 + $0x84] sm:$0xf] }
 0x10f   : > { %v2781_v32 = vrot.slane %v2780_v7, 4  ;;  %v2845_v33 = vshll.u32 %v6470_v17, 16  ;;  %v6478_v29 = vsel %vm4371_vm4, %v3715_v63, %v3780_v31  ;;  %v2849_v38 = vshrl.u32 %v6470_v17, 16 }
 0x110   : > { %v2776_v55 = vsel %vm6314_vm2, %v2771_v34, %v2775_v11  ;;  %v2841_v27 = vrot.slane %v2839_v0, 5  ;;  %v3723_v36 = vpack.c.b16 %v3700_v41, %v3699_v47  ;;  %v2855_v4 = vshll.u32 %v6474_v22, 16  ;;  %v703_v0 = vld [vmem:[#allocation2 + $0x18] sm:$0xf] }
 0x111   : > { %v2786_v37 = vsel %vm6314_vm2, %v2781_v32, %v2785_v25  ;;  %v4133_v14 = vunpack.c.l.b16 %v2776_v55  ;;  %v2847_v10 = vrot.slane %v2845_v33, 5  ;;  %v2851_v54 = vrot.slane %v2849_v38, 4  ;;  %v700_v55 = vld [vmem:[#allocation2 + $0xc] sm:$0xf] }
 0x112   : > { %v4134_v28 = vunpack.c.l.b16 %v2786_v37  ;;  %v2842_v57 = vor.u32 %v2841_v27, %v2838_v45  ;;  %v6493_v44 = vsel %vm4371_vm4, %v3723_v36, %v3796_v61  ;;  %v5179_v11 = vrot.slane %v6483_v19, 9 }
 0x113   : > { %v3196_v39 = vrot.slane %v6454_v16, 5  ;;  %v3199_v58 = vrot.slane %v6456_v3, 5  ;;  %v2852_v9 = vor.u32 %v2851_v54, %v2847_v10  ;;  %v2857_v12 = vrot.slane %v2855_v4, 5 }
 0x114   : > { %v4164_v5 = vpack.c.b16 %v4134_v28, %v4133_v14  ;;  %v2843_v21 = vrot.slane %v2842_v57, 4  ;;  %v1013_v25 = vshrl.u32 %v730_v8, 16  ;;  %v1016_v40 = vshll.u32 %v730_v8, 16 }
 0x115   : > { %v3197_v41 = vsel %vm5453_vm6, %v5179_v11, %v3196_v39  ;;  %v3198_v7 = vrot.slane %v3196_v39, 4  ;;  %v2853_v30 = vrot.slane %v2852_v9, 4  ;;  %v1024_v3 = vrot.slane %v1022_v59, 5 }
 0x116   : > { %4181 = vrot.lane.b32.xlu1 %v4164_v5, %s5368_s13  ;;  %v2848_v63 = vsel %vm6314_vm2, %v2843_v21, %v2847_v10  ;;  %v4213_v34 = vunpack.c.l.b16 %v3197_v41  ;;  %v1015_v32 = vrot.slane %v1013_v25, 4  ;;  %v1018_v45 = vrot.slane %v1016_v40, 5 }
 0x117   : > { %v4139_v31 = vunpack.c.l.b16 %v2848_v63  ;;  %v3200_v47 = vsel %vm5453_vm6, %v3198_v7, %v3199_v58  ;;  %v2858_v27 = vsel %vm6314_vm2, %v2853_v30, %v2857_v12  ;;  %v1028_v37 = vrot.slane %v1026_v23, 4 }
 0x118   : > { %v4214_v36 = vunpack.c.l.b16 %v3200_v47  ;;  %v8105_v14 = vshll.u32 %v5996_v49, 16  ;;  %v4140_v61 = vunpack.c.l.b16 %v2858_v27  ;;  %v1019_v59 = vor.u32 %v1018_v45, %v1015_v32  ;;  %v3127_v47 = vld [vmem:[#allocation2 + $0x48] sm:$0xe] }
 0x119   : > { %v797_v28 = vshrl.u32 %v703_v0, 16  ;;  %v800_v57 = vshll.u32 %v703_v0, 16  ;;  %v1029_v4 = vor.u32 %v1028_v37, %v1024_v3  ;;  %v8106_v8 = vshll.u32 %v5761_v26, 16  ;;  %v8107_v26 = vld [vmem:[#allocation5_spill] sm:$0xff] }
 0x11a   : > { %v1034_v10 = vrot.slane %v8105_v14, 5  ;;  %v4244_v54 = vpack.c.b16 %v4214_v36, %v4213_v34  ;;  %v773_v39 = vshrl.u32 %v700_v55, 16  ;;  %v4167_v58 = vpack.c.b16 %v4140_v61, %v4139_v31  ;;  %v8111_v36 = vld [vmem:[#allocation4_spill] sm:$0xff] }
 0x11b   : > { %v808_v11 = vrot.slane %v8106_v8, 5  ;;  %v1020_v5 = vrot.slane %v1019_v59, 4  ;;  %v799_v21 = vrot.slane %v797_v28, 4  ;;  %v802_v9 = vrot.slane %v800_v57, 5 }
 0x11c   : > { %4261 = vrot.lane.b32.xlu0 %v4244_v54, %s5367_s12  ;;  %v1030_v20 = vrot.slane %v1029_v4, 4  ;;  %v775_v23 = vrot.slane %v773_v39, 4  ;;  %v776_v12 = vshll.u32 %v700_v55, 16  ;;  %4187 = vrot.lane.b32.xlu2 %v4167_v58, %s5368_s13  ;;  %v8108_v25 = vshll.u32 %v8107_v26, 16  ;;  %v3802_v4 = vpop.permute.xlu2 %3801 }
 0x11d   : > { %v813_v49 = vor.u32 %v5777_v15, %v808_v11  ;;  %v1025_v41 = vsel %vm6314_vm2, %v1020_v5, %v1024_v3  ;;  %v803_v7 = vor.u32 %v802_v9, %v799_v21  ;;  %v8109_v63 = vshll.u32 %v5793_v48, 16  ;;  %v3784_v21 = vpop.permute.xlu1 %3783 }
 0x11e   : > { %v794_v40 = vrot.slane %v8108_v25, 5  ;;  %v1035_v34 = vsel %vm6314_vm2, %v1030_v20, %v1034_v10  ;;  %v3705_v0 = vunpack.c.l.b16 %v1025_v41  ;;  %v778_v15 = vrot.slane %v776_v12, 5  ;;  %v3300_v12 = vld [vmem:[#allocation2 + $0x2c] sm:$0x3] }
 0x11f   : > { %v784_v30 = vrot.slane %v8109_v63, 5  ;;  %v814_v31 = vrot.slane %v813_v49, 4  ;;  %v3706_v32 = vunpack.c.l.b16 %v1035_v34  ;;  %v804_v45 = vrot.slane %v803_v7, 4 }
 0x120   : > { %v8110_v55 = vshrl.u32 %v5793_v48, 16  ;;  %v5182_v3 = vrot.slane %v3127_v47, 9  ;;  %v779_v14 = vor.u32 %v778_v15, %v775_v23  ;;  %v3217_v61 = vrot.slane %v6470_v17, 5 }
 0x121   : > { %v819_v37 = vsel %vm6314_vm2, %v814_v31, %v8111_v36  ;;  %v3220_v59 = vrot.slane %v6474_v22, 5  ;;  %v3726_v10 = vpack.c.b16 %v3706_v32, %v3705_v0  ;;  %v809_v28 = vsel %vm6314_vm2, %v804_v45, %v808_v11 }
 0x122   : > { %v788_v27 = vrot.slane %v8110_v55, 4  ;;  %v3688_v57 = vunpack.c.l.b16 %v819_v37  ;;  %v3687_v8 = vunpack.c.l.b16 %v809_v28  ;;  %v780_v48 = vrot.slane %v779_v14, 4  ;;  %v3782_v37 = vpop.permute.xlu0 %3781 }
 0x123   : > { %v3218_v39 = vsel %vm5453_vm6, %v5182_v3, %v3217_v61  ;;  %v3219_v58 = vrot.slane %v3217_v61, 4  ;;  %v6538_v5 = vsel %vm4371_vm4, %v3726_v10, %v3802_v4  ;;  %v3339_v22 = vshrl.u32 %v6483_v19, 16  ;;  %v739_v10 = vld [vmem:[#allocation2 + $0xa8] sm:$0xf] }
 0x124   : > { %v789_v54 = vor.u32 %v788_v27, %v784_v30  ;;  %v4219_v20 = vunpack.c.l.b16 %v3218_v39  ;;  %v3717_v49 = vpack.c.b16 %v3688_v57, %v3687_v8  ;;  %v785_v11 = vsel %vm6314_vm2, %v780_v48, %v784_v30 }
 0x125   : > { %v3221_v23 = vsel %vm5453_vm6, %v3219_v58, %v3220_v59  ;;  %v3342_v41 = vshll.u32 %v6483_v19, 16  ;;  %v3685_v26 = vunpack.c.l.b16 %v785_v11  ;;  %v3341_v63 = vrot.slane %v3339_v22, 5 }
 0x126   : > { %v790_v9 = vrot.slane %v789_v54, 4  ;;  %v4220_v25 = vunpack.c.l.b16 %v3221_v23  ;;  %v6549_v34 = vsel %vm4371_vm4, %v3717_v49, %v3784_v21  ;;  %v3347_v30 = vrot.slane %v2777_v52, 5 }
 0x127   : > { %v3344_v31 = vrot.slane %v3342_v41, 6  ;;  %v3348_v32 = vrot.slane %v2773_v50, 6  ;;  %v3353_v45 = vshrl.u32 %v3300_v12, 16  ;;  %v3356_v19 = vshll.u32 %v3300_v12, 16  ;;  %v706_v41 = vld [vmem:[#allocation2 + $0x24] sm:$0xf] }
 0x128   : > { %v795_v7 = vsel %vm6314_vm2, %v790_v9, %v794_v40  ;;  %v4247_v15 = vpack.c.b16 %v4220_v25, %v4219_v20  ;;  %v3303_v40 = vld [vmem:[#allocation2 + $0x50] sm:$0x3]  ;;  %v3408_v3 = vshrl.u32 %v3127_v47, 16  ;;  %v3411_v36 = vshll.u32 %v3127_v47, 16 }
 0x129   : > { %v3686_v0 = vunpack.c.l.b16 %v795_v7  ;;  %v3345_v27 = vor.u32 %v3344_v31, %v3341_v63  ;;  %v3349_v14 = vor.u32 %v3348_v32, %v3347_v30  ;;  %v3355_v61 = vrot.slane %v3353_v45, 5  ;;  %v8113_v30 = vld [vmem:[#allocation12_spill] sm:$0xff] }
 0x12a   : > { %4267 = vrot.lane.b32.xlu1 %v4247_v15, %s5367_s12  ;;  %v3358_v59 = vrot.slane %v3356_v19, 6  ;;  %v3416_v52 = vrot.slane %v2849_v38, 5  ;;  %v3410_v28 = vrot.slane %v3408_v3, 5  ;;  %v3413_v57 = vrot.slane %v3411_v36, 6 }
 0x12b   : > { %v3716_v55 = vpack.c.b16 %v3686_v0, %v3685_v26  ;;  %v3346_v50 = vrot.slane %v3345_v27, 4  ;;  %v3351_v54 = vrot.slane %v3349_v14, 4  ;;  %v3417_v47 = vrot.slane %v2845_v33, 6 }
 0x12c   : > { %v3359_v4 = vor.u32 %v3358_v59, %v3355_v61  ;;  %v3422_v8 = vshrl.u32 %v3303_v40, 16  ;;  %v3414_v39 = vor.u32 %v3413_v57, %v3410_v28  ;;  %v3425_v58 = vshll.u32 %v3303_v40, 16  ;;  %v715_v40 = vld [vmem:[#allocation2 + $0x48] sm:$0xf]  ;;  %v8117_v57 = vld [vmem:[#allocation6_spill] sm:$0xff] }
 0x12d   : > { %v6559_v16 = vsel %vm4371_vm4, %v3716_v55, %v3782_v37  ;;  %v3350_v48 = vsel %vm6087_vm13, %v3346_v50, %v3349_v14  ;;  %v1085_v21 = vshrl.u32 %v739_v10, 16  ;;  %v3418_v20 = vor.u32 %v3417_v47, %v3416_v52 }
 0x12e   : > { %v3360_v38 = vsel %vm6087_vm13, %v3351_v54, %v3359_v4  ;;  %v4293_v9 = vunpack.c.l.b16 %v3350_v48  ;;  %v3424_v22 = vrot.slane %v3422_v8, 5  ;;  %v3415_v11 = vrot.slane %v3414_v39, 4 }
 0x12f   : > { %v4294_v49 = vunpack.c.l.b16 %v3360_v38  ;;  %v3427_v23 = vrot.slane %v3425_v58, 6  ;;  %v1087_v12 = vrot.slane %v1085_v21, 4  ;;  %v3420_v17 = vrot.slane %v3418_v20, 4 }
 0x130   : > { %v1088_v33 = vshll.u32 %v739_v10, 16  ;;  %v1096_v7 = vrot.slane %v1094_v46, 5  ;;  %v8112_v26 = vshrl.u32 %v6051_v24, 16  ;;  %v3419_v0 = vsel %vm6087_vm13, %v3415_v11, %v3418_v20  ;;  %v1722_v20 = vld [vmem:[#allocation2 + $0x6c] sm:$0xf] }
 0x131   : > { %v4324_v63 = vpack.c.b16 %v4294_v49, %v4293_v9  ;;  %v3428_v31 = vor.u32 %v3427_v23, %v3424_v22  ;;  %v8114_v15 = vshll.u32 %v8113_v30, 16  ;;  %v4299_v45 = vunpack.c.l.b16 %v3419_v0 }
 0x132   : > { %v1100_v25 = vrot.slane %v8112_v26, 4  ;;  %v1090_v19 = vrot.slane %v1088_v33, 5  ;;  %v821_v27 = vshrl.u32 %v706_v41, 16  ;;  %v824_v24 = vshll.u32 %v706_v41, 16 }
 0x133   : > { %v1106_v32 = vrot.slane %v8114_v15, 5  ;;  %4341 = vrot.lane.b32.xlu2 %v4324_v63, %s5369_s14  ;;  %v3429_v46 = vsel %vm6087_vm13, %v3420_v17, %v3428_v31  ;;  %v8115_v3 = vshll.u32 %v5865_v2, 16  ;;  %v8116_v37 = vshrl.u32 %v5865_v2, 16  ;;  %v1723_v17 = vld [vmem:[#allocation2 + $0x70] sm:$0xf]  ;;  %v8121_v63 = vld [vmem:[#allocation7_spill] sm:$0xff] }
 0x134   : > { %v1101_v55 = vor.u32 %v1100_v25, %v1096_v7  ;;  %v4300_v61 = vunpack.c.l.b16 %v3429_v46  ;;  %v1091_v59 = vor.u32 %v1090_v19, %v1087_v12  ;;  %v823_v10 = vrot.slane %v821_v27, 4 }
 0x135   : > { %v832_v36 = vrot.slane %v8115_v3, 5  ;;  %v836_v14 = vrot.slane %v8116_v37, 4  ;;  %v826_v50 = vrot.slane %v824_v24, 5  ;;  %v8118_v54 = vshll.u32 %v8117_v57, 16 }
 0x136   : > { %v1102_v52 = vrot.slane %v1101_v55, 4  ;;  %v893_v47 = vshrl.u32 %v715_v40, 16  ;;  %v4327_v8 = vpack.c.b16 %v4300_v61, %v4299_v45  ;;  %v1092_v48 = vrot.slane %v1091_v59, 4  ;;  %v1724_v55 = vld [vmem:[#allocation2 + $0x74] sm:$0x1]  ;;  %v3786_v61 = vpop.permute.xlu1 %3785 }
 0x137   : > { %v837_v28 = vor.u32 %v836_v14, %v832_v36  ;;  %v842_v4 = vrot.slane %v8118_v54, 5  ;;  %v896_v58 = vshll.u32 %v715_v40, 16  ;;  %v827_v38 = vor.u32 %v826_v50, %v823_v10  ;;  %v3808_v40 = vpop.permute.xlu2 %3807 }
 0x138   : > { %v1107_v39 = vsel %vm6314_vm2, %v1102_v52, %v1106_v32  ;;  %v895_v9 = vrot.slane %v893_v47, 4  ;;  %4347 = vrot.lane.b32.xlu0 %v4327_v8, %s5369_s14  ;;  %v1097_v22 = vsel %vm6314_vm2, %v1092_v48, %v1096_v7  ;;  %v8119_v11 = vshll.u32 %v5893_v51, 16  ;;  %v2138_v48 = vld [vmem:[#allocation2 + $0x6c] sm:$0xe] }
 0x139   : > { %v3712_v21 = vunpack.c.l.b16 %v1107_v39  ;;  %v838_v2 = vrot.slane %v837_v28, 4  ;;  %v898_v49 = vrot.slane %v896_v58, 5  ;;  %v8120_v12 = vshrl.u32 %v5893_v51, 16 }
 0x13a   : > { %v904_v23 = vrot.slane %v8119_v11, 5  ;;  %v3711_v33 = vunpack.c.l.b16 %v1097_v22  ;;  %v828_v26 = vrot.slane %v827_v38, 4  ;;  %v8122_v0 = vshll.u32 %v8121_v63, 16 }
 0x13b   : > { %v908_v41 = vrot.slane %v8120_v12, 4  ;;  %v843_v25 = vsel %vm6314_vm2, %v838_v2, %v842_v4  ;;  %v899_v15 = vor.u32 %v898_v49, %v895_v9  ;;  %v1939_v7 = vshrl.u32 %v1722_v20, 16  ;;  %v3792_v49 = vpop.permute.xlu0 %3791 }
 0x13c   : > { %v914_v31 = vrot.slane %v8122_v0, 5  ;;  %v3690_v30 = vunpack.c.l.b16 %v843_v25  ;;  %v3729_v45 = vpack.c.b16 %v3712_v21, %v3711_v33  ;;  %v833_v19 = vsel %vm6314_vm2, %v828_v26, %v832_v36 }
 0x13d   : > { %v909_v32 = vor.u32 %v908_v41, %v904_v23  ;;  %v1942_v51 = vshll.u32 %v1722_v20, 16  ;;  %v1948_v27 = vshll.u32 %v1723_v17, 16  ;;  %v3689_v46 = vunpack.c.l.b16 %v833_v19 }
 0x13e   : > { %v900_v24 = vrot.slane %v899_v15, 4  ;;  %v1941_v37 = vrot.slane %v1939_v7, 4  ;;  %v6600_v14 = vsel %vm4371_vm4, %v3729_v45, %v3808_v40  ;;  %v1952_v10 = vshrl.u32 %v1723_v17, 16 }
 0x13f   : > { %v910_v3 = vrot.slane %v909_v32, 4  ;;  %v1944_v59 = vrot.slane %v1942_v51, 5  ;;  %v1950_v52 = vrot.slane %v1948_v27, 5  ;;  %v3718_v50 = vpack.c.b16 %v3690_v30, %v3689_v46  ;;  %v718_v32 = vld [vmem:[#allocation2 + $0x54] sm:$0xf] }
 0x140   : > { %v905_v28 = vsel %vm6314_vm2, %v900_v24, %v904_v23  ;;  %v1958_v57 = vshll.u32 %v1724_v55, 16  ;;  %v1954_v8 = vrot.slane %v1952_v10, 4  ;;  %v5170_v21 = vrot.slane %v2138_v48, 9 }
 0x141   : > { %v915_v36 = vsel %vm6314_vm2, %v910_v3, %v914_v31  ;;  %v3695_v54 = vunpack.c.l.b16 %v905_v28  ;;  %v1945_v47 = vor.u32 %v1944_v59, %v1941_v37  ;;  %v6607_v39 = vsel %vm4371_vm4, %v3718_v50, %v3786_v61 }
 0x142   : > { %v3696_v4 = vunpack.c.l.b16 %v915_v36  ;;  %v1960_v58 = vrot.slane %v1958_v57, 5  ;;  %v2252_v38 = vrot.slane %v1723_v17, 5  ;;  %v1955_v20 = vor.u32 %v1954_v8, %v1950_v52  ;;  %v2314_v17 = vld [vmem:[#allocation2 + $0x74] sm:$0x3]  ;;  %v724_v57 = vld [vmem:[#allocation2 + $0x6c] sm:$0xf] }
 0x143   : > { %v1946_v9 = vrot.slane %v1945_v47, 4  ;;  %v2255_v22 = vrot.slane %v1724_v55, 5  ;;  %v2507_v12 = vshrl.u32 %v2138_v48, 16  ;;  %v2510_v41 = vshll.u32 %v2138_v48, 16 }
 0x144   : > { %v3721_v2 = vpack.c.b16 %v3696_v4, %v3695_v54  ;;  %v2253_v11 = vsel %vm5453_vm6, %v5170_v21, %v2252_v38  ;;  %v2254_v23 = vrot.slane %v2252_v38, 4  ;;  %v1956_v25 = vrot.slane %v1955_v20, 4  ;;  %v8125_v38 = vld [vmem:[#allocation8_spill] sm:$0xff] }
 0x145   : > { %v1951_v26 = vsel %vm6314_vm2, %v1946_v9, %v1950_v52  ;;  %v3987_v63 = vunpack.c.l.b16 %v2253_v11  ;;  %v2509_v30 = vrot.slane %v2507_v12, 5  ;;  %v2512_v15 = vrot.slane %v2510_v41, 6 }
 0x146   : > { %v6612_v33 = vsel %vm4371_vm4, %v3721_v2, %v3792_v49  ;;  %v3907_v0 = vunpack.c.l.b16 %v1951_v26  ;;  %v2256_v31 = vsel %vm5453_vm6, %v2254_v23, %v2255_v22  ;;  %v1961_v7 = vsel %vm6314_vm2, %v1956_v25, %v1960_v58 }
 0x147   : > { %v3988_v45 = vunpack.c.l.b16 %v2256_v31  ;;  %v2515_v19 = vrot.slane %v1952_v10, 5  ;;  %v2516_v55 = vrot.slane %v1948_v27, 6  ;;  %v3908_v51 = vunpack.c.l.b16 %v1961_v7 }
 0x148   : > { %v2513_v40 = vor.u32 %v2512_v15, %v2509_v30  ;;  %v2521_v46 = vshrl.u32 %v2314_v17, 16  ;;  %v2524_v24 = vshll.u32 %v2314_v17, 16  ;;  %v917_v61 = vshrl.u32 %v718_v32, 16  ;;  %v3862_v17 = vpop.permute.xlu2 %3861  ;;  %v2715_v15 = vld [vmem:[#allocation2 + $0x78] sm:$0xf] }
 0x149   : > { %v4011_v3 = vpack.c.b16 %v3988_v45, %v3987_v63  ;;  %v2517_v37 = vor.u32 %v2516_v55, %v2515_v19  ;;  %v920_v59 = vshll.u32 %v718_v32, 16  ;;  %v3931_v52 = vpack.c.b16 %v3908_v51, %v3907_v0  ;;  %v8129_v45 = vld [vmem:[#allocation9_spill] sm:$0xff]  ;;  %v2716_v51 = vld [vmem:[#allocation2 + $0x7c] sm:$0xf] }
 0x14a   : > { %v2514_v50 = vrot.slane %v2513_v40, 4  ;;  %v2523_v28 = vrot.slane %v2521_v46, 5  ;;  %v2526_v36 = vrot.slane %v2524_v24, 6  ;;  %v919_v4 = vrot.slane %v917_v61, 4 }
 0x14b   : > { %4035 = vrot.lane.b32.xlu2 %v4011_v3, %s5365_s10  ;;  %v2519_v54 = vrot.slane %v2517_v37, 4  ;;  %v922_v47 = vrot.slane %v920_v59, 5  ;;  %v8123_v27 = vshll.u32 %v5946_v35, 16  ;;  %3955 = vrot.lane.b32.xlu1 %v3931_v52, %s5364_s9  ;;  %v8124_v58 = vshrl.u32 %v5946_v35, 16  ;;  %v2717_v3 = vld [vmem:[#allocation2 + $0x80] sm:$0x1] }
 0x14c   : > { %v2518_v8 = vsel %vm6087_vm13, %v2514_v50, %v2517_v37  ;;  %v2527_v48 = vor.u32 %v2526_v36, %v2523_v28  ;;  %v8126_v2 = vshll.u32 %v8125_v38, 16  ;;  %v965_v49 = vshrl.u32 %v724_v57, 16 }
 0x14d   : > { %v928_v10 = vrot.slane %v8123_v27, 5  ;;  %v932_v21 = vrot.slane %v8124_v58, 4  ;;  %v4067_v20 = vunpack.c.l.b16 %v2518_v8  ;;  %v923_v22 = vor.u32 %v922_v47, %v919_v4 }
 0x14e   : > { %v938_v9 = vrot.slane %v8126_v2, 5  ;;  %v968_v11 = vshll.u32 %v724_v57, 16  ;;  %v2528_v23 = vsel %vm6087_vm13, %v2519_v54, %v2527_v48  ;;  %v8127_v41 = vshll.u32 %v5969_v18, 16  ;;  %v3794_v54 = vpop.permute.xlu1 %3793 }
 0x14f   : > { %v933_v12 = vor.u32 %v932_v21, %v928_v10  ;;  %v8128_v25 = vshrl.u32 %v5969_v18, 16  ;;  %v4068_v35 = vunpack.c.l.b16 %v2528_v23  ;;  %v924_v0 = vrot.slane %v923_v22, 4  ;;  %v3131_v21 = vld [vmem:[#allocation2 + $0x78] sm:$0xe] }
 0x150   : > { %v976_v26 = vrot.slane %v8127_v41, 5  ;;  %v967_v31 = vrot.slane %v965_v49, 4  ;;  %v970_v30 = vrot.slane %v968_v11, 5  ;;  %v8130_v19 = vshll.u32 %v8129_v45, 16 }
 0x151   : > { %v980_v63 = vrot.slane %v8128_v25, 4  ;;  %v934_v32 = vrot.slane %v933_v12, 4  ;;  %v4091_v40 = vpack.c.b16 %v4068_v35, %v4067_v20  ;;  %v929_v46 = vsel %vm6314_vm2, %v924_v0, %v928_v10 }
 0x152   : > { %v986_v55 = vrot.slane %v8130_v19, 5  ;;  %v971_v24 = vor.u32 %v970_v30, %v967_v31  ;;  %v6642_v18 = vsel %vm4420_vm5, %v6559_v16, %v3862_v17  ;;  %v3697_v61 = vunpack.c.l.b16 %v929_v46  ;;  %v3798_v17 = vpop.permute.xlu0 %3797  ;;  %v727_v46 = vld [vmem:[#allocation2 + $0x78] sm:$0xf] }
 0x153   : > { %v981_v7 = vor.u32 %v980_v63, %v976_v26  ;;  %v939_v37 = vsel %vm6314_vm2, %v934_v32, %v938_v9  ;;  %v2932_v52 = vshrl.u32 %v2715_v15, 16  ;;  %4115 = vrot.lane.b32.xlu0 %v4091_v40, %s5366_s11  ;;  %v2935_v36 = vshll.u32 %v2715_v15, 16 }
 0x154   : > { %v3698_v50 = vunpack.c.l.b16 %v939_v37  ;;  %v972_v28 = vrot.slane %v971_v24, 4  ;;  %v2941_v57 = vshll.u32 %v2716_v51, 16  ;;  %v2945_v16 = vshrl.u32 %v2716_v51, 16 }
 0x155   : > { %v982_v59 = vrot.slane %v981_v7, 4  ;;  %v2934_v47 = vrot.slane %v2932_v52, 4  ;;  %v2951_v27 = vshll.u32 %v2717_v3, 16  ;;  %v2937_v58 = vrot.slane %v2935_v36, 5  ;;  %v3307_v7 = vld [vmem:[#allocation2 + $0x80] sm:$0x3] }
 0x156   : > { %v3722_v10 = vpack.c.b16 %v3698_v50, %v3697_v61  ;;  %v977_v8 = vsel %vm6314_vm2, %v972_v28, %v976_v26  ;;  %v2943_v2 = vrot.slane %v2941_v57, 5  ;;  %v2947_v9 = vrot.slane %v2945_v16, 4 }
 0x157   : > { %v987_v4 = vsel %vm6314_vm2, %v982_v59, %v986_v55  ;;  %v3701_v38 = vunpack.c.l.b16 %v977_v8  ;;  %v2953_v20 = vrot.slane %v2951_v27, 5  ;;  %v2938_v49 = vor.u32 %v2937_v58, %v2934_v47 }
 0x158   : > { %v3702_v48 = vunpack.c.l.b16 %v987_v4  ;;  %v6652_v22 = vsel %vm4371_vm4, %v3722_v10, %v3794_v54  ;;  %v5186_v11 = vrot.slane %v3131_v21, 9  ;;  %v3245_v23 = vrot.slane %v2716_v51, 5 }
 0x159   : > { %v2948_v41 = vor.u32 %v2947_v9, %v2943_v2  ;;  %v3248_v25 = vrot.slane %v2717_v3, 5  ;;  %v3500_v63 = vshrl.u32 %v3131_v21, 16  ;;  %v2939_v35 = vrot.slane %v2938_v49, 4 }
 0x15a   : > { %v3724_v12 = vpack.c.b16 %v3702_v48, %v3701_v38  ;;  %v3246_v26 = vsel %vm5453_vm6, %v5186_v11, %v3245_v23  ;;  %v3247_v0 = vrot.slane %v3245_v23, 4  ;;  %v3503_v31 = vshll.u32 %v3131_v21, 16  ;;  %v8133_v23 = vld [vmem:[#allocation10_spill] sm:$0xff] }
 0x15b   : > { %v2949_v15 = vrot.slane %v2948_v41, 4  ;;  %v4227_v32 = vunpack.c.l.b16 %v3246_v26  ;;  %v3502_v45 = vrot.slane %v3500_v63, 5  ;;  %v2944_v19 = vsel %vm6314_vm2, %v2939_v35, %v2943_v2  ;;  %v3868_v26 = vpop.permute.xlu2 %3867 }
 0x15c   : > { %v6657_v30 = vsel %vm4371_vm4, %v3724_v12, %v3798_v17  ;;  %v3249_v55 = vsel %vm5453_vm6, %v3247_v0, %v3248_v25  ;;  %v3505_v51 = vrot.slane %v3503_v31, 6  ;;  %v3508_v40 = vrot.slane %v2945_v16, 5  ;;  %v733_v16 = vld [vmem:[#allocation2 + $0x90] sm:$0xf] }
 0x15d   : > { %v2954_v24 = vsel %vm6314_vm2, %v2949_v15, %v2953_v20  ;;  %v4147_v3 = vunpack.c.l.b16 %v2944_v19  ;;  %v4228_v37 = vunpack.c.l.b16 %v3249_v55  ;;  %v3509_v61 = vrot.slane %v2941_v57, 6 }
 0x15e   : > { %v4148_v59 = vunpack.c.l.b16 %v2954_v24  ;;  %v3506_v52 = vor.u32 %v3505_v51, %v3502_v45  ;;  %v3514_v50 = vshrl.u32 %v3307_v7, 16  ;;  %v3517_v28 = vshll.u32 %v3307_v7, 16 }
 0x15f   : > { %v4251_v36 = vpack.c.b16 %v4228_v37, %v4227_v32  ;;  %v3510_v54 = vor.u32 %v3509_v61, %v3508_v40  ;;  %v989_v4 = vshrl.u32 %v727_v46, 16  ;;  %v992_v47 = vshll.u32 %v727_v46, 16 }
 0x160   : > { %v4171_v27 = vpack.c.b16 %v4148_v59, %v4147_v3  ;;  %v3507_v10 = vrot.slane %v3506_v52, 4  ;;  %v3516_v8 = vrot.slane %v3514_v50, 5  ;;  %v3519_v48 = vrot.slane %v3517_v28, 6  ;;  %v8137_v3 = vld [vmem:[#allocation11_spill] sm:$0xff]  ;;  %v6687_v52 = vld [vmem:[#allocation2 + $0x28] sm:$0xf] }
 0x161   : > { %4275 = vrot.lane.b32.xlu2 %v4251_v36, %s5367_s12  ;;  %v3512_v58 = vrot.slane %v3510_v54, 4  ;;  %v991_v21 = vrot.slane %v989_v4, 4  ;;  %v994_v38 = vrot.slane %v992_v47, 5  ;;  %v8131_v57 = vshll.u32 %v6008_v60, 16  ;;  %v6691_v36 = vld [vmem:[#allocation2 + $0x2c] sm:$0x1] }
 0x162   : > { %4195 = vrot.lane.b32.xlu1 %v4171_v27, %s5368_s13  ;;  %v3511_v9 = vsel %vm6087_vm13, %v3507_v10, %v3510_v54  ;;  %v3520_v20 = vor.u32 %v3519_v48, %v3516_v8  ;;  %v8132_v49 = vshrl.u32 %v6008_v60, 16  ;;  %v8134_v12 = vshll.u32 %v8133_v23, 16  ;;  %v1704_v60 = vld [vmem:[#allocation2 + $0x24] sm:$0xf] }
 0x163   : > { %v1000_v2 = vrot.slane %v8131_v57, 5  ;;  %v4307_v25 = vunpack.c.l.b16 %v3511_v9  ;;  %v995_v63 = vor.u32 %v994_v38, %v991_v21  ;;  %v1037_v17 = vshrl.u32 %v733_v16, 16  ;;  %v3800_v21 = vpop.permute.xlu1 %3799 }
 0x164   : > { %v1004_v11 = vrot.slane %v8132_v49, 4  ;;  %v1010_v41 = vrot.slane %v8134_v12, 5  ;;  %v1040_v35 = vshll.u32 %v733_v16, 16  ;;  %v3521_v0 = vsel %vm6087_vm13, %v3512_v58, %v3520_v20  ;;  %v1713_v58 = vld [vmem:[#allocation2 + $0x48] sm:$0xf] }
 0x165   : > { %v8135_v15 = vshll.u32 %v6026_v42, 16  ;;  %v8136_v7 = vshrl.u32 %v6026_v42, 16  ;;  %v4308_v19 = vunpack.c.l.b16 %v3521_v0  ;;  %v996_v55 = vrot.slane %v995_v63, 4  ;;  %v6701_v20 = vld [vmem:[#allocation2 + $0x4c] sm:$0xf] }
 0x166   : > { %v1005_v31 = vor.u32 %v1004_v11, %v1000_v2  ;;  %v1039_v51 = vrot.slane %v1037_v17, 4  ;;  %v1042_v40 = vrot.slane %v1040_v35, 5  ;;  %v8138_v37 = vshll.u32 %v8137_v3, 16  ;;  %v6709_v35 = vld [vmem:[#allocation2 + $0x50] sm:$0x1] }
 0x167   : > { %v1048_v32 = vrot.slane %v8135_v15, 5  ;;  %v1052_v45 = vrot.slane %v8136_v7, 4  ;;  %v6685_v59 = vsel %vm4420_vm5, %v6386_v56, %v3868_v26  ;;  %v4331_v50 = vpack.c.b16 %v4308_v19, %v4307_v25  ;;  %v6716_v19 = vld [vmem:[#allocation2 + $0x24] sm:$0xe] }
 0x168   : > { %v1006_v46 = vrot.slane %v1005_v31, 4  ;;  %v1058_v61 = vrot.slane %v8138_v37, 5  ;;  %v1001_v42 = vsel %vm6314_vm2, %v996_v55, %v1000_v2  ;;  %v1043_v28 = vor.u32 %v1042_v40, %v1039_v51  ;;  %v3804_v55 = vpop.permute.xlu0 %3803 }
 0x169   : > { %v1053_v24 = vor.u32 %v1052_v45, %v1048_v32  ;;  %v1795_v54 = vshrl.u32 %v1704_v60, 16  ;;  %v3703_v47 = vunpack.c.l.b16 %v1001_v42  ;;  %v1798_v10 = vshll.u32 %v1704_v60, 16  ;;  %4355 = vrot.lane.b32.xlu0 %v4331_v50, %s5369_s14  ;;  %v736_v42 = vld [vmem:[#allocation2 + $0x9c] sm:$0xf] }
 0x16a   : > { %v1011_v4 = vsel %vm6314_vm2, %v1006_v46, %v1010_v41  ;;  %v1044_v8 = vrot.slane %v1043_v28, 4  ;;  %v1804_v16 = vshll.u32 %v6687_v52, 16  ;;  %v1808_v2 = vshrl.u32 %v6687_v52, 16 }
 0x16b   : > { %v1054_v27 = vrot.slane %v1053_v24, 4  ;;  %v3704_v56 = vunpack.c.l.b16 %v1011_v4  ;;  %v1797_v48 = vrot.slane %v1795_v54, 4  ;;  %v1800_v57 = vrot.slane %v1798_v10, 5 }
 0x16c   : > { %v1814_v9 = vshll.u32 %v6691_v36, 16  ;;  %v1049_v11 = vsel %vm6314_vm2, %v1044_v8, %v1048_v32  ;;  %v1806_v12 = vrot.slane %v1804_v16, 5  ;;  %v1810_v63 = vrot.slane %v1808_v2, 4 }
 0x16d   : > { %v1059_v38 = vsel %vm6314_vm2, %v1054_v27, %v1058_v61  ;;  %v3725_v49 = vpack.c.b16 %v3704_v56, %v3703_v47  ;;  %v3707_v41 = vunpack.c.l.b16 %v1049_v11  ;;  %v1801_v25 = vor.u32 %v1800_v57, %v1797_v48 }
 0x16e   : > { %v3708_v23 = vunpack.c.l.b16 %v1059_v38  ;;  %v1816_v17 = vrot.slane %v1814_v9, 5  ;;  %v1867_v0 = vshrl.u32 %v1713_v58, 16  ;;  %v1870_v31 = vshll.u32 %v1713_v58, 16 }
 0x16f   : > { %v6712_v26 = vsel %vm4371_vm4, %v3725_v49, %v3800_v21  ;;  %v1876_v15 = vshll.u32 %v6701_v20, 16  ;;  %v1802_v7 = vrot.slane %v1801_v25, 4  ;;  %v1811_v45 = vor.u32 %v1810_v63, %v1806_v12 }
 0x170   : > { %v3727_v32 = vpack.c.b16 %v3708_v23, %v3707_v41  ;;  %v1880_v60 = vshrl.u32 %v6701_v20, 16  ;;  %v1869_v51 = vrot.slane %v1867_v0, 4  ;;  %v1872_v40 = vrot.slane %v1870_v31, 5 }
 0x171   : > { %v1878_v46 = vrot.slane %v1876_v15, 5  ;;  %v1886_v24 = vshll.u32 %v6709_v35, 16  ;;  %v1807_v37 = vsel %vm6314_vm2, %v1802_v7, %v1806_v12  ;;  %v1812_v61 = vrot.slane %v1811_v45, 4 }
 0x172   : > { %v6722_v3 = vsel %vm4371_vm4, %v3727_v32, %v3804_v55  ;;  %v1882_v50 = vrot.slane %v1880_v60, 4  ;;  %v3895_v28 = vunpack.c.l.b16 %v1807_v37  ;;  %v1873_v54 = vor.u32 %v1872_v40, %v1869_v51  ;;  %v8141_v40 = vld [vmem:[#allocation13_spill] sm:$0xff] }
 0x173   : > { %v1888_v4 = vrot.slane %v1886_v24, 5  ;;  %v5164_v47 = vrot.slane %v6716_v19, 9  ;;  %v1817_v27 = vsel %vm6314_vm2, %v1812_v61, %v1816_v17  ;;  %v2210_v56 = vrot.slane %v6687_v52, 5  ;;  %v742_v17 = vld [vmem:[#allocation2 + $0xb4] sm:$0xf] }
 0x174   : > { %v1883_v10 = vor.u32 %v1882_v50, %v1878_v46  ;;  %v2213_v8 = vrot.slane %v6691_v36, 5  ;;  %v3896_v48 = vunpack.c.l.b16 %v1817_v27  ;;  %v1874_v58 = vrot.slane %v1873_v54, 4  ;;  %v3874_v54 = vpop.permute.xlu2 %3873 }
 0x175   : > { %v1061_v21 = vshrl.u32 %v736_v42, 16  ;;  %v1064_v38 = vshll.u32 %v736_v42, 16  ;;  %v2211_v9 = vsel %vm5453_vm6, %v5164_v47, %v2210_v56  ;;  %v2212_v49 = vrot.slane %v2210_v56, 4  ;;  %v6748_v42 = vld [vmem:[#allocation2 + $0xb8] sm:$0xf] }
 0x176   : > { %v1884_v57 = vrot.slane %v1883_v10, 4  ;;  %v8139_v11 = vshll.u32 %v6103_v53, 16  ;;  %v3925_v12 = vpack.c.b16 %v3896_v48, %v3895_v28  ;;  %v1879_v41 = vsel %vm6314_vm2, %v1874_v58, %v1878_v46  ;;  %v8143_v10 = vld [vmem:[#allocation14_spill] sm:$0xff] }
 0x177   : > { %v3975_v25 = vunpack.c.l.b16 %v2211_v9  ;;  %v1063_v63 = vrot.slane %v1061_v21, 4  ;;  %v3901_v0 = vunpack.c.l.b16 %v1879_v41  ;;  %v2214_v31 = vsel %vm5453_vm6, %v2212_v49, %v2213_v8  ;;  %v3806_v9 = vpop.permute.xlu1 %3805 }
 0x178   : > { %v1072_v23 = vrot.slane %v8139_v11, 5  ;;  %v1889_v36 = vsel %vm6314_vm2, %v1884_v57, %v1888_v4  ;;  %v1066_v32 = vrot.slane %v1064_v38, 5  ;;  %3943 = vrot.lane.b32.xlu1 %v3925_v12, %s5364_s9  ;;  %v3976_v45 = vunpack.c.l.b16 %v2214_v31  ;;  %v2135_v38 = vld [vmem:[#allocation2 + $0x48] sm:$0xe] }
 0x179   : > { %v3902_v7 = vunpack.c.l.b16 %v1889_v36  ;;  %v8140_v55 = vshrl.u32 %v6103_v53, 16  ;;  %v8142_v46 = vshll.u32 %v8141_v40, 16  ;;  %v1109_v61 = vshrl.u32 %v742_v17, 16  ;;  %v3810_v36 = vpop.permute.xlu0 %3809 }
 0x17a   : > { %v1067_v37 = vor.u32 %v1066_v32, %v1063_v63  ;;  %v1112_v50 = vshll.u32 %v742_v17, 16  ;;  %v1118_v28 = vshll.u32 %v6748_v42, 16  ;;  %v4005_v47 = vpack.c.b16 %v3976_v45, %v3975_v25 }
 0x17b   : > { %v1076_v51 = vrot.slane %v8140_v55, 4  ;;  %v1082_v24 = vrot.slane %v8142_v46, 5  ;;  %v3928_v4 = vpack.c.b16 %v3902_v7, %v3901_v0  ;;  %v8144_v56 = vshrl.u32 %v8143_v10, 16  ;;  %v2308_v46 = vld [vmem:[#allocation2 + $0x2c] sm:$0x3] }
 0x17c   : > { %v1068_v48 = vrot.slane %v1067_v37, 4  ;;  %v1111_v53 = vrot.slane %v1109_v61, 4  ;;  %v1114_v58 = vrot.slane %v1112_v50, 5  ;;  %v1120_v21 = vrot.slane %v1118_v28, 5  ;;  %4023 = vrot.lane.b32.xlu0 %v4005_v47, %s5365_s10 }
 0x17d   : > { %v1077_v27 = vor.u32 %v1076_v51, %v1072_v23  ;;  %v1124_v8 = vrot.slane %v8144_v56, 4  ;;  %3949 = vrot.lane.b32.xlu2 %v3928_v4, %s5364_s9  ;;  %v8145_v49 = vshll.u32 %v6137_v62, 16  ;;  %v6761_v12 = vsel %vm4420_vm5, %v6652_v22, %v3874_v54 }
 0x17e   : > { %v5167_v41 = vrot.slane %v2135_v38, 9  ;;  %v1073_v25 = vsel %vm6314_vm2, %v1068_v48, %v1072_v23  ;;  %v1115_v63 = vor.u32 %v1114_v58, %v1111_v53  ;;  %v2231_v0 = vrot.slane %v6701_v20, 5 }
 0x17f   : > { %v1078_v57 = vrot.slane %v1077_v27, 4  ;;  %v1130_v11 = vrot.slane %v8145_v49, 5  ;;  %v1125_v17 = vor.u32 %v1124_v8, %v1120_v21  ;;  %v3709_v32 = vunpack.c.l.b16 %v1073_v25  ;;  %v2311_v25 = vld [vmem:[#allocation2 + $0x50] sm:$0x3] }
 0x180   : > { %v2234_v62 = vrot.slane %v6709_v35, 5  ;;  %v2369_v7 = vshrl.u32 %v6716_v19, 16  ;;  %v1116_v22 = vrot.slane %v1115_v63, 4  ;;  %v2232_v51 = vsel %vm5453_vm6, %v5167_v41, %v2231_v0 }
 0x181   : > { %v1083_v31 = vsel %vm6314_vm2, %v1078_v57, %v1082_v24  ;;  %v1126_v55 = vrot.slane %v1125_v17, 4  ;;  %v2233_v23 = vrot.slane %v2231_v0, 4  ;;  %v3981_v40 = vunpack.c.l.b16 %v2232_v51  ;;  %v3880_v51 = vpop.permute.xlu2 %3879 }
 0x182   : > { %v3710_v45 = vunpack.c.l.b16 %v1083_v31  ;;  %v2371_v37 = vrot.slane %v2369_v7, 5  ;;  %v2372_v61 = vshll.u32 %v6716_v19, 16  ;;  %v1121_v24 = vsel %vm6314_vm2, %v1116_v22, %v1120_v21 }
 0x183   : > { %v1131_v35 = vsel %vm6314_vm2, %v1126_v55, %v1130_v11  ;;  %v2377_v54 = vrot.slane %v1808_v2, 5  ;;  %v3713_v4 = vunpack.c.l.b16 %v1121_v24  ;;  %v2235_v27 = vsel %vm5453_vm6, %v2233_v23, %v2234_v62 }
 0x184   : > { %v3728_v50 = vpack.c.b16 %v3710_v45, %v3709_v32  ;;  %v3714_v47 = vunpack.c.l.b16 %v1131_v35  ;;  %v2374_v56 = vrot.slane %v2372_v61, 6  ;;  %v3982_v19 = vunpack.c.l.b16 %v2235_v27  ;;  %v3860_v32 = vpop.permute.xlu1 %3859  ;;  %v3864_v45 = vpop.permute.xlu0 %3863  ;;  %v2697_v61 = vld [vmem:[#allocation2 + $0x30] sm:$0xf]  ;;  %v6808_v35 = vld [vmem:[#allocation2 + $0x38] sm:$0x1] }
 0x185   : > { %v2378_v48 = vrot.slane %v1804_v16, 6  ;;  %v2383_v53 = vshrl.u32 %v2308_v46, 16  ;;  %v2386_v57 = vshll.u32 %v2308_v46, 16  ;;  %v2438_v49 = vshrl.u32 %v2135_v38, 16 }
 0x186   : > { %v6782_v8 = vsel %vm4371_vm4, %v3728_v50, %v3806_v9  ;;  %v3730_v58 = vpack.c.b16 %v3714_v47, %v3713_v4  ;;  %v2375_v21 = vor.u32 %v2374_v56, %v2371_v37  ;;  %v4008_v11 = vpack.c.b16 %v3982_v19, %v3981_v40 }
 0x187   : > { %v2379_v2 = vor.u32 %v2378_v48, %v2377_v54  ;;  %v2385_v41 = vrot.slane %v2383_v53, 5  ;;  %v2441_v63 = vshll.u32 %v2135_v38, 16  ;;  %v2388_v9 = vrot.slane %v2386_v57, 6  ;;  %v2706_v57 = vld [vmem:[#allocation2 + $0x54] sm:$0xf] }
 0x188   : > { %v6787_v17 = vsel %vm4371_vm4, %v3730_v58, %v3810_v36  ;;  %v2376_v0 = vrot.slane %v2375_v21, 4  ;;  %v2440_v31 = vrot.slane %v2438_v49, 5  ;;  %4029 = vrot.lane.b32.xlu1 %v4008_v11, %s5365_s10  ;;  %v2446_v62 = vrot.slane %v1880_v60, 5  ;;  %v6800_v60 = vld [vmem:[#allocation2 + $0x34] sm:$0xf] }
 0x189   : > { %v2381_v52 = vrot.slane %v2379_v2, 4  ;;  %v2443_v16 = vrot.slane %v2441_v63, 6  ;;  %v2447_v7 = vrot.slane %v1876_v15, 6  ;;  %v2389_v36 = vor.u32 %v2388_v9, %v2385_v41  ;;  %v6819_v49 = vld [vmem:[#allocation2 + $0x58] sm:$0xf] }
 0x18a   : > { %v2380_v38 = vsel %vm6087_vm13, %v2376_v0, %v2379_v2  ;;  %v2452_v22 = vshrl.u32 %v2311_v25, 16  ;;  %v2455_v55 = vshll.u32 %v2311_v25, 16  ;;  %v6798_v37 = vsel %vm4420_vm5, %v6478_v29, %v3860_v32  ;;  %v6823_v25 = vld [vmem:[#allocation2 + $0x5c] sm:$0x1] }
 0x18b   : > { %v4055_v23 = vunpack.c.l.b16 %v2380_v38  ;;  %v2444_v40 = vor.u32 %v2443_v16, %v2440_v31  ;;  %v2448_v46 = vor.u32 %v2447_v7, %v2446_v62  ;;  %v2390_v20 = vsel %vm6087_vm13, %v2381_v52, %v2389_v36  ;;  %v3125_v7 = vld [vmem:[#allocation2 + $0x30] sm:$0xe] }
 0x18c   : > { %v2454_v15 = vrot.slane %v2452_v22, 5  ;;  %v2457_v50 = vrot.slane %v2455_v55, 6  ;;  %v6806_v24 = vsel %vm4420_vm5, %v6549_v34, %v3864_v45  ;;  %v4056_v54 = vunpack.c.l.b16 %v2390_v20 }
 0x18d   : > { %v2445_v4 = vrot.slane %v2444_v40, 4  ;;  %v2450_v47 = vrot.slane %v2448_v46, 4  ;;  %v6812_v29 = vsel %vm4420_vm5, %v6712_v26, %v3880_v51  ;;  %v2788_v56 = vshrl.u32 %v2697_v61, 16 }
 0x18e   : > { %v2458_v27 = vor.u32 %v2457_v50, %v2454_v15  ;;  %v2791_v19 = vshll.u32 %v2697_v61, 16  ;;  %v2797_v48 = vshll.u32 %v6800_v60, 16  ;;  %v4085_v53 = vpack.c.b16 %v4056_v54, %v4055_v23 }
 0x18f   : > { %v2449_v58 = vsel %vm6087_vm13, %v2445_v4, %v2448_v46  ;;  %v2801_v34 = vshrl.u32 %v6800_v60, 16  ;;  %v2807_v21 = vshll.u32 %v6808_v35, 16  ;;  %v2790_v2 = vrot.slane %v2788_v56, 4  ;;  %v3866_v46 = vpop.permute.xlu1 %3865  ;;  %v3870_v56 = vpop.permute.xlu0 %3869 }
 0x190   : > { %v2459_v26 = vsel %vm6087_vm13, %v2450_v47, %v2458_v27  ;;  %v4061_v11 = vunpack.c.l.b16 %v2449_v58  ;;  %v2793_v41 = vrot.slane %v2791_v19, 5  ;;  %4103 = vrot.lane.b32.xlu2 %v4085_v53, %s5366_s11  ;;  %v2799_v0 = vrot.slane %v2797_v48, 5  ;;  %v3886_v19 = vpop.permute.xlu2 %3885 }
 0x191   : > { %v4062_v63 = vunpack.c.l.b16 %v2459_v26  ;;  %v2803_v9 = vrot.slane %v2801_v34, 4  ;;  %v2809_v31 = vrot.slane %v2807_v21, 5  ;;  %v2860_v52 = vshrl.u32 %v2706_v57, 16 }
 0x192   : > { %v2794_v32 = vor.u32 %v2793_v41, %v2790_v2  ;;  %v2863_v16 = vshll.u32 %v2706_v57, 16  ;;  %v2869_v62 = vshll.u32 %v6819_v49, 16  ;;  %v2873_v36 = vshrl.u32 %v6819_v49, 16 }
 0x193   : > { %v4088_v45 = vpack.c.b16 %v4062_v63, %v4061_v11  ;;  %v2804_v38 = vor.u32 %v2803_v9, %v2799_v0  ;;  %v2879_v22 = vshll.u32 %v6823_v25, 16  ;;  %v2862_v51 = vrot.slane %v2860_v52, 4 }
 0x194   : > { %v2795_v55 = vrot.slane %v2794_v32, 4  ;;  %v2865_v23 = vrot.slane %v2863_v16, 5  ;;  %v2871_v40 = vrot.slane %v2869_v62, 5  ;;  %v2875_v20 = vrot.slane %v2873_v36, 4 }
 0x195   : > { %4109 = vrot.lane.b32.xlu0 %v4088_v45, %s5366_s11  ;;  %v2805_v61 = vrot.slane %v2804_v38, 4  ;;  %v2881_v15 = vrot.slane %v2879_v22, 5  ;;  %v5180_v50 = vrot.slane %v3125_v7, 9  ;;  %v3203_v47 = vrot.slane %v6800_v60, 5 }
 0x196   : > { %v2800_v54 = vsel %vm6314_vm2, %v2795_v55, %v2799_v0  ;;  %v2866_v4 = vor.u32 %v2865_v23, %v2862_v51  ;;  %v3206_v27 = vrot.slane %v6808_v35, 5  ;;  %v2876_v21 = vor.u32 %v2875_v20, %v2871_v40  ;;  %v3301_v51 = vld [vmem:[#allocation2 + $0x38] sm:$0x3] }
 0x197   : > { %v2810_v53 = vsel %vm6314_vm2, %v2805_v61, %v2809_v31  ;;  %v4135_v58 = vunpack.c.l.b16 %v2800_v54  ;;  %v6846_v57 = vsel %vm4420_vm5, %v6607_v39, %v3866_v46  ;;  %v3204_v2 = vsel %vm5453_vm6, %v5180_v50, %v3203_v47  ;;  %v3128_v31 = vld [vmem:[#allocation2 + $0x54] sm:$0xe] }
 0x198   : > { %v4136_v26 = vunpack.c.l.b16 %v2810_v53  ;;  %v2867_v11 = vrot.slane %v2866_v4, 4  ;;  %v3205_v41 = vrot.slane %v3203_v47, 4  ;;  %v2877_v63 = vrot.slane %v2876_v21, 4 }
 0x199   : > { %v4215_v0 = vunpack.c.l.b16 %v3204_v2  ;;  %v6852_v35 = vsel %vm4420_vm5, %v6426_v1, %v3870_v56  ;;  %v6856_v9 = vsel %vm4420_vm5, %v6782_v8, %v3886_v19  ;;  %v5183_v16 = vrot.slane %v3128_v31, 9 }
 0x19a   : > { %v4165_v32 = vpack.c.b16 %v4136_v26, %v4135_v58  ;;  %v2872_v39 = vsel %vm6314_vm2, %v2867_v11, %v2871_v40  ;;  %v3207_v52 = vsel %vm5453_vm6, %v3205_v41, %v3206_v27  ;;  %v2882_v45 = vsel %vm6314_vm2, %v2877_v63, %v2881_v15  ;;  %v3304_v58 = vld [vmem:[#allocation2 + $0x5c] sm:$0x3]  ;;  %v3872_v63 = vpop.permute.xlu1 %3871 }
 0x19b   : > { %v4141_v38 = vunpack.c.l.b16 %v2872_v39  ;;  %v4216_v22 = vunpack.c.l.b16 %v3207_v52  ;;  %v3224_v1 = vrot.slane %v6819_v49, 5  ;;  %v4142_v8 = vunpack.c.l.b16 %v2882_v45 }
 0x19c   : > { %4183 = vrot.lane.b32.xlu1 %v4165_v32, %s5368_s13  ;;  %v3227_v55 = vrot.slane %v6823_v25, 5  ;;  %v3362_v23 = vshrl.u32 %v3125_v7, 16  ;;  %v3365_v46 = vshll.u32 %v3125_v7, 16  ;;  %v3370_v15 = vrot.slane %v2801_v34, 5 }
 0x19d   : > { %v4245_v40 = vpack.c.b16 %v4216_v22, %v4215_v0  ;;  %v3225_v61 = vsel %vm5453_vm6, %v5183_v16, %v3224_v1  ;;  %v3226_v20 = vrot.slane %v3224_v1, 4  ;;  %v4168_v50 = vpack.c.b16 %v4142_v8, %v4141_v38  ;;  %v3876_v38 = vpop.permute.xlu0 %3875  ;;  %v1725_v8 = vld [vmem:[#allocation2 + $0x78] sm:$0xf] }
 0x19e   : > { %v4221_v54 = vunpack.c.l.b16 %v3225_v61  ;;  %v3364_v4 = vrot.slane %v3362_v23, 5  ;;  %v3367_v47 = vrot.slane %v3365_v46, 6  ;;  %v3371_v7 = vrot.slane %v2797_v48, 6 }
 0x19f   : > { %4263 = vrot.lane.b32.xlu0 %v4245_v40, %s5367_s12  ;;  %v3228_v25 = vsel %vm5453_vm6, %v3226_v20, %v3227_v55  ;;  %v3376_v27 = vshrl.u32 %v3301_v51, 16  ;;  %v3379_v56 = vshll.u32 %v3301_v51, 16  ;;  %4189 = vrot.lane.b32.xlu2 %v4168_v50, %s5368_s13  ;;  %v3431_v34 = vshrl.u32 %v3128_v31, 16  ;;  %v6888_v55 = vld [vmem:[#allocation2 + $0x7c] sm:$0xf] }
 0x1a0   : > { %v4222_v19 = vunpack.c.l.b16 %v3228_v25  ;;  %v3368_v53 = vor.u32 %v3367_v47, %v3364_v4  ;;  %v3434_v21 = vshll.u32 %v3128_v31, 16  ;;  %v3372_v26 = vor.u32 %v3371_v7, %v3370_v15  ;;  %v1734_v15 = vld [vmem:[#allocation2 + $0x9c] sm:$0xf] }
 0x1a1   : > { %v3378_v11 = vrot.slane %v3376_v27, 5  ;;  %v3381_v2 = vrot.slane %v3379_v56, 6  ;;  %v3439_v41 = vrot.slane %v2873_v36, 5  ;;  %v3433_v60 = vrot.slane %v3431_v34, 5 }
 0x1a2   : > { %v4248_v0 = vpack.c.b16 %v4222_v19, %v4221_v54  ;;  %v3369_v32 = vrot.slane %v3368_v53, 4  ;;  %v3436_v48 = vrot.slane %v3434_v21, 6  ;;  %v3374_v39 = vrot.slane %v3372_v26, 4  ;;  %v6900_v19 = vld [vmem:[#allocation2 + $0xa0] sm:$0xf] }
 0x1a3   : > { %v3382_v52 = vor.u32 %v3381_v2, %v3378_v11  ;;  %v3440_v16 = vrot.slane %v2869_v62, 6  ;;  %v3445_v45 = vshrl.u32 %v3304_v58, 16  ;;  %v3448_v1 = vshll.u32 %v3304_v58, 16 }
 0x1a4   : > { %4269 = vrot.lane.b32.xlu1 %v4248_v0, %s5367_s12  ;;  %v3373_v31 = vsel %vm6087_vm13, %v3369_v32, %v3372_v26  ;;  %v3437_v22 = vor.u32 %v3436_v48, %v3433_v60  ;;  %v6886_v36 = vsel %vm4420_vm5, %v6612_v33, %v3872_v63  ;;  %v6894_v20 = vsel %vm4420_vm5, %v6493_v44, %v3876_v38  ;;  %v1727_v33 = vld [vmem:[#allocation2 + $0x80] sm:$0x1]  ;;  %v6907_v26 = vpop.permute.xlu2 %4019  ;;  %v1736_v32 = vld [vmem:[#allocation2 + $0xa4] sm:$0x1] }
 0x1a5   : > { %v3383_v49 = vsel %vm6087_vm13, %v3374_v39, %v3382_v52  ;;  %v4295_v62 = vunpack.c.l.b16 %v3373_v31  ;;  %v3441_v51 = vor.u32 %v3440_v16, %v3439_v41  ;;  %v3447_v23 = vrot.slane %v3445_v45, 5  ;;  %v2139_v39 = vld [vmem:[#allocation2 + $0x78] sm:$0xe] }
 0x1a6   : > { %v4296_v46 = vunpack.c.l.b16 %v3383_v49  ;;  %v3438_v40 = vrot.slane %v3437_v22, 4  ;;  %v3450_v61 = vrot.slane %v3448_v1, 6  ;;  %v1963_v54 = vshrl.u32 %v1725_v8, 16 }
 0x1a7   : > { %v3443_v50 = vrot.slane %v3441_v51, 4  ;;  %v1966_v4 = vshll.u32 %v1725_v8, 16  ;;  %v1972_v47 = vshll.u32 %v6888_v55, 16  ;;  %v1976_v56 = vshrl.u32 %v6888_v55, 16 }
 0x1a8   : > { %v4325_v25 = vpack.c.b16 %v4296_v46, %v4295_v62  ;;  %v3442_v7 = vsel %vm6087_vm13, %v3438_v40, %v3441_v51  ;;  %v3451_v27 = vor.u32 %v3450_v61, %v3447_v23  ;;  %v1965_v58 = vrot.slane %v1963_v54, 4  ;;  %v3882_v54 = vpop.permute.xlu0 %3881 }
 0x1a9   : > { %v4301_v53 = vunpack.c.l.b16 %v3442_v7  ;;  %v1968_v44 = vrot.slane %v1966_v4, 5  ;;  %v1974_v34 = vrot.slane %v1972_v47, 5  ;;  %v1978_v11 = vrot.slane %v1976_v56, 4 }
 0x1aa   : > { %4343 = vrot.lane.b32.xlu2 %v4325_v25, %s5369_s14  ;;  %v3452_v21 = vsel %vm6087_vm13, %v3443_v50, %v3451_v27  ;;  %v1982_v2 = vshll.u32 %v1727_v33, 16  ;;  %v2035_v41 = vshrl.u32 %v1734_v15, 16  ;;  %v2038_v60 = vshll.u32 %v1734_v15, 16  ;;  %v3878_v50 = vpop.permute.xlu1 %3877 }
 0x1ab   : > { %v4302_v63 = vunpack.c.l.b16 %v3452_v21  ;;  %v1969_v0 = vor.u32 %v1968_v44, %v1965_v58  ;;  %v2044_v48 = vshll.u32 %v6900_v19, 16  ;;  %v1979_v52 = vor.u32 %v1978_v11, %v1974_v34 }
 0x1ac   : > { %v1984_v16 = vrot.slane %v1982_v2, 5  ;;  %v2037_v45 = vrot.slane %v2035_v41, 4  ;;  %v2048_v38 = vshrl.u32 %v6900_v19, 16  ;;  %v2040_v1 = vrot.slane %v2038_v60, 5  ;;  %v2142_v41 = vld [vmem:[#allocation2 + $0x9c] sm:$0xe] }
 0x1ad   : > { %v4328_v31 = vpack.c.b16 %v4302_v63, %v4301_v53  ;;  %v1970_v22 = vrot.slane %v1969_v0, 4  ;;  %v2046_v8 = vrot.slane %v2044_v48, 5  ;;  %v1980_v49 = vrot.slane %v1979_v52, 4 }
 0x1ae   : > { %v2050_v62 = vrot.slane %v2048_v38, 4  ;;  %v2054_v51 = vshll.u32 %v1736_v32, 16  ;;  %v5171_v23 = vrot.slane %v2139_v39, 9  ;;  %v2041_v40 = vor.u32 %v2040_v1, %v2037_v45 }
 0x1af   : > { %4349 = vrot.lane.b32.xlu0 %v4328_v31, %s5369_s14  ;;  %v1975_v46 = vsel %vm6314_vm2, %v1970_v22, %v1974_v34  ;;  %v2259_v61 = vrot.slane %v6888_v55, 5  ;;  %v2262_v15 = vrot.slane %v1727_v33, 5  ;;  %v1985_v4 = vsel %vm6314_vm2, %v1980_v49, %v1984_v16  ;;  %v2315_v49 = vld [vmem:[#allocation2 + $0x80] sm:$0x3] }
 0x1b0   : > { %v3909_v25 = vunpack.c.l.b16 %v1975_v46  ;;  %v2051_v7 = vor.u32 %v2050_v62, %v2046_v8  ;;  %v2056_v27 = vrot.slane %v2054_v51, 5  ;;  %v3910_v53 = vunpack.c.l.b16 %v1985_v4 }
 0x1b1   : > { %v2042_v58 = vrot.slane %v2041_v40, 4  ;;  %v2260_v44 = vsel %vm5453_vm6, %v5171_v23, %v2259_v61  ;;  %v2261_v21 = vrot.slane %v2259_v61, 4  ;;  %v6927_v2 = vsel %vm4420_vm5, %v6657_v30, %v3878_v50  ;;  %v6939_v30 = vpop.permute.xlu2 %4259 }
 0x1b2   : > { %v2052_v11 = vrot.slane %v2051_v7, 4  ;;  %v3989_v34 = vunpack.c.l.b16 %v2260_v44  ;;  %v6931_v33 = vsel %vm4420_vm5, %v6538_v5, %v3882_v54  ;;  %v3932_v63 = vpack.c.b16 %v3910_v53, %v3909_v25  ;;  %v2318_v53 = vld [vmem:[#allocation2 + $0xa4] sm:$0x3] }
 0x1b3   : > { %v2047_v0 = vsel %vm6314_vm2, %v2042_v58, %v2046_v8  ;;  %v2263_v60 = vsel %vm5453_vm6, %v2261_v21, %v2262_v15  ;;  %v5174_v52 = vrot.slane %v2142_v41, 9  ;;  %v2280_v22 = vrot.slane %v6900_v19, 5 }
 0x1b4   : > { %v2057_v16 = vsel %vm6314_vm2, %v2052_v11, %v2056_v27  ;;  %v3915_v45 = vunpack.c.l.b16 %v2047_v0  ;;  %v3990_v31 = vunpack.c.l.b16 %v2263_v60  ;;  %3957 = vrot.lane.b32.xlu1 %v3932_v63, %s5364_s9  ;;  %v2283_v1 = vrot.slane %v1736_v32, 5  ;;  %v3884_v63 = vpop.permute.xlu1 %3883 }
 0x1b5   : > { %v3916_v5 = vunpack.c.l.b16 %v2057_v16  ;;  %v2530_v62 = vshrl.u32 %v2139_v39, 16  ;;  %v2533_v8 = vshll.u32 %v2139_v39, 16  ;;  %v2281_v23 = vsel %vm5453_vm6, %v5174_v52, %v2280_v22 }
 0x1b6   : > { %v4012_v51 = vpack.c.b16 %v3990_v31, %v3989_v34  ;;  %v2282_v46 = vrot.slane %v2280_v22, 4  ;;  %v2538_v40 = vrot.slane %v1976_v56, 5  ;;  %v3995_v15 = vunpack.c.l.b16 %v2281_v23  ;;  %v3888_v22 = vpop.permute.xlu0 %3887 }
 0x1b7   : > { %v3935_v61 = vpack.c.b16 %v3916_v5, %v3915_v45  ;;  %v2532_v50 = vrot.slane %v2530_v62, 5  ;;  %v2535_v54 = vrot.slane %v2533_v8, 6  ;;  %v2539_v39 = vrot.slane %v1972_v47, 6 }
 0x1b8   : > { %4037 = vrot.lane.b32.xlu0 %v4012_v51, %s5365_s10  ;;  %v2284_v32 = vsel %vm5453_vm6, %v2282_v46, %v2283_v1  ;;  %v2544_v4 = vshrl.u32 %v2315_v49, 16  ;;  %v2547_v25 = vshll.u32 %v2315_v49, 16  ;;  %v2599_v56 = vshrl.u32 %v2142_v41, 16  ;;  %v4659_v49 = vld [vmem:[%s8028_s3 + $0x20] sm:$0xf] }
 0x1b9   : > { %3963 = vrot.lane.b32.xlu2 %v3935_v61, %s5364_s9  ;;  %v3996_v7 = vunpack.c.l.b16 %v2284_v32  ;;  %v2536_v27 = vor.u32 %v2535_v54, %v2532_v50  ;;  %v2602_v58 = vshll.u32 %v2142_v41, 16  ;;  %v2540_v44 = vor.u32 %v2539_v39, %v2538_v40  ;;  %v3948_v51 = vpop.permute.xlu2 %3947  ;;  %v6975_v32 = vld [vmem:[#allocation2 + $0x8c] sm:$0x1] }
 0x1ba   : > { %v2546_v21 = vrot.slane %v2544_v4, 5  ;;  %v2549_v11 = vrot.slane %v2547_v25, 6  ;;  %v2607_v34 = vrot.slane %v2048_v38, 5  ;;  %v2601_v55 = vrot.slane %v2599_v56, 5 }
 0x1bb   : > { %v4015_v0 = vpack.c.b16 %v3996_v7, %v3995_v15  ;;  %v2537_v60 = vrot.slane %v2536_v27, 4  ;;  %v2604_v47 = vrot.slane %v2602_v58, 6  ;;  %v2542_v52 = vrot.slane %v2540_v44, 4  ;;  %v6973_v15 = vld [vmem:[#allocation2 + $0x88] sm:$0xf] }
 0x1bc   : > { %v2550_v16 = vor.u32 %v2549_v11, %v2546_v21  ;;  %v2608_v45 = vrot.slane %v2044_v48, 6  ;;  %v2613_v31 = vshrl.u32 %v2318_v53, 16  ;;  %v2616_v1 = vshll.u32 %v2318_v53, 16  ;;  %v2727_v58 = vld [vmem:[#allocation2 + $0xa8] sm:$0xf] }
 0x1bd   : > { %4043 = vrot.lane.b32.xlu1 %v4015_v0, %s5365_s10  ;;  %v2541_v41 = vsel %vm6087_vm13, %v2537_v60, %v2540_v44  ;;  %v2605_v5 = vor.u32 %v2604_v47, %v2601_v55  ;;  %v6962_v38 = vsel %vm4420_vm5, %v6722_v3, %v3884_v63  ;;  %v6971_v61 = vsel %vm4420_vm5, %v6600_v14, %v3888_v22  ;;  %v2718_v3 = vld [vmem:[#allocation2 + $0x84] sm:$0xf]  ;;  %v6989_v63 = vld [vmem:[#allocation2 + $0xac] sm:$0xf]  ;;  %v5233_v60 = vld [vmem:[%s8028_s3 + $0x18] sm:$0xff] }
 0x1be   : > { %v2551_v19 = vsel %vm6087_vm13, %v2542_v52, %v2550_v16  ;;  %v4069_v48 = vunpack.c.l.b16 %v2541_v41  ;;  %v2609_v62 = vor.u32 %v2608_v45, %v2607_v34  ;;  %v2615_v8 = vrot.slane %v2613_v31, 5  ;;  %v6995_v52 = vld [vmem:[#allocation2 + $0xb0] sm:$0x1]  ;;  %v7001_v41 = vld [vmem:[#allocation2 + $0x84] sm:$0xe] }
 0x1bf   : > { %v4070_v23 = vunpack.c.l.b16 %v2551_v19  ;;  %v2606_v46 = vrot.slane %v2605_v5, 4  ;;  %v2618_v40 = vrot.slane %v2616_v1, 6  ;;  %v4677_v54 = vunpack.c.l.b16 %v4659_v49 }
 0x1c0   : > { %v2611_v50 = vrot.slane %v2609_v62, 4  ;;  %v6981_v7 = vsel %vm4453_vm8, %v6685_v59, %v3948_v51  ;;  %v2956_v53 = vshrl.u32 %v2718_v3, 16  ;;  %v2959_v56 = vshll.u32 %v2718_v3, 16 }
 0x1c1   : > { %v4092_v39 = vpack.c.b16 %v4070_v23, %v4069_v48  ;;  %v2610_v4 = vsel %vm6087_vm13, %v2606_v46, %v2609_v62  ;;  %v2619_v25 = vor.u32 %v2618_v40, %v2615_v8  ;;  %v4682_v27 = vpack.c.b16 %v4677_v54, %v4677_v54  ;;  %v3940_v23 = vpop.permute.xlu1 %3939 }
 0x1c2   : > { %v4075_v14 = vunpack.c.l.b16 %v2610_v4  ;;  %v2965_v21 = vshll.u32 %v6973_v15, 16  ;;  %v2969_v11 = vshrl.u32 %v6973_v15, 16  ;;  %v2975_v34 = vshll.u32 %v6975_v32, 16 }
 0x1c3   : > { %4117 = vrot.lane.b32.xlu2 %v4092_v39, %s5366_s11  ;;  %v2620_v44 = vsel %vm6087_vm13, %v2611_v50, %v2619_v25  ;;  %v4722_v0 = vsel %vm4720_vm11, %v4682_v27, 0  ;;  %v2958_v55 = vrot.slane %v2956_v53, 4  ;;  %v2961_v47 = vrot.slane %v2959_v56, 5 }
 0x1c4   : > { %v4076_v59 = vunpack.c.l.b16 %v2620_v44  ;;  %4727 = vmatpush.bf16.msra.mxu0 %v4722_v0  ;;  %v2967_v16 = vrot.slane %v2965_v21, 5  ;;  %v2971_v45 = vrot.slane %v2969_v11, 4  ;;  %v2977_v31 = vrot.slane %v2975_v34, 5  ;;  %5313 = vmatpush.bf16.msra.mxu1 %v4722_v0 }
 0x1c5   : > { %v3028_v22 = vshrl.u32 %v2727_v58, 16  ;;  %v2962_v1 = vor.u32 %v2961_v47, %v2958_v55  ;;  %v3031_v49 = vshll.u32 %v2727_v58, 16  ;;  %v3037_v19 = vshll.u32 %v6989_v63, 16  ;;  %5314 = vmatpush.bf16.msra.mxu2 %v4722_v0  ;;  %5315 = vmatpush.bf16.msra.mxu3 %v4722_v0 }
 0x1c6   : > { %v4095_v5 = vpack.c.b16 %v4076_v59, %v4075_v14  ;;  %v2972_v48 = vor.u32 %v2971_v45, %v2967_v16  ;;  %v3041_v8 = vshrl.u32 %v6989_v63, 16  ;;  %v3047_v51 = vshll.u32 %v6995_v52, 16  ;;  %v5232_v14 = vld [vmem:[%s8028_s3 + $0x10] sm:$0xff] }
 0x1c7   : > { %v3030_v62 = vrot.slane %v3028_v22, 4  ;;  %v2963_v46 = vrot.slane %v2962_v1, 4  ;;  %v3033_v40 = vrot.slane %v3031_v49, 5  ;;  %v3039_v3 = vrot.slane %v3037_v19, 5  ;;  %v4100_v22 = vpop.permute.xlu0 %4099 }
 0x1c8   : > { %4123 = vrot.lane.b32.xlu0 %v4095_v5, %s5366_s11  ;;  %v5187_v50 = vrot.slane %v7001_v41, 9  ;;  %4728 = vmatpush.bf16.msra.mxu0 %v5233_v60  ;;  %v2973_v54 = vrot.slane %v2972_v48, 4  ;;  %v3043_v39 = vrot.slane %v3041_v8, 4  ;;  %v3049_v4 = vrot.slane %v3047_v51, 5  ;;  %v3135_v5 = vld [vmem:[#allocation2 + $0xa8] sm:$0xe] }
 0x1c9   : > { %v3252_v25 = vrot.slane %v6973_v15, 5  ;;  %5316 = vmatpush.bf16.msra.mxu1 %v5233_v60  ;;  %v2968_v27 = vsel %vm6314_vm2, %v2963_v46, %v2967_v16  ;;  %v3034_v53 = vor.u32 %v3033_v40, %v3030_v62  ;;  %v3255_v56 = vrot.slane %v6975_v32, 5  ;;  %5317 = vmatpush.bf16.msra.mxu2 %v5233_v60 }
 0x1ca   : > { %v4455_v58 = vsel %vm4453_vm8, %v6798_v37, %v3940_v23  ;;  %5318 = vmatpush.bf16.msra.mxu3 %v5233_v60  ;;  %v2978_v44 = vsel %vm6314_vm2, %v2973_v54, %v2977_v31  ;;  %v4149_v34 = vunpack.c.l.b16 %v2968_v27  ;;  %v3044_v59 = vor.u32 %v3043_v39, %v3039_v3  ;;  %v5231_v37 = vld [vmem:[%s8028_s3 + $0x8] sm:$0xff]  ;;  %v5230_v27 = vld [vmem:[%s8028_s3] sm:$0xff] }
 0x1cb   : > { %v3253_v0 = vsel %vm5453_vm6, %v5187_v50, %v3252_v25  ;;  %v4150_v55 = vunpack.c.l.b16 %v2978_v44  ;;  %v3035_v47 = vrot.slane %v3034_v53, 4  ;;  %v3254_v45 = vrot.slane %v3252_v25, 4  ;;  %v3308_v54 = vld [vmem:[#allocation2 + $0x8c] sm:$0x3] }
 0x1cc   : > { %v4229_v16 = vunpack.c.l.b16 %v3253_v0  ;;  %v3045_v32 = vrot.slane %v3044_v59, 4  ;;  %4729 = vmatpush.bf16.msra.mxu0 %v5232_v14  ;;  %v5190_v60 = vrot.slane %v3135_v5, 9  ;;  %v4488_v48 = vsel %vm4486_vm12, %v4455_v58, %v6907_v26  ;;  %v3311_v59 = vld [vmem:[#allocation2 + $0xb0] sm:$0x3] }
 0x1cd   : > { %5319 = vmatpush.bf16.msra.mxu1 %v5232_v14  ;;  %v4172_v31 = vpack.c.b16 %v4150_v55, %v4149_v34  ;;  %v3040_v1 = vsel %vm6314_vm2, %v3035_v47, %v3039_v3  ;;  %v3256_v49 = vsel %vm5453_vm6, %v3254_v45, %v3255_v56  ;;  %5320 = vmatpush.bf16.msra.mxu2 %v5232_v14  ;;  %v3273_v3 = vrot.slane %v6989_v63, 5 }
 0x1ce   : > { %v3050_v62 = vsel %vm6314_vm2, %v3045_v32, %v3049_v4  ;;  %v4155_v51 = vunpack.c.l.b16 %v3040_v1  ;;  %v4230_v23 = vunpack.c.l.b16 %v3256_v49  ;;  %v4521_v46 = vsel %vm4519_vm14, %v4488_v48, %v4100_v22  ;;  %5321 = vmatpush.bf16.msra.mxu3 %v5232_v14  ;;  %v4180_v1 = vpop.permute.xlu1 %4179 }
 0x1cf   : > { %4197 = vrot.lane.b32.xlu1 %v4172_v31, %s5368_s13  ;;  %v4156_v40 = vunpack.c.l.b16 %v3050_v62  ;;  %v3276_v50 = vrot.slane %v6995_v52, 5  ;;  %v3523_v39 = vshrl.u32 %v7001_v41, 16  ;;  %v3526_v25 = vshll.u32 %v7001_v41, 16 }
 0x1d0   : > { %v4252_v26 = vpack.c.b16 %v4230_v23, %v4229_v16  ;;  %4730 = vmatpush.bf16.msra.mxu0 %v5231_v37  ;;  %v3531_v4 = vrot.slane %v2969_v11, 5  ;;  %v3532_v14 = vrot.slane %v2965_v21, 6  ;;  %v3274_v52 = vsel %vm5453_vm6, %v5190_v60, %v3273_v3 }
 0x1d1   : > { %5322 = vmatpush.bf16.msra.mxu1 %v5231_v37  ;;  %v4175_v53 = vpack.c.b16 %v4156_v40, %v4155_v51  ;;  %v3275_v56 = vrot.slane %v3273_v3, 4  ;;  %v3525_v58 = vrot.slane %v3523_v39, 5  ;;  %5323 = vmatpush.bf16.msra.mxu2 %v5231_v37  ;;  %v4235_v41 = vunpack.c.l.b16 %v3274_v52 }
 0x1d2   : > { %4277 = vrot.lane.b32.xlu0 %v4252_v26, %s5367_s12  ;;  %v3528_v44 = vrot.slane %v3526_v25, 6  ;;  %v3533_v11 = vor.u32 %v3532_v14, %v3531_v4  ;;  %v3537_v34 = vshrl.u32 %v3308_v54, 16  ;;  %5324 = vmatpush.bf16.msra.mxu3 %v5231_v37  ;;  %v3540_v21 = vshll.u32 %v3308_v54, 16  ;;  %v4340_v25 = vpop.permute.xlu0 %4339  ;;  %v1707_v4 = vld [vmem:[#allocation2 + $0x30] sm:$0xf] }
 0x1d3   : > { %4203 = vrot.lane.b32.xlu2 %v4175_v53, %s5368_s13  ;;  %v3277_v15 = vsel %vm5453_vm6, %v3275_v56, %v3276_v50  ;;  %v3592_v0 = vshrl.u32 %v3135_v5, 16  ;;  %v3595_v55 = vshll.u32 %v3135_v5, 16  ;;  %v3600_v37 = vrot.slane %v3041_v8, 5  ;;  %v7065_v53 = vld [vmem:[#allocation2 + $0x34] sm:$0xf] }
 0x1d4   : > { %v4236_v47 = vunpack.c.l.b16 %v3277_v15  ;;  %v3529_v45 = vor.u32 %v3528_v44, %v3525_v58  ;;  %v3535_v16 = vrot.slane %v3533_v11, 4  ;;  %v3539_v22 = vrot.slane %v3537_v34, 5  ;;  %4731 = vmatpush.bf16.msra.mxu0 %v5230_v27  ;;  %v1709_v58 = vld [vmem:[#allocation2 + $0x38] sm:$0x1] }
 0x1d5   : > { %5325 = vmatpush.bf16.msra.mxu1 %v5230_v27  ;;  %v3542_v32 = vrot.slane %v3540_v21, 6  ;;  %v3594_v60 = vrot.slane %v3592_v0, 5  ;;  %v3597_v31 = vrot.slane %v3595_v55, 6  ;;  %5326 = vmatpush.bf16.msra.mxu2 %v5230_v27  ;;  %v3601_v62 = vrot.slane %v3037_v19, 6 }
 0x1d6   : > { %v4255_v49 = vpack.c.b16 %v4236_v47, %v4235_v41  ;;  %v3530_v48 = vrot.slane %v3529_v45, 4  ;;  %v3606_v5 = vshrl.u32 %v3311_v59, 16  ;;  %5327 = vmatpush.bf16.msra.mxu3 %v5230_v27  ;;  %v3609_v40 = vshll.u32 %v3311_v59, 16  ;;  %v1716_v41 = vld [vmem:[#allocation2 + $0x54] sm:$0xf] }
 0x1d7   : > { %v3543_v51 = vor.u32 %v3542_v32, %v3539_v22  ;;  %v3598_v23 = vor.u32 %v3597_v31, %v3594_v60  ;;  %v3602_v50 = vor.u32 %v3601_v62, %v3600_v37  ;;  %v4554_v54 = vsel %vm4552_vm15, %v4521_v46, %v4180_v1  ;;  %v7077_v47 = vld [vmem:[#allocation2 + $0x58] sm:$0xf]  ;;  %v7080_v22 = vld [vmem:[#allocation2 + $0x5c] sm:$0x1] }
 0x1d8   : > { %4283 = vrot.lane.b32.xlu1 %v4255_v49, %s5367_s12  ;;  %v3534_v3 = vsel %vm6087_vm13, %v3530_v48, %v3533_v11  ;;  %v3608_v8 = vrot.slane %v3606_v5, 5  ;;  %v3611_v26 = vrot.slane %v3609_v40, 6  ;;  %vm4585_vm11 = vcmask 457728   ;;  %v2133_v49 = vld [vmem:[#allocation2 + $0x30] sm:$0xe] }
 0x1d9   : > { %v3544_v39 = vsel %vm6087_vm13, %v3535_v16, %v3543_v51  ;;  %v4309_v63 = vunpack.c.l.b16 %v3534_v3  ;;  %v3599_v19 = vrot.slane %v3598_v23, 4  ;;  %v3604_v27 = vrot.slane %v3602_v50, 4 }
 0x1da   : > { %v4310_v14 = vunpack.c.l.b16 %v3544_v39  ;;  %v3612_v56 = vor.u32 %v3611_v26, %v3608_v8  ;;  %v4587_v46 = vsel %vm4585_vm11, %v4554_v54, %v6939_v30  ;;  %v1819_v15 = vshrl.u32 %v1707_v4, 16 }
 0x1db   : > { %v3603_v52 = vsel %vm6087_vm13, %v3599_v19, %v3602_v50  ;;  %v4620_v34 = vsel %vm4618_vm1, %v4587_v46, %v4340_v25  ;;  %v1822_v59 = vshll.u32 %v1707_v4, 16  ;;  %v1828_v0 = vshll.u32 %v7065_v53, 16  ;;  %v3942_v46 = vpop.permute.xlu1 %3941 }
 0x1dc   : > { %v4332_v44 = vpack.c.b16 %v4310_v14, %v4309_v63  ;;  %v4315_v11 = vunpack.c.l.b16 %v3603_v52  ;;  %v3613_v21 = vsel %vm6087_vm13, %v3604_v27, %v3612_v56  ;;  %5210 = vmatmul.msk.bf16.vlgmr.msra.gmra.mxu0 %vm4687_vm7, %v4620_v34  ;;  %v1832_v55 = vshrl.u32 %v7065_v53, 16 }
 0x1dd   : > { %v4316_v30 = vunpack.c.l.b16 %v3613_v21  ;;  %v1821_v45 = vrot.slane %v1819_v15, 4  ;;  %v1838_v16 = vshll.u32 %v1709_v58, 16  ;;  %v1891_v32 = vshrl.u32 %v1716_v41, 16  ;;  %v4022_v15 = vpop.permute.xlu0 %4021 }
 0x1de   : > { %4357 = vrot.lane.b32.xlu2 %v4332_v44, %s5369_s14  ;;  %v1824_v60 = vrot.slane %v1822_v59, 5  ;;  %v1830_v31 = vrot.slane %v1828_v0, 5  ;;  %v1834_v37 = vrot.slane %v1832_v55, 4  ;;  %v1894_v1 = vshll.u32 %v1716_v41, 16 }
 0x1df   : > { %v4335_v48 = vpack.c.b16 %v4316_v30, %v4315_v11  ;;  %v1840_v62 = vrot.slane %v1838_v16, 5  ;;  %v1893_v5 = vrot.slane %v1891_v32, 4  ;;  %v1900_v51 = vshll.u32 %v7077_v47, 16 }
 0x1e0   : > { %v1825_v23 = vor.u32 %v1824_v60, %v1821_v45  ;;  %v1835_v40 = vor.u32 %v1834_v37, %v1830_v31  ;;  %v1896_v3 = vrot.slane %v1894_v1, 5  ;;  %v1904_v50 = vshrl.u32 %v7077_v47, 16 }
 0x1e1   : > { %4363 = vrot.lane.b32.xlu0 %v4335_v48, %s5369_s14  ;;  %v1902_v8 = vrot.slane %v1900_v51, 5  ;;  %v1910_v54 = vshll.u32 %v7080_v22, 16  ;;  %v5165_v39 = vrot.slane %v2133_v49, 9  ;;  %v2217_v63 = vrot.slane %v7065_v53, 5 }
 0x1e2   : > { %v1826_v19 = vrot.slane %v1825_v23, 4  ;;  %v1836_v26 = vrot.slane %v1835_v40, 4  ;;  %v1897_v25 = vor.u32 %v1896_v3, %v1893_v5  ;;  %v1906_v4 = vrot.slane %v1904_v50, 4  ;;  %v2309_v5 = vld [vmem:[#allocation2 + $0x38] sm:$0x3] }
 0x1e3   : > { %v1912_v14 = vrot.slane %v1910_v54, 5  ;;  %v2218_v27 = vsel %vm5453_vm6, %v5165_v39, %v2217_v63  ;;  %v2219_v52 = vrot.slane %v2217_v63, 4  ;;  %v2220_v56 = vrot.slane %v1709_v58, 5 }
 0x1e4   : > { %v1831_v41 = vsel %vm6314_vm2, %v1826_v19, %v1830_v31  ;;  %v1841_v44 = vsel %vm6314_vm2, %v1836_v26, %v1840_v62  ;;  %v1898_v11 = vrot.slane %v1897_v25, 4  ;;  %v1907_v34 = vor.u32 %v1906_v4, %v1902_v8  ;;  %v2136_v31 = vld [vmem:[#allocation2 + $0x54] sm:$0xe] }
 0x1e5   : > { %v3897_v21 = vunpack.c.l.b16 %v1831_v41  ;;  %v3898_v59 = vunpack.c.l.b16 %v1841_v44  ;;  %v2221_v30 = vsel %vm5453_vm6, %v2219_v52, %v2220_v56  ;;  %v3977_v45 = vunpack.c.l.b16 %v2218_v27  ;;  %v7120_v41 = vpop.permute.xlu2 %4101 }
 0x1e6   : > { %v1903_v16 = vsel %vm6314_vm2, %v1898_v11, %v1902_v8  ;;  %v1908_v58 = vrot.slane %v1907_v34, 4  ;;  %v3978_v32 = vunpack.c.l.b16 %v2221_v30  ;;  %v4457_v60 = vsel %vm4453_vm8, %v6642_v18, %v3942_v46  ;;  %v2312_v34 = vld [vmem:[#allocation2 + $0x5c] sm:$0x3] }
 0x1e7   : > { %v3926_v37 = vpack.c.b16 %v3898_v59, %v3897_v21  ;;  %v3903_v1 = vunpack.c.l.b16 %v1903_v16  ;;  %v7106_v48 = vsel %vm4486_vm12, %v4457_v60, %v4022_v15  ;;  %v5168_v62 = vrot.slane %v2136_v31, 9  ;;  %v2700_v16 = vld [vmem:[#allocation2 + $0x3c] sm:$0xf] }
 0x1e8   : > { %v1913_v23 = vsel %vm6314_vm2, %v1908_v58, %v1912_v14  ;;  %v4006_v40 = vpack.c.b16 %v3978_v32, %v3977_v45  ;;  %v2238_v3 = vrot.slane %v7077_v47, 5  ;;  %v2241_v8 = vrot.slane %v7080_v22, 5  ;;  %v4028_v45 = vpop.permute.xlu1 %4027 }
 0x1e9   : > { %3945 = vrot.lane.b32.xlu1 %v3926_v37, %s5364_s9  ;;  %v3904_v54 = vunpack.c.l.b16 %v1913_v23  ;;  %v2392_v18 = vshrl.u32 %v2133_v49, 16  ;;  %v2395_v39 = vshll.u32 %v2133_v49, 16  ;;  %v2400_v63 = vrot.slane %v1832_v55, 5 }
 0x1ea   : > { %4025 = vrot.lane.b32.xlu0 %v4006_v40, %s5365_s10  ;;  %v2239_v19 = vsel %vm5453_vm6, %v5168_v62, %v2238_v3  ;;  %v2240_v26 = vrot.slane %v2238_v3, 4  ;;  %v2401_v25 = vrot.slane %v1828_v0, 6  ;;  %v2406_v4 = vshrl.u32 %v2309_v5, 16  ;;  %v4108_v40 = vpop.permute.xlu0 %4107 }
 0x1eb   : > { %v3929_v14 = vpack.c.b16 %v3904_v54, %v3903_v1  ;;  %v3983_v27 = vunpack.c.l.b16 %v2239_v19  ;;  %v2394_v52 = vrot.slane %v2392_v18, 5  ;;  %v2397_v22 = vrot.slane %v2395_v39, 6 }
 0x1ec   : > { %v2242_v56 = vsel %vm5453_vm6, %v2240_v26, %v2241_v8  ;;  %v2402_v46 = vor.u32 %v2401_v25, %v2400_v63  ;;  %v2408_v49 = vrot.slane %v2406_v4, 5  ;;  %v2409_v55 = vshll.u32 %v2309_v5, 16  ;;  %v7136_v63 = vld [vmem:[#allocation2 + $0x44] sm:$0x1] }
 0x1ed   : > { %3951 = vrot.lane.b32.xlu2 %v3929_v14, %s5364_s9  ;;  %v3984_v44 = vunpack.c.l.b16 %v2242_v56  ;;  %v2398_v11 = vor.u32 %v2397_v22, %v2394_v52  ;;  %v2461_v53 = vshrl.u32 %v2136_v31, 16  ;;  %v2464_v0 = vshll.u32 %v2136_v31, 16  ;;  %v2709_v22 = vld [vmem:[#allocation2 + $0x60] sm:$0xf] }
 0x1ee   : > { %v2404_v15 = vrot.slane %v2402_v46, 4  ;;  %v2411_v21 = vrot.slane %v2409_v55, 6  ;;  %v2469_v59 = vrot.slane %v1904_v50, 5  ;;  %v2470_v30 = vrot.slane %v1900_v51, 6  ;;  %v7132_v51 = vld [vmem:[#allocation2 + $0x40] sm:$0xf] }
 0x1ef   : > { %v4009_v58 = vpack.c.b16 %v3984_v44, %v3983_v27  ;;  %v2399_v32 = vrot.slane %v2398_v11, 4  ;;  %v2463_v60 = vrot.slane %v2461_v53, 5  ;;  %v2466_v37 = vrot.slane %v2464_v0, 6  ;;  %v7146_v44 = vld [vmem:[#allocation2 + $0x64] sm:$0xf] }
 0x1f0   : > { %v2412_v1 = vor.u32 %v2411_v21, %v2408_v49  ;;  %v2471_v62 = vor.u32 %v2470_v30, %v2469_v59  ;;  %v2475_v5 = vshrl.u32 %v2312_v34, 16  ;;  %v2478_v23 = vshll.u32 %v2312_v34, 16  ;;  %v7154_v21 = vpop.permute.xlu2 %4187 }
 0x1f1   : > { %4031 = vrot.lane.b32.xlu1 %v4009_v58, %s5365_s10  ;;  %v2403_v31 = vsel %vm6087_vm13, %v2399_v32, %v2402_v46  ;;  %v2467_v50 = vor.u32 %v2466_v37, %v2463_v60  ;;  %v4496_v47 = vsel %vm4486_vm12, %v6981_v7, %v4028_v45  ;;  %v2812_v3 = vshrl.u32 %v2700_v16, 16 }
 0x1f2   : > { %v2413_v8 = vsel %vm6087_vm13, %v2404_v15, %v2412_v1  ;;  %v4057_v54 = vunpack.c.l.b16 %v2403_v31  ;;  %v2473_v18 = vrot.slane %v2471_v62, 4  ;;  %v2477_v39 = vrot.slane %v2475_v5, 5  ;;  %v7152_v15 = vld [vmem:[#allocation2 + $0x68] sm:$0x1]  ;;  %v3126_v1 = vld [vmem:[#allocation2 + $0x3c] sm:$0xe] }
 0x1f3   : > { %v4058_v19 = vunpack.c.l.b16 %v2413_v8  ;;  %v2468_v26 = vrot.slane %v2467_v50, 4  ;;  %v2480_v25 = vrot.slane %v2478_v23, 6  ;;  %v7139_v4 = vsel %vm4519_vm14, %v4496_v47, %v4108_v40 }
 0x1f4   : > { %v2814_v14 = vrot.slane %v2812_v3, 4  ;;  %v2815_v27 = vshll.u32 %v2700_v16, 16  ;;  %v2821_v7 = vshll.u32 %v7132_v51, 16  ;;  %v2825_v52 = vshrl.u32 %v7132_v51, 16 }
 0x1f5   : > { %v4086_v56 = vpack.c.b16 %v4058_v19, %v4057_v54  ;;  %v2472_v46 = vsel %vm6087_vm13, %v2468_v26, %v2471_v62  ;;  %v2481_v49 = vor.u32 %v2480_v25, %v2477_v39  ;;  %v2831_v55 = vshll.u32 %v7136_v63, 16 }
 0x1f6   : > { %v4063_v11 = vunpack.c.l.b16 %v2472_v46  ;;  %v2817_v34 = vrot.slane %v2815_v27, 5  ;;  %v2823_v53 = vrot.slane %v2821_v7, 5  ;;  %v2827_v0 = vrot.slane %v2825_v52, 4 }
 0x1f7   : > { %4105 = vrot.lane.b32.xlu2 %v4086_v56, %s5366_s11  ;;  %v2482_v59 = vsel %vm6087_vm13, %v2473_v18, %v2481_v49  ;;  %v2833_v30 = vrot.slane %v2831_v55, 5  ;;  %v2884_v45 = vshrl.u32 %v2709_v22, 16  ;;  %v2887_v16 = vshll.u32 %v2709_v22, 16  ;;  %v4182_v49 = vpop.permute.xlu1 %4181  ;;  %v3129_v55 = vld [vmem:[#allocation2 + $0x60] sm:$0xe] }
 0x1f8   : > { %v4064_v58 = vunpack.c.l.b16 %v2482_v59  ;;  %v2818_v32 = vor.u32 %v2817_v34, %v2814_v14  ;;  %v2828_v60 = vor.u32 %v2827_v0, %v2823_v53  ;;  %v2893_v37 = vshll.u32 %v7146_v44, 16  ;;  %v4262_v0 = vpop.permute.xlu0 %4261 }
 0x1f9   : > { %v2886_v62 = vrot.slane %v2884_v45, 4  ;;  %v2889_v5 = vrot.slane %v2887_v16, 5  ;;  %v2897_v23 = vshrl.u32 %v7146_v44, 16  ;;  %v2903_v40 = vshll.u32 %v7152_v15, 16 }
 0x1fa   : > { %v4089_v31 = vpack.c.b16 %v4064_v58, %v4063_v11  ;;  %v2819_v50 = vrot.slane %v2818_v32, 4  ;;  %v2829_v47 = vrot.slane %v2828_v60, 4  ;;  %v2895_v3 = vrot.slane %v2893_v37, 5 }
 0x1fb   : > { %v2890_v8 = vor.u32 %v2889_v5, %v2886_v62  ;;  %v2899_v54 = vrot.slane %v2897_v23, 4  ;;  %v2905_v18 = vrot.slane %v2903_v40, 5  ;;  %v5181_v39 = vrot.slane %v3126_v1, 9  ;;  %v4342_v5 = vpop.permute.xlu2 %4341 }
 0x1fc   : > { %4111 = vrot.lane.b32.xlu0 %v4089_v31, %s5366_s11  ;;  %v2824_v19 = vsel %vm6314_vm2, %v2819_v50, %v2823_v53  ;;  %v2834_v26 = vsel %vm6314_vm2, %v2829_v47, %v2833_v30  ;;  %v3210_v25 = vrot.slane %v7132_v51, 5  ;;  %v3213_v14 = vrot.slane %v7136_v63, 5 }
 0x1fd   : > { %v4137_v27 = vunpack.c.l.b16 %v2824_v19  ;;  %v4138_v22 = vunpack.c.l.b16 %v2834_v26  ;;  %v2891_v56 = vrot.slane %v2890_v8, 4  ;;  %v2900_v46 = vor.u32 %v2899_v54, %v2895_v3  ;;  %v3302_v54 = vld [vmem:[#allocation2 + $0x44] sm:$0x3] }
 0x1fe   : > { %v3211_v11 = vsel %vm5453_vm6, %v5181_v39, %v3210_v25  ;;  %v3212_v34 = vrot.slane %v3210_v25, 4  ;;  %v4523_v53 = vsel %vm4519_vm14, %v7106_v48, %v7120_v41  ;;  %v5184_v59 = vrot.slane %v3129_v55, 9 }
 0x1ff   : > { %v4166_v30 = vpack.c.b16 %v4138_v22, %v4137_v27  ;;  %v2896_v63 = vsel %vm6314_vm2, %v2891_v56, %v2895_v3  ;;  %v2901_v45 = vrot.slane %v2900_v46, 4  ;;  %v4217_v16 = vunpack.c.l.b16 %v3211_v11 }
 0x200   : > { %v4143_v58 = vunpack.c.l.b16 %v2896_v63  ;;  %v3214_v32 = vsel %vm5453_vm6, %v3212_v34, %v3213_v14  ;;  %v4556_v60 = vsel %vm4552_vm15, %v4523_v53, %v4182_v49  ;;  %v3231_v62 = vrot.slane %v7146_v44, 5  ;;  %v3305_v34 = vld [vmem:[#allocation2 + $0x68] sm:$0x3] }
 0x201   : > { %4185 = vrot.lane.b32.xlu1 %v4166_v30, %s5368_s13  ;;  %v2906_v48 = vsel %vm6314_vm2, %v2901_v45, %v2905_v18  ;;  %v4218_v41 = vunpack.c.l.b16 %v3214_v32  ;;  %v4589_v40 = vsel %vm4585_vm11, %v4556_v60, %v4262_v0  ;;  %v3234_v31 = vrot.slane %v7152_v15, 5 }
 0x202   : > { %v4144_v50 = vunpack.c.l.b16 %v2906_v48  ;;  %v4622_v47 = vsel %vm4618_vm1, %v4589_v40, %v4342_v5  ;;  %v3232_v3 = vsel %vm5453_vm6, %v5184_v59, %v3231_v62  ;;  %v3233_v8 = vrot.slane %v3231_v62, 4  ;;  %v4268_v5 = vpop.permute.xlu1 %4267 }
 0x203   : > { %v4246_v39 = vpack.c.b16 %v4218_v41, %v4217_v16  ;;  %5211 = vmatmul.msk.bf16.gmra.mxu0 %vm4687_vm7, %v4622_v47  ;;  %v4223_v19 = vunpack.c.l.b16 %v3232_v3  ;;  %v3385_v26 = vshrl.u32 %v3126_v1, 16  ;;  %v3388_v25 = vshll.u32 %v3126_v1, 16  ;;  %v1728_v3 = vld [vmem:[#allocation2 + $0x84] sm:$0xf] }
 0x204   : > { %v4169_v18 = vpack.c.b16 %v4144_v50, %v4143_v58  ;;  %v3235_v14 = vsel %vm5453_vm6, %v3233_v8, %v3234_v31  ;;  %v3393_v15 = vrot.slane %v2825_v52, 5  ;;  %v3394_v27 = vrot.slane %v2821_v7, 6  ;;  %v7211_v8 = vld [vmem:[#allocation2 + $0x88] sm:$0xf] }
 0x205   : > { %4265 = vrot.lane.b32.xlu0 %v4246_v39, %s5367_s12  ;;  %v4224_v22 = vunpack.c.l.b16 %v3235_v14  ;;  %v3387_v56 = vrot.slane %v3385_v26, 5  ;;  %v3390_v46 = vrot.slane %v3388_v25, 6  ;;  %v3399_v49 = vshrl.u32 %v3302_v54, 16  ;;  %v1737_v25 = vld [vmem:[#allocation2 + $0xa8] sm:$0xf] }
 0x206   : > { %4191 = vrot.lane.b32.xlu2 %v4169_v18, %s5368_s13  ;;  %v3395_v11 = vor.u32 %v3394_v27, %v3393_v15  ;;  %v3402_v1 = vshll.u32 %v3302_v54, 16  ;;  %v3454_v53 = vshrl.u32 %v3129_v55, 16  ;;  %v3457_v0 = vshll.u32 %v3129_v55, 16  ;;  %v7220_v14 = vld [vmem:[#allocation2 + $0x8c] sm:$0x1] }
 0x207   : > { %v4249_v59 = vpack.c.b16 %v4224_v22, %v4223_v19  ;;  %v3391_v30 = vor.u32 %v3390_v46, %v3387_v56  ;;  %v3401_v63 = vrot.slane %v3399_v49, 5  ;;  %v3462_v51 = vrot.slane %v2897_v23, 5  ;;  %v4348_v23 = vpop.permute.xlu0 %4347 }
 0x208   : > { %v3397_v7 = vrot.slane %v3395_v11, 4  ;;  %v3404_v52 = vrot.slane %v3402_v1, 6  ;;  %v3456_v45 = vrot.slane %v3454_v53, 5  ;;  %v3459_v16 = vrot.slane %v3457_v0, 6  ;;  %v7226_v1 = vld [vmem:[#allocation2 + $0xac] sm:$0xf] }
 0x209   : > { %4271 = vrot.lane.b32.xlu1 %v4249_v59, %s5367_s12  ;;  %v3392_v58 = vrot.slane %v3391_v30, 4  ;;  %v3463_v32 = vrot.slane %v2893_v37, 6  ;;  %v3468_v60 = vshrl.u32 %v3305_v34, 16  ;;  %v3471_v62 = vshll.u32 %v3305_v34, 16  ;;  %v4036_v34 = vpop.permute.xlu2 %4035 }
 0x20a   : > { %v3405_v55 = vor.u32 %v3404_v52, %v3401_v63  ;;  %v3460_v48 = vor.u32 %v3459_v16, %v3456_v45  ;;  %v4562_v41 = vsel %vm4552_vm15, %v7139_v4, %v7154_v21  ;;  %v1987_v15 = vshrl.u32 %v1728_v3, 16 }
 0x20b   : > { %v3396_v40 = vsel %vm6087_vm13, %v3392_v58, %v3395_v11  ;;  %v3464_v31 = vor.u32 %v3463_v32, %v3462_v51  ;;  %v3470_v50 = vrot.slane %v3468_v60, 5  ;;  %v3473_v47 = vrot.slane %v3471_v62, 6  ;;  %v2140_v62 = vld [vmem:[#allocation2 + $0x84] sm:$0xe] }
 0x20c   : > { %v3406_v44 = vsel %vm6087_vm13, %v3397_v7, %v3405_v55  ;;  %v4297_v37 = vunpack.c.l.b16 %v3396_v40  ;;  %v3461_v54 = vrot.slane %v3460_v48, 4  ;;  %v4595_v39 = vsel %vm4585_vm11, %v4562_v41, %v4268_v5  ;;  %v1739_v7 = vld [vmem:[#allocation2 + $0xb0] sm:$0x1] }
 0x20d   : > { %v4298_v19 = vunpack.c.l.b16 %v3406_v44  ;;  %v3466_v26 = vrot.slane %v3464_v31, 4  ;;  %v3474_v4 = vor.u32 %v3473_v47, %v3470_v50  ;;  %v4628_v21 = vsel %vm4618_vm1, %v4595_v39, %v4348_v23 }
 0x20e   : > { %v3465_v18 = vsel %vm6087_vm13, %v3461_v54, %v3464_v31  ;;  %5214 = vmatmul.msk.bf16.vlgmr.msra.gmra.mxu1 %vm4687_vm7, %v4628_v21  ;;  %v1990_v27 = vshll.u32 %v1728_v3, 16  ;;  %v1996_v22 = vshll.u32 %v7211_v8, 16  ;;  %v2000_v11 = vshrl.u32 %v7211_v8, 16 }
 0x20f   : > { %v4326_v56 = vpack.c.b16 %v4298_v19, %v4297_v37  ;;  %v3475_v46 = vsel %vm6087_vm13, %v3466_v26, %v3474_v4  ;;  %v4303_v49 = vunpack.c.l.b16 %v3465_v18  ;;  %v1989_v0 = vrot.slane %v1987_v15, 4  ;;  %v3956_v4 = vpop.permute.xlu1 %3955 }
 0x210   : > { %v4304_v53 = vunpack.c.l.b16 %v3475_v46  ;;  %v1992_v59 = vrot.slane %v1990_v27, 5  ;;  %v1998_v30 = vrot.slane %v1996_v22, 5  ;;  %v2002_v63 = vrot.slane %v2000_v11, 4 }
 0x211   : > { %4345 = vrot.lane.b32.xlu2 %v4326_v56, %s5369_s14  ;;  %v2006_v51 = vshll.u32 %v7220_v14, 16  ;;  %v2059_v52 = vshrl.u32 %v1737_v25, 16  ;;  %v2062_v45 = vshll.u32 %v1737_v25, 16  ;;  %v2068_v32 = vshll.u32 %v7226_v1, 16 }
 0x212   : > { %v4329_v16 = vpack.c.b16 %v4304_v53, %v4303_v49  ;;  %v1993_v58 = vor.u32 %v1992_v59, %v1989_v0  ;;  %v2072_v60 = vshrl.u32 %v7226_v1, 16  ;;  %v2003_v5 = vor.u32 %v2002_v63, %v1998_v30  ;;  %v2143_v53 = vld [vmem:[#allocation2 + $0xa8] sm:$0xe]  ;;  %v4116_v59 = vpop.permute.xlu0 %4115 }
 0x213   : > { %v2008_v55 = vrot.slane %v2006_v51, 5  ;;  %v2061_v48 = vrot.slane %v2059_v52, 4  ;;  %v2064_v41 = vrot.slane %v2062_v45, 5  ;;  %v2070_v40 = vrot.slane %v2068_v32, 5  ;;  %v7254_v51 = vpop.permute.xlu2 %4275 }
 0x214   : > { %4351 = vrot.lane.b32.xlu0 %v4329_v16, %s5369_s14  ;;  %v1994_v23 = vrot.slane %v1993_v58, 4  ;;  %v2074_v31 = vrot.slane %v2072_v60, 4  ;;  %v2078_v50 = vshll.u32 %v1739_v7, 16  ;;  %v2004_v47 = vrot.slane %v2003_v5, 4 }
 0x215   : > { %v2065_v3 = vor.u32 %v2064_v41, %v2061_v48  ;;  %v5172_v44 = vrot.slane %v2140_v62, 9  ;;  %v2266_v37 = vrot.slane %v7211_v8, 5  ;;  %v2269_v26 = vrot.slane %v7220_v14, 5  ;;  %v2316_v41 = vld [vmem:[#allocation2 + $0x8c] sm:$0x3] }
 0x216   : > { %v1999_v54 = vsel %vm6314_vm2, %v1994_v23, %v1998_v30  ;;  %v2075_v39 = vor.u32 %v2074_v31, %v2070_v40  ;;  %v2080_v19 = vrot.slane %v2078_v50, 5  ;;  %v2009_v21 = vsel %vm6314_vm2, %v2004_v47, %v2008_v55 }
 0x217   : > { %v3911_v25 = vunpack.c.l.b16 %v1999_v54  ;;  %v2066_v18 = vrot.slane %v2065_v3, 4  ;;  %v2267_v15 = vsel %vm5453_vm6, %v5172_v44, %v2266_v37  ;;  %v3912_v27 = vunpack.c.l.b16 %v2009_v21 }
 0x218   : > { %v2076_v56 = vrot.slane %v2075_v39, 4  ;;  %v2268_v46 = vrot.slane %v2266_v37, 4  ;;  %v3991_v49 = vunpack.c.l.b16 %v2267_v15  ;;  %v4471_v14 = vsel %vm4453_vm8, %v6894_v20, %v3956_v4 }
 0x219   : > { %v2071_v0 = vsel %vm6314_vm2, %v2066_v18, %v2070_v40  ;;  %v5175_v30 = vrot.slane %v2143_v53, 9  ;;  %v2287_v63 = vrot.slane %v7226_v1, 5  ;;  %v3933_v52 = vpack.c.b16 %v3912_v27, %v3911_v25  ;;  %v2319_v18 = vld [vmem:[#allocation2 + $0xb0] sm:$0x3] }
 0x21a   : > { %v2081_v45 = vsel %vm6314_vm2, %v2076_v56, %v2080_v19  ;;  %v3917_v16 = vunpack.c.l.b16 %v2071_v0  ;;  %v2270_v58 = vsel %vm5453_vm6, %v2268_v46, %v2269_v26  ;;  %v4504_v48 = vsel %vm4486_vm12, %v4471_v14, %v4036_v34 }
 0x21b   : > { %v3918_v5 = vunpack.c.l.b16 %v2081_v45  ;;  %v3992_v55 = vunpack.c.l.b16 %v2270_v58  ;;  %v2288_v20 = vsel %vm5453_vm6, %v5175_v30, %v2287_v63  ;;  %3959 = vrot.lane.b32.xlu1 %v3933_v52, %s5364_s9  ;;  %v4537_v23 = vsel %vm4519_vm14, %v4504_v48, %v4116_v59  ;;  %v7277_v58 = vpop.permute.xlu2 %3949 }
 0x21c   : > { %v2289_v40 = vrot.slane %v2287_v63, 4  ;;  %v2290_v31 = vrot.slane %v1739_v7, 5  ;;  %v3997_v50 = vunpack.c.l.b16 %v2288_v20  ;;  %v2553_v44 = vshrl.u32 %v2140_v62, 16 }
 0x21d   : > { %v3936_v47 = vpack.c.b16 %v3918_v5, %v3917_v16  ;;  %v4013_v3 = vpack.c.b16 %v3992_v55, %v3991_v49  ;;  %v2556_v37 = vshll.u32 %v2140_v62, 16  ;;  %v2561_v34 = vrot.slane %v2000_v11, 5  ;;  %v2721_v49 = vld [vmem:[#allocation2 + $0x90] sm:$0xf] }
 0x21e   : > { %v2291_v54 = vsel %vm5453_vm6, %v2289_v40, %v2290_v31  ;;  %v2562_v39 = vrot.slane %v1996_v22, 6  ;;  %v2567_v19 = vshrl.u32 %v2316_v41, 16  ;;  %v2555_v26 = vrot.slane %v2553_v44, 5  ;;  %v4196_v22 = vpop.permute.xlu1 %4195  ;;  %v7285_v40 = vld [vmem:[#allocation2 + $0x94] sm:$0xf] }
 0x21f   : > { %3965 = vrot.lane.b32.xlu2 %v3936_v47, %s5364_s9  ;;  %4039 = vrot.lane.b32.xlu0 %v4013_v3, %s5365_s10  ;;  %v3998_v7 = vunpack.c.l.b16 %v2291_v54  ;;  %v2558_v4 = vrot.slane %v2556_v37, 6  ;;  %v2570_v21 = vshll.u32 %v2316_v41, 16  ;;  %v2622_v15 = vshrl.u32 %v2143_v53, 16  ;;  %v4356_v41 = vpop.permute.xlu0 %4355  ;;  %v2723_v37 = vld [vmem:[#allocation2 + $0x98] sm:$0x1] }
 0x220   : > { %v2563_v25 = vor.u32 %v2562_v39, %v2561_v34  ;;  %v2569_v62 = vrot.slane %v2567_v19, 5  ;;  %v2625_v27 = vshll.u32 %v2143_v53, 16  ;;  %v2630_v8 = vrot.slane %v2072_v60, 5  ;;  %v2730_v39 = vld [vmem:[#allocation2 + $0xb4] sm:$0xf] }
 0x221   : > { %v4016_v56 = vpack.c.b16 %v3998_v7, %v3997_v50  ;;  %v2559_v46 = vor.u32 %v2558_v4, %v2555_v26  ;;  %v2572_v11 = vrot.slane %v2570_v21, 6  ;;  %v2624_v14 = vrot.slane %v2622_v15, 5  ;;  %v7293_v21 = vld [vmem:[#allocation2 + $0xb8] sm:$0xf] }
 0x222   : > { %v2565_v0 = vrot.slane %v2563_v25, 4  ;;  %v2627_v59 = vrot.slane %v2625_v27, 6  ;;  %v2631_v30 = vrot.slane %v2068_v32, 6  ;;  %v2636_v45 = vshrl.u32 %v2319_v18, 16 }
 0x223   : > { %v2560_v63 = vrot.slane %v2559_v46, 4  ;;  %v2573_v52 = vor.u32 %v2572_v11, %v2569_v62  ;;  %v2639_v16 = vshll.u32 %v2319_v18, 16  ;;  %4045 = vrot.lane.b32.xlu1 %v4016_v56, %s5365_s10  ;;  %v4570_v60 = vsel %vm4552_vm15, %v4537_v23, %v4196_v22  ;;  %v2732_v46 = vld [vmem:[#allocation2 + $0xbc] sm:$0x1] }
 0x224   : > { %v2628_v53 = vor.u32 %v2627_v59, %v2624_v14  ;;  %v2632_v5 = vor.u32 %v2631_v30, %v2630_v8  ;;  %v2980_v55 = vshrl.u32 %v2721_v49, 16  ;;  %v2638_v32 = vrot.slane %v2636_v45, 5  ;;  %v3133_v14 = vld [vmem:[#allocation2 + $0x90] sm:$0xe] }
 0x225   : > { %v2564_v48 = vsel %vm6087_vm13, %v2560_v63, %v2563_v25  ;;  %v2574_v1 = vsel %vm6087_vm13, %v2565_v0, %v2573_v52  ;;  %v2641_v20 = vrot.slane %v2639_v16, 6  ;;  %v4603_v23 = vsel %vm4585_vm11, %v4570_v60, %v7254_v51  ;;  %v7308_v60 = vpop.permute.xlu2 %4103 }
 0x226   : > { %v4071_v31 = vunpack.c.l.b16 %v2564_v48  ;;  %v4072_v50 = vunpack.c.l.b16 %v2574_v1  ;;  %v2629_v47 = vrot.slane %v2628_v53, 4  ;;  %v2634_v3 = vrot.slane %v2632_v5, 4 }
 0x227   : > { %v2642_v44 = vor.u32 %v2641_v20, %v2638_v32  ;;  %v2982_v54 = vrot.slane %v2980_v55, 4  ;;  %v2983_v34 = vshll.u32 %v2721_v49, 16  ;;  %v4636_v26 = vsel %vm4618_vm1, %v4603_v23, %v4356_v41 }
 0x228   : > { %v4093_v19 = vpack.c.b16 %v4072_v50, %v4071_v31  ;;  %v2633_v7 = vsel %vm6087_vm13, %v2629_v47, %v2632_v5  ;;  %v2989_v4 = vshll.u32 %v7285_v40, 16  ;;  %5218 = vmatmul.msk.bf16.vlgmr.msra.gmra.mxu2 %vm4687_vm7, %v4636_v26  ;;  %v2993_v18 = vshrl.u32 %v7285_v40, 16  ;;  %v3136_v26 = vld [vmem:[#allocation2 + $0xb4] sm:$0xe] }
 0x229   : > { %v2643_v25 = vsel %vm6087_vm13, %v2634_v3, %v2642_v44  ;;  %v4077_v62 = vunpack.c.l.b16 %v2633_v7  ;;  %v2985_v51 = vrot.slane %v2983_v34, 5  ;;  %v2999_v56 = vshll.u32 %v2723_v37, 16 }
 0x22a   : > { %4119 = vrot.lane.b32.xlu2 %v4093_v19, %s5366_s11  ;;  %v4078_v15 = vunpack.c.l.b16 %v2643_v25  ;;  %v2991_v27 = vrot.slane %v2989_v4, 5  ;;  %v3052_v11 = vshrl.u32 %v2730_v39, 16  ;;  %v2995_v22 = vrot.slane %v2993_v18, 4 }
 0x22b   : > { %v2986_v8 = vor.u32 %v2985_v51, %v2982_v54  ;;  %v3055_v49 = vshll.u32 %v2730_v39, 16  ;;  %v3061_v0 = vshll.u32 %v7293_v21, 16  ;;  %v3001_v30 = vrot.slane %v2999_v56, 5  ;;  %v3944_v54 = vpop.permute.xlu1 %3943  ;;  %v4024_v51 = vpop.permute.xlu0 %4023 }
 0x22c   : > { %v4096_v59 = vpack.c.b16 %v4078_v15, %v4077_v62  ;;  %v3054_v63 = vrot.slane %v3052_v11, 4  ;;  %v3065_v52 = vshrl.u32 %v7293_v21, 16  ;;  %v2996_v16 = vor.u32 %v2995_v22, %v2991_v27 }
 0x22d   : > { %v2987_v45 = vrot.slane %v2986_v8, 4  ;;  %v3057_v53 = vrot.slane %v3055_v49, 5  ;;  %v3063_v5 = vrot.slane %v3061_v0, 5  ;;  %v3071_v48 = vshll.u32 %v2732_v46, 16 }
 0x22e   : > { %4125 = vrot.lane.b32.xlu0 %v4096_v59, %s5366_s11  ;;  %v3067_v55 = vrot.slane %v3065_v52, 4  ;;  %v5188_v1 = vrot.slane %v3133_v14, 9  ;;  %v3259_v32 = vrot.slane %v7285_v40, 5  ;;  %v2997_v41 = vrot.slane %v2996_v16, 4  ;;  %v3309_v16 = vld [vmem:[#allocation2 + $0x98] sm:$0x3] }
 0x22f   : > { %v2992_v20 = vsel %vm6314_vm2, %v2987_v45, %v2991_v27  ;;  %v3058_v31 = vor.u32 %v3057_v53, %v3054_v63  ;;  %v3262_v50 = vrot.slane %v2723_v37, 5  ;;  %v3073_v44 = vrot.slane %v3071_v48, 5 }
 0x230   : > { %v4151_v47 = vunpack.c.l.b16 %v2992_v20  ;;  %v3068_v3 = vor.u32 %v3067_v55, %v3063_v5  ;;  %v3260_v23 = vsel %vm5453_vm6, %v5188_v1, %v3259_v32  ;;  %v4465_v34 = vsel %vm4453_vm8, %v6852_v35, %v7277_v58 }
 0x231   : > { %v3002_v39 = vsel %vm6314_vm2, %v2997_v41, %v3001_v30  ;;  %v3059_v19 = vrot.slane %v3058_v31, 4  ;;  %v3261_v7 = vrot.slane %v3259_v32, 4  ;;  %v4231_v37 = vunpack.c.l.b16 %v3260_v23  ;;  %v7341_v41 = vpop.permute.xlu2 %4189 }
 0x232   : > { %v4152_v25 = vunpack.c.l.b16 %v3002_v39  ;;  %v3069_v62 = vrot.slane %v3068_v3, 4  ;;  %v5191_v15 = vrot.slane %v3136_v26, 9  ;;  %v4459_v35 = vsel %vm4453_vm8, %v6806_v24, %v3944_v54 }
 0x233   : > { %v3064_v27 = vsel %vm6314_vm2, %v3059_v19, %v3063_v5  ;;  %v3263_v56 = vsel %vm5453_vm6, %v3261_v7, %v3262_v50  ;;  %v3280_v58 = vrot.slane %v7293_v21, 5  ;;  %v3283_v45 = vrot.slane %v2732_v46, 5 }
 0x234   : > { %v4173_v11 = vpack.c.b16 %v4152_v25, %v4151_v47  ;;  %v3074_v8 = vsel %vm6314_vm2, %v3069_v62, %v3073_v44  ;;  %v4157_v22 = vunpack.c.l.b16 %v3064_v27  ;;  %v4232_v49 = vunpack.c.l.b16 %v3263_v56  ;;  %v3312_v44 = vld [vmem:[#allocation2 + $0xbc] sm:$0x3] }
 0x235   : > { %v4158_v59 = vunpack.c.l.b16 %v3074_v8  ;;  %v3281_v30 = vsel %vm5453_vm6, %v5191_v15, %v3280_v58  ;;  %v3282_v63 = vrot.slane %v3280_v58, 4  ;;  %v3546_v24 = vshrl.u32 %v3133_v14, 16 }
 0x236   : > { %4199 = vrot.lane.b32.xlu1 %v4173_v11, %s5368_s13  ;;  %v4253_v53 = vpack.c.b16 %v4232_v49, %v4231_v37  ;;  %v4237_v5 = vunpack.c.l.b16 %v3281_v30  ;;  %v3549_v55 = vshll.u32 %v3133_v14, 16  ;;  %v3554_v32 = vrot.slane %v2993_v18, 5  ;;  %v4110_v11 = vpop.permute.xlu0 %4109 }
 0x237   : > { %v4176_v48 = vpack.c.b16 %v4158_v59, %v4157_v22  ;;  %v3284_v1 = vsel %vm5453_vm6, %v3282_v63, %v3283_v45  ;;  %v3555_v20 = vrot.slane %v2989_v4, 6  ;;  %v3548_v31 = vrot.slane %v3546_v24, 5  ;;  %v4030_v4 = vpop.permute.xlu1 %4029 }
 0x238   : > { %4279 = vrot.lane.b32.xlu0 %v4253_v53, %s5367_s12  ;;  %v4238_v46 = vunpack.c.l.b16 %v3284_v1  ;;  %v3551_v50 = vrot.slane %v3549_v55, 6  ;;  %v3560_v47 = vshrl.u32 %v3309_v16, 16  ;;  %v3563_v3 = vshll.u32 %v3309_v16, 16 }
 0x239   : > { %4205 = vrot.lane.b32.xlu2 %v4176_v48, %s5368_s13  ;;  %v3556_v14 = vor.u32 %v3555_v20, %v3554_v32  ;;  %v3615_v23 = vshrl.u32 %v3136_v26, 16  ;;  %v3618_v54 = vshll.u32 %v3136_v26, 16  ;;  %v3623_v40 = vrot.slane %v3065_v52, 5  ;;  %v1719_v52 = vld [vmem:[#allocation2 + $0x60] sm:$0xf] }
 0x23a   : > { %v4256_v39 = vpack.c.b16 %v4238_v46, %v4237_v5  ;;  %v3552_v18 = vor.u32 %v3551_v50, %v3548_v31  ;;  %v3562_v19 = vrot.slane %v3560_v47, 5  ;;  %v3565_v25 = vrot.slane %v3563_v3, 6  ;;  %v1721_v48 = vld [vmem:[#allocation2 + $0x68] sm:$0x1]  ;;  %v7363_v46 = vpop.permute.xlu2 %4343  ;;  %v2137_v3 = vld [vmem:[#allocation2 + $0x60] sm:$0xe] }
 0x23b   : > { %v3558_v7 = vrot.slane %v3556_v14, 4  ;;  %v3617_v62 = vrot.slane %v3615_v23, 5  ;;  %v3620_v37 = vrot.slane %v3618_v54, 6  ;;  %v3624_v27 = vrot.slane %v3061_v0, 6  ;;  %v1720_v0 = vld [vmem:[#allocation2 + $0x64] sm:$0xf] }
 0x23c   : > { %v3553_v15 = vrot.slane %v3552_v18, 4  ;;  %v3629_v56 = vshrl.u32 %v3312_v44, 16  ;;  %v3632_v58 = vshll.u32 %v3312_v44, 16  ;;  %v7350_v26 = vsel %vm4486_vm12, %v4459_v35, %v4024_v51 }
 0x23d   : > { %v3566_v8 = vor.u32 %v3565_v25, %v3562_v19  ;;  %v3621_v22 = vor.u32 %v3620_v37, %v3617_v62  ;;  %v4498_v49 = vsel %vm4486_vm12, %v4465_v34, %v4030_v4  ;;  %v3625_v30 = vor.u32 %v3624_v27, %v3623_v40 }
 0x23e   : > { %4285 = vrot.lane.b32.xlu1 %v4256_v39, %s5367_s12  ;;  %v3557_v59 = vsel %vm6087_vm13, %v3553_v15, %v3556_v14  ;;  %v3631_v63 = vrot.slane %v3629_v56, 5  ;;  %v3634_v21 = vrot.slane %v3632_v58, 6  ;;  %v7359_v35 = vsel %vm4519_vm14, %v4498_v49, %v4110_v11  ;;  %v2313_v58 = vld [vmem:[#allocation2 + $0x68] sm:$0x3] }
 0x23f   : > { %v3567_v45 = vsel %vm6087_vm13, %v3558_v7, %v3566_v8  ;;  %v4311_v16 = vunpack.c.l.b16 %v3557_v59  ;;  %v3622_v51 = vrot.slane %v3621_v22, 4  ;;  %v3627_v34 = vrot.slane %v3625_v30, 4 }
 0x240   : > { %v4312_v53 = vunpack.c.l.b16 %v3567_v45  ;;  %v3635_v5 = vor.u32 %v3634_v21, %v3631_v63  ;;  %v1915_v24 = vshrl.u32 %v1719_v52, 16  ;;  %v1918_v1 = vshll.u32 %v1719_v52, 16 }
 0x241   : > { %v3626_v55 = vsel %vm6087_vm13, %v3622_v51, %v3625_v30  ;;  %v1924_v32 = vshll.u32 %v1720_v0, 16  ;;  %v1928_v20 = vshrl.u32 %v1720_v0, 16  ;;  %v1934_v18 = vshll.u32 %v1721_v48, 16 }
 0x242   : > { %v4333_v31 = vpack.c.b16 %v4312_v53, %v4311_v16  ;;  %v3636_v50 = vsel %vm6087_vm13, %v3627_v34, %v3635_v5  ;;  %v4317_v47 = vunpack.c.l.b16 %v3626_v55  ;;  %v1917_v14 = vrot.slane %v1915_v24, 4  ;;  %v4264_v34 = vpop.permute.xlu0 %4263 }
 0x243   : > { %v4318_v44 = vunpack.c.l.b16 %v3636_v50  ;;  %v1920_v23 = vrot.slane %v1918_v1, 5  ;;  %v1926_v54 = vrot.slane %v1924_v32, 5  ;;  %v1930_v39 = vrot.slane %v1928_v20, 4  ;;  %v2712_v1 = vld [vmem:[#allocation2 + $0x6c] sm:$0xf] }
 0x244   : > { %4359 = vrot.lane.b32.xlu2 %v4333_v31, %s5369_s14  ;;  %v5169_v19 = vrot.slane %v2137_v3, 9  ;;  %v2245_v40 = vrot.slane %v1720_v0, 5  ;;  %v2248_v4 = vrot.slane %v1721_v48, 5  ;;  %v2484_v37 = vshrl.u32 %v2137_v3, 16  ;;  %v4184_v0 = vpop.permute.xlu1 %4183 }
 0x245   : > { %v4336_v7 = vpack.c.b16 %v4318_v44, %v4317_v47  ;;  %v1921_v25 = vor.u32 %v1920_v23, %v1917_v14  ;;  %v1931_v62 = vor.u32 %v1930_v39, %v1926_v54  ;;  %v1936_v15 = vrot.slane %v1934_v18, 5  ;;  %v7380_v14 = vpop.permute.xlu2 %3963 }
 0x246   : > { %v2246_v27 = vsel %vm5453_vm6, %v5169_v19, %v2245_v40  ;;  %v2247_v56 = vrot.slane %v2245_v40, 4  ;;  %v2487_v11 = vshll.u32 %v2137_v3, 16  ;;  %v2486_v52 = vrot.slane %v2484_v37, 5  ;;  %v2714_v19 = vld [vmem:[#allocation2 + $0x74] sm:$0x1] }
 0x247   : > { %4365 = vrot.lane.b32.xlu0 %v4336_v7, %s5369_s14  ;;  %v1922_v8 = vrot.slane %v1921_v25, 4  ;;  %v1932_v22 = vrot.slane %v1931_v62, 4  ;;  %v3985_v49 = vunpack.c.l.b16 %v2246_v27  ;;  %v2492_v63 = vrot.slane %v1928_v20, 5  ;;  %v2713_v20 = vld [vmem:[#allocation2 + $0x70] sm:$0xf] }
 0x248   : > { %v2249_v59 = vsel %vm5453_vm6, %v2247_v56, %v2248_v4  ;;  %v2489_v30 = vrot.slane %v2487_v11, 6  ;;  %v2493_v21 = vrot.slane %v1924_v32, 6  ;;  %v2498_v53 = vshrl.u32 %v2313_v58, 16  ;;  %v3130_v56 = vld [vmem:[#allocation2 + $0x6c] sm:$0xe] }
 0x249   : > { %v1927_v45 = vsel %vm6314_vm2, %v1922_v8, %v1926_v54  ;;  %v1937_v16 = vsel %vm6314_vm2, %v1932_v22, %v1936_v15  ;;  %v3986_v51 = vunpack.c.l.b16 %v2249_v59  ;;  %v2501_v47 = vshll.u32 %v2313_v58, 16 }
 0x24a   : > { %v3905_v5 = vunpack.c.l.b16 %v1927_v45  ;;  %v3906_v24 = vunpack.c.l.b16 %v1937_v16  ;;  %v2490_v55 = vor.u32 %v2489_v30, %v2486_v52  ;;  %v2494_v48 = vor.u32 %v2493_v21, %v2492_v63 }
 0x24b   : > { %v4010_v31 = vpack.c.b16 %v3986_v51, %v3985_v49  ;;  %v2500_v50 = vrot.slane %v2498_v53, 5  ;;  %v4525_v32 = vsel %vm4519_vm14, %v7350_v26, %v7308_v60  ;;  %v2503_v39 = vrot.slane %v2501_v47, 6 }
 0x24c   : > { %v3930_v3 = vpack.c.b16 %v3906_v24, %v3905_v5  ;;  %v2491_v44 = vrot.slane %v2490_v55, 4  ;;  %v2496_v23 = vrot.slane %v2494_v48, 4  ;;  %v4558_v54 = vsel %vm4552_vm15, %v4525_v32, %v4184_v0  ;;  %v4270_v45 = vpop.permute.xlu1 %4269  ;;  %v4350_v5 = vpop.permute.xlu0 %4349 }
 0x24d   : > { %4033 = vrot.lane.b32.xlu2 %v4010_v31, %s5365_s10  ;;  %v4591_v18 = vsel %vm4585_vm11, %v4558_v54, %v4264_v34  ;;  %v2908_v40 = vshrl.u32 %v2712_v1, 16  ;;  %v2911_v4 = vshll.u32 %v2712_v1, 16  ;;  %v2917_v7 = vshll.u32 %v2713_v20, 16  ;;  %v3306_v1 = vld [vmem:[#allocation2 + $0x74] sm:$0x3] }
 0x24e   : > { %3953 = vrot.lane.b32.xlu1 %v3930_v3, %s5364_s9  ;;  %v2495_v60 = vsel %vm6087_vm13, %v2491_v44, %v2494_v48  ;;  %v4624_v26 = vsel %vm4618_vm1, %v4591_v18, %v7363_v46  ;;  %v2921_v25 = vshrl.u32 %v2713_v20, 16  ;;  %v2504_v62 = vor.u32 %v2503_v39, %v2500_v50  ;;  %v1731_v3 = vld [vmem:[#allocation2 + $0x90] sm:$0xf]  ;;  %v7400_v44 = vpop.permute.xlu2 %4117 }
 0x24f   : > { %v4065_v37 = vunpack.c.l.b16 %v2495_v60  ;;  %5212 = vmatmul.msk.bf16.gmra.mxu0 %vm4687_vm7, %v4624_v26  ;;  %v2910_v15 = vrot.slane %v2908_v40, 4  ;;  %v2913_v27 = vrot.slane %v2911_v4, 5  ;;  %v2919_v58 = vrot.slane %v2917_v7, 5 }
 0x250   : > { %v2923_v11 = vrot.slane %v2921_v25, 4  ;;  %v2927_v8 = vshll.u32 %v2714_v19, 16  ;;  %v5185_v22 = vrot.slane %v3130_v56, 9  ;;  %v2505_v49 = vsel %vm6087_vm13, %v2496_v23, %v2504_v62 }
 0x251   : > { %v2914_v52 = vor.u32 %v2913_v27, %v2910_v15  ;;  %v3238_v59 = vrot.slane %v2713_v20, 5  ;;  %v3241_v30 = vrot.slane %v2714_v19, 5  ;;  %v4066_v46 = vunpack.c.l.b16 %v2505_v49 }
 0x252   : > { %v2924_v63 = vor.u32 %v2923_v11, %v2919_v58  ;;  %v2929_v21 = vrot.slane %v2927_v8, 5  ;;  %v3477_v0 = vshrl.u32 %v3130_v56, 16  ;;  %v3480_v34 = vshll.u32 %v3130_v56, 16  ;;  %v7409_v8 = vld [vmem:[#allocation2 + $0x98] sm:$0x1] }
 0x253   : > { %v2915_v16 = vrot.slane %v2914_v52, 4  ;;  %v3239_v51 = vsel %vm5453_vm6, %v5185_v22, %v3238_v59  ;;  %v3240_v53 = vrot.slane %v3238_v59, 4  ;;  %v4090_v24 = vpack.c.b16 %v4066_v46, %v4065_v37  ;;  %v7407_v37 = vld [vmem:[#allocation2 + $0x94] sm:$0xf] }
 0x254   : > { %v2925_v55 = vrot.slane %v2924_v63, 4  ;;  %v4225_v48 = vunpack.c.l.b16 %v3239_v51  ;;  %v3479_v31 = vrot.slane %v3477_v0, 5  ;;  %v3482_v32 = vrot.slane %v3480_v34, 6  ;;  %v1740_v59 = vld [vmem:[#allocation2 + $0xb4] sm:$0xf]  ;;  %v3958_v51 = vpop.permute.xlu1 %3957 }
 0x255   : > { %v2920_v50 = vsel %vm6314_vm2, %v2915_v16, %v2919_v58  ;;  %v3242_v47 = vsel %vm5453_vm6, %v3240_v53, %v3241_v30  ;;  %v3485_v20 = vrot.slane %v2921_v25, 5  ;;  %4113 = vrot.lane.b32.xlu0 %v4090_v24, %s5366_s11  ;;  %v3486_v18 = vrot.slane %v2917_v7, 6  ;;  %v7421_v16 = vld [vmem:[#allocation2 + $0xb8] sm:$0xf] }
 0x256   : > { %v2930_v23 = vsel %vm6314_vm2, %v2925_v55, %v2929_v21  ;;  %v4145_v54 = vunpack.c.l.b16 %v2920_v50  ;;  %v4226_v39 = vunpack.c.l.b16 %v3242_v47  ;;  %v3483_v40 = vor.u32 %v3482_v32, %v3479_v31  ;;  %v7433_v32 = vld [vmem:[#allocation2 + $0x90] sm:$0xe] }
 0x257   : > { %v4146_v19 = vunpack.c.l.b16 %v2930_v23  ;;  %v3491_v4 = vshrl.u32 %v3306_v1, 16  ;;  %v3494_v60 = vshll.u32 %v3306_v1, 16  ;;  %v3487_v62 = vor.u32 %v3486_v18, %v3485_v20  ;;  %v7437_v18 = vpop.permute.xlu2 %4203 }
 0x258   : > { %v4250_v26 = vpack.c.b16 %v4226_v39, %v4225_v48  ;;  %v4564_v25 = vsel %vm4552_vm15, %v7359_v35, %v7341_v41  ;;  %v2011_v15 = vshrl.u32 %v1731_v3, 16  ;;  %v3484_v56 = vrot.slane %v3483_v40, 4  ;;  %v7429_v48 = vpop.permute.xlu0 %4037 }
 0x259   : > { %v4170_v27 = vpack.c.b16 %v4146_v19, %v4145_v54  ;;  %v3493_v58 = vrot.slane %v3491_v4, 5  ;;  %v3496_v11 = vrot.slane %v3494_v60, 6  ;;  %v3489_v7 = vrot.slane %v3487_v62, 4 }
 0x25a   : > { %4273 = vrot.lane.b32.xlu2 %v4250_v26, %s5367_s12  ;;  %v4597_v22 = vsel %vm4585_vm11, %v4564_v25, %v4270_v45  ;;  %v2013_v49 = vrot.slane %v2011_v15, 4  ;;  %v2014_v52 = vshll.u32 %v1731_v3, 16  ;;  %v3488_v41 = vsel %vm6087_vm13, %v3484_v56, %v3487_v62 }
 0x25b   : > { %4193 = vrot.lane.b32.xlu1 %v4170_v27, %s5368_s13  ;;  %v3497_v35 = vor.u32 %v3496_v11, %v3493_v58  ;;  %v4630_v30 = vsel %vm4618_vm1, %v4597_v22, %v4350_v5  ;;  %v2020_v46 = vshll.u32 %v7407_v37, 16  ;;  %v4305_v63 = vunpack.c.l.b16 %v3488_v41  ;;  %v7427_v5 = vld [vmem:[#allocation2 + $0xbc] sm:$0x1] }
 0x25c   : > { %5215 = vmatmul.msk.bf16.gmra.mxu1 %vm4687_vm7, %v4630_v30  ;;  %v2016_v21 = vrot.slane %v2014_v52, 5  ;;  %v2024_v0 = vshrl.u32 %v7407_v37, 16  ;;  %v2030_v45 = vshll.u32 %v7409_v8, 16  ;;  %v2083_v24 = vshrl.u32 %v1740_v59, 16 }
 0x25d   : > { %v3498_v53 = vsel %vm6087_vm13, %v3489_v7, %v3497_v35  ;;  %v2022_v34 = vrot.slane %v2020_v46, 5  ;;  %v2086_v55 = vshll.u32 %v1740_v59, 16  ;;  %v2092_v23 = vshll.u32 %v7421_v16, 16 }
 0x25e   : > { %v4306_v1 = vunpack.c.l.b16 %v3498_v53  ;;  %v2017_v31 = vor.u32 %v2016_v21, %v2013_v49  ;;  %v2026_v50 = vrot.slane %v2024_v0, 4  ;;  %v2032_v47 = vrot.slane %v2030_v45, 5  ;;  %v2144_v53 = vld [vmem:[#allocation2 + $0xb4] sm:$0xe] }
 0x25f   : > { %v2085_v20 = vrot.slane %v2083_v24, 4  ;;  %v2088_v3 = vrot.slane %v2086_v55, 5  ;;  %v2096_v54 = vshrl.u32 %v7421_v16, 16  ;;  %v2102_v4 = vshll.u32 %v7427_v5, 16  ;;  %v4044_v24 = vpop.permute.xlu1 %4043 }
 0x260   : > { %v4330_v39 = vpack.c.b16 %v4306_v1, %v4305_v63  ;;  %v2018_v19 = vrot.slane %v2017_v31, 4  ;;  %v2027_v40 = vor.u32 %v2026_v50, %v2022_v34  ;;  %v2094_v26 = vrot.slane %v2092_v23, 5 }
 0x261   : > { %v2089_v60 = vor.u32 %v2088_v3, %v2085_v20  ;;  %v2098_v62 = vrot.slane %v2096_v54, 4  ;;  %v5173_v25 = vrot.slane %v7433_v32, 9  ;;  %v2104_v56 = vrot.slane %v2102_v4, 5 }
 0x262   : > { %4353 = vrot.lane.b32.xlu0 %v4330_v39, %s5369_s14  ;;  %v2023_v15 = vsel %vm6314_vm2, %v2018_v19, %v2022_v34  ;;  %v2028_v27 = vrot.slane %v2027_v40, 4  ;;  %v2273_v58 = vrot.slane %v7407_v37, 5  ;;  %v2276_v49 = vrot.slane %v7409_v8, 5  ;;  %v2320_v39 = vld [vmem:[#allocation2 + $0xbc] sm:$0x3] }
 0x263   : > { %v3913_v11 = vunpack.c.l.b16 %v2023_v15  ;;  %v2090_v7 = vrot.slane %v2089_v60, 4  ;;  %v2099_v22 = vor.u32 %v2098_v62, %v2094_v26  ;;  %v4479_v52 = vsel %vm4453_vm8, %v6962_v38, %v7380_v14  ;;  %v7466_v62 = vpop.permute.xlu2 %4357 }
 0x264   : > { %v2033_v59 = vsel %vm6314_vm2, %v2028_v27, %v2032_v47  ;;  %v2274_v41 = vsel %vm5453_vm6, %v5173_v25, %v2273_v58  ;;  %v2275_v35 = vrot.slane %v2273_v58, 4  ;;  %v4473_v38 = vsel %vm4453_vm8, %v6927_v2, %v3958_v51  ;;  %v4124_v47 = vpop.permute.xlu0 %4123 }
 0x265   : > { %v3914_v30 = vunpack.c.l.b16 %v2033_v59  ;;  %v2095_v63 = vsel %vm6314_vm2, %v2090_v7, %v2094_v26  ;;  %v2100_v21 = vrot.slane %v2099_v22, 4  ;;  %v3993_v45 = vunpack.c.l.b16 %v2274_v41  ;;  %v7475_v59 = vld [vmem:[#allocation2 + $0xa0] sm:$0xf] }
 0x266   : > { %v3919_v34 = vunpack.c.l.b16 %v2095_v63  ;;  %v2277_v8 = vsel %vm5453_vm6, %v2275_v35, %v2276_v49  ;;  %v5176_v14 = vrot.slane %v2144_v53, 9  ;;  %v2294_v50 = vrot.slane %v7421_v16, 5 }
 0x267   : > { %v3934_v55 = vpack.c.b16 %v3914_v30, %v3913_v11  ;;  %v2105_v1 = vsel %vm6314_vm2, %v2100_v21, %v2104_v56  ;;  %v3994_v31 = vunpack.c.l.b16 %v2277_v8  ;;  %v2297_v3 = vrot.slane %v7427_v5, 5  ;;  %v2724_v11 = vld [vmem:[#allocation2 + $0x9c] sm:$0xf] }
 0x268   : > { %v3920_v20 = vunpack.c.l.b16 %v2105_v1  ;;  %v2645_v19 = vshrl.u32 %v2144_v53, 16  ;;  %v2648_v40 = vshll.u32 %v2144_v53, 16  ;;  %v2295_v2 = vsel %vm5453_vm6, %v5176_v14, %v2294_v50 }
 0x269   : > { %3961 = vrot.lane.b32.xlu1 %v3934_v55, %s5364_s9  ;;  %v4014_v4 = vpack.c.b16 %v3994_v31, %v3993_v45  ;;  %v2296_v51 = vrot.slane %v2294_v50, 4  ;;  %v2653_v60 = vrot.slane %v2096_v54, 5  ;;  %v3999_v25 = vunpack.c.l.b16 %v2295_v2  ;;  %v4198_v50 = vpop.permute.xlu1 %4197 }
 0x26a   : > { %v3937_v26 = vpack.c.b16 %v3920_v20, %v3919_v34  ;;  %v2647_v16 = vrot.slane %v2645_v19, 5  ;;  %v2650_v15 = vrot.slane %v2648_v40, 6  ;;  %v2654_v27 = vrot.slane %v2092_v23, 6  ;;  %v2726_v23 = vld [vmem:[#allocation2 + $0xa4] sm:$0x1]  ;;  %v5312_v40 = vld [vmem:[%s5426_s23 + $0x78] sm:$0xff]  }
 0x26b   : > { %4041 = vrot.lane.b32.xlu0 %v4014_v4, %s5365_s10  ;;  %v2298_v5 = vsel %vm5453_vm6, %v2296_v51, %v2297_v3  ;;  %v2659_v56 = vshrl.u32 %v2320_v39, 16  ;;  %v2662_v58 = vshll.u32 %v2320_v39, 16  ;;  %v4506_v54 = vsel %vm4486_vm12, %v4473_v38, %v7429_v48 }
 0x26c   : > { %3967 = vrot.lane.b32.xlu2 %v3937_v26, %s5364_s9  ;;  %v4000_v7 = vunpack.c.l.b16 %v2298_v5  ;;  %v2651_v22 = vor.u32 %v2650_v15, %v2647_v16  ;;  %v4512_v49 = vsel %vm4486_vm12, %v4479_v52, %v4044_v24  ;;  %v2655_v41 = vor.u32 %v2654_v27, %v2653_v60  ;;  %v7480_v52 = vld [vmem:[#allocation2 + $0x9c] sm:$0xe]  ;;  %v4278_v19 = vpop.permute.xlu0 %4277  ;;  %v7496_v27 = vpop.permute.xlu2 %3951 }
 0x26d   : > { %v2661_v35 = vrot.slane %v2659_v56, 5  ;;  %v2664_v30 = vrot.slane %v2662_v58, 6  ;;  %v4545_v63 = vsel %vm4519_vm14, %v4512_v49, %v4124_v47  ;;  %v3004_v53 = vshrl.u32 %v2724_v11, 16 }
 0x26e   : > { %v4017_v21 = vpack.c.b16 %v4000_v7, %v3999_v25  ;;  %v2652_v45 = vrot.slane %v2651_v22, 4  ;;  %v3007_v34 = vshll.u32 %v2724_v11, 16  ;;  %v2657_v8 = vrot.slane %v2655_v41, 4 }
 0x26f   : > { %v2665_v14 = vor.u32 %v2664_v30, %v2661_v35  ;;  %v3013_v48 = vshll.u32 %v7475_v59, 16  ;;  %v3017_v38 = vshrl.u32 %v7475_v59, 16  ;;  %v3006_v55 = vrot.slane %v3004_v53, 4  ;;  %v5350_v53 = vld [vmem:[%s8026_s1] ss:$0 sm:$0xff] }
 0x270   : > { %v2656_v24 = vsel %vm6087_vm13, %v2652_v45, %v2655_v41  ;;  %v3009_v1 = vrot.slane %v3007_v34, 5  ;;  %v3023_v31 = vshll.u32 %v2726_v23, 16  ;;  %v5189_v60 = vrot.slane %v7480_v52, 9 }
 0x271   : > { %4047 = vrot.lane.b32.xlu1 %v4017_v21, %s5365_s10  ;;  %v2666_v47 = vsel %vm6087_vm13, %v2657_v8, %v2665_v14  ;;  %v4079_v20 = vunpack.c.l.b16 %v2656_v24  ;;  %v3015_v3 = vrot.slane %v3013_v48, 5  ;;  %v3019_v39 = vrot.slane %v3017_v38, 4 }
 0x272   : > { %v4080_v4 = vunpack.c.l.b16 %v2666_v47  ;;  %v3010_v2 = vor.u32 %v3009_v1, %v3006_v55  ;;  %v3025_v51 = vrot.slane %v3023_v31, 5  ;;  %v3266_v25 = vrot.slane %v7475_v59, 5  ;;  %v5351_v55 = vld [vmem:[%s8027_s2] ss:$0 sm:$0xff]  ;;  %v2317_v31 = vld [vmem:[#allocation2 + $0x98] sm:$0x3] }
 0x273   : > { %v3020_v26 = vor.u32 %v3019_v39, %v3015_v3  ;;  %v3269_v16 = vrot.slane %v2726_v23, 5  ;;  %v4539_v15 = vsel %vm4519_vm14, %v4506_v54, %v7400_v44  ;;  %v5296_v11 = vunpack.c.l.bf16 %v5312_v40 }
 0x274   : > { %v4097_v5 = vpack.c.b16 %v4080_v4, %v4079_v20  ;;  %v3011_v56 = vrot.slane %v3010_v2, 4  ;;  %v4572_v58 = vsel %vm4552_vm15, %v4539_v15, %v4198_v50  ;;  %v3267_v22 = vsel %vm5453_vm6, %v5189_v60, %v3266_v25  ;;  %v4364_v60 = vpop.permute.xlu0 %4363  ;;  %v7530_v37 = vpop.permute.xlu2 %4105 }
 0x275   : > { %v3021_v7 = vrot.slane %v3020_v26, 4  ;;  %v3268_v49 = vrot.slane %v3266_v25, 4  ;;  %v4605_v41 = vsel %vm4585_vm11, %v4572_v58, %v4278_v19  ;;  %v4233_v44 = vunpack.c.l.b16 %v3267_v22 }
 0x276   : > { %4127 = vrot.lane.b32.xlu0 %v4097_v5, %s5366_s11  ;;  %v3016_v35 = vsel %vm6314_vm2, %v3011_v56, %v3015_v3  ;;  %v4638_v54 = vsel %vm4618_vm1, %v4605_v41, %v7466_v62  ;;  %v5297_v30 = vunpack.c.h.bf16 %v5312_v40  ;;  %v335_v34 = vmul.f32 %v5350_v53, %v5296_v11  ;;  %v4284_v40 = vpop.permute.xlu1 %4283  ;;  %v5352_v56 = vld [vmem:[#allocation2 + $0xb4] sm:$0xe] }
 0x277   : > { %v3026_v23 = vsel %vm6314_vm2, %v3021_v7, %v3025_v51  ;;  %v4153_v21 = vunpack.c.l.b16 %v3016_v35  ;;  %v3270_v45 = vsel %vm5453_vm6, %v3268_v49, %v3269_v16  ;;  %5219 = vmatmul.msk.bf16.gmra.mxu2 %vm4687_vm7, %v4638_v54  ;;  %v4578_v62 = vsel %vm4552_vm15, %v4545_v63, %v7437_v18  ;;  %v1326_v49 = vld [vmem:[#allocation2 + $0xbc] sm:$0x3] }
 0x278   : > { %v4154_v8 = vunpack.c.l.b16 %v3026_v23  ;;  %v4234_v14 = vunpack.c.l.b16 %v3270_v45  ;;  %v336_v24 = vmul.f32 %v5350_v53, %v5297_v30  ;;  %v371_v1 = vadd.f32 %v5351_v55, %v335_v34 }
 0x279   : > { %v2576_v50 = vshrl.u32 %v7433_v32, 16  ;;  %v2579_v47 = vshll.u32 %v7433_v32, 16  ;;  %v2584_v20 = vrot.slane %v2024_v0, 5  ;;  %v2585_v18 = vrot.slane %v2020_v46, 6 }
 0x27a   : > { %v4174_v3 = vpack.c.b16 %v4154_v8, %v4153_v21  ;;  %v4254_v39 = vpack.c.b16 %v4234_v14, %v4233_v44  ;;  %v372_v19 = vadd.f32 %v5351_v55, %v336_v24  ;;  %v403_v63 = vmax.f32 %v371_v1, 0.0 }
 0x27b   : > { %v4611_v4 = vsel %vm4585_vm11, %v4578_v62, %v4284_v40  ;;  %v2578_v2 = vrot.slane %v2576_v50, 5  ;;  %v2581_v51 = vrot.slane %v2579_v47, 6  ;;  %v2586_v32 = vor.u32 %v2585_v18, %v2584_v20  ;;  %v7551_v40 = vld [vmem:[#allocation2 + $0xcc] sm:$0xe] }
 0x27c   : > { %4201 = vrot.lane.b32.xlu1 %v4174_v3, %s5368_s13  ;;  %v404_v26 = vmax.f32 %v372_v19, 0.0  ;;  %v2590_v25 = vshrl.u32 %v2317_v31, 16  ;;  %v2593_v16 = vshll.u32 %v2317_v31, 16  ;;  %v482_v0 = vpack.c.bf16 %v403_v63, %v403_v63  ;;  %v7549_v19 = vld [vmem:[#allocation2 + $0xd4] sm:$0x1] }
 0x27d   : > { %v2582_v15 = vor.u32 %v2581_v51, %v2578_v2  ;;  %v4644_v5 = vsel %vm4618_vm1, %v4611_v4, %v4364_v60  ;;  %v1676_v58 = vshrl.u32 %v5352_v56, 16  ;;  %v2588_v11 = vrot.slane %v2586_v32, 4 }
 0x27e   : > { %4281 = vrot.lane.b32.xlu0 %v4254_v39, %s5367_s12  ;;  %v483_v46 = vpack.c.bf16 %v404_v26, %v404_v26  ;;  %v2592_v7 = vrot.slane %v2590_v25, 5  ;;  %v2595_v22 = vrot.slane %v2593_v16, 6  ;;  %5222 = vmatmul.msk.bf16.vlgmr.msra.gmra.mxu3 %vm4687_vm7, %v4644_v5  ;;  %v594_v41 = vrot.slane %v482_v0, 7  ;;  %v3946_v50 = vpop.permute.xlu1 %3945  ;;  %v4026_v39 = vpop.permute.xlu0 %4025 }
 0x27f   : > { %v2583_v35 = vrot.slane %v2582_v15, 4  ;;  %v1678_v44 = vrot.slane %v1676_v58, 5  ;;  %v1679_v54 = vshll.u32 %v5352_v56, 16  ;;  %v8146_v21 = vshrl.u32 %v8143_v10, 16  ;;  %v7542_v10 = vld [vmem:[#allocation2 + $0xd0] sm:$0xf]  ;;  %v7575_v58 = vpop.permute.xlu2 %4191 }
 0x280   : > { %v596_v30 = vrot.slane %v483_v46, 7  ;;  %v2596_v23 = vor.u32 %v2595_v22, %v2592_v7  ;;  %v1685_v53 = vrot.slane %v1118_v28, 6  ;;  %v595_v34 = vrot.slane %v594_v41, 4  ;;  %694 = vst.msk [vmem:[#allocation2 + $0xc0] sm:$0xe] %vm648_vm10, %v594_v41 }
 0x281   : > { %v1684_v45 = vrot.slane %v8146_v21, 5  ;;  %v2587_v8 = vsel %vm6087_vm13, %v2583_v35, %v2586_v32  ;;  %v1681_v14 = vrot.slane %v1679_v54, 6  ;;  %v1690_v24 = vshrl.u32 %v1326_v49, 16 }
 0x282   : > { %v598_v62 = vrot.slane %v596_v30, 4  ;;  %v2597_v55 = vsel %vm6087_vm13, %v2588_v11, %v2596_v23  ;;  %v4073_v1 = vunpack.c.l.b16 %v2587_v8  ;;  %v4467_v42 = vsel %vm4453_vm8, %v6886_v36, %v7496_v27 }
 0x283   : > { %v1686_v31 = vor.u32 %v1685_v53, %v1684_v45  ;;  %v597_v47 = vsel %vm5518_vm9, %v595_v34, %v596_v30  ;;  %v4074_v20 = vunpack.c.l.b16 %v2597_v55  ;;  %v1682_v3 = vor.u32 %v1681_v14, %v1678_v44 }
 0x284   : > { %695 = vst.msk [vmem:[#allocation2 + $0xc4] sm:$0xf] %vm405_vm0, %v597_v47  ;;  %v1692_v63 = vrot.slane %v1690_v24, 5  ;;  %v1693_v4 = vshll.u32 %v1326_v49, 16  ;;  %v5193_v2 = vrot.slane %v7551_v40, 9  ;;  %v4461_v51 = vsel %vm4453_vm8, %v6846_v57, %v3946_v50 }
 0x285   : > { %v1688_v18 = vrot.slane %v1686_v31, 4  ;;  %696 = vst.msk [vmem:[#allocation2 + $0xc8] sm:$0x1] %vm414_vm3, %v598_v62  ;;  %v4094_v36 = vpack.c.b16 %v4074_v20, %v4073_v1  ;;  %v1683_v27 = vrot.slane %v1682_v3, 4  ;;  %v3294_v60 = vrot.slane %v7542_v10, 5 }
 0x286   : > { %v1695_v26 = vrot.slane %v1693_v4, 6  ;;  %v3297_v32 = vrot.slane %v7549_v19, 5  ;;  %v3569_v25 = vshrl.u32 %v7480_v52, 16  ;;  %v3572_v16 = vshll.u32 %v7480_v52, 16  ;;  %v4032_v53 = vpop.permute.xlu1 %4031  ;;  %v7587_v55 = vpop.permute.xlu0 %4111 }
 0x287   : > { %4121 = vrot.lane.b32.xlu2 %v4094_v36, %s5366_s11  ;;  %v1687_v0 = vsel %vm6087_vm13, %v1683_v27, %v1686_v31  ;;  %v7567_v15 = vsel %vm5453_vm6, %v5193_v2, %v3294_v60  ;;  %v7569_v5 = vrot.slane %v3294_v60, 4  ;;  %v7573_v57 = vrot.slane %v3017_v38, 5  ;;  %v3137_v56 = vld [vmem:[#allocation2 + $0xc0] sm:$0xe] }
 0x288   : > { %v1696_v46 = vor.u32 %v1695_v26, %v1692_v63  ;;  %v3841_v11 = vunpack.c.l.b16 %v1687_v0  ;;  %v7577_v7 = vld [vmem:[#allocation2 + $0xc0] sm:$0xe]  ;;  %v4494_v49 = vsel %vm4486_vm12, %v4461_v51, %v4026_v39  ;;  %v4241_v41 = vunpack.c.l.b16 %v7567_v15 }
 0x289   : > { %v2733_v22 = vld [vmem:[#allocation2 + $0xc0] sm:$0xf]  ;;  %v5192_v35 = vrot.slane %v3137_v56, 9  ;;  %v3638_v44 = vshrl.u32 %v3137_v56, 16  ;;  %v3641_v54 = vshll.u32 %v3137_v56, 16  ;;  %v5177_v30 = vrot.slane %v7577_v7, 9 }
 0x28a   : > { %v1697_v38 = vsel %vm6087_vm13, %v1688_v18, %v1696_v46  ;;  %v3076_v23 = vshrl.u32 %v2733_v22, 16  ;;  %v3079_v21 = vshll.u32 %v2733_v22, 16  ;;  %v2668_v45 = vshrl.u32 %v7577_v7, 16 }
 0x28b   : > { %v2734_v34 = vld [vmem:[#allocation2 + $0xc4] sm:$0xf]  ;;  %v3640_v8 = vrot.slane %v3638_v44, 5  ;;  %v3643_v14 = vrot.slane %v3641_v54, 6  ;;  %v3842_v24 = vunpack.c.l.b16 %v1697_v38  ;;  %v7591_v1 = vsel %vm4519_vm14, %v4494_v49, %v7530_v37 }
 0x28c   : > { %v7585_v62 = vld [vmem:[#allocation2 + $0xc4] sm:$0xf]  ;;  %v2735_v31 = vld [vmem:[#allocation2 + $0xc8] sm:$0x1]  ;;  %v3287_v50 = vrot.slane %v2734_v34, 5  ;;  %v3085_v28 = vshll.u32 %v2734_v34, 16  ;;  %v7595_v4 = vsel %vm4486_vm12, %v4467_v42, %v4032_v53 }
 0x28d   : > { %v3089_v47 = vshrl.u32 %v2734_v34, 16  ;;  %v2301_v20 = vrot.slane %v7585_v62, 5  ;;  %v3290_v3 = vrot.slane %v2735_v31, 5  ;;  %v3313_v39 = vld [vmem:[#allocation2 + $0xc8] sm:$0x3]  ;;  %v3644_v18 = vor.u32 %v3643_v14, %v3640_v8  ;;  %v7610_v14 = vpop.permute.xlu2 %4345 }
 0x28e   : > { %v3078_v63 = vrot.slane %v3076_v23, 4  ;;  %v3288_v2 = vsel %vm5453_vm6, %v5192_v35, %v3287_v50  ;;  %v3289_v36 = vrot.slane %v3287_v50, 4  ;;  %v3647_v37 = vrot.slane %v3085_v28, 6  ;;  %v7599_v51 = vld [vmem:[#allocation2 + $0xc8] sm:$0x1]  ;;  %v7612_v50 = vpop.permute.xlu1 %4185 }
 0x28f   : > { %v3646_v27 = vrot.slane %v3089_v47, 5  ;;  %v4239_v60 = vunpack.c.l.b16 %v3288_v2  ;;  %v3645_v26 = vrot.slane %v3644_v18, 4  ;;  %v3652_v0 = vshrl.u32 %v3313_v39, 16  ;;  %v7617_v18 = vpop.permute.xlu0 %4265 }
 0x290   : > { %v3655_v56 = vshll.u32 %v3313_v39, 16  ;;  %v3291_v46 = vsel %vm5453_vm6, %v3289_v36, %v3290_v3  ;;  %v7605_v42 = vsel %vm5453_vm6, %v5177_v30, %v2301_v20  ;;  %v2303_v49 = vrot.slane %v2301_v20, 4 }
 0x291   : > { %v3648_v22 = vor.u32 %v3647_v37, %v3646_v27  ;;  %v4240_v44 = vunpack.c.l.b16 %v3291_v46  ;;  %v3654_v35 = vrot.slane %v3652_v0, 5  ;;  %v2304_v38 = vrot.slane %v7599_v51, 5 }
 0x292   : > { %v3657_v54 = vrot.slane %v3655_v56, 6  ;;  %v3858_v34 = vpack.c.b16 %v3842_v24, %v3841_v11  ;;  %v3081_v8 = vrot.slane %v3079_v21, 5  ;;  %v4001_v20 = vunpack.c.l.b16 %v7605_v42 }
 0x293   : > { %v3649_v23 = vsel %vm6087_vm13, %v3645_v26, %v3648_v22  ;;  %v3650_v53 = vrot.slane %v3648_v22, 4  ;;  %v4257_v3 = vpack.c.b16 %v4240_v44, %v4239_v60  ;;  %v2305_v30 = vsel %vm5453_vm6, %v2303_v49, %v2304_v38  ;;  %v2321_v22 = vld [vmem:[#allocation2 + $0xc8] sm:$0x3] }
 0x294   : > { %v3658_v39 = vor.u32 %v3657_v54, %v3654_v35  ;;  %v4319_v2 = vunpack.c.l.b16 %v3649_v23  ;;  %v3082_v36 = vor.u32 %v3081_v8, %v3078_v63  ;;  %v3087_v27 = vrot.slane %v3085_v28, 5  ;;  %v4733_v8 = vpop.f32.mrf.mxu0 }
 0x295   : > { %v3091_v37 = vrot.slane %v3089_v47, 4  ;;  %4287 = vrot.lane.b32.xlu1 %v4257_v3, %s5367_s12  ;;  %v3095_v21 = vshll.u32 %v2735_v31, 16  ;;  %v2116_v24 = vshll.u32 %v7585_v62, 16  ;;  %v2120_v60 = vshrl.u32 %v7585_v62, 16 }
 0x296   : > { %v3659_v11 = vsel %vm6087_vm13, %v3650_v53, %v3658_v39  ;;  %v4002_v0 = vunpack.c.l.b16 %v2305_v30  ;;  %v3083_v56 = vrot.slane %v3082_v36, 4  ;;  %v2670_v49 = vrot.slane %v2668_v45, 5  ;;  %v3310_v39 = vld [vmem:[#allocation2 + $0xa4] sm:$0x3] }
 0x297   : > { %v4320_v26 = vunpack.c.l.b16 %v3659_v11  ;;  %v3092_v46 = vor.u32 %v3091_v37, %v3087_v27  ;;  %v3097_v42 = vrot.slane %v3095_v21, 5  ;;  %v2671_v28 = vshll.u32 %v7577_v7, 16  ;;  %v7643_v21 = vpop.permute.xlu0 %4351 }
 0x298   : > { %v2676_v47 = vrot.slane %v2120_v60, 5  ;;  %v3088_v31 = vsel %vm6314_vm2, %v3083_v56, %v3087_v27  ;;  %v2677_v35 = vrot.slane %v2116_v24, 6  ;;  %v2682_v23 = vshrl.u32 %v2321_v22, 16 }
 0x299   : > { %v4337_v63 = vpack.c.b16 %v4320_v26, %v4319_v2  ;;  %v3093_v44 = vrot.slane %v3092_v46, 4  ;;  %v4159_v54 = vunpack.c.l.b16 %v3088_v31  ;;  %v2673_v38 = vrot.slane %v2671_v28, 6  ;;  %v7641_v2 = vpop.permute.xlu1 %4271 }
 0x29a   : > { %v2685_v53 = vshll.u32 %v2321_v22, 16  ;;  %v2678_v45 = vor.u32 %v2677_v35, %v2676_v47  ;;  %v3298_v3 = vsel %vm5453_vm6, %v7569_v5, %v3297_v32  ;;  %v3571_v30 = vrot.slane %v3569_v25, 5  ;;  %v7649_v32 = vpop.permute.xlu2 %3965  ;;  %v3314_v35 = vld [vmem:[#allocation2 + $0xd4] sm:$0x3] }
 0x29b   : > { %4367 = vrot.lane.b32.xlu0 %v4337_v63, %s5369_s14  ;;  %v3098_v7 = vsel %vm6314_vm2, %v3093_v44, %v3097_v42  ;;  %v2674_v27 = vor.u32 %v2673_v38, %v2670_v49  ;;  %v2684_v37 = vrot.slane %v2682_v23, 5  ;;  %v4242_v56 = vunpack.c.l.b16 %v3298_v3 }
 0x29c   : > { %v4160_v36 = vunpack.c.l.b16 %v3098_v7  ;;  %v2687_v11 = vrot.slane %v2685_v53, 6  ;;  %v2680_v26 = vrot.slane %v2678_v45, 4  ;;  %v3574_v46 = vrot.slane %v3572_v16, 6 }
 0x29d   : > { %v3578_v13 = vrot.slane %v3013_v48, 6  ;;  %3889 = vrot.lane.b32.xlu1 %v3858_v34, %s5363_s8  ;;  %v2675_v5 = vrot.slane %v2674_v27, 4  ;;  %v3583_v42 = vshrl.u32 %v3310_v39, 16  ;;  %v4018_v49 = vpack.c.b16 %v4002_v0, %v4001_v20 }
 0x29e   : > { %v4177_v25 = vpack.c.b16 %v4160_v36, %v4159_v54  ;;  %v2688_v22 = vor.u32 %v2687_v11, %v2684_v37  ;;  %v3575_v28 = vor.u32 %v3574_v46, %v3571_v30  ;;  %v3586_v63 = vshll.u32 %v3310_v39, 16  ;;  %v4735_v39 = vpop.f32.mrf.mxu0 }
 0x29f   : > { %v3579_v47 = vor.u32 %v3578_v13, %v7573_v57  ;;  %v2679_v59 = vsel %vm6087_vm13, %v2675_v5, %v2678_v45  ;;  %v4258_v52 = vpack.c.b16 %v4242_v56, %v4241_v41  ;;  %v3585_v16 = vrot.slane %v3583_v42, 5  ;;  %v7681_v30 = vpop.permute.xlu0 %4039 }
 0x2a0   : > { %4207 = vrot.lane.b32.xlu2 %v4177_v25, %s5368_s13  ;;  %v2689_v48 = vsel %vm6087_vm13, %v2680_v26, %v2688_v22  ;;  %v4081_v34 = vunpack.c.l.b16 %v2679_v59  ;;  %v3576_v44 = vrot.slane %v3575_v28, 4  ;;  %v3588_v57 = vrot.slane %v3586_v63, 6  ;;  %v1743_v63 = vld [vmem:[#allocation2 + $0xc0] sm:$0xf] }
 0x2a1   : > { %v4082_v31 = vunpack.c.l.b16 %v2689_v48  ;;  %v3581_v20 = vrot.slane %v3579_v47, 4  ;;  %v7670_v0 = vsel %vm4519_vm14, %v7595_v4, %v7587_v55  ;;  %v4813_v15 = vsel %vm4371_vm4, %v4733_v8, 0.0  ;;  %v7677_v7 = vpop.permute.xlu1 %3959 }
 0x2a2   : > { %v4882_v41 = vmul.f32 %v4733_v8, %v4733_v8  ;;  %v3580_v38 = vsel %vm6087_vm13, %v3576_v44, %v3579_v47  ;;  %v4986_v23 = vpack.c.bf16 %v4733_v8, %v4733_v8  ;;  %v3109_v53 = vshll.u32 %v7542_v10, 16  ;;  %v7697_v22 = vpop.permute.xlu2 %4119 }
 0x2a3   : > { %4049 = vrot.lane.b32.xlu0 %v4018_v49, %s5365_s10  ;;  %v4098_v54 = vpack.c.b16 %v4082_v31, %v4081_v34  ;;  %v3589_v45 = vor.u32 %v3588_v57, %v3585_v16  ;;  %v4313_v3 = vunpack.c.l.b16 %v3580_v38  ;;  %v3113_v4 = vshrl.u32 %v7542_v10, 16  ;;  %v2736_v38 = vld [vmem:[#allocation2 + $0xcc] sm:$0xf] }
 0x2a4   : > { %v4914_v55 = vsel %vm4371_vm4, %v4882_v41, 0.0  ;;  %5018 = vst.msk [vmem:[%s7665_s15] sm:$0xf] %vm405_vm0, %v4986_v23  ;;  %v3661_v36 = vshrl.u32 %v7551_v40, 16  ;;  %v3664_v27 = vshll.u32 %v7551_v40, 16  ;;  %v3670_v8 = vrot.slane %v3109_v53, 6 }
 0x2a5   : > { %v3675_v37 = vshrl.u32 %v3314_v35, 16  ;;  %4129 = vrot.lane.b32.xlu1 %v4098_v54, %s5366_s11  ;;  %v3590_v11 = vsel %vm6087_vm13, %v3581_v20, %v3589_v45  ;;  %v3669_v26 = vrot.slane %v3113_v4, 5  ;;  %v3678_v56 = vshll.u32 %v3314_v35, 16  ;;  %s235_s11 = scalar_lea.vmem %s8030_s5, %s5145_s20 }
 0x2a6   : > { %v4560_v46 = vsel %vm4552_vm15, %v7591_v1, %v7612_v50  ;;  %v4314_v13 = vunpack.c.l.b16 %v3590_v11  ;;  %v3663_v25 = vrot.slane %v3661_v36, 5  ;;  %v3666_v40 = vrot.slane %v3664_v27, 6  ;;  %v4738_v23 = vpop.f32.mrf.mxu0 }
 0x2a7   : > { %v3677_v5 = vrot.slane %v3675_v37, 5  ;;  %v3671_v42 = vor.u32 %v3670_v8, %v3669_v26  ;;  %v3680_v49 = vrot.slane %v3678_v56, 6  ;;  %v4593_v28 = vsel %vm4585_vm11, %v4560_v46, %v7617_v18  ;;  %v4126_v45 = vpop.permute.xlu0 %4125  ;;  %v7726_v56 = vpop.f32.mrf.mxu1 }
 0x2a8   : > { %v4814_v47 = vsel %vm4371_vm4, %v4735_v39, 0.0  ;;  %v4334_v59 = vpack.c.b16 %v4314_v13, %v4313_v3  ;;  %v3667_v48 = vor.u32 %v3666_v40, %v3663_v25  ;;  %v4883_v34 = vmul.f32 %v4735_v39, %v4735_v39 }
 0x2a9   : > { %v4815_v16 = vadd.f32 %v4814_v47, %v4813_v15  ;;  %v3673_v1 = vrot.slane %v3671_v42, 4  ;;  %v3681_v50 = vor.u32 %v3680_v49, %v3677_v5  ;;  %v4987_v31 = vpack.c.bf16 %v4735_v39, %v4735_v39  ;;  %v4046_v35 = vpop.permute.xlu1 %4045 }
 0x2aa   : > { %v4626_v44 = vsel %vm4618_vm1, %v4593_v28, %v7610_v14  ;;  %4361 = vrot.lane.b32.xlu2 %v4334_v59, %s5369_s14  ;;  %v3668_v20 = vrot.slane %v3667_v48, 4  ;;  %v4915_v18 = vsel %vm4371_vm4, %v4883_v34, 0.0  ;;  %v2107_v57 = vshrl.u32 %v1743_v63, 16 }
 0x2ab   : > { %4289 = vrot.lane.b32.xlu0 %v4258_v52, %s5367_s12  ;;  %v2110_v41 = vshll.u32 %v1743_v63, 16  ;;  %v3682_v15 = vsel %vm6087_vm13, %v3673_v1, %v3681_v50  ;;  %v7709_v54 = vadd.f32 %v4915_v18, %v4914_v55  ;;  %5019 = vst.msk [vmem:[%s7665_s15 + $0x4] sm:$0xf] %vm405_vm0, %v4987_v31  ;;  %5213 = vmatmul.msk.bf16.gmra.mxu0 %vm4687_vm7, %v4626_v44  ;;  %v2118_v14 = vrot.slane %v2116_v24, 5  ;;  %v7742_v28 = vpop.f32.mrf.mxu2 }
 0x2ac   : > { %v2122_v52 = vrot.slane %v2120_v60, 4  ;;  %v3672_v3 = vsel %vm6087_vm13, %v3668_v20, %v3671_v42  ;;  %v4322_v39 = vunpack.c.l.b16 %v3682_v15  ;;  %v2109_v36 = vrot.slane %v2107_v57, 4 }
 0x2ad   : > { %v2112_v55 = vrot.slane %v2110_v41, 5  ;;  %v4321_v27 = vunpack.c.l.b16 %v3672_v3  ;;  %v2126_v37 = vshll.u32 %v7599_v51, 16  ;;  %v4566_v24 = vsel %vm4552_vm15, %v7670_v0, %v7575_v58  ;;  %v4206_v51 = vpop.permute.xlu2 %4205 }
 0x2ae   : > { %v2123_v8 = vor.u32 %v2122_v52, %v2118_v14  ;;  %v4599_v62 = vsel %vm4585_vm11, %v4566_v24, %v7641_v2  ;;  %v3100_v60 = vshrl.u32 %v2736_v38, 16  ;;  %v3103_v26 = vshll.u32 %v2736_v38, 16  ;;  %v4740_v57 = vpop.f32.mrf.mxu0 }
 0x2af   : > { %v2113_v11 = vor.u32 %v2112_v55, %v2109_v36  ;;  %v4338_v6 = vpack.c.b16 %v4322_v39, %v4321_v27  ;;  %v2128_v13 = vrot.slane %v2126_v37, 5  ;;  %v4632_v25 = vsel %vm4618_vm1, %v4599_v62, %v7643_v21  ;;  %v7768_v3 = vpop.f32.mrf.mxu1 }
 0x2b0   : > { %v2124_v46 = vrot.slane %v2123_v8, 4  ;;  %5216 = vmatmul.msk.bf16.gmra.mxu1 %vm4687_vm7, %v4632_v25  ;;  %v3102_v5 = vrot.slane %v3100_v60, 4  ;;  %v3105_v58 = vrot.slane %v3103_v26, 5  ;;  %v3111_v0 = vrot.slane %v3109_v53, 5 }
 0x2b1   : > { %v2114_v40 = vrot.slane %v2113_v11, 4  ;;  %v4481_v2 = vsel %vm4453_vm8, %v6856_v9, %v7649_v32  ;;  %4369 = vrot.lane.b32.xlu1 %v4338_v6, %s5369_s14  ;;  %v3115_v21 = vrot.slane %v3113_v4, 4  ;;  %v3119_v49 = vshll.u32 %v7549_v19, 16  ;;  %v4200_v32 = vpop.permute.xlu1 %4199  ;;  %v4280_v4 = vpop.permute.xlu0 %4279 }
 0x2b2   : > { %v2129_v42 = vsel %vm6314_vm2, %v2124_v46, %v2128_v13  ;;  %v3106_v63 = vor.u32 %v3105_v58, %v3102_v5  ;;  %v4475_v9 = vsel %vm4453_vm8, %v6812_v29, %v7677_v7  ;;  %v4816_v10 = vsel %vm4371_vm4, %v4738_v23, 0.0 }
 0x2b3   : > { %v2119_v47 = vsel %vm6314_vm2, %v2114_v40, %v2118_v14  ;;  %v3922_v53 = vunpack.c.l.b16 %v2129_v42  ;;  %v3116_v48 = vor.u32 %v3115_v21, %v3111_v0  ;;  %v3121_v34 = vrot.slane %v3119_v49, 5  ;;  %v7780_v60 = vpop.f32.mrf.mxu2 }
 0x2b4   : > { %v3921_v59 = vunpack.c.l.b16 %v2119_v47  ;;  %v3107_v19 = vrot.slane %v3106_v63, 4  ;;  %v4817_v1 = vadd.f32 %v4816_v10, %v4815_v16  ;;  %v4884_v50 = vmul.f32 %v4738_v23, %v4738_v23 }
 0x2b5   : > { %v4988_v31 = vpack.c.bf16 %v4738_v23, %v4738_v23  ;;  %v3117_v20 = vrot.slane %v3116_v48, 4  ;;  %v4514_v18 = vsel %vm4486_vm12, %v4481_v2, %v4046_v35  ;;  %v4508_v7 = vsel %vm4486_vm12, %v4475_v9, %v7681_v30  ;;  %v4360_v27 = vpop.permute.xlu2 %4359 }
 0x2b6   : > { %v3938_v44 = vpack.c.b16 %v3922_v53, %v3921_v59  ;;  %v3112_v29 = vsel %vm6314_vm2, %v3107_v19, %v3111_v0  ;;  %v4917_v41 = vsel %vm4371_vm4, %v4884_v50, 0.0  ;;  %v4994_v16 = vpack.c.bf16 %v7726_v56, %v7726_v56 }
 0x2b7   : > { %5020 = vst.msk [vmem:[%s7665_s15 + $0x8] sm:$0xf] %vm405_vm0, %v4988_v31  ;;  %v3122_v15 = vsel %vm6314_vm2, %v3117_v20, %v3121_v34  ;;  %v4161_v35 = vunpack.c.l.b16 %v3112_v29  ;;  %v4918_v14 = vadd.f32 %v4917_v41, %v7709_v54  ;;  %v4547_v30 = vsel %vm4519_vm14, %v4514_v18, %v4126_v45 }
 0x2b8   : > { %3969 = vrot.lane.b32.xlu2 %v3938_v44, %s5364_s9  ;;  %v4162_v52 = vunpack.c.l.b16 %v3122_v15  ;;  %5026 = vst.msk [vmem:[%s7665_s15 + $0x20] sm:$0xf] %vm405_vm0, %v4994_v16  ;;  %v4818_v38 = vsel %vm4371_vm4, %v4740_v57, 0.0  ;;  %v4885_v23 = vmul.f32 %v4740_v57, %v4740_v57  ;;  %v4989_v36 = vpack.c.bf16 %v4740_v57, %v4740_v57 }
 0x2b9   : > { %v4819_v39 = vadd.f32 %v4818_v38, %v4817_v1  ;;  %v4541_v43 = vsel %vm4519_vm14, %v4508_v7, %v7697_v22  ;;  %v4286_v37 = vpop.permute.xlu1 %4285  ;;  %v4995_v45 = vpack.c.bf16 %v7768_v3, %v7768_v3  ;;  %v4580_v62 = vsel %vm4552_vm15, %v4547_v30, %v4206_v51  ;;  %v4366_v22 = vpop.permute.xlu0 %4365 }
 0x2ba   : > { %v4178_v55 = vpack.c.b16 %v4162_v52, %v4161_v35  ;;  %v4919_v54 = vsel %vm4371_vm4, %v4885_v23, 0.0  ;;  %v4574_v8 = vsel %vm4552_vm15, %v4541_v43, %v4200_v32  ;;  %5021 = vst.msk [vmem:[%s7665_s15 + $0xc] sm:$0xf] %vm405_vm0, %v4989_v36  ;;  %v4613_v6 = vsel %vm4585_vm11, %v4580_v62, %v4286_v37 }
 0x2bb   : > { %v4920_v24 = vadd.f32 %v4919_v54, %v4918_v14  ;;  %v4607_v11 = vsel %vm4585_vm11, %v4574_v8, %v4280_v4  ;;  %5027 = vst.msk [vmem:[%s7665_s15 + $0x24] sm:$0xf] %vm405_vm0, %v4995_v45  ;;  %v4646_v46 = vsel %vm4618_vm1, %v4613_v6, %v4366_v22  ;;  %v5002_v13 = vpack.c.bf16 %v7742_v28, %v7742_v28 }
 0x2bc   : > { %v4640_v26 = vsel %vm4618_vm1, %v4607_v11, %v4360_v27  ;;  %5223 = vmatmul.msk.bf16.gmra.mxu3 %vm4687_vm7, %v4646_v46  ;;  %v5003_v25 = vpack.c.bf16 %v7780_v60, %v7780_v60 }
 0x2bd   : > { %5220 = vmatmul.msk.bf16.gmra.mxu2 %vm4687_vm7, %v4640_v26  ;;  %5034 = vst.msk [vmem:[%s7665_s15 + $0x40] sm:$0xf] %vm405_vm0, %v5002_v13  ;;  %v4034_v51 = vpop.permute.xlu2 %4033 }
 0x2be   : > { %5035 = vst.msk [vmem:[%s7665_s15 + $0x44] sm:$0xf] %vm405_vm0, %v5003_v25 }
 0x2c0   : > { %4209 = vrot.lane.b32.xlu2 %v4178_v55, %s5368_s13 }
 0x2c1   : > { %v3954_v40 = vpop.permute.xlu1 %3953 }
 0x2c2   : > { %v4469_v5 = vsel %vm4453_vm8, %v6761_v12, %v3954_v40 }
 0x2c3   : > { %v4502_v0 = vsel %vm4486_vm12, %v4469_v5, %v4034_v51 }
 0x2c5   : > { %v4274_v59 = vpop.permute.xlu2 %4273 }
 0x2c7   : > { %v4114_v58 = vpop.permute.xlu0 %4113 }
 0x2c8   : > { %v4535_v53 = vsel %vm4519_vm14, %v4502_v0, %v4114_v58 }
 0x2cc   : > { %v4743_v2 = vpop.f32.mrf.mxu0 }
 0x2cd   : > { %v4194_v42 = vpop.permute.xlu1 %4193  ;;  %v4820_v21 = vsel %vm4371_vm4, %v4743_v2, 0.0  ;;  %v4886_v49 = vmul.f32 %v4743_v2, %v4743_v2  ;;  %v4990_v47 = vpack.c.bf16 %v4743_v2, %v4743_v2  ;;  %v3968_v20 = vpop.permute.xlu2 %3967 }
 0x2ce   : > { %v7803_v63 = vadd.f32 %v4820_v21, %v4819_v39  ;;  %v4568_v9 = vsel %vm4552_vm15, %v4535_v53, %v4194_v42 }
 0x2cf   : > { %v4921_v32 = vsel %vm4371_vm4, %v4886_v49, 0.0  ;;  %5022 = vst.msk [vmem:[%s7665_s15 + $0x10] sm:$0xf] %vm405_vm0, %v4990_v47  ;;  %v4601_v48 = vsel %vm4585_vm11, %v4568_v9, %v4274_v59 }
 0x2d0   : > { %v7809_v12 = vadd.f32 %v4921_v32, %v4920_v24 }
 0x2d4   : > { %v4354_v34 = vpop.permute.xlu0 %4353  ;;  %v7812_v10 = vpop.f32.mrf.mxu0 }
 0x2d5   : > { %v4634_v4 = vsel %vm4618_vm1, %v4601_v48, %v4354_v34  ;;  %v4991_v19 = vpack.c.bf16 %v7812_v10, %v7812_v10  ;;  %v4887_v47 = vmul.f32 %v7812_v10, %v7812_v10  ;;  %v4822_v32 = vsel %vm4371_vm4, %v7812_v10, 0.0 }
 0x2d6   : > { %5217 = vmatmul.msk.bf16.gmra.mxu1 %vm4687_vm7, %v4634_v4  ;;  %v4823_v48 = vadd.f32 %v4822_v32, %v7803_v63  ;;  %v4890_v63 = vmul.f32 %v7726_v56, %v7726_v56 }
 0x2d7   : > { %5023 = vst.msk [vmem:[%s7665_s15 + $0x14] sm:$0xf] %vm405_vm0, %v4991_v19  ;;  %v4923_v59 = vsel %vm4371_vm4, %v4887_v47, 0.0 }
 0x2d9   : > { %v7820_v1 = vpop.f32.mrf.mxu1 }
 0x2da   : > { %v4996_v50 = vpack.c.bf16 %v7820_v1, %v7820_v1 }
 0x2db   : > { %v3962_v18 = vpop.permute.xlu1 %3961 }
 0x2dc   : > { %5028 = vst.msk [vmem:[%s7665_s15 + $0x28] sm:$0xf] %vm405_vm0, %v4996_v50  ;;  %v4477_v16 = vsel %vm4453_vm8, %v6931_v33, %v3962_v18  ;;  %v4483_v33 = vsel %vm4453_vm8, %v6971_v61, %v3968_v20 }
 0x2dd   : > { %v4042_v57 = vpop.permute.xlu0 %4041 }
 0x2de   : > { %v4510_v14 = vsel %vm4486_vm12, %v4477_v16, %v4042_v57 }
 0x2e1   : > { %v7826_v31 = vpop.f32.mrf.mxu1  ;;  %v4122_v29 = vpop.permute.xlu2 %4121 }
 0x2e2   : > { %v4997_v44 = vpack.c.bf16 %v7826_v31, %v7826_v31  ;;  %v4543_v38 = vsel %vm4519_vm14, %v4510_v14, %v4122_v29  ;;  %v4828_v14 = vsel %vm4371_vm4, %v7726_v56, 0.0 }
 0x2e3   : > { %v4048_v7 = vpop.permute.xlu1 %4047 }
 0x2e4   : > { %5029 = vst.msk [vmem:[%s7665_s15 + $0x2c] sm:$0xf] %vm405_vm0, %v4997_v44  ;;  %v4516_v54 = vsel %vm4486_vm12, %v4483_v33, %v4048_v7  ;;  %v4924_v44 = vadd.f32 %v4923_v59, %v7809_v12  ;;  %v4830_v33 = vsel %vm4371_vm4, %v7768_v3, 0.0 }
 0x2e8   : > { %v4128_v41 = vpop.permute.xlu0 %4127 }
 0x2e9   : > { %v4549_v61 = vsel %vm4519_vm14, %v4516_v54, %v4128_v41 }
 0x2ee   : > { %v4202_v30 = vpop.permute.xlu1 %4201 }
 0x2ef   : > { %v4576_v23 = vsel %vm4552_vm15, %v4543_v38, %v4202_v30 }
 0x2f0   : > { %v4282_v39 = vpop.permute.xlu0 %4281 }
 0x2f1   : > { %v4609_v43 = vsel %vm4585_vm11, %v4576_v23, %v4282_v39  ;;  %v4929_v39 = vsel %vm4371_vm4, %v4890_v63, 0.0 }
 0x2fa   : > { %v4208_v15 = vpop.permute.xlu2 %4207  ;;  %v7834_v35 = vpop.f32.mrf.mxu2 }
 0x2fb   : > { %v5004_v52 = vpack.c.bf16 %v7834_v35, %v7834_v35  ;;  %v4582_v11 = vsel %vm4552_vm15, %v4549_v61, %v4208_v15 }
 0x2fd   : > { %5036 = vst.msk [vmem:[%s7665_s15 + $0x48] sm:$0xf] %vm405_vm0, %v5004_v52  ;;  %v4891_v52 = vmul.f32 %v7768_v3, %v7768_v3  ;;  %v4834_v3 = vsel %vm4371_vm4, %v7826_v31, 0.0 }
 0x301   : > { %v7843_v36 = vpop.f32.mrf.mxu3 }
 0x302   : > { %v5010_v55 = vpack.c.bf16 %v7843_v36, %v7843_v36  ;;  %v7850_v27 = vpop.f32.mrf.mxu2 }
 0x303   : > { %v5005_v8 = vpack.c.bf16 %v7850_v27, %v7850_v27 }
 0x304   : > { %v4362_v37 = vpop.permute.xlu2 %4361  ;;  %5042 = vst.msk [vmem:[%s7665_s15 + $0x60] sm:$0xf] %vm405_vm0, %v5010_v55 }
 0x305   : > { %v4642_v24 = vsel %vm4618_vm1, %v4609_v43, %v4362_v37  ;;  %5037 = vst.msk [vmem:[%s7665_s15 + $0x4c] sm:$0xf] %vm405_vm0, %v5005_v8  ;;  %v4892_v43 = vmul.f32 %v7820_v1, %v7820_v1  ;;  %v4931_v8 = vsel %vm4371_vm4, %v4891_v52, 0.0  ;;  %v4832_v37 = vsel %vm4371_vm4, %v7820_v1, 0.0 }
 0x306   : > { %5221 = vmatmul.msk.bf16.gmra.mxu2 %vm4687_vm7, %v4642_v24  ;;  %v4893_v24 = vmul.f32 %v7826_v31, %v7826_v31 }
 0x307   : > { %v4288_v45 = vpop.permute.xlu1 %4287 }
 0x308   : > { %v4615_v22 = vsel %vm4585_vm11, %v4582_v11, %v4288_v45 }
 0x309   : > { %v7863_v62 = vpop.f32.mrf.mxu3 }
 0x30a   : > { %v5011_v26 = vpack.c.bf16 %v7863_v62, %v7863_v62 }
 0x30c   : > { %5043 = vst.msk [vmem:[%s7665_s15 + $0x64] sm:$0xf] %vm405_vm0, %v5011_v26 }
 0x30d   : > { %v4368_v6 = vpop.permute.xlu0 %4367 }
 0x30e   : > { %v4648_v46 = vsel %vm4618_vm1, %v4615_v22, %v4368_v6  ;;  %v4933_v22 = vsel %vm4371_vm4, %v4892_v43, 0.0  ;;  %v4901_v43 = vmul.f32 %v7850_v27, %v7850_v27 }
 0x30f   : > { %5224 = vmatmul.msk.bf16.gmra.mxu3 %vm4687_vm7, %v4648_v46  ;;  %v3890_v13 = vpop.permute.xlu1 %3889 }
 0x310   : > { %v4452_v40 = vsel %vm4420_vm5, %v6787_v17, %v3890_v13  ;;  %v4935_v13 = vsel %vm4371_vm4, %v4893_v24, 0.0 }
 0x312   : > { %v3970_v25 = vpop.permute.xlu2 %3969 }
 0x313   : > { %v4485_v5 = vsel %vm4453_vm8, %v4452_v40, %v3970_v25 }
 0x315   : > { %v4050_v51 = vpop.permute.xlu0 %4049 }
 0x316   : > { %v4518_v0 = vsel %vm4486_vm12, %v4485_v5, %v4050_v51 }
 0x317   : > { %v4130_v58 = vpop.permute.xlu1 %4129 }
 0x318   : > { %v4551_v2 = vsel %vm4519_vm14, %v4518_v0, %v4130_v58 }
 0x31a   : > { %v4210_v42 = vpop.permute.xlu2 %4209 }
 0x31b   : > { %v4584_v21 = vsel %vm4552_vm15, %v4551_v2, %v4210_v42 }
 0x31d   : > { %v4290_v49 = vpop.permute.xlu0 %4289 }
 0x31e   : > { %v4617_v53 = vsel %vm4585_vm11, %v4584_v21, %v4290_v49 }
 0x323   : > { %v4370_v9 = vpop.permute.xlu1 %4369 }
 0x324   : > { %v4650_v17 = vsel %vm4618_vm1, %v4617_v53, %v4370_v9  ;;  %vm8148_vm1 = vcmask 1040384  }
 0x325   : > { %5225 = vmatmul.msk.bf16.gmra.mxu3 %vm4687_vm7, %v4650_v17 }
 0x328   : > { %v4748_v34 = vpop.f32.mrf.mxu0 }
 0x329   : > { %v4824_v4 = vsel %vm4371_vm4, %v4748_v34, 0.0  ;;  %v4888_v19 = vmul.f32 %v4748_v34, %v4748_v34  ;;  %v4992_v50 = vpack.c.bf16 %v4748_v34, %v4748_v34 }
 0x32a   : > { %v4825_v20 = vadd.f32 %v4824_v4, %v4823_v48 }
 0x32b   : > { %v4925_v18 = vsel %vm4371_vm4, %v4888_v19, 0.0  ;;  %5024 = vst.msk [vmem:[%s7665_s15 + $0x18] sm:$0xf] %vm405_vm0, %v4992_v50 }
 0x32c   : > { %v4926_v10 = vadd.f32 %v4925_v18, %v4924_v44  ;;  %v4898_v18 = vmul.f32 %v7742_v28, %v7742_v28 }
 0x32d   : > { %v4763_v57 = vpop.f32.mrf.mxu1 }
 0x32e   : > { %v4998_v29 = vpack.c.bf16 %v4763_v57, %v4763_v57  ;;  %v4894_v26 = vmul.f32 %v4763_v57, %v4763_v57  ;;  %v4836_v1 = vsel %vm4371_vm4, %v4763_v57, 0.0  ;;  %v4945_v52 = vsel %vm4371_vm4, %v4898_v18, 0.0 }
 0x330   : > { %5030 = vst.msk [vmem:[%s7665_s15 + $0x30] sm:$0xf] %vm405_vm0, %v4998_v29  ;;  %v4750_v7 = vpop.f32.mrf.mxu0  ;;  %v4937_v5 = vsel %vm4371_vm4, %v4894_v26, 0.0 }
 0x331   : > { %v4826_v41 = vsel %vm4371_vm4, %v4750_v7, 0.0  ;;  %v4889_v16 = vmul.f32 %v4750_v7, %v4750_v7  ;;  %v4993_v15 = vpack.c.bf16 %v4750_v7, %v4750_v7 }
 0x332   : > { %v4827_v12 = vadd.f32 %v4826_v41, %v4825_v20  ;;  %v4844_v41 = vsel %vm4371_vm4, %v7742_v28, 0.0 }
 0x333   : > { %v4927_v30 = vsel %vm4371_vm4, %v4889_v16, 0.0  ;;  %5025 = vst.msk [vmem:[%s7665_s15 + $0x1c] sm:$0xf] %vm405_vm0, %v4993_v15  ;;  %v4899_v16 = vmul.f32 %v7780_v60, %v7780_v60 }
 0x334   : > { %v4829_v38 = vadd.f32 %v4828_v14, %v4827_v12  ;;  %v4928_v23 = vadd.f32 %v4927_v30, %v4926_v10  ;;  %v4846_v30 = vsel %vm4371_vm4, %v7780_v60, 0.0  ;;  %v4850_v60 = vsel %vm4371_vm4, %v7850_v27, 0.0 }
 0x335   : > { %v4765_v55 = vpop.f32.mrf.mxu1  ;;  %v4947_v28 = vsel %vm4371_vm4, %v4899_v16, 0.0 }
 0x336   : > { %v4831_v56 = vadd.f32 %v4830_v33, %v4829_v38  ;;  %v4930_v54 = vadd.f32 %v4929_v39, %v4928_v23  ;;  %v4999_v61 = vpack.c.bf16 %v4765_v55, %v4765_v55  ;;  %v4895_v25 = vmul.f32 %v4765_v55, %v4765_v55 }
 0x337   : > { %v4838_v58 = vsel %vm4371_vm4, %v4765_v55, 0.0  ;;  %v4900_v38 = vmul.f32 %v7834_v35, %v7834_v35  ;;  %v4848_v33 = vsel %vm4371_vm4, %v7834_v35, 0.0 }
 0x338   : > { %v4833_v45 = vadd.f32 %v4832_v37, %v4831_v56  ;;  %v4932_v11 = vadd.f32 %v4931_v8, %v4930_v54  ;;  %5031 = vst.msk [vmem:[%s7665_s15 + $0x34] sm:$0xf] %vm405_vm0, %v4999_v61  ;;  %v4939_v2 = vsel %vm4371_vm4, %v4895_v25, 0.0  ;;  %v4951_v61 = vsel %vm4371_vm4, %v4901_v43, 0.0 }
 0x339   : > { %v4949_v54 = vsel %vm4371_vm4, %v4900_v38, 0.0 }
 0x33a   : > { %v4934_v6 = vadd.f32 %v4933_v22, %v4932_v11  ;;  %v4835_v46 = vadd.f32 %v4834_v3, %v4833_v45 }
 0x33c   : > { %v4837_v40 = vadd.f32 %v4836_v1, %v4835_v46  ;;  %v4936_v51 = vadd.f32 %v4935_v13, %v4934_v6 }
 0x33e   : > { %v4839_v31 = vadd.f32 %v4838_v58, %v4837_v40  ;;  %v4938_v0 = vadd.f32 %v4937_v5, %v4936_v51 }
 0x33f   : > { %v7924_v47 = vpop.f32.mrf.mxu3 }
 0x340   : > { %v4940_v42 = vadd.f32 %v4939_v2, %v4938_v0  ;;  %v4783_v21 = vpop.f32.mrf.mxu2  ;;  %v5012_v53 = vpack.c.bf16 %v7924_v47, %v7924_v47  ;;  %v4864_v18 = vsel %vm4371_vm4, %v7924_v47, 0.0 }
 0x341   : > { %v5006_v49 = vpack.c.bf16 %v4783_v21, %v4783_v21  ;;  %v4902_v8 = vmul.f32 %v4783_v21, %v4783_v21  ;;  %v4852_v45 = vsel %vm4371_vm4, %v4783_v21, 0.0  ;;  %v4906_v21 = vmul.f32 %v7843_v36, %v7843_v36 }
 0x342   : > { %5044 = vst.msk [vmem:[%s7665_s15 + $0x68] sm:$0xf] %vm405_vm0, %v5012_v53 }
 0x343   : > { %5038 = vst.msk [vmem:[%s7665_s15 + $0x50] sm:$0xf] %vm405_vm0, %v5006_v49  ;;  %v4953_v3 = vsel %vm4371_vm4, %v4902_v8, 0.0 }
 0x347   : > { %v7932_v32 = vpop.f32.mrf.mxu3 }
 0x348   : > { %v4785_v9 = vpop.f32.mrf.mxu2  ;;  %v5013_v59 = vpack.c.bf16 %v7932_v32, %v7932_v32 }
 0x349   : > { %v5007_v17 = vpack.c.bf16 %v4785_v9, %v4785_v9  ;;  %v4903_v11 = vmul.f32 %v4785_v9, %v4785_v9  ;;  %v4854_v26 = vsel %vm4371_vm4, %v4785_v9, 0.0 }
 0x34a   : > { %5045 = vst.msk [vmem:[%s7665_s15 + $0x6c] sm:$0xf] %vm405_vm0, %v5013_v59 }
 0x34b   : > { %5039 = vst.msk [vmem:[%s7665_s15 + $0x54] sm:$0xf] %vm405_vm0, %v5007_v17  ;;  %v4955_v13 = vsel %vm4371_vm4, %v4903_v11, 0.0  ;;  %v4860_v17 = vsel %vm4371_vm4, %v7843_v36, 0.0  ;;  %v4908_v36 = vmul.f32 %v7924_v47, %v7924_v47 }
 0x34d   : > { %v4965_v16 = vsel %vm4371_vm4, %v4908_v36, 0.0 }
 0x353   : > { %v4768_v48 = vpop.f32.mrf.mxu1 }
 0x354   : > { %v5000_v34 = vpack.c.bf16 %v4768_v48, %v4768_v48  ;;  %v4896_v4 = vmul.f32 %v4768_v48, %v4768_v48  ;;  %v4840_v19 = vsel %vm4371_vm4, %v4768_v48, 0.0  ;;  %v4907_v48 = vmul.f32 %v7863_v62, %v7863_v62 }
 0x355   : > { %v4841_v44 = vadd.f32 %v4840_v19, %v4839_v31  ;;  %v4862_v19 = vsel %vm4371_vm4, %v7863_v62, 0.0 }
 0x356   : > { %5032 = vst.msk [vmem:[%s7665_s15 + $0x38] sm:$0xf] %vm405_vm0, %v5000_v34  ;;  %v4941_v50 = vsel %vm4371_vm4, %v4896_v4, 0.0 }
 0x357   : > { %v4942_v7 = vadd.f32 %v4941_v50, %v4940_v42 }
 0x35b   : > { %v4770_v20 = vpop.f32.mrf.mxu1 }
 0x35c   : > { %v4842_v10 = vsel %vm4371_vm4, %v4770_v20, 0.0  ;;  %v4897_v57 = vmul.f32 %v4770_v20, %v4770_v20  ;;  %v5001_v29 = vpack.c.bf16 %v4770_v20, %v4770_v20 }
 0x35d   : > { %v4843_v63 = vadd.f32 %v4842_v10, %v4841_v44  ;;  %v4961_v44 = vsel %vm4371_vm4, %v4906_v21, 0.0 }
 0x35e   : > { %v4943_v15 = vsel %vm4371_vm4, %v4897_v57, 0.0  ;;  %5033 = vst.msk [vmem:[%s7665_s15 + $0x3c] sm:$0xf] %vm405_vm0, %v5001_v29  ;;  %v4963_v57 = vsel %vm4371_vm4, %v4907_v48, 0.0 }
 0x35f   : > { %v4845_v12 = vadd.f32 %v4844_v41, %v4843_v63  ;;  %v4944_v14 = vadd.f32 %v4943_v15, %v4942_v7  ;;  %v4909_v15 = vmul.f32 %v7932_v32, %v7932_v32 }
 0x361   : > { %v4847_v23 = vadd.f32 %v4846_v30, %v4845_v12  ;;  %v4946_v39 = vadd.f32 %v4945_v52, %v4944_v14  ;;  %v4866_v12 = vsel %vm4371_vm4, %v7932_v32, 0.0  ;;  %v4967_v14 = vsel %vm4371_vm4, %v4909_v15, 0.0 }
 0x363   : > { %v4849_v55 = vadd.f32 %v4848_v33, %v4847_v23  ;;  %v4948_v56 = vadd.f32 %v4947_v28, %v4946_v39 }
 0x365   : > { %v4950_v37 = vadd.f32 %v4949_v54, %v4948_v56  ;;  %v4851_v24 = vadd.f32 %v4850_v60, %v4849_v55 }
 0x367   : > { %v4853_v35 = vadd.f32 %v4852_v45, %v4851_v24  ;;  %v4952_v22 = vadd.f32 %v4951_v61, %v4950_v37 }
 0x369   : > { %v4855_v6 = vadd.f32 %v4854_v26, %v4853_v35  ;;  %v4954_v46 = vadd.f32 %v4953_v3, %v4952_v22 }
 0x36b   : > { %v4956_v27 = vadd.f32 %v4955_v13, %v4954_v46 }
 0x389   : > { %v4788_v1 = vpop.f32.mrf.mxu2 }
 0x38a   : > { %v5008_v25 = vpack.c.bf16 %v4788_v1, %v4788_v1  ;;  %v4904_v40 = vmul.f32 %v4788_v1, %v4788_v1  ;;  %v4856_v51 = vsel %vm4371_vm4, %v4788_v1, 0.0 }
 0x38b   : > { %v4857_v5 = vadd.f32 %v4856_v51, %v4855_v6 }
 0x38c   : > { %5040 = vst.msk [vmem:[%s7665_s15 + $0x58] sm:$0xf] %vm405_vm0, %v5008_v25  ;;  %v4957_v58 = vsel %vm4371_vm4, %v4904_v40, 0.0 }
 0x38d   : > { %v4958_v59 = vadd.f32 %v4957_v58, %v4956_v27 }
 0x391   : > { %v4790_v0 = vpop.f32.mrf.mxu2 }
 0x392   : > { %v4803_v31 = vpop.f32.mrf.mxu3  ;;  %v4858_v42 = vsel %vm4371_vm4, %v4790_v0, 0.0  ;;  %v4905_v53 = vmul.f32 %v4790_v0, %v4790_v0  ;;  %v5009_v9 = vpack.c.bf16 %v4790_v0, %v4790_v0 }
 0x393   : > { %v5014_v2 = vpack.c.bf16 %v4803_v31, %v4803_v31  ;;  %v4859_v49 = vadd.f32 %v4858_v42, %v4857_v5  ;;  %v4910_v52 = vmul.f32 %v4803_v31, %v4803_v31  ;;  %v4868_v23 = vsel %vm4371_vm4, %v4803_v31, 0.0 }
 0x394   : > { %v4959_v4 = vsel %vm4371_vm4, %v4905_v53, 0.0  ;;  %5041 = vst.msk [vmem:[%s7665_s15 + $0x5c] sm:$0xf] %vm405_vm0, %v5009_v9 }
 0x395   : > { %5046 = vst.msk [vmem:[%s7665_s15 + $0x70] sm:$0xf] %vm405_vm0, %v5014_v2  ;;  %v4861_v34 = vadd.f32 %v4860_v17, %v4859_v49  ;;  %v4960_v50 = vadd.f32 %v4959_v4, %v4958_v59  ;;  %v4969_v33 = vsel %vm4371_vm4, %v4910_v52, 0.0 }
 0x397   : > { %v4863_v20 = vadd.f32 %v4862_v19, %v4861_v34  ;;  %v4962_v10 = vadd.f32 %v4961_v44, %v4960_v50 }
 0x399   : > { %v4865_v29 = vadd.f32 %v4864_v18, %v4863_v20  ;;  %v4964_v63 = vadd.f32 %v4963_v57, %v4962_v10 }
 0x39a   : > { %v4805_v7 = vpop.f32.mrf.mxu3 }
 0x39b   : > { %v5015_v41 = vpack.c.bf16 %v4805_v7, %v4805_v7  ;;  %v4966_v62 = vadd.f32 %v4965_v16, %v4964_v63  ;;  %v4867_v47 = vadd.f32 %v4866_v12, %v4865_v29  ;;  %v4911_v43 = vmul.f32 %v4805_v7, %v4805_v7 }
 0x39c   : > { %v4870_v32 = vsel %vm4371_vm4, %v4805_v7, 0.0 }
 0x39d   : > { %5047 = vst.msk [vmem:[%s7665_s15 + $0x74] sm:$0xf] %vm405_vm0, %v5015_v41  ;;  %v4968_v30 = vadd.f32 %v4967_v14, %v4966_v62  ;;  %v4869_v28 = vadd.f32 %v4868_v23, %v4867_v47  ;;  %v4971_v8 = vsel %vm4371_vm4, %v4911_v43, 0.0 }
 0x39f   : > { %v4970_v56 = vadd.f32 %v4969_v33, %v4968_v30  ;;  %v4871_v60 = vadd.f32 %v4870_v32, %v4869_v28 }
 0x3a1   : > { %v4972_v24 = vadd.f32 %v4971_v8, %v4970_v56 }
 0x3a8   : > { %v4808_v38 = vpop.f32.mrf.mxu3 }
 0x3a9   : > { %v5016_v39 = vpack.c.bf16 %v4808_v38, %v4808_v38  ;;  %v4912_v55 = vmul.f32 %v4808_v38, %v4808_v38  ;;  %v4872_v54 = vsel %vm4371_vm4, %v4808_v38, 0.0 }
 0x3aa   : > { %v4873_v61 = vadd.f32 %v4872_v54, %v4871_v60 }
 0x3ab   : > { %5048 = vst.msk [vmem:[%s7665_s15 + $0x78] sm:$0xf] %vm405_vm0, %v5016_v39  ;;  %v4973_v37 = vsel %vm4371_vm4, %v4912_v55, 0.0 }
 0x3ac   : > { %v4974_v3 = vadd.f32 %v4973_v37, %v4972_v24 }
 0x3b0   : > { %v4810_v45 = vpop.f32.mrf.mxu3 }
 0x3b1   : > { %v4874_v11 = vsel %vm4371_vm4, %v4810_v45, 0.0  ;;  %v4913_v35 = vmul.f32 %v4810_v45, %v4810_v45  ;;  %v5017_v22 = vpack.c.bf16 %v4810_v45, %v4810_v45 }
 0x3b2   : > { %v4875_v26 = vadd.f32 %v4874_v11, %v4873_v61 }
 0x3b3   : > { %v4975_v6 = vsel %vm4371_vm4, %v4913_v35, 0.0  ;;  %5049 = vst.msk [vmem:[%s7665_s15 + $0x7c] sm:$0xf] %vm405_vm0, %v5017_v22  ;;  %vm8149_vm0 = vcmask 58368  }
 0x3b4   : > { %v4876_v46 = vrot.slane %v4875_v26, 4  ;;  %v4976_v13 = vadd.f32 %v4975_v6, %v4974_v3 }
 0x3b6   : > { %v4877_v27 = vadd.f32 %v4876_v46, %v4875_v26  ;;  %v4977_v1 = vrot.slane %v4976_v13, 4 }
 0x3b8   : > { %v4878_v25 = vrot.slane %v4877_v27, 2  ;;  %v4978_v40 = vadd.f32 %v4977_v1, %v4976_v13 }
 0x3ba   : > { %v4879_v51 = vadd.f32 %v4878_v25, %v4877_v27  ;;  %v4979_v5 = vrot.slane %v4978_v40, 2 }
 0x3bc   : > { %v4880_v58 = vrot.slane %v4879_v51, 1  ;;  %v4980_v31 = vadd.f32 %v4979_v5, %v4978_v40 }
 0x3be   : > { %v4981_v0 = vrot.slane %v4980_v31, 1  ;;  %v4881_v2 = vadd.f32 %v4880_v58, %v4879_v51 }
 0x3c0   : > { %v4982_v42 = vadd.f32 %v4981_v0, %v4980_v31 }
 0x3c2   : > { %v4984_v21 = vsel %vm8148_vm1, %v4881_v2, %v4982_v42 }
 0x3c3   : > { %4985 = vst.msk [vmem:[%s235_s11] sm:$0x3] %vm8149_vm0, %v4984_v21 }
 0x3c4 PF: > { %s16_s18 = sadd.s32 1, %s5359_s18  }
 0x3c5   : > { %p13_p4 = scmp.ge.s32.totalorder %s16_s18, 4  }
 0x3c7   :  { %15 = sbr.rel (!%p13_p4) target bundleno = 1 (0x1), region = 81 }

</bundles_post_ra>
